<compile_context>
chip_gen: v7x
topology: tpu7x:2x2x1
jax: 0.10.0
libtpu: 0.0.40
codegen_flags: <defaults>
</compile_context>

<pallas_src>
import functools
import math

import jax
import jax.numpy as jnp
from jax.experimental import pallas as pl
from jax.experimental.pallas import tpu as pltpu

BN_EPS = 1e-5
VMEM_LIMIT = 32 * 1024 * 1024   # explicit scoped-VMEM cap, safe on v5e/v6e/v7x


def _round_up(x, m):
    return ((x + m - 1) // m) * m


def _pick_tile(dim, max_tile, align):
    """Pick (tile, padded_dim) with tile % align == 0 and tile | padded_dim.

    Prefers a tile that divides `dim` exactly (no padding copy); only pads `dim`
    for awkward sizes with no decent divisor.
    """
    if dim <= max_tile:
        p = _round_up(dim, align)
        return p, p
    best = 0
    t = (max_tile // align) * align
    while t >= align:
        if dim % t == 0:
            best = t
            break
        t -= align
    if best >= 128:
        return best, dim
    t = min((max_tile // align) * align, 256)
    return t, _round_up(dim, t)


# ---------------------------------------------------------------------------
# Pallas kernels
# ---------------------------------------------------------------------------
def _mm_bn_act_kernel(*refs, relu, has_res, n_k):
    """out = maybe_relu((A @ B) * scale + bias [+ residual]); accumulate in o_ref."""
    if has_res:
        a_ref, b_ref, s_ref, bi_ref, r_ref, o_ref = refs
    else:
        a_ref, b_ref, s_ref, bi_ref, o_ref = refs
        r_ref = None

    def epilogue(acc):
        y = acc * s_ref[...] + bi_ref[...]
        if has_res:
            y = y + r_ref[...]
        if relu:
            y = jnp.maximum(y, 0.0)
        return y

    if n_k == 1:
        acc = jnp.dot(a_ref[...], b_ref[...], preferred_element_type=jnp.float32)
        o_ref[...] = epilogue(acc)
    else:
        k = pl.program_id(2)

        @pl.when(k == 0)
        def _():
            o_ref[...] = jnp.zeros_like(o_ref)

        o_ref[...] += jnp.dot(a_ref[...], b_ref[...],
                              preferred_element_type=jnp.float32)

        @pl.when(k == n_k - 1)
        def _():
            o_ref[...] = epilogue(o_ref[...])


def _max_pool_kernel(*refs):
    o_ref = refs[-1]
    acc = refs[0][...]
    for r in refs[1:-1]:
        acc = jnp.maximum(acc, r[...])
    o_ref[...] = acc


def _avg_pool_kernel(x_ref, o_ref):
    o_ref[...] = jnp.mean(x_ref[...], axis=1)


# ---------------------------------------------------------------------------
# Pallas wrappers
# ---------------------------------------------------------------------------
def matmul_bn_act(a, b, scale, bias, *, relu, residual=None):
    """a: (M, K), b: (K, N), scale/bias: (N,), residual: (M, N) f32 or None.

    Returns maybe_relu((a @ b) * scale + bias [+ residual]) in f32.  a/b go to the
    MXU in bf16; accumulation and the BN/ReLU epilogue are f32.
    """
    M, K = a.shape
    K2, N = b.shape
    assert K == K2

    # ---- tile selection ----------------------------------------------------
    # M (sublane axis): bf16 wants multiples of 16; prefer exact divisors of M.
    tm, Mp = _pick_tile(M, 512, 16)
    # N (lane axis): ResNet couts are 64/128/256/512 -> full width or 256 tiles.
    if N <= 256:
        tn, Np = N, N
    else:
        tn, Np = 256, _round_up(N, 256)
    # K: single full-K step when small (no K padding for K=147/64/576/1152);
    # otherwise the largest of 512/256/128 dividing K; pad only as a fallback.
    if K <= 1152:
        tk, Kp = K, K
    elif K % 512 == 0:
        tk, Kp = 512, K
    elif K % 256 == 0:
        tk, Kp = 256, K
    elif K % 128 == 0:
        tk, Kp = 128, K
    else:
        tk, Kp = 256, _round_up(K, 256)

    a_bf = a.astype(jnp.bfloat16)
    b_bf = b.astype(jnp.bfloat16)
    if (Mp, Kp) != (M, K):
        a_bf = jnp.pad(a_bf, ((0, Mp - M), (0, Kp - K)))
    if (Kp, Np) != (K, N):
        b_bf = jnp.pad(b_bf, ((0, Kp - K), (0, Np - N)))
    s2 = scale.reshape(1, N).astype(jnp.float32)
    bi2 = bias.reshape(1, N).astype(jnp.float32)
    if Np != N:
        s2 = jnp.pad(s2, ((0, 0), (0, Np - N)))
        bi2 = jnp.pad(bi2, ((0, 0), (0, Np - N)))

    inputs = [a_bf, b_bf, s2, bi2]
    in_specs = [
        pl.BlockSpec((tm, tk), lambda i, j, k: (i, k)),
        pl.BlockSpec((tk, tn), lambda i, j, k: (k, j)),
        pl.BlockSpec((1, tn), lambda i, j, k: (0, j)),
        pl.BlockSpec((1, tn), lambda i, j, k: (0, j)),
    ]
    has_res = residual is not None
    if has_res:
        r = residual.astype(jnp.float32)
        if (Mp, Np) != (M, N):
            r = jnp.pad(r, ((0, Mp - M), (0, Np - N)))
        inputs.append(r)
        in_specs.append(pl.BlockSpec((tm, tn), lambda i, j, k: (i, j)))

    n_k = Kp // tk
    out = pl.pallas_call(
        functools.partial(_mm_bn_act_kernel, relu=relu, has_res=has_res, n_k=n_k),
        out_shape=jax.ShapeDtypeStruct((Mp, Np), jnp.float32),
        grid_spec=pltpu.PrefetchScalarGridSpec(
            num_scalar_prefetch=0,
            grid=(Mp // tm, Np // tn, n_k),
            in_specs=in_specs,
            out_specs=pl.BlockSpec((tm, tn), lambda i, j, k: (i, j)),
        ),
        compiler_params=pltpu.CompilerParams(
            dimension_semantics=("parallel", "parallel", "arbitrary"),
            vmem_limit_bytes=VMEM_LIMIT),
    )(*inputs)
    if (Mp, Np) != (M, N):
        out = out[:M, :N]
    return out


def _window_slices(x, kh, kw, stride):
    """x: (N, Hp, Wp, C) already padded; returns list of (N, oh, ow, C) slices."""
    n, hp, wp, c = x.shape
    oh = (hp - kh) // stride + 1
    ow = (wp - kw) // stride + 1
    slices = []
    for i in range(kh):
        for j in range(kw):
            s = jax.lax.slice(
                x, (0, i, j, 0),
                (n, i + (oh - 1) * stride + 1, j + (ow - 1) * stride + 1, c),
                (1, stride, stride, 1))
            slices.append(s)
    return slices, oh, ow


def im2col(x, kh, kw, stride, pad):
    """Materialize patches (in bf16 to halve HBM bytes) as an (M, kh*kw*C) matrix."""
    # TODO(synk): gather the patches inside the matmul kernel from a halo'd VMEM
    # tile (manual DMA) to avoid the kh*kw-fold HBM blowup entirely.
    x = x.astype(jnp.bfloat16)
    if pad > 0:
        x = jnp.pad(x, ((0, 0), (pad, pad), (pad, pad), (0, 0)))
    slices, oh, ow = _window_slices(x, kh, kw, stride)
    n, c = x.shape[0], x.shape[3]
    patches = jnp.stack(slices, axis=3)            # (N, oh, ow, kh*kw, C)
    return patches.reshape(n * oh * ow, kh * kw * c), oh, ow


def maxpool_3x3_s2_p1(x):
    n, h, w, c = x.shape
    xp = jnp.pad(x, ((0, 0), (1, 1), (1, 1), (0, 0)), constant_values=-jnp.inf)
    slices, oh, ow = _window_slices(xp, 3, 3, 2)
    m = n * oh * ow
    tm, mp = _pick_tile(m, 512, 8)
    flat = []
    for s in slices:
        s2 = s.reshape(m, c)
        if mp != m:
            s2 = jnp.pad(s2, ((0, mp - m), (0, 0)))
        flat.append(s2)

    out = pl.pallas_call(
        _max_pool_kernel,
        out_shape=jax.ShapeDtypeStruct((mp, c), jnp.float32),
        grid_spec=pltpu.PrefetchScalarGridSpec(
            num_scalar_prefetch=0,
            grid=(mp // tm,),
            in_specs=[pl.BlockSpec((tm, c), lambda i: (i, 0))] * 9,
            out_specs=pl.BlockSpec((tm, c), lambda i: (i, 0)),
        ),
        compiler_params=pltpu.CompilerParams(
            dimension_semantics=("parallel",),
            vmem_limit_bytes=VMEM_LIMIT),
    )(*flat)
    if mp != m:
        out = out[:m]
    return out.reshape(n, oh, ow, c)


def global_avgpool(x):
    n, h, w, c = x.shape
    hw = h * w
    xr = x.reshape(n, hw, c)                        # keep C on the lane axis
    out = pl.pallas_call(
        _avg_pool_kernel,
        out_shape=jax.ShapeDtypeStruct((n, c), jnp.float32),
        grid_spec=pltpu.PrefetchScalarGridSpec(
            num_scalar_prefetch=0,
            grid=(1,),
            in_specs=[pl.BlockSpec((n, hw, c), lambda i: (0, 0, 0))],
            out_specs=pl.BlockSpec((n, c), lambda i: (0, 0)),
        ),
        compiler_params=pltpu.CompilerParams(
            dimension_semantics=("arbitrary",),
            vmem_limit_bytes=VMEM_LIMIT),
    )(xr)
    return out


# ---------------------------------------------------------------------------
# ResNet-18 (feature trunk) built from the kernels above
# ---------------------------------------------------------------------------
def _fold_bn(p):
    scale = p["gamma"] / jnp.sqrt(p["var"] + BN_EPS)
    bias = p["beta"] - p["mean"] * scale
    return scale, bias


def conv_bn(x, p, *, stride, pad, relu, residual=None):
    kh, kw, cin, cout = p["w"].shape
    patches, oh, ow = im2col(x, kh, kw, stride, pad)
    w2 = p["w"].reshape(kh * kw * cin, cout)
    scale, bias = _fold_bn(p)
    res_flat = None
    if residual is not None:
        res_flat = residual.reshape(-1, cout)
    out = matmul_bn_act(patches, w2, scale, bias, relu=relu, residual=res_flat)
    return out.reshape(x.shape[0], oh, ow, cout)


def basic_block(x, p):
    stride = 2 if "down" in p else 1                # resnet18: downsample <=> stride 2
    identity = x
    out = conv_bn(x, p["conv1"], stride=stride, pad=1, relu=True)
    if "down" in p:
        identity = conv_bn(x, p["down"], stride=stride, pad=0, relu=False)
    # fused: relu(bn2(conv2(out)) + identity)
    out = conv_bn(out, p["conv2"], stride=1, pad=1, relu=True, residual=identity)
    return out


def featurizer_forward(x_nchw, params):
    x = jnp.transpose(x_nchw, (0, 2, 3, 1)).astype(jnp.float32)   # NCHW -> NHWC
    x = conv_bn(x, params["conv1"], stride=2, pad=3, relu=True)
    x = maxpool_3x3_s2_p1(x)
    for layer in params["layers"]:
        for block in layer:
            x = basic_block(x, block)
    return global_avgpool(x)                                      # (N, 512)


# ---------------------------------------------------------------------------
# Deterministic parameter init (synthetic; resnet18 shapes, pretrained=False)
# ---------------------------------------------------------------------------
def _conv_bn_params(key, kh, kw, cin, cout):
    k1, k2, k3 = jax.random.split(key, 3)
    std = 1.0 / math.sqrt(kh * kw * cin)
    return dict(
        w=jax.random.normal(k1, (kh, kw, cin, cout), jnp.float32) * std,
        gamma=1.0 + 0.1 * jax.random.normal(k2, (cout,), jnp.float32),
        beta=0.1 * jax.random.normal(k3, (cout,), jnp.float32),
        mean=jnp.zeros((cout,), jnp.float32),
        var=jnp.ones((cout,), jnp.float32),
    )


def init_resnet18_params(key):
    keys = iter(jax.random.split(key, 64))
    params = {"conv1": _conv_bn_params(next(keys), 7, 7, 3, 64)}
    stages = [(64, 64, 1), (64, 128, 2), (128, 256, 2), (256, 512, 2)]
    layers = []
    for cin, cout, stride in stages:
        b0 = {
            "conv1": _conv_bn_params(next(keys), 3, 3, cin, cout),
            "conv2": _conv_bn_params(next(keys), 3, 3, cout, cout),
        }
        if stride != 1 or cin != cout:
            b0["down"] = _conv_bn_params(next(keys), 1, 1, cin, cout)
        b1 = {
            "conv1": _conv_bn_params(next(keys), 3, 3, cout, cout),
            "conv2": _conv_bn_params(next(keys), 3, 3, cout, cout),
        }
        layers.append([b0, b1])
    params["layers"] = layers
    return params


if __name__ == "__main__":
    key = jax.random.PRNGKey(0)
    kp, kx = jax.random.split(key)
    params = init_resnet18_params(kp)
    # PyTorch-style NCHW input; resnet18 expects 3 input channels.
    x = jax.random.normal(kx, (2, 3, 32, 32), jnp.float32)

    fwd = jax.jit(featurizer_forward)
    feats = jax.block_until_ready(fwd(x, params))

    assert feats.shape == (2, 512), feats.shape          # output_dim = 512
    assert bool(jnp.all(jnp.isfinite(feats)))
    print("KERNEL_OK")
</pallas_src>

<mosaic_0001>
module attributes {stable_mosaic.version = 11 : i64} {
  func.func @_mm_bn_act_kernel(%arg0: i32, %arg1: i32, %arg2: i32, %arg3: memref<512x147xbf16, #tpu.memory_space<vmem>>, %arg4: memref<147x64xbf16, #tpu.memory_space<vmem>>, %arg5: memref<1x64xf32, #tpu.memory_space<vmem>>, %arg6: memref<1x64xf32, #tpu.memory_space<vmem>>, %arg7: memref<512x64xf32, #tpu.memory_space<vmem>>) attributes {dimension_semantics = [#tpu.dimension_semantics<parallel>, #tpu.dimension_semantics<parallel>, #tpu.dimension_semantics<arbitrary>], iteration_bounds = array<i64: 1, 1, 1>, scalar_prefetch = 0 : i64, scratch_operands = 0 : i64, tpu.core_type = #tpu.core_type<tc>, window_params = [{transform_indices = @transform_0, window_bounds = array<i64: 512, 147>}, {transform_indices = @transform_1, window_bounds = array<i64: 147, 64>}, {transform_indices = @transform_2, window_bounds = array<i64: 1, 64>}, {transform_indices = @transform_3, window_bounds = array<i64: 1, 64>}, {transform_indices = @transform_4, window_bounds = array<i64: 512, 64>}]} {
    %c0 = arith.constant 0 : index
    %c0_0 = arith.constant 0 : index
    %0 = vector.load %arg3[%c0, %c0_0] : memref<512x147xbf16, #tpu.memory_space<vmem>>, vector<512x147xbf16>
    %c0_1 = arith.constant 0 : index
    %c0_2 = arith.constant 0 : index
    %1 = vector.load %arg4[%c0_1, %c0_2] : memref<147x64xbf16, #tpu.memory_space<vmem>>, vector<147x64xbf16>
    %cst = arith.constant dense<0.000000e+00> : vector<512x64xf32>
    %2 = tpu.matmul %0, %1, %cst {dimension_numbers = #tpu.dot_dimension_numbers<[1], [0], [0], [1], [0, 0, 1, 1], [], []>} : vector<512x147xbf16>, vector<147x64xbf16>, vector<512x64xf32> -> vector<512x64xf32>
    %c0_3 = arith.constant 0 : index
    %c0_4 = arith.constant 0 : index
    %3 = vector.load %arg5[%c0_3, %c0_4] : memref<1x64xf32, #tpu.memory_space<vmem>>, vector<1x64xf32>
    %4 = vector.broadcast %3 : vector<1x64xf32> to vector<512x64xf32>
    %5 = arith.mulf %2, %4 : vector<512x64xf32>
    %c0_5 = arith.constant 0 : index
    %c0_6 = arith.constant 0 : index
    %6 = vector.load %arg6[%c0_5, %c0_6] : memref<1x64xf32, #tpu.memory_space<vmem>>, vector<1x64xf32>
    %7 = vector.broadcast %6 : vector<1x64xf32> to vector<512x64xf32>
    %8 = arith.addf %5, %7 : vector<512x64xf32>
    %cst_7 = arith.constant 0.000000e+00 : f32
    %9 = vector.broadcast %cst_7 : f32 to vector<512x64xf32>
    %10 = arith.maximumf %8, %9 : vector<512x64xf32>
    %c0_8 = arith.constant 0 : index
    %c0_9 = arith.constant 0 : index
    %11 = vector.load %arg7[%c0_8, %c0_9] : memref<512x64xf32, #tpu.memory_space<vmem>>, vector<512x64xf32>
    tpu.vector_store %arg7[%c0_8, %c0_9], %10 {strides = array<i32>} : memref<512x64xf32, #tpu.memory_space<vmem>>, vector<512x64xf32>,
    return
  }
  func.func @transform_0(%arg0: i32, %arg1: i32, %arg2: i32) -> (i32, i32) {
    %c0_i32 = arith.constant 0 : i32
    return %arg0, %arg2 : i32, i32
  }
  func.func @transform_1(%arg0: i32, %arg1: i32, %arg2: i32) -> (i32, i32) {
    %c0_i32 = arith.constant 0 : i32
    return %arg2, %arg1 : i32, i32
  }
  func.func @transform_2(%arg0: i32, %arg1: i32, %arg2: i32) -> (i32, i32) {
    %c0_i32 = arith.constant 0 : i32
    %c0_i32_0 = arith.constant 0 : i32
    return %c0_i32, %arg1 : i32, i32
  }
  func.func @transform_3(%arg0: i32, %arg1: i32, %arg2: i32) -> (i32, i32) {
    %c0_i32 = arith.constant 0 : i32
    %c0_i32_0 = arith.constant 0 : i32
    return %c0_i32, %arg1 : i32, i32
  }
  func.func @transform_4(%arg0: i32, %arg1: i32, %arg2: i32) -> (i32, i32) {
    %c0_i32 = arith.constant 0 : i32
    return %arg0, %arg1 : i32, i32
  }
}

module attributes {stable_mosaic.version = 11 : i64} {
  func.func @_max_pool_kernel(%arg0: i32, %arg1: memref<128x64xf32, #tpu.memory_space<vmem>>, %arg2: memref<128x64xf32, #tpu.memory_space<vmem>>, %arg3: memref<128x64xf32, #tpu.memory_space<vmem>>, %arg4: memref<128x64xf32, #tpu.memory_space<vmem>>, %arg5: memref<128x64xf32, #tpu.memory_space<vmem>>, %arg6: memref<128x64xf32, #tpu.memory_space<vmem>>, %arg7: memref<128x64xf32, #tpu.memory_space<vmem>>, %arg8: memref<128x64xf32, #tpu.memory_space<vmem>>, %arg9: memref<128x64xf32, #tpu.memory_space<vmem>>, %arg10: memref<128x64xf32, #tpu.memory_space<vmem>>) attributes {dimension_semantics = [#tpu.dimension_semantics<parallel>], iteration_bounds = array<i64: 1>, scalar_prefetch = 0 : i64, scratch_operands = 0 : i64, tpu.core_type = #tpu.core_type<tc>, window_params = [{transform_indices = @transform_0, window_bounds = array<i64: 128, 64>}, {transform_indices = @transform_1, window_bounds = array<i64: 128, 64>}, {transform_indices = @transform_2, window_bounds = array<i64: 128, 64>}, {transform_indices = @transform_3, window_bounds = array<i64: 128, 64>}, {transform_indices = @transform_4, window_bounds = array<i64: 128, 64>}, {transform_indices = @transform_5, window_bounds = array<i64: 128, 64>}, {transform_indices = @transform_6, window_bounds = array<i64: 128, 64>}, {transform_indices = @transform_7, window_bounds = array<i64: 128, 64>}, {transform_indices = @transform_8, window_bounds = array<i64: 128, 64>}, {transform_indices = @transform_9, window_bounds = array<i64: 128, 64>}]} {
    %c0 = arith.constant 0 : index
    %c0_0 = arith.constant 0 : index
    %0 = vector.load %arg1[%c0, %c0_0] : memref<128x64xf32, #tpu.memory_space<vmem>>, vector<128x64xf32>
    %c0_1 = arith.constant 0 : index
    %c0_2 = arith.constant 0 : index
    %1 = vector.load %arg2[%c0_1, %c0_2] : memref<128x64xf32, #tpu.memory_space<vmem>>, vector<128x64xf32>
    %2 = arith.maximumf %0, %1 : vector<128x64xf32>
    %c0_3 = arith.constant 0 : index
    %c0_4 = arith.constant 0 : index
    %3 = vector.load %arg3[%c0_3, %c0_4] : memref<128x64xf32, #tpu.memory_space<vmem>>, vector<128x64xf32>
    %4 = arith.maximumf %2, %3 : vector<128x64xf32>
    %c0_5 = arith.constant 0 : index
    %c0_6 = arith.constant 0 : index
    %5 = vector.load %arg4[%c0_5, %c0_6] : memref<128x64xf32, #tpu.memory_space<vmem>>, vector<128x64xf32>
    %6 = arith.maximumf %4, %5 : vector<128x64xf32>
    %c0_7 = arith.constant 0 : index
    %c0_8 = arith.constant 0 : index
    %7 = vector.load %arg5[%c0_7, %c0_8] : memref<128x64xf32, #tpu.memory_space<vmem>>, vector<128x64xf32>
    %8 = arith.maximumf %6, %7 : vector<128x64xf32>
    %c0_9 = arith.constant 0 : index
    %c0_10 = arith.constant 0 : index
    %9 = vector.load %arg6[%c0_9, %c0_10] : memref<128x64xf32, #tpu.memory_space<vmem>>, vector<128x64xf32>
    %10 = arith.maximumf %8, %9 : vector<128x64xf32>
    %c0_11 = arith.constant 0 : index
    %c0_12 = arith.constant 0 : index
    %11 = vector.load %arg7[%c0_11, %c0_12] : memref<128x64xf32, #tpu.memory_space<vmem>>, vector<128x64xf32>
    %12 = arith.maximumf %10, %11 : vector<128x64xf32>
    %c0_13 = arith.constant 0 : index
    %c0_14 = arith.constant 0 : index
    %13 = vector.load %arg8[%c0_13, %c0_14] : memref<128x64xf32, #tpu.memory_space<vmem>>, vector<128x64xf32>
    %14 = arith.maximumf %12, %13 : vector<128x64xf32>
    %c0_15 = arith.constant 0 : index
    %c0_16 = arith.constant 0 : index
    %15 = vector.load %arg9[%c0_15, %c0_16] : memref<128x64xf32, #tpu.memory_space<vmem>>, vector<128x64xf32>
    %16 = arith.maximumf %14, %15 : vector<128x64xf32>
    %c0_17 = arith.constant 0 : index
    %c0_18 = arith.constant 0 : index
    %17 = vector.load %arg10[%c0_17, %c0_18] : memref<128x64xf32, #tpu.memory_space<vmem>>, vector<128x64xf32>
    tpu.vector_store %arg10[%c0_17, %c0_18], %16 {strides = array<i32>} : memref<128x64xf32, #tpu.memory_space<vmem>>, vector<128x64xf32>,
    return
  }
  func.func @transform_0(%arg0: i32) -> (i32, i32) {
    %c0_i32 = arith.constant 0 : i32
    %c0_i32_0 = arith.constant 0 : i32
    return %arg0, %c0_i32 : i32, i32
  }
  func.func @transform_1(%arg0: i32) -> (i32, i32) {
    %c0_i32 = arith.constant 0 : i32
    %c0_i32_0 = arith.constant 0 : i32
    return %arg0, %c0_i32 : i32, i32
  }
  func.func @transform_2(%arg0: i32) -> (i32, i32) {
    %c0_i32 = arith.constant 0 : i32
    %c0_i32_0 = arith.constant 0 : i32
    return %arg0, %c0_i32 : i32, i32
  }
  func.func @transform_3(%arg0: i32) -> (i32, i32) {
    %c0_i32 = arith.constant 0 : i32
    %c0_i32_0 = arith.constant 0 : i32
    return %arg0, %c0_i32 : i32, i32
  }
  func.func @transform_4(%arg0: i32) -> (i32, i32) {
    %c0_i32 = arith.constant 0 : i32
    %c0_i32_0 = arith.constant 0 : i32
    return %arg0, %c0_i32 : i32, i32
  }
  func.func @transform_5(%arg0: i32) -> (i32, i32) {
    %c0_i32 = arith.constant 0 : i32
    %c0_i32_0 = arith.constant 0 : i32
    return %arg0, %c0_i32 : i32, i32
  }
  func.func @transform_6(%arg0: i32) -> (i32, i32) {
    %c0_i32 = arith.constant 0 : i32
    %c0_i32_0 = arith.constant 0 : i32
    return %arg0, %c0_i32 : i32, i32
  }
  func.func @transform_7(%arg0: i32) -> (i32, i32) {
    %c0_i32 = arith.constant 0 : i32
    %c0_i32_0 = arith.constant 0 : i32
    return %arg0, %c0_i32 : i32, i32
  }
  func.func @transform_8(%arg0: i32) -> (i32, i32) {
    %c0_i32 = arith.constant 0 : i32
    %c0_i32_0 = arith.constant 0 : i32
    return %arg0, %c0_i32 : i32, i32
  }
  func.func @transform_9(%arg0: i32) -> (i32, i32) {
    %c0_i32 = arith.constant 0 : i32
    %c0_i32_0 = arith.constant 0 : i32
    return %arg0, %c0_i32 : i32, i32
  }
}

module attributes {stable_mosaic.version = 11 : i64} {
  func.func @_mm_bn_act_kernel(%arg0: i32, %arg1: i32, %arg2: i32, %arg3: memref<128x576xbf16, #tpu.memory_space<vmem>>, %arg4: memref<576x64xbf16, #tpu.memory_space<vmem>>, %arg5: memref<1x64xf32, #tpu.memory_space<vmem>>, %arg6: memref<1x64xf32, #tpu.memory_space<vmem>>, %arg7: memref<128x64xf32, #tpu.memory_space<vmem>>) attributes {dimension_semantics = [#tpu.dimension_semantics<parallel>, #tpu.dimension_semantics<parallel>, #tpu.dimension_semantics<arbitrary>], iteration_bounds = array<i64: 1, 1, 1>, scalar_prefetch = 0 : i64, scratch_operands = 0 : i64, tpu.core_type = #tpu.core_type<tc>, window_params = [{transform_indices = @transform_0, window_bounds = array<i64: 128, 576>}, {transform_indices = @transform_1, window_bounds = array<i64: 576, 64>}, {transform_indices = @transform_2, window_bounds = array<i64: 1, 64>}, {transform_indices = @transform_3, window_bounds = array<i64: 1, 64>}, {transform_indices = @transform_4, window_bounds = array<i64: 128, 64>}]} {
    %c0 = arith.constant 0 : index
    %c0_0 = arith.constant 0 : index
    %0 = vector.load %arg3[%c0, %c0_0] : memref<128x576xbf16, #tpu.memory_space<vmem>>, vector<128x576xbf16>
    %c0_1 = arith.constant 0 : index
    %c0_2 = arith.constant 0 : index
    %1 = vector.load %arg4[%c0_1, %c0_2] : memref<576x64xbf16, #tpu.memory_space<vmem>>, vector<576x64xbf16>
    %cst = arith.constant dense<0.000000e+00> : vector<128x64xf32>
    %2 = tpu.matmul %0, %1, %cst {dimension_numbers = #tpu.dot_dimension_numbers<[1], [0], [0], [1], [0, 0, 1, 1], [], []>} : vector<128x576xbf16>, vector<576x64xbf16>, vector<128x64xf32> -> vector<128x64xf32>
    %c0_3 = arith.constant 0 : index
    %c0_4 = arith.constant 0 : index
    %3 = vector.load %arg5[%c0_3, %c0_4] : memref<1x64xf32, #tpu.memory_space<vmem>>, vector<1x64xf32>
    %4 = vector.broadcast %3 : vector<1x64xf32> to vector<128x64xf32>
    %5 = arith.mulf %2, %4 : vector<128x64xf32>
    %c0_5 = arith.constant 0 : index
    %c0_6 = arith.constant 0 : index
    %6 = vector.load %arg6[%c0_5, %c0_6] : memref<1x64xf32, #tpu.memory_space<vmem>>, vector<1x64xf32>
    %7 = vector.broadcast %6 : vector<1x64xf32> to vector<128x64xf32>
    %8 = arith.addf %5, %7 : vector<128x64xf32>
    %cst_7 = arith.constant 0.000000e+00 : f32
    %9 = vector.broadcast %cst_7 : f32 to vector<128x64xf32>
    %10 = arith.maximumf %8, %9 : vector<128x64xf32>
    %c0_8 = arith.constant 0 : index
    %c0_9 = arith.constant 0 : index
    %11 = vector.load %arg7[%c0_8, %c0_9] : memref<128x64xf32, #tpu.memory_space<vmem>>, vector<128x64xf32>
    tpu.vector_store %arg7[%c0_8, %c0_9], %10 {strides = array<i32>} : memref<128x64xf32, #tpu.memory_space<vmem>>, vector<128x64xf32>,
    return
  }
  func.func @transform_0(%arg0: i32, %arg1: i32, %arg2: i32) -> (i32, i32) {
    %c0_i32 = arith.constant 0 : i32
    return %arg0, %arg2 : i32, i32
  }
  func.func @transform_1(%arg0: i32, %arg1: i32, %arg2: i32) -> (i32, i32) {
    %c0_i32 = arith.constant 0 : i32
    return %arg2, %arg1 : i32, i32
  }
  func.func @transform_2(%arg0: i32, %arg1: i32, %arg2: i32) -> (i32, i32) {
    %c0_i32 = arith.constant 0 : i32
    %c0_i32_0 = arith.constant 0 : i32
    return %c0_i32, %arg1 : i32, i32
  }
  func.func @transform_3(%arg0: i32, %arg1: i32, %arg2: i32) -> (i32, i32) {
    %c0_i32 = arith.constant 0 : i32
    %c0_i32_0 = arith.constant 0 : i32
    return %c0_i32, %arg1 : i32, i32
  }
  func.func @transform_4(%arg0: i32, %arg1: i32, %arg2: i32) -> (i32, i32) {
    %c0_i32 = arith.constant 0 : i32
    return %arg0, %arg1 : i32, i32
  }
}

module attributes {stable_mosaic.version = 11 : i64} {
  func.func @_mm_bn_act_kernel(%arg0: i32, %arg1: i32, %arg2: i32, %arg3: memref<128x576xbf16, #tpu.memory_space<vmem>>, %arg4: memref<576x64xbf16, #tpu.memory_space<vmem>>, %arg5: memref<1x64xf32, #tpu.memory_space<vmem>>, %arg6: memref<1x64xf32, #tpu.memory_space<vmem>>, %arg7: memref<128x64xf32, #tpu.memory_space<vmem>>, %arg8: memref<128x64xf32, #tpu.memory_space<vmem>>) attributes {dimension_semantics = [#tpu.dimension_semantics<parallel>, #tpu.dimension_semantics<parallel>, #tpu.dimension_semantics<arbitrary>], iteration_bounds = array<i64: 1, 1, 1>, scalar_prefetch = 0 : i64, scratch_operands = 0 : i64, tpu.core_type = #tpu.core_type<tc>, window_params = [{transform_indices = @transform_0, window_bounds = array<i64: 128, 576>}, {transform_indices = @transform_1, window_bounds = array<i64: 576, 64>}, {transform_indices = @transform_2, window_bounds = array<i64: 1, 64>}, {transform_indices = @transform_3, window_bounds = array<i64: 1, 64>}, {transform_indices = @transform_4, window_bounds = array<i64: 128, 64>}, {transform_indices = @transform_5, window_bounds = array<i64: 128, 64>}]} {
    %c0 = arith.constant 0 : index
    %c0_0 = arith.constant 0 : index
    %0 = vector.load %arg3[%c0, %c0_0] : memref<128x576xbf16, #tpu.memory_space<vmem>>, vector<128x576xbf16>
    %c0_1 = arith.constant 0 : index
    %c0_2 = arith.constant 0 : index
    %1 = vector.load %arg4[%c0_1, %c0_2] : memref<576x64xbf16, #tpu.memory_space<vmem>>, vector<576x64xbf16>
    %cst = arith.constant dense<0.000000e+00> : vector<128x64xf32>
    %2 = tpu.matmul %0, %1, %cst {dimension_numbers = #tpu.dot_dimension_numbers<[1], [0], [0], [1], [0, 0, 1, 1], [], []>} : vector<128x576xbf16>, vector<576x64xbf16>, vector<128x64xf32> -> vector<128x64xf32>
    %c0_3 = arith.constant 0 : index
    %c0_4 = arith.constant 0 : index
    %3 = vector.load %arg5[%c0_3, %c0_4] : memref<1x64xf32, #tpu.memory_space<vmem>>, vector<1x64xf32>
    %4 = vector.broadcast %3 : vector<1x64xf32> to vector<128x64xf32>
    %5 = arith.mulf %2, %4 : vector<128x64xf32>
    %c0_5 = arith.constant 0 : index
    %c0_6 = arith.constant 0 : index
    %6 = vector.load %arg6[%c0_5, %c0_6] : memref<1x64xf32, #tpu.memory_space<vmem>>, vector<1x64xf32>
    %7 = vector.broadcast %6 : vector<1x64xf32> to vector<128x64xf32>
    %8 = arith.addf %5, %7 : vector<128x64xf32>
    %c0_7 = arith.constant 0 : index
    %c0_8 = arith.constant 0 : index
    %9 = vector.load %arg7[%c0_7, %c0_8] : memref<128x64xf32, #tpu.memory_space<vmem>>, vector<128x64xf32>
    %10 = arith.addf %8, %9 : vector<128x64xf32>
    %cst_9 = arith.constant 0.000000e+00 : f32
    %11 = vector.broadcast %cst_9 : f32 to vector<128x64xf32>
    %12 = arith.maximumf %10, %11 : vector<128x64xf32>
    %c0_10 = arith.constant 0 : index
    %c0_11 = arith.constant 0 : index
    %13 = vector.load %arg8[%c0_10, %c0_11] : memref<128x64xf32, #tpu.memory_space<vmem>>, vector<128x64xf32>
    tpu.vector_store %arg8[%c0_10, %c0_11], %12 {strides = array<i32>} : memref<128x64xf32, #tpu.memory_space<vmem>>, vector<128x64xf32>,
    return
  }
  func.func @transform_0(%arg0: i32, %arg1: i32, %arg2: i32) -> (i32, i32) {
    %c0_i32 = arith.constant 0 : i32
    return %arg0, %arg2 : i32, i32
  }
  func.func @transform_1(%arg0: i32, %arg1: i32, %arg2: i32) -> (i32, i32) {
    %c0_i32 = arith.constant 0 : i32
    return %arg2, %arg1 : i32, i32
  }
  func.func @transform_2(%arg0: i32, %arg1: i32, %arg2: i32) -> (i32, i32) {
    %c0_i32 = arith.constant 0 : i32
    %c0_i32_0 = arith.constant 0 : i32
    return %c0_i32, %arg1 : i32, i32
  }
  func.func @transform_3(%arg0: i32, %arg1: i32, %arg2: i32) -> (i32, i32) {
    %c0_i32 = arith.constant 0 : i32
    %c0_i32_0 = arith.constant 0 : i32
    return %c0_i32, %arg1 : i32, i32
  }
  func.func @transform_4(%arg0: i32, %arg1: i32, %arg2: i32) -> (i32, i32) {
    %c0_i32 = arith.constant 0 : i32
    return %arg0, %arg1 : i32, i32
  }
  func.func @transform_5(%arg0: i32, %arg1: i32, %arg2: i32) -> (i32, i32) {
    %c0_i32 = arith.constant 0 : i32
    return %arg0, %arg1 : i32, i32
  }
}

module attributes {stable_mosaic.version = 11 : i64} {
  func.func @_mm_bn_act_kernel(%arg0: i32, %arg1: i32, %arg2: i32, %arg3: memref<32x576xbf16, #tpu.memory_space<vmem>>, %arg4: memref<576x128xbf16, #tpu.memory_space<vmem>>, %arg5: memref<1x128xf32, #tpu.memory_space<vmem>>, %arg6: memref<1x128xf32, #tpu.memory_space<vmem>>, %arg7: memref<32x128xf32, #tpu.memory_space<vmem>>) attributes {dimension_semantics = [#tpu.dimension_semantics<parallel>, #tpu.dimension_semantics<parallel>, #tpu.dimension_semantics<arbitrary>], iteration_bounds = array<i64: 1, 1, 1>, scalar_prefetch = 0 : i64, scratch_operands = 0 : i64, tpu.core_type = #tpu.core_type<tc>, window_params = [{transform_indices = @transform_0, window_bounds = array<i64: 32, 576>}, {transform_indices = @transform_1, window_bounds = array<i64: 576, 128>}, {transform_indices = @transform_2, window_bounds = array<i64: 1, 128>}, {transform_indices = @transform_3, window_bounds = array<i64: 1, 128>}, {transform_indices = @transform_4, window_bounds = array<i64: 32, 128>}]} {
    %c0 = arith.constant 0 : index
    %c0_0 = arith.constant 0 : index
    %0 = vector.load %arg3[%c0, %c0_0] : memref<32x576xbf16, #tpu.memory_space<vmem>>, vector<32x576xbf16>
    %c0_1 = arith.constant 0 : index
    %c0_2 = arith.constant 0 : index
    %1 = vector.load %arg4[%c0_1, %c0_2] : memref<576x128xbf16, #tpu.memory_space<vmem>>, vector<576x128xbf16>
    %cst = arith.constant dense<0.000000e+00> : vector<32x128xf32>
    %2 = tpu.matmul %0, %1, %cst {dimension_numbers = #tpu.dot_dimension_numbers<[1], [0], [0], [1], [0, 0, 1, 1], [], []>} : vector<32x576xbf16>, vector<576x128xbf16>, vector<32x128xf32> -> vector<32x128xf32>
    %c0_3 = arith.constant 0 : index
    %c0_4 = arith.constant 0 : index
    %3 = vector.load %arg5[%c0_3, %c0_4] : memref<1x128xf32, #tpu.memory_space<vmem>>, vector<1x128xf32>
    %4 = vector.broadcast %3 : vector<1x128xf32> to vector<32x128xf32>
    %5 = arith.mulf %2, %4 : vector<32x128xf32>
    %c0_5 = arith.constant 0 : index
    %c0_6 = arith.constant 0 : index
    %6 = vector.load %arg6[%c0_5, %c0_6] : memref<1x128xf32, #tpu.memory_space<vmem>>, vector<1x128xf32>
    %7 = vector.broadcast %6 : vector<1x128xf32> to vector<32x128xf32>
    %8 = arith.addf %5, %7 : vector<32x128xf32>
    %cst_7 = arith.constant 0.000000e+00 : f32
    %9 = vector.broadcast %cst_7 : f32 to vector<32x128xf32>
    %10 = arith.maximumf %8, %9 : vector<32x128xf32>
    %c0_8 = arith.constant 0 : index
    %c0_9 = arith.constant 0 : index
    %11 = vector.load %arg7[%c0_8, %c0_9] : memref<32x128xf32, #tpu.memory_space<vmem>>, vector<32x128xf32>
    tpu.vector_store %arg7[%c0_8, %c0_9], %10 {strides = array<i32>} : memref<32x128xf32, #tpu.memory_space<vmem>>, vector<32x128xf32>,
    return
  }
  func.func @transform_0(%arg0: i32, %arg1: i32, %arg2: i32) -> (i32, i32) {
    %c0_i32 = arith.constant 0 : i32
    return %arg0, %arg2 : i32, i32
  }
  func.func @transform_1(%arg0: i32, %arg1: i32, %arg2: i32) -> (i32, i32) {
    %c0_i32 = arith.constant 0 : i32
    return %arg2, %arg1 : i32, i32
  }
  func.func @transform_2(%arg0: i32, %arg1: i32, %arg2: i32) -> (i32, i32) {
    %c0_i32 = arith.constant 0 : i32
    %c0_i32_0 = arith.constant 0 : i32
    return %c0_i32, %arg1 : i32, i32
  }
  func.func @transform_3(%arg0: i32, %arg1: i32, %arg2: i32) -> (i32, i32) {
    %c0_i32 = arith.constant 0 : i32
    %c0_i32_0 = arith.constant 0 : i32
    return %c0_i32, %arg1 : i32, i32
  }
  func.func @transform_4(%arg0: i32, %arg1: i32, %arg2: i32) -> (i32, i32) {
    %c0_i32 = arith.constant 0 : i32
    return %arg0, %arg1 : i32, i32
  }
}

module attributes {stable_mosaic.version = 11 : i64} {
  func.func @_mm_bn_act_kernel(%arg0: i32, %arg1: i32, %arg2: i32, %arg3: memref<32x64xbf16, #tpu.memory_space<vmem>>, %arg4: memref<64x128xbf16, #tpu.memory_space<vmem>>, %arg5: memref<1x128xf32, #tpu.memory_space<vmem>>, %arg6: memref<1x128xf32, #tpu.memory_space<vmem>>, %arg7: memref<32x128xf32, #tpu.memory_space<vmem>>) attributes {dimension_semantics = [#tpu.dimension_semantics<parallel>, #tpu.dimension_semantics<parallel>, #tpu.dimension_semantics<arbitrary>], iteration_bounds = array<i64: 1, 1, 1>, scalar_prefetch = 0 : i64, scratch_operands = 0 : i64, tpu.core_type = #tpu.core_type<tc>, window_params = [{transform_indices = @transform_0, window_bounds = array<i64: 32, 64>}, {transform_indices = @transform_1, window_bounds = array<i64: 64, 128>}, {transform_indices = @transform_2, window_bounds = array<i64: 1, 128>}, {transform_indices = @transform_3, window_bounds = array<i64: 1, 128>}, {transform_indices = @transform_4, window_bounds = array<i64: 32, 128>}]} {
    %c0 = arith.constant 0 : index
    %c0_0 = arith.constant 0 : index
    %0 = vector.load %arg3[%c0, %c0_0] : memref<32x64xbf16, #tpu.memory_space<vmem>>, vector<32x64xbf16>
    %c0_1 = arith.constant 0 : index
    %c0_2 = arith.constant 0 : index
    %1 = vector.load %arg4[%c0_1, %c0_2] : memref<64x128xbf16, #tpu.memory_space<vmem>>, vector<64x128xbf16>
    %cst = arith.constant dense<0.000000e+00> : vector<32x128xf32>
    %2 = tpu.matmul %0, %1, %cst {dimension_numbers = #tpu.dot_dimension_numbers<[1], [0], [0], [1], [0, 0, 1, 1], [], []>} : vector<32x64xbf16>, vector<64x128xbf16>, vector<32x128xf32> -> vector<32x128xf32>
    %c0_3 = arith.constant 0 : index
    %c0_4 = arith.constant 0 : index
    %3 = vector.load %arg5[%c0_3, %c0_4] : memref<1x128xf32, #tpu.memory_space<vmem>>, vector<1x128xf32>
    %4 = vector.broadcast %3 : vector<1x128xf32> to vector<32x128xf32>
    %5 = arith.mulf %2, %4 : vector<32x128xf32>
    %c0_5 = arith.constant 0 : index
    %c0_6 = arith.constant 0 : index
    %6 = vector.load %arg6[%c0_5, %c0_6] : memref<1x128xf32, #tpu.memory_space<vmem>>, vector<1x128xf32>
    %7 = vector.broadcast %6 : vector<1x128xf32> to vector<32x128xf32>
    %8 = arith.addf %5, %7 : vector<32x128xf32>
    %c0_7 = arith.constant 0 : index
    %c0_8 = arith.constant 0 : index
    %9 = vector.load %arg7[%c0_7, %c0_8] : memref<32x128xf32, #tpu.memory_space<vmem>>, vector<32x128xf32>
    tpu.vector_store %arg7[%c0_7, %c0_8], %8 {strides = array<i32>} : memref<32x128xf32, #tpu.memory_space<vmem>>, vector<32x128xf32>,
    return
  }
  func.func @transform_0(%arg0: i32, %arg1: i32, %arg2: i32) -> (i32, i32) {
    %c0_i32 = arith.constant 0 : i32
    return %arg0, %arg2 : i32, i32
  }
  func.func @transform_1(%arg0: i32, %arg1: i32, %arg2: i32) -> (i32, i32) {
    %c0_i32 = arith.constant 0 : i32
    return %arg2, %arg1 : i32, i32
  }
  func.func @transform_2(%arg0: i32, %arg1: i32, %arg2: i32) -> (i32, i32) {
    %c0_i32 = arith.constant 0 : i32
    %c0_i32_0 = arith.constant 0 : i32
    return %c0_i32, %arg1 : i32, i32
  }
  func.func @transform_3(%arg0: i32, %arg1: i32, %arg2: i32) -> (i32, i32) {
    %c0_i32 = arith.constant 0 : i32
    %c0_i32_0 = arith.constant 0 : i32
    return %c0_i32, %arg1 : i32, i32
  }
  func.func @transform_4(%arg0: i32, %arg1: i32, %arg2: i32) -> (i32, i32) {
    %c0_i32 = arith.constant 0 : i32
    return %arg0, %arg1 : i32, i32
  }
}

module attributes {stable_mosaic.version = 11 : i64} {
  func.func @_mm_bn_act_kernel(%arg0: i32, %arg1: i32, %arg2: i32, %arg3: memref<32x1152xbf16, #tpu.memory_space<vmem>>, %arg4: memref<1152x128xbf16, #tpu.memory_space<vmem>>, %arg5: memref<1x128xf32, #tpu.memory_space<vmem>>, %arg6: memref<1x128xf32, #tpu.memory_space<vmem>>, %arg7: memref<32x128xf32, #tpu.memory_space<vmem>>, %arg8: memref<32x128xf32, #tpu.memory_space<vmem>>) attributes {dimension_semantics = [#tpu.dimension_semantics<parallel>, #tpu.dimension_semantics<parallel>, #tpu.dimension_semantics<arbitrary>], iteration_bounds = array<i64: 1, 1, 1>, scalar_prefetch = 0 : i64, scratch_operands = 0 : i64, tpu.core_type = #tpu.core_type<tc>, window_params = [{transform_indices = @transform_0, window_bounds = array<i64: 32, 1152>}, {transform_indices = @transform_1, window_bounds = array<i64: 1152, 128>}, {transform_indices = @transform_2, window_bounds = array<i64: 1, 128>}, {transform_indices = @transform_3, window_bounds = array<i64: 1, 128>}, {transform_indices = @transform_4, window_bounds = array<i64: 32, 128>}, {transform_indices = @transform_5, window_bounds = array<i64: 32, 128>}]} {
    %c0 = arith.constant 0 : index
    %c0_0 = arith.constant 0 : index
    %0 = vector.load %arg3[%c0, %c0_0] : memref<32x1152xbf16, #tpu.memory_space<vmem>>, vector<32x1152xbf16>
    %c0_1 = arith.constant 0 : index
    %c0_2 = arith.constant 0 : index
    %1 = vector.load %arg4[%c0_1, %c0_2] : memref<1152x128xbf16, #tpu.memory_space<vmem>>, vector<1152x128xbf16>
    %cst = arith.constant dense<0.000000e+00> : vector<32x128xf32>
    %2 = tpu.matmul %0, %1, %cst {dimension_numbers = #tpu.dot_dimension_numbers<[1], [0], [0], [1], [0, 0, 1, 1], [], []>} : vector<32x1152xbf16>, vector<1152x128xbf16>, vector<32x128xf32> -> vector<32x128xf32>
    %c0_3 = arith.constant 0 : index
    %c0_4 = arith.constant 0 : index
    %3 = vector.load %arg5[%c0_3, %c0_4] : memref<1x128xf32, #tpu.memory_space<vmem>>, vector<1x128xf32>
    %4 = vector.broadcast %3 : vector<1x128xf32> to vector<32x128xf32>
    %5 = arith.mulf %2, %4 : vector<32x128xf32>
    %c0_5 = arith.constant 0 : index
    %c0_6 = arith.constant 0 : index
    %6 = vector.load %arg6[%c0_5, %c0_6] : memref<1x128xf32, #tpu.memory_space<vmem>>, vector<1x128xf32>
    %7 = vector.broadcast %6 : vector<1x128xf32> to vector<32x128xf32>
    %8 = arith.addf %5, %7 : vector<32x128xf32>
    %c0_7 = arith.constant 0 : index
    %c0_8 = arith.constant 0 : index
    %9 = vector.load %arg7[%c0_7, %c0_8] : memref<32x128xf32, #tpu.memory_space<vmem>>, vector<32x128xf32>
    %10 = arith.addf %8, %9 : vector<32x128xf32>
    %cst_9 = arith.constant 0.000000e+00 : f32
    %11 = vector.broadcast %cst_9 : f32 to vector<32x128xf32>
    %12 = arith.maximumf %10, %11 : vector<32x128xf32>
    %c0_10 = arith.constant 0 : index
    %c0_11 = arith.constant 0 : index
    %13 = vector.load %arg8[%c0_10, %c0_11] : memref<32x128xf32, #tpu.memory_space<vmem>>, vector<32x128xf32>
    tpu.vector_store %arg8[%c0_10, %c0_11], %12 {strides = array<i32>} : memref<32x128xf32, #tpu.memory_space<vmem>>, vector<32x128xf32>,
    return
  }
  func.func @transform_0(%arg0: i32, %arg1: i32, %arg2: i32) -> (i32, i32) {
    %c0_i32 = arith.constant 0 : i32
    return %arg0, %arg2 : i32, i32
  }
  func.func @transform_1(%arg0: i32, %arg1: i32, %arg2: i32) -> (i32, i32) {
    %c0_i32 = arith.constant 0 : i32
    return %arg2, %arg1 : i32, i32
  }
  func.func @transform_2(%arg0: i32, %arg1: i32, %arg2: i32) -> (i32, i32) {
    %c0_i32 = arith.constant 0 : i32
    %c0_i32_0 = arith.constant 0 : i32
    return %c0_i32, %arg1 : i32, i32
  }
  func.func @transform_3(%arg0: i32, %arg1: i32, %arg2: i32) -> (i32, i32) {
    %c0_i32 = arith.constant 0 : i32
    %c0_i32_0 = arith.constant 0 : i32
    return %c0_i32, %arg1 : i32, i32
  }
  func.func @transform_4(%arg0: i32, %arg1: i32, %arg2: i32) -> (i32, i32) {
    %c0_i32 = arith.constant 0 : i32
    return %arg0, %arg1 : i32, i32
  }
  func.func @transform_5(%arg0: i32, %arg1: i32, %arg2: i32) -> (i32, i32) {
    %c0_i32 = arith.constant 0 : i32
    return %arg0, %arg1 : i32, i32
  }
}

module attributes {stable_mosaic.version = 11 : i64} {
  func.func @_mm_bn_act_kernel(%arg0: i32, %arg1: i32, %arg2: i32, %arg3: memref<32x1152xbf16, #tpu.memory_space<vmem>>, %arg4: memref<1152x128xbf16, #tpu.memory_space<vmem>>, %arg5: memref<1x128xf32, #tpu.memory_space<vmem>>, %arg6: memref<1x128xf32, #tpu.memory_space<vmem>>, %arg7: memref<32x128xf32, #tpu.memory_space<vmem>>) attributes {dimension_semantics = [#tpu.dimension_semantics<parallel>, #tpu.dimension_semantics<parallel>, #tpu.dimension_semantics<arbitrary>], iteration_bounds = array<i64: 1, 1, 1>, scalar_prefetch = 0 : i64, scratch_operands = 0 : i64, tpu.core_type = #tpu.core_type<tc>, window_params = [{transform_indices = @transform_0, window_bounds = array<i64: 32, 1152>}, {transform_indices = @transform_1, window_bounds = array<i64: 1152, 128>}, {transform_indices = @transform_2, window_bounds = array<i64: 1, 128>}, {transform_indices = @transform_3, window_bounds = array<i64: 1, 128>}, {transform_indices = @transform_4, window_bounds = array<i64: 32, 128>}]} {
    %c0 = arith.constant 0 : index
    %c0_0 = arith.constant 0 : index
    %0 = vector.load %arg3[%c0, %c0_0] : memref<32x1152xbf16, #tpu.memory_space<vmem>>, vector<32x1152xbf16>
    %c0_1 = arith.constant 0 : index
    %c0_2 = arith.constant 0 : index
    %1 = vector.load %arg4[%c0_1, %c0_2] : memref<1152x128xbf16, #tpu.memory_space<vmem>>, vector<1152x128xbf16>
    %cst = arith.constant dense<0.000000e+00> : vector<32x128xf32>
    %2 = tpu.matmul %0, %1, %cst {dimension_numbers = #tpu.dot_dimension_numbers<[1], [0], [0], [1], [0, 0, 1, 1], [], []>} : vector<32x1152xbf16>, vector<1152x128xbf16>, vector<32x128xf32> -> vector<32x128xf32>
    %c0_3 = arith.constant 0 : index
    %c0_4 = arith.constant 0 : index
    %3 = vector.load %arg5[%c0_3, %c0_4] : memref<1x128xf32, #tpu.memory_space<vmem>>, vector<1x128xf32>
    %4 = vector.broadcast %3 : vector<1x128xf32> to vector<32x128xf32>
    %5 = arith.mulf %2, %4 : vector<32x128xf32>
    %c0_5 = arith.constant 0 : index
    %c0_6 = arith.constant 0 : index
    %6 = vector.load %arg6[%c0_5, %c0_6] : memref<1x128xf32, #tpu.memory_space<vmem>>, vector<1x128xf32>
    %7 = vector.broadcast %6 : vector<1x128xf32> to vector<32x128xf32>
    %8 = arith.addf %5, %7 : vector<32x128xf32>
    %cst_7 = arith.constant 0.000000e+00 : f32
    %9 = vector.broadcast %cst_7 : f32 to vector<32x128xf32>
    %10 = arith.maximumf %8, %9 : vector<32x128xf32>
    %c0_8 = arith.constant 0 : index
    %c0_9 = arith.constant 0 : index
    %11 = vector.load %arg7[%c0_8, %c0_9] : memref<32x128xf32, #tpu.memory_space<vmem>>, vector<32x128xf32>
    tpu.vector_store %arg7[%c0_8, %c0_9], %10 {strides = array<i32>} : memref<32x128xf32, #tpu.memory_space<vmem>>, vector<32x128xf32>,
    return
  }
  func.func @transform_0(%arg0: i32, %arg1: i32, %arg2: i32) -> (i32, i32) {
    %c0_i32 = arith.constant 0 : i32
    return %arg0, %arg2 : i32, i32
  }
  func.func @transform_1(%arg0: i32, %arg1: i32, %arg2: i32) -> (i32, i32) {
    %c0_i32 = arith.constant 0 : i32
    return %arg2, %arg1 : i32, i32
  }
  func.func @transform_2(%arg0: i32, %arg1: i32, %arg2: i32) -> (i32, i32) {
    %c0_i32 = arith.constant 0 : i32
    %c0_i32_0 = arith.constant 0 : i32
    return %c0_i32, %arg1 : i32, i32
  }
  func.func @transform_3(%arg0: i32, %arg1: i32, %arg2: i32) -> (i32, i32) {
    %c0_i32 = arith.constant 0 : i32
    %c0_i32_0 = arith.constant 0 : i32
    return %c0_i32, %arg1 : i32, i32
  }
  func.func @transform_4(%arg0: i32, %arg1: i32, %arg2: i32) -> (i32, i32) {
    %c0_i32 = arith.constant 0 : i32
    return %arg0, %arg1 : i32, i32
  }
}

module attributes {stable_mosaic.version = 11 : i64} {
  func.func @_mm_bn_act_kernel(%arg0: i32, %arg1: i32, %arg2: i32, %arg3: memref<16x1152xbf16, #tpu.memory_space<vmem>>, %arg4: memref<1152x256xbf16, #tpu.memory_space<vmem>>, %arg5: memref<1x256xf32, #tpu.memory_space<vmem>>, %arg6: memref<1x256xf32, #tpu.memory_space<vmem>>, %arg7: memref<16x256xf32, #tpu.memory_space<vmem>>) attributes {dimension_semantics = [#tpu.dimension_semantics<parallel>, #tpu.dimension_semantics<parallel>, #tpu.dimension_semantics<arbitrary>], iteration_bounds = array<i64: 1, 1, 1>, scalar_prefetch = 0 : i64, scratch_operands = 0 : i64, tpu.core_type = #tpu.core_type<tc>, window_params = [{transform_indices = @transform_0, window_bounds = array<i64: 16, 1152>}, {transform_indices = @transform_1, window_bounds = array<i64: 1152, 256>}, {transform_indices = @transform_2, window_bounds = array<i64: 1, 256>}, {transform_indices = @transform_3, window_bounds = array<i64: 1, 256>}, {transform_indices = @transform_4, window_bounds = array<i64: 16, 256>}]} {
    %c0 = arith.constant 0 : index
    %c0_0 = arith.constant 0 : index
    %0 = vector.load %arg3[%c0, %c0_0] : memref<16x1152xbf16, #tpu.memory_space<vmem>>, vector<16x1152xbf16>
    %c0_1 = arith.constant 0 : index
    %c0_2 = arith.constant 0 : index
    %1 = vector.load %arg4[%c0_1, %c0_2] : memref<1152x256xbf16, #tpu.memory_space<vmem>>, vector<1152x256xbf16>
    %cst = arith.constant dense<0.000000e+00> : vector<16x256xf32>
    %2 = tpu.matmul %0, %1, %cst {dimension_numbers = #tpu.dot_dimension_numbers<[1], [0], [0], [1], [0, 0, 1, 1], [], []>} : vector<16x1152xbf16>, vector<1152x256xbf16>, vector<16x256xf32> -> vector<16x256xf32>
    %c0_3 = arith.constant 0 : index
    %c0_4 = arith.constant 0 : index
    %3 = vector.load %arg5[%c0_3, %c0_4] : memref<1x256xf32, #tpu.memory_space<vmem>>, vector<1x256xf32>
    %4 = vector.broadcast %3 : vector<1x256xf32> to vector<16x256xf32>
    %5 = arith.mulf %2, %4 : vector<16x256xf32>
    %c0_5 = arith.constant 0 : index
    %c0_6 = arith.constant 0 : index
    %6 = vector.load %arg6[%c0_5, %c0_6] : memref<1x256xf32, #tpu.memory_space<vmem>>, vector<1x256xf32>
    %7 = vector.broadcast %6 : vector<1x256xf32> to vector<16x256xf32>
    %8 = arith.addf %5, %7 : vector<16x256xf32>
    %cst_7 = arith.constant 0.000000e+00 : f32
    %9 = vector.broadcast %cst_7 : f32 to vector<16x256xf32>
    %10 = arith.maximumf %8, %9 : vector<16x256xf32>
    %c0_8 = arith.constant 0 : index
    %c0_9 = arith.constant 0 : index
    %11 = vector.load %arg7[%c0_8, %c0_9] : memref<16x256xf32, #tpu.memory_space<vmem>>, vector<16x256xf32>
    tpu.vector_store %arg7[%c0_8, %c0_9], %10 {strides = array<i32>} : memref<16x256xf32, #tpu.memory_space<vmem>>, vector<16x256xf32>,
    return
  }
  func.func @transform_0(%arg0: i32, %arg1: i32, %arg2: i32) -> (i32, i32) {
    %c0_i32 = arith.constant 0 : i32
    return %arg0, %arg2 : i32, i32
  }
  func.func @transform_1(%arg0: i32, %arg1: i32, %arg2: i32) -> (i32, i32) {
    %c0_i32 = arith.constant 0 : i32
    return %arg2, %arg1 : i32, i32
  }
  func.func @transform_2(%arg0: i32, %arg1: i32, %arg2: i32) -> (i32, i32) {
    %c0_i32 = arith.constant 0 : i32
    %c0_i32_0 = arith.constant 0 : i32
    return %c0_i32, %arg1 : i32, i32
  }
  func.func @transform_3(%arg0: i32, %arg1: i32, %arg2: i32) -> (i32, i32) {
    %c0_i32 = arith.constant 0 : i32
    %c0_i32_0 = arith.constant 0 : i32
    return %c0_i32, %arg1 : i32, i32
  }
  func.func @transform_4(%arg0: i32, %arg1: i32, %arg2: i32) -> (i32, i32) {
    %c0_i32 = arith.constant 0 : i32
    return %arg0, %arg1 : i32, i32
  }
}

module attributes {stable_mosaic.version = 11 : i64} {
  func.func @_mm_bn_act_kernel(%arg0: i32, %arg1: i32, %arg2: i32, %arg3: memref<16x128xbf16, #tpu.memory_space<vmem>>, %arg4: memref<128x256xbf16, #tpu.memory_space<vmem>>, %arg5: memref<1x256xf32, #tpu.memory_space<vmem>>, %arg6: memref<1x256xf32, #tpu.memory_space<vmem>>, %arg7: memref<16x256xf32, #tpu.memory_space<vmem>>) attributes {dimension_semantics = [#tpu.dimension_semantics<parallel>, #tpu.dimension_semantics<parallel>, #tpu.dimension_semantics<arbitrary>], iteration_bounds = array<i64: 1, 1, 1>, scalar_prefetch = 0 : i64, scratch_operands = 0 : i64, tpu.core_type = #tpu.core_type<tc>, window_params = [{transform_indices = @transform_0, window_bounds = array<i64: 16, 128>}, {transform_indices = @transform_1, window_bounds = array<i64: 128, 256>}, {transform_indices = @transform_2, window_bounds = array<i64: 1, 256>}, {transform_indices = @transform_3, window_bounds = array<i64: 1, 256>}, {transform_indices = @transform_4, window_bounds = array<i64: 16, 256>}]} {
    %c0 = arith.constant 0 : index
    %c0_0 = arith.constant 0 : index
    %0 = vector.load %arg3[%c0, %c0_0] : memref<16x128xbf16, #tpu.memory_space<vmem>>, vector<16x128xbf16>
    %c0_1 = arith.constant 0 : index
    %c0_2 = arith.constant 0 : index
    %1 = vector.load %arg4[%c0_1, %c0_2] : memref<128x256xbf16, #tpu.memory_space<vmem>>, vector<128x256xbf16>
    %cst = arith.constant dense<0.000000e+00> : vector<16x256xf32>
    %2 = tpu.matmul %0, %1, %cst {dimension_numbers = #tpu.dot_dimension_numbers<[1], [0], [0], [1], [0, 0, 1, 1], [], []>} : vector<16x128xbf16>, vector<128x256xbf16>, vector<16x256xf32> -> vector<16x256xf32>
    %c0_3 = arith.constant 0 : index
    %c0_4 = arith.constant 0 : index
    %3 = vector.load %arg5[%c0_3, %c0_4] : memref<1x256xf32, #tpu.memory_space<vmem>>, vector<1x256xf32>
    %4 = vector.broadcast %3 : vector<1x256xf32> to vector<16x256xf32>
    %5 = arith.mulf %2, %4 : vector<16x256xf32>
    %c0_5 = arith.constant 0 : index
    %c0_6 = arith.constant 0 : index
    %6 = vector.load %arg6[%c0_5, %c0_6] : memref<1x256xf32, #tpu.memory_space<vmem>>, vector<1x256xf32>
    %7 = vector.broadcast %6 : vector<1x256xf32> to vector<16x256xf32>
    %8 = arith.addf %5, %7 : vector<16x256xf32>
    %c0_7 = arith.constant 0 : index
    %c0_8 = arith.constant 0 : index
    %9 = vector.load %arg7[%c0_7, %c0_8] : memref<16x256xf32, #tpu.memory_space<vmem>>, vector<16x256xf32>
    tpu.vector_store %arg7[%c0_7, %c0_8], %8 {strides = array<i32>} : memref<16x256xf32, #tpu.memory_space<vmem>>, vector<16x256xf32>,
    return
  }
  func.func @transform_0(%arg0: i32, %arg1: i32, %arg2: i32) -> (i32, i32) {
    %c0_i32 = arith.constant 0 : i32
    return %arg0, %arg2 : i32, i32
  }
  func.func @transform_1(%arg0: i32, %arg1: i32, %arg2: i32) -> (i32, i32) {
    %c0_i32 = arith.constant 0 : i32
    return %arg2, %arg1 : i32, i32
  }
  func.func @transform_2(%arg0: i32, %arg1: i32, %arg2: i32) -> (i32, i32) {
    %c0_i32 = arith.constant 0 : i32
    %c0_i32_0 = arith.constant 0 : i32
    return %c0_i32, %arg1 : i32, i32
  }
  func.func @transform_3(%arg0: i32, %arg1: i32, %arg2: i32) -> (i32, i32) {
    %c0_i32 = arith.constant 0 : i32
    %c0_i32_0 = arith.constant 0 : i32
    return %c0_i32, %arg1 : i32, i32
  }
  func.func @transform_4(%arg0: i32, %arg1: i32, %arg2: i32) -> (i32, i32) {
    %c0_i32 = arith.constant 0 : i32
    return %arg0, %arg1 : i32, i32
  }
}

module attributes {stable_mosaic.version = 11 : i64} {
  func.func @_mm_bn_act_kernel(%arg0: i32, %arg1: i32, %arg2: i32, %arg3: memref<16x256xbf16, #tpu.memory_space<vmem>>, %arg4: memref<256x256xbf16, #tpu.memory_space<vmem>>, %arg5: memref<1x256xf32, #tpu.memory_space<vmem>>, %arg6: memref<1x256xf32, #tpu.memory_space<vmem>>, %arg7: memref<16x256xf32, #tpu.memory_space<vmem>>, %arg8: memref<16x256xf32, #tpu.memory_space<vmem>>) attributes {dimension_semantics = [#tpu.dimension_semantics<parallel>, #tpu.dimension_semantics<parallel>, #tpu.dimension_semantics<arbitrary>], iteration_bounds = array<i64: 1, 1, 9>, scalar_prefetch = 0 : i64, scratch_operands = 0 : i64, tpu.core_type = #tpu.core_type<tc>, window_params = [{transform_indices = @transform_0, window_bounds = array<i64: 16, 256>}, {transform_indices = @transform_1, window_bounds = array<i64: 256, 256>}, {transform_indices = @transform_2, window_bounds = array<i64: 1, 256>}, {transform_indices = @transform_3, window_bounds = array<i64: 1, 256>}, {transform_indices = @transform_4, window_bounds = array<i64: 16, 256>}, {transform_indices = @transform_5, window_bounds = array<i64: 16, 256>}]} {
    %c0_i32 = arith.constant 0 : i32
    %0 = arith.cmpi eq, %arg2, %c0_i32 : i32
    %1 = arith.extui %0 : i1 to i32
    %c0_i32_0 = arith.constant 0 : i32
    %2 = arith.cmpi ne, %1, %c0_i32_0 : i32
    scf.if %2 {
      %cst_9 = arith.constant 0.000000e+00 : f32
      %12 = vector.broadcast %cst_9 : f32 to vector<16x256xf32>
      %c0_10 = arith.constant 0 : index
      %c0_11 = arith.constant 0 : index
      %13 = vector.load %arg8[%c0_10, %c0_11] : memref<16x256xf32, #tpu.memory_space<vmem>>, vector<16x256xf32>
      tpu.vector_store %arg8[%c0_10, %c0_11], %12 {strides = array<i32>} : memref<16x256xf32, #tpu.memory_space<vmem>>, vector<16x256xf32>,
    } else {
    }
    %c0 = arith.constant 0 : index
    %c0_1 = arith.constant 0 : index
    %3 = vector.load %arg8[%c0, %c0_1] : memref<16x256xf32, #tpu.memory_space<vmem>>, vector<16x256xf32>
    %c0_2 = arith.constant 0 : index
    %c0_3 = arith.constant 0 : index
    %4 = vector.load %arg3[%c0_2, %c0_3] : memref<16x256xbf16, #tpu.memory_space<vmem>>, vector<16x256xbf16>
    %c0_4 = arith.constant 0 : index
    %c0_5 = arith.constant 0 : index
    %5 = vector.load %arg4[%c0_4, %c0_5] : memref<256x256xbf16, #tpu.memory_space<vmem>>, vector<256x256xbf16>
    %cst = arith.constant dense<0.000000e+00> : vector<16x256xf32>
    %6 = tpu.matmul %4, %5, %cst {dimension_numbers = #tpu.dot_dimension_numbers<[1], [0], [0], [1], [0, 0, 1, 1], [], []>} : vector<16x256xbf16>, vector<256x256xbf16>, vector<16x256xf32> -> vector<16x256xf32>
    %7 = arith.addf %3, %6 : vector<16x256xf32>
    %c0_6 = arith.constant 0 : index
    %c0_7 = arith.constant 0 : index
    %8 = vector.load %arg8[%c0_6, %c0_7] : memref<16x256xf32, #tpu.memory_space<vmem>>, vector<16x256xf32>
    tpu.vector_store %arg8[%c0_6, %c0_7], %7 {strides = array<i32>} : memref<16x256xf32, #tpu.memory_space<vmem>>, vector<16x256xf32>,
    %c8_i32 = arith.constant 8 : i32
    %9 = arith.cmpi eq, %arg2, %c8_i32 : i32
    %10 = arith.extui %9 : i1 to i32
    %c0_i32_8 = arith.constant 0 : i32
    %11 = arith.cmpi ne, %10, %c0_i32_8 : i32
    scf.if %11 {
      %c0_9 = arith.constant 0 : index
      %c0_10 = arith.constant 0 : index
      %12 = vector.load %arg8[%c0_9, %c0_10] : memref<16x256xf32, #tpu.memory_space<vmem>>, vector<16x256xf32>
      %c0_11 = arith.constant 0 : index
      %c0_12 = arith.constant 0 : index
      %13 = vector.load %arg5[%c0_11, %c0_12] : memref<1x256xf32, #tpu.memory_space<vmem>>, vector<1x256xf32>
      %14 = vector.broadcast %13 : vector<1x256xf32> to vector<16x256xf32>
      %15 = arith.mulf %12, %14 : vector<16x256xf32>
      %c0_13 = arith.constant 0 : index
      %c0_14 = arith.constant 0 : index
      %16 = vector.load %arg6[%c0_13, %c0_14] : memref<1x256xf32, #tpu.memory_space<vmem>>, vector<1x256xf32>
      %17 = vector.broadcast %16 : vector<1x256xf32> to vector<16x256xf32>
      %18 = arith.addf %15, %17 : vector<16x256xf32>
      %c0_15 = arith.constant 0 : index
      %c0_16 = arith.constant 0 : index
      %19 = vector.load %arg7[%c0_15, %c0_16] : memref<16x256xf32, #tpu.memory_space<vmem>>, vector<16x256xf32>
      %20 = arith.addf %18, %19 : vector<16x256xf32>
      %cst_17 = arith.constant 0.000000e+00 : f32
      %21 = vector.broadcast %cst_17 : f32 to vector<16x256xf32>
      %22 = arith.maximumf %20, %21 : vector<16x256xf32>
      %c0_18 = arith.constant 0 : index
      %c0_19 = arith.constant 0 : index
      %23 = vector.load %arg8[%c0_18, %c0_19] : memref<16x256xf32, #tpu.memory_space<vmem>>, vector<16x256xf32>
      tpu.vector_store %arg8[%c0_18, %c0_19], %22 {strides = array<i32>} : memref<16x256xf32, #tpu.memory_space<vmem>>, vector<16x256xf32>,
    } else {
    }
    return
  }
  func.func @transform_0(%arg0: i32, %arg1: i32, %arg2: i32) -> (i32, i32) {
    %c0_i32 = arith.constant 0 : i32
    return %arg0, %arg2 : i32, i32
  }
  func.func @transform_1(%arg0: i32, %arg1: i32, %arg2: i32) -> (i32, i32) {
    %c0_i32 = arith.constant 0 : i32
    return %arg2, %arg1 : i32, i32
  }
  func.func @transform_2(%arg0: i32, %arg1: i32, %arg2: i32) -> (i32, i32) {
    %c0_i32 = arith.constant 0 : i32
    %c0_i32_0 = arith.constant 0 : i32
    return %c0_i32, %arg1 : i32, i32
  }
  func.func @transform_3(%arg0: i32, %arg1: i32, %arg2: i32) -> (i32, i32) {
    %c0_i32 = arith.constant 0 : i32
    %c0_i32_0 = arith.constant 0 : i32
    return %c0_i32, %arg1 : i32, i32
  }
  func.func @transform_4(%arg0: i32, %arg1: i32, %arg2: i32) -> (i32, i32) {
    %c0_i32 = arith.constant 0 : i32
    return %arg0, %arg1 : i32, i32
  }
  func.func @transform_5(%arg0: i32, %arg1: i32, %arg2: i32) -> (i32, i32) {
    %c0_i32 = arith.constant 0 : i32
    return %arg0, %arg1 : i32, i32
  }
}

module attributes {stable_mosaic.version = 11 : i64} {
  func.func @_mm_bn_act_kernel(%arg0: i32, %arg1: i32, %arg2: i32, %arg3: memref<16x256xbf16, #tpu.memory_space<vmem>>, %arg4: memref<256x256xbf16, #tpu.memory_space<vmem>>, %arg5: memref<1x256xf32, #tpu.memory_space<vmem>>, %arg6: memref<1x256xf32, #tpu.memory_space<vmem>>, %arg7: memref<16x256xf32, #tpu.memory_space<vmem>>) attributes {dimension_semantics = [#tpu.dimension_semantics<parallel>, #tpu.dimension_semantics<parallel>, #tpu.dimension_semantics<arbitrary>], iteration_bounds = array<i64: 1, 1, 9>, scalar_prefetch = 0 : i64, scratch_operands = 0 : i64, tpu.core_type = #tpu.core_type<tc>, window_params = [{transform_indices = @transform_0, window_bounds = array<i64: 16, 256>}, {transform_indices = @transform_1, window_bounds = array<i64: 256, 256>}, {transform_indices = @transform_2, window_bounds = array<i64: 1, 256>}, {transform_indices = @transform_3, window_bounds = array<i64: 1, 256>}, {transform_indices = @transform_4, window_bounds = array<i64: 16, 256>}]} {
    %c0_i32 = arith.constant 0 : i32
    %0 = arith.cmpi eq, %arg2, %c0_i32 : i32
    %1 = arith.extui %0 : i1 to i32
    %c0_i32_0 = arith.constant 0 : i32
    %2 = arith.cmpi ne, %1, %c0_i32_0 : i32
    scf.if %2 {
      %cst_9 = arith.constant 0.000000e+00 : f32
      %12 = vector.broadcast %cst_9 : f32 to vector<16x256xf32>
      %c0_10 = arith.constant 0 : index
      %c0_11 = arith.constant 0 : index
      %13 = vector.load %arg7[%c0_10, %c0_11] : memref<16x256xf32, #tpu.memory_space<vmem>>, vector<16x256xf32>
      tpu.vector_store %arg7[%c0_10, %c0_11], %12 {strides = array<i32>} : memref<16x256xf32, #tpu.memory_space<vmem>>, vector<16x256xf32>,
    } else {
    }
    %c0 = arith.constant 0 : index
    %c0_1 = arith.constant 0 : index
    %3 = vector.load %arg7[%c0, %c0_1] : memref<16x256xf32, #tpu.memory_space<vmem>>, vector<16x256xf32>
    %c0_2 = arith.constant 0 : index
    %c0_3 = arith.constant 0 : index
    %4 = vector.load %arg3[%c0_2, %c0_3] : memref<16x256xbf16, #tpu.memory_space<vmem>>, vector<16x256xbf16>
    %c0_4 = arith.constant 0 : index
    %c0_5 = arith.constant 0 : index
    %5 = vector.load %arg4[%c0_4, %c0_5] : memref<256x256xbf16, #tpu.memory_space<vmem>>, vector<256x256xbf16>
    %cst = arith.constant dense<0.000000e+00> : vector<16x256xf32>
    %6 = tpu.matmul %4, %5, %cst {dimension_numbers = #tpu.dot_dimension_numbers<[1], [0], [0], [1], [0, 0, 1, 1], [], []>} : vector<16x256xbf16>, vector<256x256xbf16>, vector<16x256xf32> -> vector<16x256xf32>
    %7 = arith.addf %3, %6 : vector<16x256xf32>
    %c0_6 = arith.constant 0 : index
    %c0_7 = arith.constant 0 : index
    %8 = vector.load %arg7[%c0_6, %c0_7] : memref<16x256xf32, #tpu.memory_space<vmem>>, vector<16x256xf32>
    tpu.vector_store %arg7[%c0_6, %c0_7], %7 {strides = array<i32>} : memref<16x256xf32, #tpu.memory_space<vmem>>, vector<16x256xf32>,
    %c8_i32 = arith.constant 8 : i32
    %9 = arith.cmpi eq, %arg2, %c8_i32 : i32
    %10 = arith.extui %9 : i1 to i32
    %c0_i32_8 = arith.constant 0 : i32
    %11 = arith.cmpi ne, %10, %c0_i32_8 : i32
    scf.if %11 {
      %c0_9 = arith.constant 0 : index
      %c0_10 = arith.constant 0 : index
      %12 = vector.load %arg7[%c0_9, %c0_10] : memref<16x256xf32, #tpu.memory_space<vmem>>, vector<16x256xf32>
      %c0_11 = arith.constant 0 : index
      %c0_12 = arith.constant 0 : index
      %13 = vector.load %arg5[%c0_11, %c0_12] : memref<1x256xf32, #tpu.memory_space<vmem>>, vector<1x256xf32>
      %14 = vector.broadcast %13 : vector<1x256xf32> to vector<16x256xf32>
      %15 = arith.mulf %12, %14 : vector<16x256xf32>
      %c0_13 = arith.constant 0 : index
      %c0_14 = arith.constant 0 : index
      %16 = vector.load %arg6[%c0_13, %c0_14] : memref<1x256xf32, #tpu.memory_space<vmem>>, vector<1x256xf32>
      %17 = vector.broadcast %16 : vector<1x256xf32> to vector<16x256xf32>
      %18 = arith.addf %15, %17 : vector<16x256xf32>
      %cst_15 = arith.constant 0.000000e+00 : f32
      %19 = vector.broadcast %cst_15 : f32 to vector<16x256xf32>
      %20 = arith.maximumf %18, %19 : vector<16x256xf32>
      %c0_16 = arith.constant 0 : index
      %c0_17 = arith.constant 0 : index
      %21 = vector.load %arg7[%c0_16, %c0_17] : memref<16x256xf32, #tpu.memory_space<vmem>>, vector<16x256xf32>
      tpu.vector_store %arg7[%c0_16, %c0_17], %20 {strides = array<i32>} : memref<16x256xf32, #tpu.memory_space<vmem>>, vector<16x256xf32>,
    } else {
    }
    return
  }
  func.func @transform_0(%arg0: i32, %arg1: i32, %arg2: i32) -> (i32, i32) {
    %c0_i32 = arith.constant 0 : i32
    return %arg0, %arg2 : i32, i32
  }
  func.func @transform_1(%arg0: i32, %arg1: i32, %arg2: i32) -> (i32, i32) {
    %c0_i32 = arith.constant 0 : i32
    return %arg2, %arg1 : i32, i32
  }
  func.func @transform_2(%arg0: i32, %arg1: i32, %arg2: i32) -> (i32, i32) {
    %c0_i32 = arith.constant 0 : i32
    %c0_i32_0 = arith.constant 0 : i32
    return %c0_i32, %arg1 : i32, i32
  }
  func.func @transform_3(%arg0: i32, %arg1: i32, %arg2: i32) -> (i32, i32) {
    %c0_i32 = arith.constant 0 : i32
    %c0_i32_0 = arith.constant 0 : i32
    return %c0_i32, %arg1 : i32, i32
  }
  func.func @transform_4(%arg0: i32, %arg1: i32, %arg2: i32) -> (i32, i32) {
    %c0_i32 = arith.constant 0 : i32
    return %arg0, %arg1 : i32, i32
  }
}

module attributes {stable_mosaic.version = 11 : i64} {
  func.func @_mm_bn_act_kernel(%arg0: i32, %arg1: i32, %arg2: i32, %arg3: memref<16x256xbf16, #tpu.memory_space<vmem>>, %arg4: memref<256x256xbf16, #tpu.memory_space<vmem>>, %arg5: memref<1x256xf32, #tpu.memory_space<vmem>>, %arg6: memref<1x256xf32, #tpu.memory_space<vmem>>, %arg7: memref<16x256xf32, #tpu.memory_space<vmem>>) attributes {dimension_semantics = [#tpu.dimension_semantics<parallel>, #tpu.dimension_semantics<parallel>, #tpu.dimension_semantics<arbitrary>], iteration_bounds = array<i64: 1, 2, 9>, scalar_prefetch = 0 : i64, scratch_operands = 0 : i64, tpu.core_type = #tpu.core_type<tc>, window_params = [{transform_indices = @transform_0, window_bounds = array<i64: 16, 256>}, {transform_indices = @transform_1, window_bounds = array<i64: 256, 256>}, {transform_indices = @transform_2, window_bounds = array<i64: 1, 256>}, {transform_indices = @transform_3, window_bounds = array<i64: 1, 256>}, {transform_indices = @transform_4, window_bounds = array<i64: 16, 256>}]} {
    %c0_i32 = arith.constant 0 : i32
    %0 = arith.cmpi eq, %arg2, %c0_i32 : i32
    %1 = arith.extui %0 : i1 to i32
    %c0_i32_0 = arith.constant 0 : i32
    %2 = arith.cmpi ne, %1, %c0_i32_0 : i32
    scf.if %2 {
      %cst_9 = arith.constant 0.000000e+00 : f32
      %12 = vector.broadcast %cst_9 : f32 to vector<16x256xf32>
      %c0_10 = arith.constant 0 : index
      %c0_11 = arith.constant 0 : index
      %13 = vector.load %arg7[%c0_10, %c0_11] : memref<16x256xf32, #tpu.memory_space<vmem>>, vector<16x256xf32>
      tpu.vector_store %arg7[%c0_10, %c0_11], %12 {strides = array<i32>} : memref<16x256xf32, #tpu.memory_space<vmem>>, vector<16x256xf32>,
    } else {
    }
    %c0 = arith.constant 0 : index
    %c0_1 = arith.constant 0 : index
    %3 = vector.load %arg7[%c0, %c0_1] : memref<16x256xf32, #tpu.memory_space<vmem>>, vector<16x256xf32>
    %c0_2 = arith.constant 0 : index
    %c0_3 = arith.constant 0 : index
    %4 = vector.load %arg3[%c0_2, %c0_3] : memref<16x256xbf16, #tpu.memory_space<vmem>>, vector<16x256xbf16>
    %c0_4 = arith.constant 0 : index
    %c0_5 = arith.constant 0 : index
    %5 = vector.load %arg4[%c0_4, %c0_5] : memref<256x256xbf16, #tpu.memory_space<vmem>>, vector<256x256xbf16>
    %cst = arith.constant dense<0.000000e+00> : vector<16x256xf32>
    %6 = tpu.matmul %4, %5, %cst {dimension_numbers = #tpu.dot_dimension_numbers<[1], [0], [0], [1], [0, 0, 1, 1], [], []>} : vector<16x256xbf16>, vector<256x256xbf16>, vector<16x256xf32> -> vector<16x256xf32>
    %7 = arith.addf %3, %6 : vector<16x256xf32>
    %c0_6 = arith.constant 0 : index
    %c0_7 = arith.constant 0 : index
    %8 = vector.load %arg7[%c0_6, %c0_7] : memref<16x256xf32, #tpu.memory_space<vmem>>, vector<16x256xf32>
    tpu.vector_store %arg7[%c0_6, %c0_7], %7 {strides = array<i32>} : memref<16x256xf32, #tpu.memory_space<vmem>>, vector<16x256xf32>,
    %c8_i32 = arith.constant 8 : i32
    %9 = arith.cmpi eq, %arg2, %c8_i32 : i32
    %10 = arith.extui %9 : i1 to i32
    %c0_i32_8 = arith.constant 0 : i32
    %11 = arith.cmpi ne, %10, %c0_i32_8 : i32
    scf.if %11 {
      %c0_9 = arith.constant 0 : index
      %c0_10 = arith.constant 0 : index
      %12 = vector.load %arg7[%c0_9, %c0_10] : memref<16x256xf32, #tpu.memory_space<vmem>>, vector<16x256xf32>
      %c0_11 = arith.constant 0 : index
      %c0_12 = arith.constant 0 : index
      %13 = vector.load %arg5[%c0_11, %c0_12] : memref<1x256xf32, #tpu.memory_space<vmem>>, vector<1x256xf32>
      %14 = vector.broadcast %13 : vector<1x256xf32> to vector<16x256xf32>
      %15 = arith.mulf %12, %14 : vector<16x256xf32>
      %c0_13 = arith.constant 0 : index
      %c0_14 = arith.constant 0 : index
      %16 = vector.load %arg6[%c0_13, %c0_14] : memref<1x256xf32, #tpu.memory_space<vmem>>, vector<1x256xf32>
      %17 = vector.broadcast %16 : vector<1x256xf32> to vector<16x256xf32>
      %18 = arith.addf %15, %17 : vector<16x256xf32>
      %cst_15 = arith.constant 0.000000e+00 : f32
      %19 = vector.broadcast %cst_15 : f32 to vector<16x256xf32>
      %20 = arith.maximumf %18, %19 : vector<16x256xf32>
      %c0_16 = arith.constant 0 : index
      %c0_17 = arith.constant 0 : index
      %21 = vector.load %arg7[%c0_16, %c0_17] : memref<16x256xf32, #tpu.memory_space<vmem>>, vector<16x256xf32>
      tpu.vector_store %arg7[%c0_16, %c0_17], %20 {strides = array<i32>} : memref<16x256xf32, #tpu.memory_space<vmem>>, vector<16x256xf32>,
    } else {
    }
    return
  }
  func.func @transform_0(%arg0: i32, %arg1: i32, %arg2: i32) -> (i32, i32) {
    %c0_i32 = arith.constant 0 : i32
    return %arg0, %arg2 : i32, i32
  }
  func.func @transform_1(%arg0: i32, %arg1: i32, %arg2: i32) -> (i32, i32) {
    %c0_i32 = arith.constant 0 : i32
    return %arg2, %arg1 : i32, i32
  }
  func.func @transform_2(%arg0: i32, %arg1: i32, %arg2: i32) -> (i32, i32) {
    %c0_i32 = arith.constant 0 : i32
    %c0_i32_0 = arith.constant 0 : i32
    return %c0_i32, %arg1 : i32, i32
  }
  func.func @transform_3(%arg0: i32, %arg1: i32, %arg2: i32) -> (i32, i32) {
    %c0_i32 = arith.constant 0 : i32
    %c0_i32_0 = arith.constant 0 : i32
    return %c0_i32, %arg1 : i32, i32
  }
  func.func @transform_4(%arg0: i32, %arg1: i32, %arg2: i32) -> (i32, i32) {
    %c0_i32 = arith.constant 0 : i32
    return %arg0, %arg1 : i32, i32
  }
}

module attributes {stable_mosaic.version = 11 : i64} {
  func.func @_mm_bn_act_kernel(%arg0: i32, %arg1: i32, %arg2: i32, %arg3: memref<16x256xbf16, #tpu.memory_space<vmem>>, %arg4: memref<256x256xbf16, #tpu.memory_space<vmem>>, %arg5: memref<1x256xf32, #tpu.memory_space<vmem>>, %arg6: memref<1x256xf32, #tpu.memory_space<vmem>>, %arg7: memref<16x256xf32, #tpu.memory_space<vmem>>) attributes {dimension_semantics = [#tpu.dimension_semantics<parallel>, #tpu.dimension_semantics<parallel>, #tpu.dimension_semantics<arbitrary>], iteration_bounds = array<i64: 1, 2, 1>, scalar_prefetch = 0 : i64, scratch_operands = 0 : i64, tpu.core_type = #tpu.core_type<tc>, window_params = [{transform_indices = @transform_0, window_bounds = array<i64: 16, 256>}, {transform_indices = @transform_1, window_bounds = array<i64: 256, 256>}, {transform_indices = @transform_2, window_bounds = array<i64: 1, 256>}, {transform_indices = @transform_3, window_bounds = array<i64: 1, 256>}, {transform_indices = @transform_4, window_bounds = array<i64: 16, 256>}]} {
    %c0 = arith.constant 0 : index
    %c0_0 = arith.constant 0 : index
    %0 = vector.load %arg3[%c0, %c0_0] : memref<16x256xbf16, #tpu.memory_space<vmem>>, vector<16x256xbf16>
    %c0_1 = arith.constant 0 : index
    %c0_2 = arith.constant 0 : index
    %1 = vector.load %arg4[%c0_1, %c0_2] : memref<256x256xbf16, #tpu.memory_space<vmem>>, vector<256x256xbf16>
    %cst = arith.constant dense<0.000000e+00> : vector<16x256xf32>
    %2 = tpu.matmul %0, %1, %cst {dimension_numbers = #tpu.dot_dimension_numbers<[1], [0], [0], [1], [0, 0, 1, 1], [], []>} : vector<16x256xbf16>, vector<256x256xbf16>, vector<16x256xf32> -> vector<16x256xf32>
    %c0_3 = arith.constant 0 : index
    %c0_4 = arith.constant 0 : index
    %3 = vector.load %arg5[%c0_3, %c0_4] : memref<1x256xf32, #tpu.memory_space<vmem>>, vector<1x256xf32>
    %4 = vector.broadcast %3 : vector<1x256xf32> to vector<16x256xf32>
    %5 = arith.mulf %2, %4 : vector<16x256xf32>
    %c0_5 = arith.constant 0 : index
    %c0_6 = arith.constant 0 : index
    %6 = vector.load %arg6[%c0_5, %c0_6] : memref<1x256xf32, #tpu.memory_space<vmem>>, vector<1x256xf32>
    %7 = vector.broadcast %6 : vector<1x256xf32> to vector<16x256xf32>
    %8 = arith.addf %5, %7 : vector<16x256xf32>
    %c0_7 = arith.constant 0 : index
    %c0_8 = arith.constant 0 : index
    %9 = vector.load %arg7[%c0_7, %c0_8] : memref<16x256xf32, #tpu.memory_space<vmem>>, vector<16x256xf32>
    tpu.vector_store %arg7[%c0_7, %c0_8], %8 {strides = array<i32>} : memref<16x256xf32, #tpu.memory_space<vmem>>, vector<16x256xf32>,
    return
  }
  func.func @transform_0(%arg0: i32, %arg1: i32, %arg2: i32) -> (i32, i32) {
    %c0_i32 = arith.constant 0 : i32
    return %arg0, %arg2 : i32, i32
  }
  func.func @transform_1(%arg0: i32, %arg1: i32, %arg2: i32) -> (i32, i32) {
    %c0_i32 = arith.constant 0 : i32
    return %arg2, %arg1 : i32, i32
  }
  func.func @transform_2(%arg0: i32, %arg1: i32, %arg2: i32) -> (i32, i32) {
    %c0_i32 = arith.constant 0 : i32
    %c0_i32_0 = arith.constant 0 : i32
    return %c0_i32, %arg1 : i32, i32
  }
  func.func @transform_3(%arg0: i32, %arg1: i32, %arg2: i32) -> (i32, i32) {
    %c0_i32 = arith.constant 0 : i32
    %c0_i32_0 = arith.constant 0 : i32
    return %c0_i32, %arg1 : i32, i32
  }
  func.func @transform_4(%arg0: i32, %arg1: i32, %arg2: i32) -> (i32, i32) {
    %c0_i32 = arith.constant 0 : i32
    return %arg0, %arg1 : i32, i32
  }
}

module attributes {stable_mosaic.version = 11 : i64} {
  func.func @_mm_bn_act_kernel(%arg0: i32, %arg1: i32, %arg2: i32, %arg3: memref<16x512xbf16, #tpu.memory_space<vmem>>, %arg4: memref<512x256xbf16, #tpu.memory_space<vmem>>, %arg5: memref<1x256xf32, #tpu.memory_space<vmem>>, %arg6: memref<1x256xf32, #tpu.memory_space<vmem>>, %arg7: memref<16x256xf32, #tpu.memory_space<vmem>>, %arg8: memref<16x256xf32, #tpu.memory_space<vmem>>) attributes {dimension_semantics = [#tpu.dimension_semantics<parallel>, #tpu.dimension_semantics<parallel>, #tpu.dimension_semantics<arbitrary>], iteration_bounds = array<i64: 1, 2, 9>, scalar_prefetch = 0 : i64, scratch_operands = 0 : i64, tpu.core_type = #tpu.core_type<tc>, window_params = [{transform_indices = @transform_0, window_bounds = array<i64: 16, 512>}, {transform_indices = @transform_1, window_bounds = array<i64: 512, 256>}, {transform_indices = @transform_2, window_bounds = array<i64: 1, 256>}, {transform_indices = @transform_3, window_bounds = array<i64: 1, 256>}, {transform_indices = @transform_4, window_bounds = array<i64: 16, 256>}, {transform_indices = @transform_5, window_bounds = array<i64: 16, 256>}]} {
    %c0_i32 = arith.constant 0 : i32
    %0 = arith.cmpi eq, %arg2, %c0_i32 : i32
    %1 = arith.extui %0 : i1 to i32
    %c0_i32_0 = arith.constant 0 : i32
    %2 = arith.cmpi ne, %1, %c0_i32_0 : i32
    scf.if %2 {
      %cst_9 = arith.constant 0.000000e+00 : f32
      %12 = vector.broadcast %cst_9 : f32 to vector<16x256xf32>
      %c0_10 = arith.constant 0 : index
      %c0_11 = arith.constant 0 : index
      %13 = vector.load %arg8[%c0_10, %c0_11] : memref<16x256xf32, #tpu.memory_space<vmem>>, vector<16x256xf32>
      tpu.vector_store %arg8[%c0_10, %c0_11], %12 {strides = array<i32>} : memref<16x256xf32, #tpu.memory_space<vmem>>, vector<16x256xf32>,
    } else {
    }
    %c0 = arith.constant 0 : index
    %c0_1 = arith.constant 0 : index
    %3 = vector.load %arg8[%c0, %c0_1] : memref<16x256xf32, #tpu.memory_space<vmem>>, vector<16x256xf32>
    %c0_2 = arith.constant 0 : index
    %c0_3 = arith.constant 0 : index
    %4 = vector.load %arg3[%c0_2, %c0_3] : memref<16x512xbf16, #tpu.memory_space<vmem>>, vector<16x512xbf16>
    %c0_4 = arith.constant 0 : index
    %c0_5 = arith.constant 0 : index
    %5 = vector.load %arg4[%c0_4, %c0_5] : memref<512x256xbf16, #tpu.memory_space<vmem>>, vector<512x256xbf16>
    %cst = arith.constant dense<0.000000e+00> : vector<16x256xf32>
    %6 = tpu.matmul %4, %5, %cst {dimension_numbers = #tpu.dot_dimension_numbers<[1], [0], [0], [1], [0, 0, 1, 1], [], []>} : vector<16x512xbf16>, vector<512x256xbf16>, vector<16x256xf32> -> vector<16x256xf32>
    %7 = arith.addf %3, %6 : vector<16x256xf32>
    %c0_6 = arith.constant 0 : index
    %c0_7 = arith.constant 0 : index
    %8 = vector.load %arg8[%c0_6, %c0_7] : memref<16x256xf32, #tpu.memory_space<vmem>>, vector<16x256xf32>
    tpu.vector_store %arg8[%c0_6, %c0_7], %7 {strides = array<i32>} : memref<16x256xf32, #tpu.memory_space<vmem>>, vector<16x256xf32>,
    %c8_i32 = arith.constant 8 : i32
    %9 = arith.cmpi eq, %arg2, %c8_i32 : i32
    %10 = arith.extui %9 : i1 to i32
    %c0_i32_8 = arith.constant 0 : i32
    %11 = arith.cmpi ne, %10, %c0_i32_8 : i32
    scf.if %11 {
      %c0_9 = arith.constant 0 : index
      %c0_10 = arith.constant 0 : index
      %12 = vector.load %arg8[%c0_9, %c0_10] : memref<16x256xf32, #tpu.memory_space<vmem>>, vector<16x256xf32>
      %c0_11 = arith.constant 0 : index
      %c0_12 = arith.constant 0 : index
      %13 = vector.load %arg5[%c0_11, %c0_12] : memref<1x256xf32, #tpu.memory_space<vmem>>, vector<1x256xf32>
      %14 = vector.broadcast %13 : vector<1x256xf32> to vector<16x256xf32>
      %15 = arith.mulf %12, %14 : vector<16x256xf32>
      %c0_13 = arith.constant 0 : index
      %c0_14 = arith.constant 0 : index
      %16 = vector.load %arg6[%c0_13, %c0_14] : memref<1x256xf32, #tpu.memory_space<vmem>>, vector<1x256xf32>
      %17 = vector.broadcast %16 : vector<1x256xf32> to vector<16x256xf32>
      %18 = arith.addf %15, %17 : vector<16x256xf32>
      %c0_15 = arith.constant 0 : index
      %c0_16 = arith.constant 0 : index
      %19 = vector.load %arg7[%c0_15, %c0_16] : memref<16x256xf32, #tpu.memory_space<vmem>>, vector<16x256xf32>
      %20 = arith.addf %18, %19 : vector<16x256xf32>
      %cst_17 = arith.constant 0.000000e+00 : f32
      %21 = vector.broadcast %cst_17 : f32 to vector<16x256xf32>
      %22 = arith.maximumf %20, %21 : vector<16x256xf32>
      %c0_18 = arith.constant 0 : index
      %c0_19 = arith.constant 0 : index
      %23 = vector.load %arg8[%c0_18, %c0_19] : memref<16x256xf32, #tpu.memory_space<vmem>>, vector<16x256xf32>
      tpu.vector_store %arg8[%c0_18, %c0_19], %22 {strides = array<i32>} : memref<16x256xf32, #tpu.memory_space<vmem>>, vector<16x256xf32>,
    } else {
    }
    return
  }
  func.func @transform_0(%arg0: i32, %arg1: i32, %arg2: i32) -> (i32, i32) {
    %c0_i32 = arith.constant 0 : i32
    return %arg0, %arg2 : i32, i32
  }
  func.func @transform_1(%arg0: i32, %arg1: i32, %arg2: i32) -> (i32, i32) {
    %c0_i32 = arith.constant 0 : i32
    return %arg2, %arg1 : i32, i32
  }
  func.func @transform_2(%arg0: i32, %arg1: i32, %arg2: i32) -> (i32, i32) {
    %c0_i32 = arith.constant 0 : i32
    %c0_i32_0 = arith.constant 0 : i32
    return %c0_i32, %arg1 : i32, i32
  }
  func.func @transform_3(%arg0: i32, %arg1: i32, %arg2: i32) -> (i32, i32) {
    %c0_i32 = arith.constant 0 : i32
    %c0_i32_0 = arith.constant 0 : i32
    return %c0_i32, %arg1 : i32, i32
  }
  func.func @transform_4(%arg0: i32, %arg1: i32, %arg2: i32) -> (i32, i32) {
    %c0_i32 = arith.constant 0 : i32
    return %arg0, %arg1 : i32, i32
  }
  func.func @transform_5(%arg0: i32, %arg1: i32, %arg2: i32) -> (i32, i32) {
    %c0_i32 = arith.constant 0 : i32
    return %arg0, %arg1 : i32, i32
  }
}

module attributes {stable_mosaic.version = 11 : i64} {
  func.func @_mm_bn_act_kernel(%arg0: i32, %arg1: i32, %arg2: i32, %arg3: memref<16x512xbf16, #tpu.memory_space<vmem>>, %arg4: memref<512x256xbf16, #tpu.memory_space<vmem>>, %arg5: memref<1x256xf32, #tpu.memory_space<vmem>>, %arg6: memref<1x256xf32, #tpu.memory_space<vmem>>, %arg7: memref<16x256xf32, #tpu.memory_space<vmem>>) attributes {dimension_semantics = [#tpu.dimension_semantics<parallel>, #tpu.dimension_semantics<parallel>, #tpu.dimension_semantics<arbitrary>], iteration_bounds = array<i64: 1, 2, 9>, scalar_prefetch = 0 : i64, scratch_operands = 0 : i64, tpu.core_type = #tpu.core_type<tc>, window_params = [{transform_indices = @transform_0, window_bounds = array<i64: 16, 512>}, {transform_indices = @transform_1, window_bounds = array<i64: 512, 256>}, {transform_indices = @transform_2, window_bounds = array<i64: 1, 256>}, {transform_indices = @transform_3, window_bounds = array<i64: 1, 256>}, {transform_indices = @transform_4, window_bounds = array<i64: 16, 256>}]} {
    %c0_i32 = arith.constant 0 : i32
    %0 = arith.cmpi eq, %arg2, %c0_i32 : i32
    %1 = arith.extui %0 : i1 to i32
    %c0_i32_0 = arith.constant 0 : i32
    %2 = arith.cmpi ne, %1, %c0_i32_0 : i32
    scf.if %2 {
      %cst_9 = arith.constant 0.000000e+00 : f32
      %12 = vector.broadcast %cst_9 : f32 to vector<16x256xf32>
      %c0_10 = arith.constant 0 : index
      %c0_11 = arith.constant 0 : index
      %13 = vector.load %arg7[%c0_10, %c0_11] : memref<16x256xf32, #tpu.memory_space<vmem>>, vector<16x256xf32>
      tpu.vector_store %arg7[%c0_10, %c0_11], %12 {strides = array<i32>} : memref<16x256xf32, #tpu.memory_space<vmem>>, vector<16x256xf32>,
    } else {
    }
    %c0 = arith.constant 0 : index
    %c0_1 = arith.constant 0 : index
    %3 = vector.load %arg7[%c0, %c0_1] : memref<16x256xf32, #tpu.memory_space<vmem>>, vector<16x256xf32>
    %c0_2 = arith.constant 0 : index
    %c0_3 = arith.constant 0 : index
    %4 = vector.load %arg3[%c0_2, %c0_3] : memref<16x512xbf16, #tpu.memory_space<vmem>>, vector<16x512xbf16>
    %c0_4 = arith.constant 0 : index
    %c0_5 = arith.constant 0 : index
    %5 = vector.load %arg4[%c0_4, %c0_5] : memref<512x256xbf16, #tpu.memory_space<vmem>>, vector<512x256xbf16>
    %cst = arith.constant dense<0.000000e+00> : vector<16x256xf32>
    %6 = tpu.matmul %4, %5, %cst {dimension_numbers = #tpu.dot_dimension_numbers<[1], [0], [0], [1], [0, 0, 1, 1], [], []>} : vector<16x512xbf16>, vector<512x256xbf16>, vector<16x256xf32> -> vector<16x256xf32>
    %7 = arith.addf %3, %6 : vector<16x256xf32>
    %c0_6 = arith.constant 0 : index
    %c0_7 = arith.constant 0 : index
    %8 = vector.load %arg7[%c0_6, %c0_7] : memref<16x256xf32, #tpu.memory_space<vmem>>, vector<16x256xf32>
    tpu.vector_store %arg7[%c0_6, %c0_7], %7 {strides = array<i32>} : memref<16x256xf32, #tpu.memory_space<vmem>>, vector<16x256xf32>,
    %c8_i32 = arith.constant 8 : i32
    %9 = arith.cmpi eq, %arg2, %c8_i32 : i32
    %10 = arith.extui %9 : i1 to i32
    %c0_i32_8 = arith.constant 0 : i32
    %11 = arith.cmpi ne, %10, %c0_i32_8 : i32
    scf.if %11 {
      %c0_9 = arith.constant 0 : index
      %c0_10 = arith.constant 0 : index
      %12 = vector.load %arg7[%c0_9, %c0_10] : memref<16x256xf32, #tpu.memory_space<vmem>>, vector<16x256xf32>
      %c0_11 = arith.constant 0 : index
      %c0_12 = arith.constant 0 : index
      %13 = vector.load %arg5[%c0_11, %c0_12] : memref<1x256xf32, #tpu.memory_space<vmem>>, vector<1x256xf32>
      %14 = vector.broadcast %13 : vector<1x256xf32> to vector<16x256xf32>
      %15 = arith.mulf %12, %14 : vector<16x256xf32>
      %c0_13 = arith.constant 0 : index
      %c0_14 = arith.constant 0 : index
      %16 = vector.load %arg6[%c0_13, %c0_14] : memref<1x256xf32, #tpu.memory_space<vmem>>, vector<1x256xf32>
      %17 = vector.broadcast %16 : vector<1x256xf32> to vector<16x256xf32>
      %18 = arith.addf %15, %17 : vector<16x256xf32>
      %cst_15 = arith.constant 0.000000e+00 : f32
      %19 = vector.broadcast %cst_15 : f32 to vector<16x256xf32>
      %20 = arith.maximumf %18, %19 : vector<16x256xf32>
      %c0_16 = arith.constant 0 : index
      %c0_17 = arith.constant 0 : index
      %21 = vector.load %arg7[%c0_16, %c0_17] : memref<16x256xf32, #tpu.memory_space<vmem>>, vector<16x256xf32>
      tpu.vector_store %arg7[%c0_16, %c0_17], %20 {strides = array<i32>} : memref<16x256xf32, #tpu.memory_space<vmem>>, vector<16x256xf32>,
    } else {
    }
    return
  }
  func.func @transform_0(%arg0: i32, %arg1: i32, %arg2: i32) -> (i32, i32) {
    %c0_i32 = arith.constant 0 : i32
    return %arg0, %arg2 : i32, i32
  }
  func.func @transform_1(%arg0: i32, %arg1: i32, %arg2: i32) -> (i32, i32) {
    %c0_i32 = arith.constant 0 : i32
    return %arg2, %arg1 : i32, i32
  }
  func.func @transform_2(%arg0: i32, %arg1: i32, %arg2: i32) -> (i32, i32) {
    %c0_i32 = arith.constant 0 : i32
    %c0_i32_0 = arith.constant 0 : i32
    return %c0_i32, %arg1 : i32, i32
  }
  func.func @transform_3(%arg0: i32, %arg1: i32, %arg2: i32) -> (i32, i32) {
    %c0_i32 = arith.constant 0 : i32
    %c0_i32_0 = arith.constant 0 : i32
    return %c0_i32, %arg1 : i32, i32
  }
  func.func @transform_4(%arg0: i32, %arg1: i32, %arg2: i32) -> (i32, i32) {
    %c0_i32 = arith.constant 0 : i32
    return %arg0, %arg1 : i32, i32
  }
}

module attributes {stable_mosaic.version = 11 : i64} {
  func.func @_avg_pool_kernel(%arg0: i32, %arg1: memref<2x1x512xf32, #tpu.memory_space<vmem>>, %arg2: memref<2x512xf32, #tpu.memory_space<vmem>>) attributes {dimension_semantics = [#tpu.dimension_semantics<arbitrary>], iteration_bounds = array<i64: 1>, scalar_prefetch = 0 : i64, scratch_operands = 0 : i64, tpu.core_type = #tpu.core_type<tc>, window_params = [{pipeline_mode = #tpu.pipeline_mode<synchronous>, transform_indices = @transform_0, window_bounds = array<i64: 2, 1, 512>}, {pipeline_mode = #tpu.pipeline_mode<synchronous>, transform_indices = @transform_1, window_bounds = array<i64: 2, 512>}]} {
    %c0 = arith.constant 0 : index
    %c0_0 = arith.constant 0 : index
    %c0_1 = arith.constant 0 : index
    %0 = vector.load %arg1[%c0, %c0_0, %c0_1] : memref<2x1x512xf32, #tpu.memory_space<vmem>>, vector<2x1x512xf32>
    %cst = arith.constant dense<0.000000e+00> : vector<2x512xf32>
    %1 = vector.multi_reduction <add>, %0, %cst [1] : vector<2x1x512xf32> to vector<2x512xf32>
    %cst_2 = arith.constant 1.000000e+00 : f32
    %2 = vector.broadcast %cst_2 : f32 to vector<2x512xf32>
    %3 = arith.divf %1, %2 : vector<2x512xf32>
    %c0_3 = arith.constant 0 : index
    %c0_4 = arith.constant 0 : index
    %4 = vector.load %arg2[%c0_3, %c0_4] : memref<2x512xf32, #tpu.memory_space<vmem>>, vector<2x512xf32>
    tpu.vector_store %arg2[%c0_3, %c0_4], %3 {strides = array<i32>} : memref<2x512xf32, #tpu.memory_space<vmem>>, vector<2x512xf32>,
    return
  }
  func.func @transform_0(%arg0: i32) -> (i32, i32, i32) {
    %c0_i32 = arith.constant 0 : i32
    %c0_i32_0 = arith.constant 0 : i32
    %c0_i32_1 = arith.constant 0 : i32
    %c0_i32_2 = arith.constant 0 : i32
    return %c0_i32, %c0_i32_0, %c0_i32_1 : i32, i32, i32
  }
  func.func @transform_1(%arg0: i32) -> (i32, i32) {
    %c0_i32 = arith.constant 0 : i32
    %c0_i32_0 = arith.constant 0 : i32
    %c0_i32_1 = arith.constant 0 : i32
    return %c0_i32, %c0_i32_0 : i32, i32
  }
}

</mosaic_0001>

<bundles_post_ra>
// kernel: featurizer_forward.22
= control target key start
LH: loop header
LB: loop body
LE: loop exit
PB: predicated region body
PF: predicated region fallthrough
CT: control target
= control target key end

     0   :  { %v1350_v0 = vmov 0   ;;  %vm446_vm0 = vcmask 154624   ;;  %vm543_vm1 = vcmask 1040384   ;;  %vm544_vm2 = vcmask 1041408   ;;  %s2025_s1 = inlined_call_operand.vmem [shape: bf16[147,64], index: 1, kind: input, shape index: {}]   ;;  %s2026_s0 = inlined_call_operand.vmem [shape: bf16[512,147], index: 0, kind: input, shape index: {}]   ;;  %s2027_s2 = inlined_call_operand.vmem [shape: f32[1,64], index: 2, kind: input, shape index: {}]   ;;  %s2028_s3 = inlined_call_operand.vmem [shape: f32[1,64], index: 3, kind: input, shape index: {}]   ;;  %s2029_s4 = inlined_call_operand.vmem [shape: f32[512,64], index: 4, kind: output, shape index: {}]  }
   0x1   :  { %550 = vmatprep.subr.bf16.mxu0 %v1350_v0  ;;  %1222 = vmatprep.subr.bf16.mxu1 %v1350_v0  ;;  %v1244_v1 = vld [vmem:[%s2025_s1] sm:$0xff]   ;;  %v1245_v2 = vld [vmem:[%s2025_s1 + $0x8] sm:$0xff]   ;;  %v1246_v3 = vld [vmem:[%s2025_s1 + $0x10] sm:$0xff]   ;;  %v1351_v11 = vmov 65535   ;;  %vm1045_vm3 = vcmask 523264  }
   0x2   :  { %551 = vmatpush1.bf16.msra.mxu0 %v1244_v1  ;;  %1232 = vmatpush1.bf16.msra.mxu1 %v1244_v1  ;;  %v1247_v4 = vld [vmem:[%s2025_s1 + $0x18] sm:$0xff]   ;;  %v1256_v5 = vld [vmem:[%s2026_s0 + $0x4] ss:$8 sps:$4 sm:$0xff]   ;;  %v1250_v9 = vld [vmem:[%s2025_s1 + $0x30] sm:$0xff]   ;;  %v545_v12 = vsel %vm543_vm1, 4294967295, %v1351_v11 }
   0x3   :  { %552 = vmatprep.subr.bf16.mxu0 %v1350_v0  ;;  %1223 = vmatprep.subr.bf16.mxu1 %v1350_v0  ;;  %v1259_v6 = vld [vmem:[%s2026_s0 + $0x104] ss:$8 sps:$4 sm:$0xff]   ;;  %v1251_v10 = vld [vmem:[%s2025_s1 + $0x38] sm:$0xff]   ;;  %v1253_v14 = vld [vmem:[%s2025_s1 + $0x48] ss:$0 sps:$4 sm:$0x33]  }
   0x4   :  { %1188 = vmatprep.mubr.msk.bf16.mxu0 %vm446_vm0, %v1256_v5  ;;  %v1248_v7 = vld [vmem:[%s2025_s1 + $0x20] sm:$0xff]   ;;  %1204 = vmatprep.mubr.msk.bf16.mxu1 %vm446_vm0, %v1259_v6  ;;  %v1249_v8 = vld [vmem:[%s2025_s1 + $0x28] sm:$0xff]   ;;  %v546_v15 = vsel %vm544_vm2, %v545_v12, 0  ;;  %v1260_v19 = vld [vmem:[%s2026_s0 + $0x14] ss:$8 sps:$4 sm:$0xff]  }
   0x5   :  { %v1252_v13 = vld [vmem:[%s2025_s1 + $0x40] sm:$0xff]   ;;  %v548_v16 = vand.u32 %v1253_v14, %v546_v15  ;;  %v1262_v20 = vld [vmem:[%s2026_s0 + $0x114] ss:$8 sps:$4 sm:$0xff]   ;;  %v1264_v21 = vld [vmem:[%s2026_s0 + $0x10] ss:$8 sps:$4 sm:$0xff]  }
   0x6   :  { %553 = vmatpush1.bf16.msra.mxu0 %v1245_v2  ;;  %1233 = vmatpush1.bf16.msra.mxu1 %v1245_v2  ;;  %v1254_v17 = vld [vmem:[%s2026_s0] ss:$8 sps:$4 sm:$0xff]   ;;  %v1265_v22 = vld [vmem:[%s2026_s0 + $0x110] ss:$8 sps:$4 sm:$0xff]   ;;  %v1266_v23 = vld [vmem:[%s2026_s0 + $0x24] ss:$8 sps:$4 sm:$0xff]  }
   0x7   :  { %554 = vmatprep.subr.bf16.mxu0 %v1350_v0  ;;  %1224 = vmatprep.subr.bf16.mxu1 %v1350_v0  ;;  %v1257_v18 = vld [vmem:[%s2026_s0 + $0x100] ss:$8 sps:$4 sm:$0xff]   ;;  %v1268_v24 = vld [vmem:[%s2026_s0 + $0x124] ss:$8 sps:$4 sm:$0xff]   ;;  %v1272_v27 = vld [vmem:[%s2026_s0 + $0x34] ss:$8 sps:$4 sm:$0xff]  }
   0x8   :  { %v1270_v25 = vld [vmem:[%s2026_s0 + $0x20] ss:$8 sps:$4 sm:$0xff]   ;;  %v1274_v28 = vld [vmem:[%s2026_s0 + $0x134] ss:$8 sps:$4 sm:$0xff]   ;;  %v1276_v29 = vld [vmem:[%s2026_s0 + $0x30] ss:$8 sps:$4 sm:$0xff]  }
   0x9   :  { %v1271_v26 = vld [vmem:[%s2026_s0 + $0x120] ss:$8 sps:$4 sm:$0xff]   ;;  %v1277_v30 = vld [vmem:[%s2026_s0 + $0x130] ss:$8 sps:$4 sm:$0xff]   ;;  %v1278_v31 = vld [vmem:[%s2026_s0 + $0x44] ss:$8 sps:$4 sm:$0xff]  }
   0xa   :  { %555 = vmatpush1.bf16.msra.mxu0 %v1246_v3  ;;  %1234 = vmatpush1.bf16.msra.mxu1 %v1246_v3  ;;  %v1280_v32 = vld [vmem:[%s2026_s0 + $0x144] ss:$8 sps:$4 sm:$0xff]   ;;  %v1282_v33 = vld [vmem:[%s2026_s0 + $0x40] ss:$8 sps:$4 sm:$0xff]   ;;  %v1284_v35 = vld [vmem:[%s2026_s0 + $0x54] ss:$8 sps:$4 sm:$0xff]  }
   0xb   :  { %556 = vmatprep.subr.bf16.mxu0 %v1350_v0  ;;  %1225 = vmatprep.subr.bf16.mxu1 %v1350_v0  ;;  %v1283_v34 = vld [vmem:[%s2026_s0 + $0x140] ss:$8 sps:$4 sm:$0xff]   ;;  %v1286_v36 = vld [vmem:[%s2026_s0 + $0x154] ss:$8 sps:$4 sm:$0xff]   ;;  %v1288_v37 = vld [vmem:[%s2026_s0 + $0x50] ss:$8 sps:$4 sm:$0xff]  }
   0xc   :  { %v1289_v38 = vld [vmem:[%s2026_s0 + $0x150] ss:$8 sps:$4 sm:$0xff]   ;;  %v1290_v39 = vld [vmem:[%s2026_s0 + $0x64] ss:$8 sps:$4 sm:$0xff]   ;;  %v1294_v41 = vld [vmem:[%s2026_s0 + $0x60] ss:$8 sps:$4 sm:$0xff]  }
   0xd   :  { %v1292_v40 = vld [vmem:[%s2026_s0 + $0x164] ss:$8 sps:$4 sm:$0xff]   ;;  %v1295_v42 = vld [vmem:[%s2026_s0 + $0x160] ss:$8 sps:$4 sm:$0xff]   ;;  %v1296_v43 = vld [vmem:[%s2026_s0 + $0x74] ss:$8 sps:$4 sm:$0xff]  }
   0xe   :  { %557 = vmatpush1.bf16.msra.mxu0 %v1247_v4  ;;  %1235 = vmatpush1.bf16.msra.mxu1 %v1247_v4  ;;  %v1298_v44 = vld [vmem:[%s2026_s0 + $0x174] ss:$8 sps:$4 sm:$0xff]   ;;  %v1300_v45 = vld [vmem:[%s2026_s0 + $0x70] ss:$8 sps:$4 sm:$0xff]   ;;  %v1302_v47 = vld [vmem:[%s2026_s0 + $0x84] ss:$8 sps:$4 sm:$0xff]  }
   0xf   :  { %558 = vmatprep.subr.bf16.mxu0 %v1350_v0  ;;  %1226 = vmatprep.subr.bf16.mxu1 %v1350_v0  ;;  %v1301_v46 = vld [vmem:[%s2026_s0 + $0x170] ss:$8 sps:$4 sm:$0xff]   ;;  %v1304_v48 = vld [vmem:[%s2026_s0 + $0x184] ss:$8 sps:$4 sm:$0xff]   ;;  %v1306_v49 = vld [vmem:[%s2026_s0 + $0x80] ss:$8 sps:$4 sm:$0xff]  }
  0x10   :  { %v1307_v50 = vld [vmem:[%s2026_s0 + $0x180] ss:$8 sps:$4 sm:$0xff]   ;;  %v1308_v51 = vld [vmem:[%s2026_s0 + $0x94] ss:$8 sps:$4 sm:$0xff]   ;;  %v1312_v53 = vld [vmem:[%s2026_s0 + $0x90] ss:$8 sps:$4 sm:$0xff]  }
  0x11   :  { %v1310_v52 = vld [vmem:[%s2026_s0 + $0x194] ss:$8 sps:$4 sm:$0xff]   ;;  %v1313_v54 = vld [vmem:[%s2026_s0 + $0x190] ss:$8 sps:$4 sm:$0xff]   ;;  %v1314_v55 = vld [vmem:[%s2026_s0 + $0xa4] ss:$8 sps:$4 sm:$0xff]  }
  0x12   :  { %559 = vmatpush1.bf16.msra.mxu0 %v1248_v7  ;;  %1236 = vmatpush1.bf16.msra.mxu1 %v1248_v7  ;;  %v1316_v56 = vld [vmem:[%s2026_s0 + $0x1a4] ss:$8 sps:$4 sm:$0xff]   ;;  %v1318_v57 = vld [vmem:[%s2026_s0 + $0xa0] ss:$8 sps:$4 sm:$0xff]   ;;  %v1320_v59 = vld [vmem:[%s2026_s0 + $0xb4] ss:$8 sps:$4 sm:$0xff]  }
  0x13   :  { %560 = vmatprep.subr.bf16.mxu0 %v1350_v0  ;;  %1227 = vmatprep.subr.bf16.mxu1 %v1350_v0  ;;  %v1319_v58 = vld [vmem:[%s2026_s0 + $0x1a0] ss:$8 sps:$4 sm:$0xff]   ;;  %v1322_v60 = vld [vmem:[%s2026_s0 + $0x1b4] ss:$8 sps:$4 sm:$0xff]   ;;  %v1324_v61 = vld [vmem:[%s2026_s0 + $0xb0] ss:$8 sps:$4 sm:$0xff]  }
  0x14   :  { %v1325_v62 = vld [vmem:[%s2026_s0 + $0x1b0] ss:$8 sps:$4 sm:$0xff]   ;;  %v1326_v63 = vld [vmem:[%s2026_s0 + $0xc4] ss:$8 sps:$4 sm:$0xff]   ;;  %v1330_v1 = vld [vmem:[%s2026_s0 + $0xc0] ss:$8 sps:$4 sm:$0xff]  }
  0x15   :  { %v1331_v2 = vld [vmem:[%s2026_s0 + $0x1c0] ss:$8 sps:$4 sm:$0xff]   ;;  %v1332_v3 = vld [vmem:[%s2026_s0 + $0xd4] ss:$8 sps:$4 sm:$0xff]   ;;  %v1336_v5 = vld [vmem:[%s2026_s0 + $0xd0] ss:$8 sps:$4 sm:$0xff]  }
  0x16   :  { %561 = vmatpush1.bf16.msra.mxu0 %v1249_v8  ;;  %1237 = vmatpush1.bf16.msra.mxu1 %v1249_v8  ;;  %v1334_v4 = vld [vmem:[%s2026_s0 + $0x1d4] ss:$8 sps:$4 sm:$0xff]   ;;  %v1337_v6 = vld [vmem:[%s2026_s0 + $0x1d0] ss:$8 sps:$4 sm:$0xff]   ;;  %v1338_v7 = vld [vmem:[%s2026_s0 + $0xe4] ss:$8 sps:$4 sm:$0xff]  }
  0x17   :  { %562 = vmatprep.subr.bf16.mxu0 %v1350_v0  ;;  %1228 = vmatprep.subr.bf16.mxu1 %v1350_v0  ;;  %v1340_v8 = vld [vmem:[%s2026_s0 + $0x1e4] ss:$8 sps:$4 sm:$0xff]   ;;  %v1344_v11 = vld [vmem:[%s2026_s0 + $0xf4] ss:$8 sps:$4 sm:$0xff]   ;;  %v1349_v14 = vld [vmem:[%s2026_s0 + $0x1f0] ss:$8 sps:$4 sm:$0xff]  }
  0x18   :  { %v1346_v12 = vld [vmem:[%s2026_s0 + $0x1f4] ss:$8 sps:$4 sm:$0xff]   ;;  %v1634_v15 = vld [vmem:[%s2027_s2] ss:$0 sm:$0xff] }
  0x1a   :  { %563 = vmatpush1.bf16.msra.mxu0 %v1250_v9  ;;  %1238 = vmatpush1.bf16.msra.mxu1 %v1250_v9  ;;  %v1342_v9 = vld [vmem:[%s2026_s0 + $0xe0] ss:$8 sps:$4 sm:$0xff]  }
  0x1b   :  { %564 = vmatprep.subr.bf16.mxu0 %v1350_v0  ;;  %1229 = vmatprep.subr.bf16.mxu1 %v1350_v0 }
  0x1e   :  { %565 = vmatpush1.bf16.msra.mxu0 %v1251_v10  ;;  %1239 = vmatpush1.bf16.msra.mxu1 %v1251_v10  ;;  %v1343_v10 = vld [vmem:[%s2026_s0 + $0x1e0] ss:$8 sps:$4 sm:$0xff]  }
  0x1f   :  { %566 = vmatprep.subr.bf16.mxu0 %v1350_v0  ;;  %1230 = vmatprep.subr.bf16.mxu1 %v1350_v0 }
  0x22   :  { %567 = vmatpush1.bf16.msra.mxu0 %v1252_v13  ;;  %1240 = vmatpush1.bf16.msra.mxu1 %v1252_v13  ;;  %v1348_v13 = vld [vmem:[%s2026_s0 + $0xf0] ss:$8 sps:$4 sm:$0xff]  }
  0x23   :  { %568 = vmatprep.subr.bf16.mxu0 %v1350_v0  ;;  %1231 = vmatprep.subr.bf16.mxu1 %v1350_v0  ;;  %v1328_v0 = vld [vmem:[%s2026_s0 + $0x1c4] ss:$8 sps:$4 sm:$0xff]  }
  0x26   :  { %569 = vmatpush1.bf16.msra.mxu0 %v548_v16  ;;  %1241 = vmatpush1.bf16.msra.mxu1 %v548_v16 }
  0x29   :  { %583 = vmatmul.mubr.bf16.vlgmr.msra.gmra.mrb[0].mxu0 %v1254_v17  ;;  %711 = vmatmul.mubr.bf16.vlgmr.msra.gmra.mrb[0].mxu1 %v1257_v18  ;;  %v1639_v17 = vld [vmem:[%s2028_s3] ss:$0 sm:$0xff] }
  0x2a   :  { %1189 = vmatprep.mubr.msk.bf16.mxu0 %vm446_vm0, %v1260_v19  ;;  %1205 = vmatprep.mubr.msk.bf16.mxu1 %vm446_vm0, %v1262_v20 }
  0x31   :  { %591 = vmatmul.mubr.bf16.gmra.mrb[4].mxu0 %v1264_v21  ;;  %719 = vmatmul.mubr.bf16.gmra.mrb[4].mxu1 %v1265_v22 }
  0x32   :  { %1190 = vmatprep.mubr.msk.bf16.mxu0 %vm446_vm0, %v1266_v23  ;;  %1206 = vmatprep.mubr.msk.bf16.mxu1 %vm446_vm0, %v1268_v24 }
  0x39   :  { %599 = vmatmul.mubr.bf16.gmra.mrb[8].mxu0 %v1270_v25  ;;  %727 = vmatmul.mubr.bf16.gmra.mrb[8].mxu1 %v1271_v26 }
  0x3a   :  { %1191 = vmatprep.mubr.msk.bf16.mxu0 %vm446_vm0, %v1272_v27  ;;  %1207 = vmatprep.mubr.msk.bf16.mxu1 %vm446_vm0, %v1274_v28 }
  0x41   :  { %607 = vmatmul.mubr.bf16.gmra.mrb[12].mxu0 %v1276_v29  ;;  %735 = vmatmul.mubr.bf16.gmra.mrb[12].mxu1 %v1277_v30 }
  0x42   :  { %1192 = vmatprep.mubr.msk.bf16.mxu0 %vm446_vm0, %v1278_v31  ;;  %1208 = vmatprep.mubr.msk.bf16.mxu1 %vm446_vm0, %v1280_v32 }
  0x49   :  { %615 = vmatmul.mubr.bf16.gmra.mrb[16].mxu0 %v1282_v33  ;;  %743 = vmatmul.mubr.bf16.gmra.mrb[16].mxu1 %v1283_v34 }
  0x4a   :  { %1193 = vmatprep.mubr.msk.bf16.mxu0 %vm446_vm0, %v1284_v35  ;;  %1209 = vmatprep.mubr.msk.bf16.mxu1 %vm446_vm0, %v1286_v36 }
  0x51   :  { %623 = vmatmul.mubr.bf16.gmra.mrb[20].mxu0 %v1288_v37  ;;  %751 = vmatmul.mubr.bf16.gmra.mrb[20].mxu1 %v1289_v38 }
  0x52   :  { %1194 = vmatprep.mubr.msk.bf16.mxu0 %vm446_vm0, %v1290_v39  ;;  %1210 = vmatprep.mubr.msk.bf16.mxu1 %vm446_vm0, %v1292_v40 }
  0x59   :  { %631 = vmatmul.mubr.bf16.gmra.mrb[24].mxu0 %v1294_v41  ;;  %759 = vmatmul.mubr.bf16.gmra.mrb[24].mxu1 %v1295_v42 }
  0x5a   :  { %1195 = vmatprep.mubr.msk.bf16.mxu0 %vm446_vm0, %v1296_v43  ;;  %1211 = vmatprep.mubr.msk.bf16.mxu1 %vm446_vm0, %v1298_v44 }
  0x61   :  { %639 = vmatmul.mubr.bf16.gmra.mrb[28].mxu0 %v1300_v45  ;;  %767 = vmatmul.mubr.bf16.gmra.mrb[28].mxu1 %v1301_v46 }
  0x62   :  { %1196 = vmatprep.mubr.msk.bf16.mxu0 %vm446_vm0, %v1302_v47  ;;  %1212 = vmatprep.mubr.msk.bf16.mxu1 %vm446_vm0, %v1304_v48 }
  0x69   :  { %647 = vmatmul.mubr.bf16.gmra.mrb[32].mxu0 %v1306_v49  ;;  %775 = vmatmul.mubr.bf16.gmra.mrb[32].mxu1 %v1307_v50 }
  0x6a   :  { %1197 = vmatprep.mubr.msk.bf16.mxu0 %vm446_vm0, %v1308_v51  ;;  %1213 = vmatprep.mubr.msk.bf16.mxu1 %vm446_vm0, %v1310_v52 }
  0x71   :  { %655 = vmatmul.mubr.bf16.gmra.mrb[36].mxu0 %v1312_v53  ;;  %783 = vmatmul.mubr.bf16.gmra.mrb[36].mxu1 %v1313_v54 }
  0x72   :  { %1198 = vmatprep.mubr.msk.bf16.mxu0 %vm446_vm0, %v1314_v55  ;;  %1214 = vmatprep.mubr.msk.bf16.mxu1 %vm446_vm0, %v1316_v56 }
  0x79   :  { %663 = vmatmul.mubr.bf16.gmra.mrb[40].mxu0 %v1318_v57  ;;  %791 = vmatmul.mubr.bf16.gmra.mrb[40].mxu1 %v1319_v58 }
  0x7a   :  { %1199 = vmatprep.mubr.msk.bf16.mxu0 %vm446_vm0, %v1320_v59  ;;  %1215 = vmatprep.mubr.msk.bf16.mxu1 %vm446_vm0, %v1322_v60 }
  0x81   :  { %671 = vmatmul.mubr.bf16.gmra.mrb[44].mxu0 %v1324_v61  ;;  %799 = vmatmul.mubr.bf16.gmra.mrb[44].mxu1 %v1325_v62 }
  0x82   :  { %1200 = vmatprep.mubr.msk.bf16.mxu0 %vm446_vm0, %v1326_v63  ;;  %1216 = vmatprep.mubr.msk.bf16.mxu1 %vm446_vm0, %v1328_v0 }
  0x89   :  { %679 = vmatmul.mubr.bf16.gmra.mrb[48].mxu0 %v1330_v1  ;;  %807 = vmatmul.mubr.bf16.gmra.mrb[48].mxu1 %v1331_v2 }
  0x8a   :  { %1201 = vmatprep.mubr.msk.bf16.mxu0 %vm446_vm0, %v1332_v3  ;;  %1217 = vmatprep.mubr.msk.bf16.mxu1 %vm446_vm0, %v1334_v4 }
  0x91   :  { %687 = vmatmul.mubr.bf16.gmra.mrb[52].mxu0 %v1336_v5  ;;  %815 = vmatmul.mubr.bf16.gmra.mrb[52].mxu1 %v1337_v6 }
  0x92   :  { %1202 = vmatprep.mubr.msk.bf16.mxu0 %vm446_vm0, %v1338_v7  ;;  %1218 = vmatprep.mubr.msk.bf16.mxu1 %vm446_vm0, %v1340_v8 }
  0x99   :  { %695 = vmatmul.mubr.bf16.gmra.mrb[56].mxu0 %v1342_v9  ;;  %823 = vmatmul.mubr.bf16.gmra.mrb[56].mxu1 %v1343_v10 }
  0x9a   :  { %1203 = vmatprep.mubr.msk.bf16.mxu0 %vm446_vm0, %v1344_v11  ;;  %1219 = vmatprep.mubr.msk.bf16.mxu1 %vm446_vm0, %v1346_v12 }
  0xa1   :  { %703 = vmatmul.mubr.bf16.gmra.mrb[60].mxu0 %v1348_v13  ;;  %831 = vmatmul.mubr.bf16.gmra.mrb[60].mxu1 %v1349_v14 }
  0xfc   :  { %v584_v16 = vpop.f32.mrb[0].mxu0  ;;  %v712_v18 = vpop.f32.mrb[0].mxu1 }
  0xfd   :  { %v846_v19 = vmul.f32 %v1634_v15, %v584_v16  ;;  %v878_v20 = vmul.f32 %v1634_v15, %v712_v18  ;;  %v586_v21 = vpop.f32.mrb[1].mxu0  ;;  %v714_v22 = vpop.f32.mrb[1].mxu1 }
  0xfe   :  { %v587_v23 = vpop.f32.mrb[2].mxu0  ;;  %v715_v24 = vpop.f32.mrb[2].mxu1 }
  0xff   :  { %v917_v25 = vadd.f32 %v1639_v17, %v846_v19  ;;  %v949_v26 = vadd.f32 %v1639_v17, %v878_v20  ;;  %v847_v27 = vmul.f32 %v1634_v15, %v587_v23  ;;  %v879_v28 = vmul.f32 %v1634_v15, %v715_v24  ;;  %v589_v29 = vpop.f32.mrb[3].mxu0  ;;  %v717_v30 = vpop.f32.mrb[3].mxu1 }
 0x101   :  { %v981_v31 = vmax.f32 %v917_v25, 0.0  ;;  %v1013_v32 = vmax.f32 %v949_v26, 0.0  ;;  %v918_v33 = vadd.f32 %v1639_v17, %v847_v27  ;;  %v950_v34 = vadd.f32 %v1639_v17, %v879_v28 }
 0x103   :  { %1046 = vst.msk [vmem:[%s2029_s4] sm:$0xff] %vm1045_vm3, %v981_v31  ;;  %1078 = vst.msk [vmem:[%s2029_s4 + $0x100] sm:$0xff] %vm1045_vm3, %v1013_v32  ;;  %v982_v35 = vmax.f32 %v918_v33, 0.0  ;;  %v1014_v36 = vmax.f32 %v950_v34, 0.0 }
 0x104   :  { %v592_v37 = vpop.f32.mrb[4].mxu0  ;;  %v720_v38 = vpop.f32.mrb[4].mxu1 }
 0x105   :  { %1047 = vst.msk [vmem:[%s2029_s4 + $0x8] sm:$0xff] %vm1045_vm3, %v982_v35  ;;  %1079 = vst.msk [vmem:[%s2029_s4 + $0x108] sm:$0xff] %vm1045_vm3, %v1014_v36  ;;  %v848_v39 = vmul.f32 %v1634_v15, %v592_v37  ;;  %v880_v40 = vmul.f32 %v1634_v15, %v720_v38  ;;  %v594_v41 = vpop.f32.mrb[5].mxu0  ;;  %v722_v42 = vpop.f32.mrb[5].mxu1 }
 0x106   :  { %v595_v43 = vpop.f32.mrb[6].mxu0  ;;  %v723_v44 = vpop.f32.mrb[6].mxu1 }
 0x107   :  { %v919_v45 = vadd.f32 %v1639_v17, %v848_v39  ;;  %v951_v46 = vadd.f32 %v1639_v17, %v880_v40  ;;  %v849_v47 = vmul.f32 %v1634_v15, %v595_v43  ;;  %v881_v48 = vmul.f32 %v1634_v15, %v723_v44  ;;  %v597_v49 = vpop.f32.mrb[7].mxu0  ;;  %v725_v50 = vpop.f32.mrb[7].mxu1 }
 0x109   :  { %v983_v51 = vmax.f32 %v919_v45, 0.0  ;;  %v1015_v52 = vmax.f32 %v951_v46, 0.0  ;;  %v920_v53 = vadd.f32 %v1639_v17, %v849_v47  ;;  %v952_v54 = vadd.f32 %v1639_v17, %v881_v48 }
 0x10b   :  { %1048 = vst.msk [vmem:[%s2029_s4 + $0x10] sm:$0xff] %vm1045_vm3, %v983_v51  ;;  %1080 = vst.msk [vmem:[%s2029_s4 + $0x110] sm:$0xff] %vm1045_vm3, %v1015_v52  ;;  %v984_v55 = vmax.f32 %v920_v53, 0.0  ;;  %v1016_v56 = vmax.f32 %v952_v54, 0.0 }
 0x10c   :  { %v600_v57 = vpop.f32.mrb[8].mxu0  ;;  %v728_v58 = vpop.f32.mrb[8].mxu1 }
 0x10d   :  { %1049 = vst.msk [vmem:[%s2029_s4 + $0x18] sm:$0xff] %vm1045_vm3, %v984_v55  ;;  %1081 = vst.msk [vmem:[%s2029_s4 + $0x118] sm:$0xff] %vm1045_vm3, %v1016_v56  ;;  %v850_v59 = vmul.f32 %v1634_v15, %v600_v57  ;;  %v882_v60 = vmul.f32 %v1634_v15, %v728_v58  ;;  %v602_v61 = vpop.f32.mrb[9].mxu0  ;;  %v730_v62 = vpop.f32.mrb[9].mxu1 }
 0x10e   :  { %v603_v63 = vpop.f32.mrb[10].mxu0  ;;  %v731_v0 = vpop.f32.mrb[10].mxu1 }
 0x10f   :  { %v921_v1 = vadd.f32 %v1639_v17, %v850_v59  ;;  %v953_v2 = vadd.f32 %v1639_v17, %v882_v60  ;;  %v851_v3 = vmul.f32 %v1634_v15, %v603_v63  ;;  %v883_v4 = vmul.f32 %v1634_v15, %v731_v0  ;;  %v605_v5 = vpop.f32.mrb[11].mxu0  ;;  %v733_v6 = vpop.f32.mrb[11].mxu1 }
 0x111   :  { %v985_v7 = vmax.f32 %v921_v1, 0.0  ;;  %v1017_v8 = vmax.f32 %v953_v2, 0.0  ;;  %v922_v9 = vadd.f32 %v1639_v17, %v851_v3  ;;  %v954_v10 = vadd.f32 %v1639_v17, %v883_v4 }
 0x113   :  { %1050 = vst.msk [vmem:[%s2029_s4 + $0x20] sm:$0xff] %vm1045_vm3, %v985_v7  ;;  %1082 = vst.msk [vmem:[%s2029_s4 + $0x120] sm:$0xff] %vm1045_vm3, %v1017_v8  ;;  %v986_v11 = vmax.f32 %v922_v9, 0.0  ;;  %v1018_v12 = vmax.f32 %v954_v10, 0.0 }
 0x114   :  { %v608_v13 = vpop.f32.mrb[12].mxu0  ;;  %v736_v14 = vpop.f32.mrb[12].mxu1 }
 0x115   :  { %1051 = vst.msk [vmem:[%s2029_s4 + $0x28] sm:$0xff] %vm1045_vm3, %v986_v11  ;;  %1083 = vst.msk [vmem:[%s2029_s4 + $0x128] sm:$0xff] %vm1045_vm3, %v1018_v12  ;;  %v852_v16 = vmul.f32 %v1634_v15, %v608_v13  ;;  %v884_v18 = vmul.f32 %v1634_v15, %v736_v14  ;;  %v610_v19 = vpop.f32.mrb[13].mxu0  ;;  %v738_v20 = vpop.f32.mrb[13].mxu1 }
 0x116   :  { %v611_v21 = vpop.f32.mrb[14].mxu0  ;;  %v739_v22 = vpop.f32.mrb[14].mxu1 }
 0x117   :  { %v923_v23 = vadd.f32 %v1639_v17, %v852_v16  ;;  %v955_v24 = vadd.f32 %v1639_v17, %v884_v18  ;;  %v853_v25 = vmul.f32 %v1634_v15, %v611_v21  ;;  %v885_v26 = vmul.f32 %v1634_v15, %v739_v22  ;;  %v613_v27 = vpop.f32.mrb[15].mxu0  ;;  %v741_v28 = vpop.f32.mrb[15].mxu1 }
 0x119   :  { %v987_v29 = vmax.f32 %v923_v23, 0.0  ;;  %v1019_v30 = vmax.f32 %v955_v24, 0.0  ;;  %v924_v31 = vadd.f32 %v1639_v17, %v853_v25  ;;  %v956_v32 = vadd.f32 %v1639_v17, %v885_v26 }
 0x11b   :  { %1052 = vst.msk [vmem:[%s2029_s4 + $0x30] sm:$0xff] %vm1045_vm3, %v987_v29  ;;  %1084 = vst.msk [vmem:[%s2029_s4 + $0x130] sm:$0xff] %vm1045_vm3, %v1019_v30  ;;  %v988_v33 = vmax.f32 %v924_v31, 0.0  ;;  %v1020_v34 = vmax.f32 %v956_v32, 0.0 }
 0x11c   :  { %v616_v35 = vpop.f32.mrb[16].mxu0  ;;  %v744_v36 = vpop.f32.mrb[16].mxu1 }
 0x11d   :  { %1053 = vst.msk [vmem:[%s2029_s4 + $0x38] sm:$0xff] %vm1045_vm3, %v988_v33  ;;  %1085 = vst.msk [vmem:[%s2029_s4 + $0x138] sm:$0xff] %vm1045_vm3, %v1020_v34  ;;  %v854_v37 = vmul.f32 %v1634_v15, %v616_v35  ;;  %v886_v38 = vmul.f32 %v1634_v15, %v744_v36  ;;  %v618_v39 = vpop.f32.mrb[17].mxu0  ;;  %v746_v40 = vpop.f32.mrb[17].mxu1 }
 0x11e   :  { %v619_v41 = vpop.f32.mrb[18].mxu0  ;;  %v747_v42 = vpop.f32.mrb[18].mxu1 }
 0x11f   :  { %v925_v43 = vadd.f32 %v1639_v17, %v854_v37  ;;  %v957_v44 = vadd.f32 %v1639_v17, %v886_v38  ;;  %v855_v45 = vmul.f32 %v1634_v15, %v619_v41  ;;  %v887_v46 = vmul.f32 %v1634_v15, %v747_v42  ;;  %v621_v47 = vpop.f32.mrb[19].mxu0  ;;  %v749_v48 = vpop.f32.mrb[19].mxu1 }
 0x121   :  { %v989_v49 = vmax.f32 %v925_v43, 0.0  ;;  %v1021_v50 = vmax.f32 %v957_v44, 0.0  ;;  %v926_v51 = vadd.f32 %v1639_v17, %v855_v45  ;;  %v958_v52 = vadd.f32 %v1639_v17, %v887_v46 }
 0x123   :  { %1054 = vst.msk [vmem:[%s2029_s4 + $0x40] sm:$0xff] %vm1045_vm3, %v989_v49  ;;  %1086 = vst.msk [vmem:[%s2029_s4 + $0x140] sm:$0xff] %vm1045_vm3, %v1021_v50  ;;  %v990_v53 = vmax.f32 %v926_v51, 0.0  ;;  %v1022_v54 = vmax.f32 %v958_v52, 0.0 }
 0x124   :  { %v624_v55 = vpop.f32.mrb[20].mxu0  ;;  %v752_v56 = vpop.f32.mrb[20].mxu1 }
 0x125   :  { %1055 = vst.msk [vmem:[%s2029_s4 + $0x48] sm:$0xff] %vm1045_vm3, %v990_v53  ;;  %1087 = vst.msk [vmem:[%s2029_s4 + $0x148] sm:$0xff] %vm1045_vm3, %v1022_v54  ;;  %v856_v57 = vmul.f32 %v1634_v15, %v624_v55  ;;  %v888_v58 = vmul.f32 %v1634_v15, %v752_v56  ;;  %v626_v59 = vpop.f32.mrb[21].mxu0  ;;  %v754_v60 = vpop.f32.mrb[21].mxu1 }
 0x126   :  { %v627_v61 = vpop.f32.mrb[22].mxu0  ;;  %v755_v62 = vpop.f32.mrb[22].mxu1 }
 0x127   :  { %v927_v63 = vadd.f32 %v1639_v17, %v856_v57  ;;  %v959_v0 = vadd.f32 %v1639_v17, %v888_v58  ;;  %v857_v1 = vmul.f32 %v1634_v15, %v627_v61  ;;  %v889_v2 = vmul.f32 %v1634_v15, %v755_v62  ;;  %v629_v3 = vpop.f32.mrb[23].mxu0  ;;  %v757_v4 = vpop.f32.mrb[23].mxu1 }
 0x129   :  { %v991_v5 = vmax.f32 %v927_v63, 0.0  ;;  %v1023_v6 = vmax.f32 %v959_v0, 0.0  ;;  %v928_v7 = vadd.f32 %v1639_v17, %v857_v1  ;;  %v960_v8 = vadd.f32 %v1639_v17, %v889_v2 }
 0x12b   :  { %1056 = vst.msk [vmem:[%s2029_s4 + $0x50] sm:$0xff] %vm1045_vm3, %v991_v5  ;;  %1088 = vst.msk [vmem:[%s2029_s4 + $0x150] sm:$0xff] %vm1045_vm3, %v1023_v6  ;;  %v992_v9 = vmax.f32 %v928_v7, 0.0  ;;  %v1024_v10 = vmax.f32 %v960_v8, 0.0 }
 0x12c   :  { %v632_v11 = vpop.f32.mrb[24].mxu0  ;;  %v760_v12 = vpop.f32.mrb[24].mxu1 }
 0x12d   :  { %1057 = vst.msk [vmem:[%s2029_s4 + $0x58] sm:$0xff] %vm1045_vm3, %v992_v9  ;;  %1089 = vst.msk [vmem:[%s2029_s4 + $0x158] sm:$0xff] %vm1045_vm3, %v1024_v10  ;;  %v858_v13 = vmul.f32 %v1634_v15, %v632_v11  ;;  %v890_v14 = vmul.f32 %v1634_v15, %v760_v12  ;;  %v634_v16 = vpop.f32.mrb[25].mxu0  ;;  %v762_v18 = vpop.f32.mrb[25].mxu1 }
 0x12e   :  { %v635_v19 = vpop.f32.mrb[26].mxu0  ;;  %v763_v20 = vpop.f32.mrb[26].mxu1 }
 0x12f   :  { %v929_v21 = vadd.f32 %v1639_v17, %v858_v13  ;;  %v961_v22 = vadd.f32 %v1639_v17, %v890_v14  ;;  %v859_v23 = vmul.f32 %v1634_v15, %v635_v19  ;;  %v891_v24 = vmul.f32 %v1634_v15, %v763_v20  ;;  %v637_v25 = vpop.f32.mrb[27].mxu0  ;;  %v765_v26 = vpop.f32.mrb[27].mxu1 }
 0x131   :  { %v993_v27 = vmax.f32 %v929_v21, 0.0  ;;  %v1025_v28 = vmax.f32 %v961_v22, 0.0  ;;  %v930_v29 = vadd.f32 %v1639_v17, %v859_v23  ;;  %v962_v30 = vadd.f32 %v1639_v17, %v891_v24 }
 0x133   :  { %1058 = vst.msk [vmem:[%s2029_s4 + $0x60] sm:$0xff] %vm1045_vm3, %v993_v27  ;;  %1090 = vst.msk [vmem:[%s2029_s4 + $0x160] sm:$0xff] %vm1045_vm3, %v1025_v28  ;;  %v994_v31 = vmax.f32 %v930_v29, 0.0  ;;  %v1026_v32 = vmax.f32 %v962_v30, 0.0 }
 0x134   :  { %v640_v33 = vpop.f32.mrb[28].mxu0  ;;  %v768_v34 = vpop.f32.mrb[28].mxu1 }
 0x135   :  { %1059 = vst.msk [vmem:[%s2029_s4 + $0x68] sm:$0xff] %vm1045_vm3, %v994_v31  ;;  %1091 = vst.msk [vmem:[%s2029_s4 + $0x168] sm:$0xff] %vm1045_vm3, %v1026_v32  ;;  %v860_v35 = vmul.f32 %v1634_v15, %v640_v33  ;;  %v892_v36 = vmul.f32 %v1634_v15, %v768_v34  ;;  %v642_v37 = vpop.f32.mrb[29].mxu0  ;;  %v770_v38 = vpop.f32.mrb[29].mxu1 }
 0x136   :  { %v643_v39 = vpop.f32.mrb[30].mxu0  ;;  %v771_v40 = vpop.f32.mrb[30].mxu1 }
 0x137   :  { %v931_v41 = vadd.f32 %v1639_v17, %v860_v35  ;;  %v963_v42 = vadd.f32 %v1639_v17, %v892_v36  ;;  %v861_v43 = vmul.f32 %v1634_v15, %v643_v39  ;;  %v893_v44 = vmul.f32 %v1634_v15, %v771_v40  ;;  %v645_v45 = vpop.f32.mrb[31].mxu0  ;;  %v773_v46 = vpop.f32.mrb[31].mxu1 }
 0x139   :  { %v995_v47 = vmax.f32 %v931_v41, 0.0  ;;  %v1027_v48 = vmax.f32 %v963_v42, 0.0  ;;  %v932_v49 = vadd.f32 %v1639_v17, %v861_v43  ;;  %v964_v50 = vadd.f32 %v1639_v17, %v893_v44 }
 0x13b   :  { %1060 = vst.msk [vmem:[%s2029_s4 + $0x70] sm:$0xff] %vm1045_vm3, %v995_v47  ;;  %1092 = vst.msk [vmem:[%s2029_s4 + $0x170] sm:$0xff] %vm1045_vm3, %v1027_v48  ;;  %v996_v51 = vmax.f32 %v932_v49, 0.0  ;;  %v1028_v52 = vmax.f32 %v964_v50, 0.0 }
 0x13c   :  { %v648_v53 = vpop.f32.mrb[32].mxu0  ;;  %v776_v54 = vpop.f32.mrb[32].mxu1 }
 0x13d   :  { %1061 = vst.msk [vmem:[%s2029_s4 + $0x78] sm:$0xff] %vm1045_vm3, %v996_v51  ;;  %1093 = vst.msk [vmem:[%s2029_s4 + $0x178] sm:$0xff] %vm1045_vm3, %v1028_v52  ;;  %v862_v55 = vmul.f32 %v1634_v15, %v648_v53  ;;  %v894_v56 = vmul.f32 %v1634_v15, %v776_v54  ;;  %v650_v57 = vpop.f32.mrb[33].mxu0  ;;  %v778_v58 = vpop.f32.mrb[33].mxu1 }
 0x13e   :  { %v651_v59 = vpop.f32.mrb[34].mxu0  ;;  %v779_v60 = vpop.f32.mrb[34].mxu1 }
 0x13f   :  { %v933_v61 = vadd.f32 %v1639_v17, %v862_v55  ;;  %v965_v62 = vadd.f32 %v1639_v17, %v894_v56  ;;  %v863_v63 = vmul.f32 %v1634_v15, %v651_v59  ;;  %v895_v0 = vmul.f32 %v1634_v15, %v779_v60  ;;  %v653_v1 = vpop.f32.mrb[35].mxu0  ;;  %v781_v2 = vpop.f32.mrb[35].mxu1 }
 0x141   :  { %v997_v3 = vmax.f32 %v933_v61, 0.0  ;;  %v1029_v4 = vmax.f32 %v965_v62, 0.0  ;;  %v934_v5 = vadd.f32 %v1639_v17, %v863_v63  ;;  %v966_v6 = vadd.f32 %v1639_v17, %v895_v0 }
 0x143   :  { %1062 = vst.msk [vmem:[%s2029_s4 + $0x80] sm:$0xff] %vm1045_vm3, %v997_v3  ;;  %1094 = vst.msk [vmem:[%s2029_s4 + $0x180] sm:$0xff] %vm1045_vm3, %v1029_v4  ;;  %v998_v7 = vmax.f32 %v934_v5, 0.0  ;;  %v1030_v8 = vmax.f32 %v966_v6, 0.0 }
 0x144   :  { %v656_v9 = vpop.f32.mrb[36].mxu0  ;;  %v784_v10 = vpop.f32.mrb[36].mxu1 }
 0x145   :  { %1063 = vst.msk [vmem:[%s2029_s4 + $0x88] sm:$0xff] %vm1045_vm3, %v998_v7  ;;  %1095 = vst.msk [vmem:[%s2029_s4 + $0x188] sm:$0xff] %vm1045_vm3, %v1030_v8  ;;  %v864_v11 = vmul.f32 %v1634_v15, %v656_v9  ;;  %v896_v12 = vmul.f32 %v1634_v15, %v784_v10  ;;  %v658_v13 = vpop.f32.mrb[37].mxu0  ;;  %v786_v14 = vpop.f32.mrb[37].mxu1 }
 0x146   :  { %v659_v16 = vpop.f32.mrb[38].mxu0  ;;  %v787_v18 = vpop.f32.mrb[38].mxu1 }
 0x147   :  { %v935_v19 = vadd.f32 %v1639_v17, %v864_v11  ;;  %v967_v20 = vadd.f32 %v1639_v17, %v896_v12  ;;  %v865_v21 = vmul.f32 %v1634_v15, %v659_v16  ;;  %v897_v22 = vmul.f32 %v1634_v15, %v787_v18  ;;  %v661_v23 = vpop.f32.mrb[39].mxu0  ;;  %v789_v24 = vpop.f32.mrb[39].mxu1 }
 0x149   :  { %v999_v25 = vmax.f32 %v935_v19, 0.0  ;;  %v1031_v26 = vmax.f32 %v967_v20, 0.0  ;;  %v936_v27 = vadd.f32 %v1639_v17, %v865_v21  ;;  %v968_v28 = vadd.f32 %v1639_v17, %v897_v22 }
 0x14b   :  { %1064 = vst.msk [vmem:[%s2029_s4 + $0x90] sm:$0xff] %vm1045_vm3, %v999_v25  ;;  %1096 = vst.msk [vmem:[%s2029_s4 + $0x190] sm:$0xff] %vm1045_vm3, %v1031_v26  ;;  %v1000_v29 = vmax.f32 %v936_v27, 0.0  ;;  %v1032_v30 = vmax.f32 %v968_v28, 0.0 }
 0x14c   :  { %v664_v31 = vpop.f32.mrb[40].mxu0  ;;  %v792_v32 = vpop.f32.mrb[40].mxu1 }
 0x14d   :  { %1065 = vst.msk [vmem:[%s2029_s4 + $0x98] sm:$0xff] %vm1045_vm3, %v1000_v29  ;;  %1097 = vst.msk [vmem:[%s2029_s4 + $0x198] sm:$0xff] %vm1045_vm3, %v1032_v30  ;;  %v866_v33 = vmul.f32 %v1634_v15, %v664_v31  ;;  %v898_v34 = vmul.f32 %v1634_v15, %v792_v32  ;;  %v666_v35 = vpop.f32.mrb[41].mxu0  ;;  %v794_v36 = vpop.f32.mrb[41].mxu1 }
 0x14e   :  { %v667_v37 = vpop.f32.mrb[42].mxu0  ;;  %v795_v38 = vpop.f32.mrb[42].mxu1 }
 0x14f   :  { %v937_v39 = vadd.f32 %v1639_v17, %v866_v33  ;;  %v969_v40 = vadd.f32 %v1639_v17, %v898_v34  ;;  %v867_v41 = vmul.f32 %v1634_v15, %v667_v37  ;;  %v899_v42 = vmul.f32 %v1634_v15, %v795_v38  ;;  %v669_v43 = vpop.f32.mrb[43].mxu0  ;;  %v797_v44 = vpop.f32.mrb[43].mxu1 }
 0x151   :  { %v1001_v45 = vmax.f32 %v937_v39, 0.0  ;;  %v1033_v46 = vmax.f32 %v969_v40, 0.0  ;;  %v938_v47 = vadd.f32 %v1639_v17, %v867_v41  ;;  %v970_v48 = vadd.f32 %v1639_v17, %v899_v42 }
 0x153   :  { %1066 = vst.msk [vmem:[%s2029_s4 + $0xa0] sm:$0xff] %vm1045_vm3, %v1001_v45  ;;  %1098 = vst.msk [vmem:[%s2029_s4 + $0x1a0] sm:$0xff] %vm1045_vm3, %v1033_v46  ;;  %v1002_v49 = vmax.f32 %v938_v47, 0.0  ;;  %v1034_v50 = vmax.f32 %v970_v48, 0.0 }
 0x154   :  { %v672_v51 = vpop.f32.mrb[44].mxu0  ;;  %v800_v52 = vpop.f32.mrb[44].mxu1 }
 0x155   :  { %1067 = vst.msk [vmem:[%s2029_s4 + $0xa8] sm:$0xff] %vm1045_vm3, %v1002_v49  ;;  %1099 = vst.msk [vmem:[%s2029_s4 + $0x1a8] sm:$0xff] %vm1045_vm3, %v1034_v50  ;;  %v868_v53 = vmul.f32 %v1634_v15, %v672_v51  ;;  %v900_v54 = vmul.f32 %v1634_v15, %v800_v52  ;;  %v674_v55 = vpop.f32.mrb[45].mxu0  ;;  %v802_v56 = vpop.f32.mrb[45].mxu1 }
 0x156   :  { %v675_v57 = vpop.f32.mrb[46].mxu0  ;;  %v803_v58 = vpop.f32.mrb[46].mxu1 }
 0x157   :  { %v939_v59 = vadd.f32 %v1639_v17, %v868_v53  ;;  %v971_v60 = vadd.f32 %v1639_v17, %v900_v54  ;;  %v869_v61 = vmul.f32 %v1634_v15, %v675_v57  ;;  %v901_v62 = vmul.f32 %v1634_v15, %v803_v58  ;;  %v677_v63 = vpop.f32.mrb[47].mxu0  ;;  %v805_v0 = vpop.f32.mrb[47].mxu1 }
 0x159   :  { %v1003_v1 = vmax.f32 %v939_v59, 0.0  ;;  %v1035_v2 = vmax.f32 %v971_v60, 0.0  ;;  %v940_v3 = vadd.f32 %v1639_v17, %v869_v61  ;;  %v972_v4 = vadd.f32 %v1639_v17, %v901_v62 }
 0x15b   :  { %1068 = vst.msk [vmem:[%s2029_s4 + $0xb0] sm:$0xff] %vm1045_vm3, %v1003_v1  ;;  %1100 = vst.msk [vmem:[%s2029_s4 + $0x1b0] sm:$0xff] %vm1045_vm3, %v1035_v2  ;;  %v1004_v5 = vmax.f32 %v940_v3, 0.0  ;;  %v1036_v6 = vmax.f32 %v972_v4, 0.0 }
 0x15c   :  { %v680_v7 = vpop.f32.mrb[48].mxu0  ;;  %v808_v8 = vpop.f32.mrb[48].mxu1 }
 0x15d   :  { %1069 = vst.msk [vmem:[%s2029_s4 + $0xb8] sm:$0xff] %vm1045_vm3, %v1004_v5  ;;  %1101 = vst.msk [vmem:[%s2029_s4 + $0x1b8] sm:$0xff] %vm1045_vm3, %v1036_v6  ;;  %v870_v9 = vmul.f32 %v1634_v15, %v680_v7  ;;  %v902_v10 = vmul.f32 %v1634_v15, %v808_v8  ;;  %v682_v11 = vpop.f32.mrb[49].mxu0  ;;  %v810_v12 = vpop.f32.mrb[49].mxu1 }
 0x15e   :  { %v683_v13 = vpop.f32.mrb[50].mxu0  ;;  %v811_v14 = vpop.f32.mrb[50].mxu1 }
 0x15f   :  { %v941_v16 = vadd.f32 %v1639_v17, %v870_v9  ;;  %v973_v18 = vadd.f32 %v1639_v17, %v902_v10  ;;  %v871_v19 = vmul.f32 %v1634_v15, %v683_v13  ;;  %v903_v20 = vmul.f32 %v1634_v15, %v811_v14  ;;  %v685_v21 = vpop.f32.mrb[51].mxu0  ;;  %v813_v22 = vpop.f32.mrb[51].mxu1 }
 0x161   :  { %v1005_v23 = vmax.f32 %v941_v16, 0.0  ;;  %v1037_v24 = vmax.f32 %v973_v18, 0.0  ;;  %v942_v25 = vadd.f32 %v1639_v17, %v871_v19  ;;  %v974_v26 = vadd.f32 %v1639_v17, %v903_v20 }
 0x163   :  { %1070 = vst.msk [vmem:[%s2029_s4 + $0xc0] sm:$0xff] %vm1045_vm3, %v1005_v23  ;;  %1102 = vst.msk [vmem:[%s2029_s4 + $0x1c0] sm:$0xff] %vm1045_vm3, %v1037_v24  ;;  %v1006_v27 = vmax.f32 %v942_v25, 0.0  ;;  %v1038_v28 = vmax.f32 %v974_v26, 0.0 }
 0x164   :  { %v688_v29 = vpop.f32.mrb[52].mxu0  ;;  %v816_v30 = vpop.f32.mrb[52].mxu1 }
 0x165   :  { %1071 = vst.msk [vmem:[%s2029_s4 + $0xc8] sm:$0xff] %vm1045_vm3, %v1006_v27  ;;  %1103 = vst.msk [vmem:[%s2029_s4 + $0x1c8] sm:$0xff] %vm1045_vm3, %v1038_v28  ;;  %v872_v31 = vmul.f32 %v1634_v15, %v688_v29  ;;  %v904_v32 = vmul.f32 %v1634_v15, %v816_v30  ;;  %v690_v33 = vpop.f32.mrb[53].mxu0  ;;  %v818_v34 = vpop.f32.mrb[53].mxu1 }
 0x166   :  { %v691_v35 = vpop.f32.mrb[54].mxu0  ;;  %v819_v36 = vpop.f32.mrb[54].mxu1 }
 0x167   :  { %v943_v37 = vadd.f32 %v1639_v17, %v872_v31  ;;  %v975_v38 = vadd.f32 %v1639_v17, %v904_v32  ;;  %v873_v39 = vmul.f32 %v1634_v15, %v691_v35  ;;  %v905_v40 = vmul.f32 %v1634_v15, %v819_v36  ;;  %v693_v41 = vpop.f32.mrb[55].mxu0  ;;  %v821_v42 = vpop.f32.mrb[55].mxu1 }
 0x169   :  { %v1007_v43 = vmax.f32 %v943_v37, 0.0  ;;  %v1039_v44 = vmax.f32 %v975_v38, 0.0  ;;  %v944_v45 = vadd.f32 %v1639_v17, %v873_v39  ;;  %v976_v46 = vadd.f32 %v1639_v17, %v905_v40 }
 0x16b   :  { %1072 = vst.msk [vmem:[%s2029_s4 + $0xd0] sm:$0xff] %vm1045_vm3, %v1007_v43  ;;  %1104 = vst.msk [vmem:[%s2029_s4 + $0x1d0] sm:$0xff] %vm1045_vm3, %v1039_v44  ;;  %v1008_v47 = vmax.f32 %v944_v45, 0.0  ;;  %v1040_v48 = vmax.f32 %v976_v46, 0.0 }
 0x16c   :  { %v696_v49 = vpop.f32.mrb[56].mxu0  ;;  %v824_v50 = vpop.f32.mrb[56].mxu1 }
 0x16d   :  { %1073 = vst.msk [vmem:[%s2029_s4 + $0xd8] sm:$0xff] %vm1045_vm3, %v1008_v47  ;;  %1105 = vst.msk [vmem:[%s2029_s4 + $0x1d8] sm:$0xff] %vm1045_vm3, %v1040_v48  ;;  %v874_v51 = vmul.f32 %v1634_v15, %v696_v49  ;;  %v906_v52 = vmul.f32 %v1634_v15, %v824_v50  ;;  %v698_v53 = vpop.f32.mrb[57].mxu0  ;;  %v826_v54 = vpop.f32.mrb[57].mxu1 }
 0x16e   :  { %v699_v55 = vpop.f32.mrb[58].mxu0  ;;  %v827_v56 = vpop.f32.mrb[58].mxu1 }
 0x16f   :  { %v945_v57 = vadd.f32 %v1639_v17, %v874_v51  ;;  %v977_v58 = vadd.f32 %v1639_v17, %v906_v52  ;;  %v875_v59 = vmul.f32 %v1634_v15, %v699_v55  ;;  %v907_v60 = vmul.f32 %v1634_v15, %v827_v56  ;;  %v701_v61 = vpop.f32.mrb[59].mxu0  ;;  %v829_v62 = vpop.f32.mrb[59].mxu1 }
 0x171   :  { %v1009_v63 = vmax.f32 %v945_v57, 0.0  ;;  %v1041_v0 = vmax.f32 %v977_v58, 0.0  ;;  %v946_v1 = vadd.f32 %v1639_v17, %v875_v59  ;;  %v978_v2 = vadd.f32 %v1639_v17, %v907_v60 }
 0x173   :  { %1074 = vst.msk [vmem:[%s2029_s4 + $0xe0] sm:$0xff] %vm1045_vm3, %v1009_v63  ;;  %1106 = vst.msk [vmem:[%s2029_s4 + $0x1e0] sm:$0xff] %vm1045_vm3, %v1041_v0  ;;  %v1010_v3 = vmax.f32 %v946_v1, 0.0  ;;  %v1042_v4 = vmax.f32 %v978_v2, 0.0 }
 0x174   :  { %v704_v5 = vpop.f32.mrb[60].mxu0  ;;  %v832_v6 = vpop.f32.mrb[60].mxu1 }
 0x175   :  { %1075 = vst.msk [vmem:[%s2029_s4 + $0xe8] sm:$0xff] %vm1045_vm3, %v1010_v3  ;;  %1107 = vst.msk [vmem:[%s2029_s4 + $0x1e8] sm:$0xff] %vm1045_vm3, %v1042_v4  ;;  %v876_v7 = vmul.f32 %v1634_v15, %v704_v5  ;;  %v908_v8 = vmul.f32 %v1634_v15, %v832_v6  ;;  %v706_v9 = vpop.f32.mrb[61].mxu0  ;;  %v834_v10 = vpop.f32.mrb[61].mxu1 }
 0x176   :  { %v707_v11 = vpop.f32.mrb[62].mxu0  ;;  %v835_v12 = vpop.f32.mrb[62].mxu1 }
 0x177   :  { %v947_v13 = vadd.f32 %v1639_v17, %v876_v7  ;;  %v979_v14 = vadd.f32 %v1639_v17, %v908_v8  ;;  %v877_v16 = vmul.f32 %v1634_v15, %v707_v11  ;;  %v909_v18 = vmul.f32 %v1634_v15, %v835_v12  ;;  %v709_v19 = vpop.f32.mrb[63].mxu0  ;;  %v837_v20 = vpop.f32.mrb[63].mxu1 }
 0x179   :  { %v1011_v21 = vmax.f32 %v947_v13, 0.0  ;;  %v1043_v22 = vmax.f32 %v979_v14, 0.0  ;;  %v948_v23 = vadd.f32 %v1639_v17, %v877_v16  ;;  %v980_v24 = vadd.f32 %v1639_v17, %v909_v18 }
 0x17b   :  { %1076 = vst.msk [vmem:[%s2029_s4 + $0xf0] sm:$0xff] %vm1045_vm3, %v1011_v21  ;;  %1108 = vst.msk [vmem:[%s2029_s4 + $0x1f0] sm:$0xff] %vm1045_vm3, %v1043_v22  ;;  %v1012_v25 = vmax.f32 %v948_v23, 0.0  ;;  %v1044_v15 = vmax.f32 %v980_v24, 0.0 }
 0x17d   :  { %1077 = vst.msk [vmem:[%s2029_s4 + $0xf8] sm:$0xff] %vm1045_vm3, %v1012_v25  ;;  %1109 = vst.msk [vmem:[%s2029_s4 + $0x1f8] sm:$0xff] %vm1045_vm3, %v1044_v15 }

// kernel: featurizer_forward.23
= control target key start
LH: loop header
LB: loop body
LE: loop exit
PB: predicated region body
PF: predicated region fallthrough
CT: control target
= control target key end

     0   :  { %vm304_vm0 = vcmask 523264   ;;  %s871_s0 = inlined_call_operand.vmem [shape: f32[128,64], index: 0, kind: input, shape index: {}]   ;;  %s872_s1 = inlined_call_operand.vmem [shape: f32[128,64], index: 1, kind: input, shape index: {}]   ;;  %s873_s2 = inlined_call_operand.vmem [shape: f32[128,64], index: 2, kind: input, shape index: {}]   ;;  %s874_s3 = inlined_call_operand.vmem [shape: f32[128,64], index: 3, kind: input, shape index: {}]   ;;  %s875_s4 = inlined_call_operand.vmem [shape: f32[128,64], index: 4, kind: input, shape index: {}]   ;;  %s876_s5 = inlined_call_operand.vmem [shape: f32[128,64], index: 5, kind: input, shape index: {}]   ;;  %s877_s6 = inlined_call_operand.vmem [shape: f32[128,64], index: 6, kind: input, shape index: {}]   ;;  %s878_s7 = inlined_call_operand.vmem [shape: f32[128,64], index: 7, kind: input, shape index: {}]   ;;  %s879_s8 = inlined_call_operand.vmem [shape: f32[128,64], index: 8, kind: input, shape index: {}]   ;;  %s880_s9 = inlined_call_operand.vmem [shape: f32[128,64], index: 9, kind: output, shape index: {}]  }
   0x1   :  { %v32_v0 = vld [vmem:[%s871_s0] sm:$0xff]  ;;  %v33_v6 = vld [vmem:[%s871_s0 + $0x8] sm:$0xff]  ;;  %v34_v15 = vld [vmem:[%s871_s0 + $0x10] sm:$0xff] }
   0x2   :  { %v48_v1 = vld [vmem:[%s872_s1] sm:$0xff]  ;;  %v49_v7 = vld [vmem:[%s872_s1 + $0x8] sm:$0xff]  ;;  %v50_v16 = vld [vmem:[%s872_s1 + $0x10] sm:$0xff] }
   0x3   :  { %v80_v2 = vld [vmem:[%s873_s2] sm:$0xff]  ;;  %v64_v3 = vmax.f32 %v32_v0, %v48_v1  ;;  %v81_v8 = vld [vmem:[%s873_s2 + $0x8] sm:$0xff]  ;;  %v65_v10 = vmax.f32 %v33_v6, %v49_v7  ;;  %v82_v17 = vld [vmem:[%s873_s2 + $0x10] sm:$0xff]  ;;  %v66_v20 = vmax.f32 %v34_v15, %v50_v16 }
   0x4   :  { %v112_v4 = vld [vmem:[%s874_s3] sm:$0xff]  ;;  %v113_v13 = vld [vmem:[%s874_s3 + $0x8] sm:$0xff]  ;;  %v114_v24 = vld [vmem:[%s874_s3 + $0x10] sm:$0xff] }
   0x5   :  { %v96_v5 = vmax.f32 %v64_v3, %v80_v2  ;;  %v144_v9 = vld [vmem:[%s875_s4] sm:$0xff]  ;;  %v97_v14 = vmax.f32 %v65_v10, %v81_v8  ;;  %v145_v19 = vld [vmem:[%s875_s4 + $0x8] sm:$0xff]  ;;  %v98_v26 = vmax.f32 %v66_v20, %v82_v17  ;;  %v35_v27 = vld [vmem:[%s871_s0 + $0x18] sm:$0xff] }
   0x6   :  { %v176_v12 = vld [vmem:[%s876_s5] sm:$0xff]  ;;  %v177_v23 = vld [vmem:[%s876_s5 + $0x8] sm:$0xff]  ;;  %v51_v28 = vld [vmem:[%s872_s1 + $0x18] sm:$0xff] }
   0x7   :  { %v128_v11 = vmax.f32 %v96_v5, %v112_v4  ;;  %v208_v21 = vld [vmem:[%s877_s6] sm:$0xff]  ;;  %v129_v22 = vmax.f32 %v97_v14, %v113_v13  ;;  %v83_v29 = vld [vmem:[%s873_s2 + $0x18] sm:$0xff]  ;;  %v146_v33 = vld [vmem:[%s875_s4 + $0x10] sm:$0xff]  ;;  %v67_v34 = vmax.f32 %v35_v27, %v51_v28  ;;  %v130_v37 = vmax.f32 %v98_v26, %v114_v24 }
   0x8   :  { %v240_v30 = vld [vmem:[%s878_s7] sm:$0xff]  ;;  %v209_v36 = vld [vmem:[%s877_s6 + $0x8] sm:$0xff]  ;;  %v178_v38 = vld [vmem:[%s876_s5 + $0x10] sm:$0xff] }
   0x9   :  { %v160_v18 = vmax.f32 %v128_v11, %v144_v9  ;;  %v272_v31 = vld [vmem:[%s879_s8] sm:$0xff]  ;;  %v161_v32 = vmax.f32 %v129_v22, %v145_v19  ;;  %v115_v39 = vld [vmem:[%s874_s3 + $0x18] sm:$0xff]  ;;  %v99_v41 = vmax.f32 %v67_v34, %v83_v29  ;;  %v241_v46 = vld [vmem:[%s878_s7 + $0x8] sm:$0xff]  ;;  %v162_v48 = vmax.f32 %v130_v37, %v146_v33 }
   0xa   :  { %v36_v42 = vld [vmem:[%s871_s0 + $0x20] sm:$0xff]  ;;  %v273_v47 = vld [vmem:[%s879_s8 + $0x8] sm:$0xff]  ;;  %v147_v49 = vld [vmem:[%s875_s4 + $0x18] sm:$0xff] }
   0xb   :  { %v192_v25 = vmax.f32 %v160_v18, %v176_v12  ;;  %v193_v40 = vmax.f32 %v161_v32, %v177_v23  ;;  %v52_v43 = vld [vmem:[%s872_s1 + $0x20] sm:$0xff]  ;;  %v210_v52 = vld [vmem:[%s877_s6 + $0x10] sm:$0xff]  ;;  %v131_v53 = vmax.f32 %v99_v41, %v115_v39  ;;  %v179_v54 = vld [vmem:[%s876_s5 + $0x18] sm:$0xff]  ;;  %v194_v57 = vmax.f32 %v162_v48, %v178_v38 }
   0xc   :  { %v84_v44 = vld [vmem:[%s873_s2 + $0x20] sm:$0xff]  ;;  %v68_v50 = vmax.f32 %v36_v42, %v52_v43  ;;  %v37_v59 = vld [vmem:[%s871_s0 + $0x28] sm:$0xff]  ;;  %v242_v63 = vld [vmem:[%s878_s7 + $0x10] sm:$0xff] }
   0xd   :  { %v224_v35 = vmax.f32 %v192_v25, %v208_v21  ;;  %v225_v51 = vmax.f32 %v193_v40, %v209_v36  ;;  %v116_v55 = vld [vmem:[%s874_s3 + $0x20] sm:$0xff]  ;;  %v53_v60 = vld [vmem:[%s872_s1 + $0x28] sm:$0xff]  ;;  %v274_v0 = vld [vmem:[%s879_s8 + $0x10] sm:$0xff]  ;;  %v163_v1 = vmax.f32 %v131_v53, %v147_v49  ;;  %v226_v4 = vmax.f32 %v194_v57, %v210_v52 }
   0xe   :  { %v100_v58 = vmax.f32 %v68_v50, %v84_v44  ;;  %v85_v61 = vld [vmem:[%s873_s2 + $0x28] sm:$0xff]  ;;  %v148_v2 = vld [vmem:[%s875_s4 + $0x20] sm:$0xff]  ;;  %v69_v3 = vmax.f32 %v37_v59, %v53_v60  ;;  %v211_v5 = vld [vmem:[%s877_s6 + $0x18] sm:$0xff] }
   0xf   :  { %v256_v45 = vmax.f32 %v224_v35, %v240_v30  ;;  %v257_v62 = vmax.f32 %v225_v51, %v241_v46  ;;  %v180_v7 = vld [vmem:[%s876_s5 + $0x20] sm:$0xff]  ;;  %v117_v8 = vld [vmem:[%s874_s3 + $0x28] sm:$0xff]  ;;  %v195_v10 = vmax.f32 %v163_v1, %v179_v54  ;;  %v38_v12 = vld [vmem:[%s871_s0 + $0x30] sm:$0xff]  ;;  %v258_v15 = vmax.f32 %v226_v4, %v242_v63 }
  0x10   :  { %v132_v6 = vmax.f32 %v100_v58, %v116_v55  ;;  %v101_v11 = vmax.f32 %v69_v3, %v85_v61  ;;  %v54_v13 = vld [vmem:[%s872_s1 + $0x30] sm:$0xff]  ;;  %v243_v16 = vld [vmem:[%s878_s7 + $0x18] sm:$0xff]  ;;  %v149_v19 = vld [vmem:[%s875_s4 + $0x28] sm:$0xff] }
  0x11   :  { %v288_v56 = vmax.f32 %v256_v45, %v272_v31  ;;  %v289_v9 = vmax.f32 %v257_v62, %v273_v47  ;;  %v86_v14 = vld [vmem:[%s873_s2 + $0x30] sm:$0xff]  ;;  %v275_v17 = vld [vmem:[%s879_s8 + $0x18] sm:$0xff]  ;;  %v70_v20 = vmax.f32 %v38_v12, %v54_v13  ;;  %v227_v21 = vmax.f32 %v195_v10, %v211_v5  ;;  %v212_v22 = vld [vmem:[%s877_s6 + $0x20] sm:$0xff] }
  0x12   :  { %v164_v18 = vmax.f32 %v132_v6, %v148_v2  ;;  %v133_v23 = vmax.f32 %v101_v11, %v117_v8  ;;  %v181_v24 = vld [vmem:[%s876_s5 + $0x28] sm:$0xff]  ;;  %v118_v25 = vld [vmem:[%s874_s3 + $0x30] sm:$0xff]  ;;  %v290_v26 = vmax.f32 %v258_v15, %v274_v0  ;;  %v39_v29 = vld [vmem:[%s871_s0 + $0x38] sm:$0xff] }
  0x13   :  { %305 = vst.msk [vmem:[%s880_s9] sm:$0xff] %vm304_vm0, %v288_v56  ;;  %306 = vst.msk [vmem:[%s880_s9 + $0x8] sm:$0xff] %vm304_vm0, %v289_v9  ;;  %v102_v28 = vmax.f32 %v70_v20, %v86_v14  ;;  %v55_v30 = vld [vmem:[%s872_s1 + $0x38] sm:$0xff]  ;;  %v259_v32 = vmax.f32 %v227_v21, %v243_v16  ;;  %v244_v33 = vld [vmem:[%s878_s7 + $0x20] sm:$0xff] }
  0x14   :  { %v196_v27 = vmax.f32 %v164_v18, %v180_v7  ;;  %v87_v31 = vld [vmem:[%s873_s2 + $0x38] sm:$0xff]  ;;  %v276_v34 = vld [vmem:[%s879_s8 + $0x20] sm:$0xff]  ;;  %v165_v35 = vmax.f32 %v133_v23, %v149_v19  ;;  %v150_v36 = vld [vmem:[%s875_s4 + $0x30] sm:$0xff]  ;;  %v71_v37 = vmax.f32 %v39_v29, %v55_v30  ;;  %307 = vst.msk [vmem:[%s880_s9 + $0x10] sm:$0xff] %vm304_vm0, %v290_v26 }
  0x15   :  { %v213_v39 = vld [vmem:[%s877_s6 + $0x28] sm:$0xff]  ;;  %v134_v40 = vmax.f32 %v102_v28, %v118_v25  ;;  %v182_v41 = vld [vmem:[%s876_s5 + $0x30] sm:$0xff]  ;;  %v119_v42 = vld [vmem:[%s874_s3 + $0x38] sm:$0xff]  ;;  %v291_v43 = vmax.f32 %v259_v32, %v275_v17 }
  0x16   :  { %v228_v38 = vmax.f32 %v196_v27, %v212_v22  ;;  %v197_v44 = vmax.f32 %v165_v35, %v181_v24  ;;  %v103_v45 = vmax.f32 %v71_v37, %v87_v31  ;;  %v40_v46 = vld [vmem:[%s871_s0 + $0x40] sm:$0xff]  ;;  %v245_v50 = vld [vmem:[%s878_s7 + $0x28] sm:$0xff]  ;;  %v151_v53 = vld [vmem:[%s875_s4 + $0x38] sm:$0xff] }
  0x17   :  { %v56_v47 = vld [vmem:[%s872_s1 + $0x40] sm:$0xff]  ;;  %v277_v51 = vld [vmem:[%s879_s8 + $0x28] sm:$0xff]  ;;  %v166_v52 = vmax.f32 %v134_v40, %v150_v36  ;;  %308 = vst.msk [vmem:[%s880_s9 + $0x18] sm:$0xff] %vm304_vm0, %v291_v43  ;;  %v214_v56 = vld [vmem:[%s877_s6 + $0x30] sm:$0xff] }
  0x18   :  { %v88_v48 = vld [vmem:[%s873_s2 + $0x40] sm:$0xff]  ;;  %v260_v49 = vmax.f32 %v228_v38, %v244_v33  ;;  %v72_v54 = vmax.f32 %v40_v46, %v56_v47  ;;  %v229_v55 = vmax.f32 %v197_v44, %v213_v39  ;;  %v135_v57 = vmax.f32 %v103_v45, %v119_v42  ;;  %v183_v58 = vld [vmem:[%s876_s5 + $0x38] sm:$0xff]  ;;  %v41_v63 = vld [vmem:[%s871_s0 + $0x48] sm:$0xff] }
  0x19   :  { %v120_v59 = vld [vmem:[%s874_s3 + $0x40] sm:$0xff]  ;;  %v198_v61 = vmax.f32 %v166_v52, %v182_v41  ;;  %v57_v0 = vld [vmem:[%s872_s1 + $0x48] sm:$0xff]  ;;  %v246_v3 = vld [vmem:[%s878_s7 + $0x30] sm:$0xff] }
  0x1a   :  { %v292_v60 = vmax.f32 %v260_v49, %v276_v34  ;;  %v104_v62 = vmax.f32 %v72_v54, %v88_v48  ;;  %v89_v1 = vld [vmem:[%s873_s2 + $0x48] sm:$0xff]  ;;  %v261_v2 = vmax.f32 %v229_v55, %v245_v50  ;;  %v278_v4 = vld [vmem:[%s879_s8 + $0x30] sm:$0xff]  ;;  %v167_v5 = vmax.f32 %v135_v57, %v151_v53  ;;  %v152_v6 = vld [vmem:[%s875_s4 + $0x40] sm:$0xff] }
  0x1b   :  { %v73_v7 = vmax.f32 %v41_v63, %v57_v0  ;;  %v230_v8 = vmax.f32 %v198_v61, %v214_v56  ;;  %v215_v9 = vld [vmem:[%s877_s6 + $0x38] sm:$0xff]  ;;  %v184_v11 = vld [vmem:[%s876_s5 + $0x40] sm:$0xff]  ;;  %v121_v12 = vld [vmem:[%s874_s3 + $0x48] sm:$0xff] }
  0x1c   :  { %309 = vst.msk [vmem:[%s880_s9 + $0x20] sm:$0xff] %vm304_vm0, %v292_v60  ;;  %v136_v10 = vmax.f32 %v104_v62, %v120_v59  ;;  %v293_v13 = vmax.f32 %v261_v2, %v277_v51  ;;  %v199_v14 = vmax.f32 %v167_v5, %v183_v58  ;;  %v42_v16 = vld [vmem:[%s871_s0 + $0x50] sm:$0xff]  ;;  %v247_v20 = vld [vmem:[%s878_s7 + $0x38] sm:$0xff]  ;;  %v153_v23 = vld [vmem:[%s875_s4 + $0x48] sm:$0xff] }
  0x1d   :  { %v105_v15 = vmax.f32 %v73_v7, %v89_v1  ;;  %v58_v17 = vld [vmem:[%s872_s1 + $0x50] sm:$0xff]  ;;  %v262_v19 = vmax.f32 %v230_v8, %v246_v3  ;;  %v279_v21 = vld [vmem:[%s879_s8 + $0x38] sm:$0xff]  ;;  %v216_v26 = vld [vmem:[%s877_s6 + $0x40] sm:$0xff] }
  0x1e   :  { %v90_v18 = vld [vmem:[%s873_s2 + $0x50] sm:$0xff]  ;;  %v168_v22 = vmax.f32 %v136_v10, %v152_v6  ;;  %v74_v24 = vmax.f32 %v42_v16, %v58_v17  ;;  %310 = vst.msk [vmem:[%s880_s9 + $0x28] sm:$0xff] %vm304_vm0, %v293_v13  ;;  %v231_v25 = vmax.f32 %v199_v14, %v215_v9  ;;  %v185_v28 = vld [vmem:[%s876_s5 + $0x48] sm:$0xff]  ;;  %v43_v33 = vld [vmem:[%s871_s0 + $0x58] sm:$0xff] }
  0x1f   :  { %v137_v27 = vmax.f32 %v105_v15, %v121_v12  ;;  %v122_v29 = vld [vmem:[%s874_s3 + $0x50] sm:$0xff]  ;;  %v294_v30 = vmax.f32 %v262_v19, %v278_v4  ;;  %v59_v34 = vld [vmem:[%s872_s1 + $0x58] sm:$0xff]  ;;  %v248_v37 = vld [vmem:[%s878_s7 + $0x40] sm:$0xff] }
  0x20   :  { %v200_v31 = vmax.f32 %v168_v22, %v184_v11  ;;  %v106_v32 = vmax.f32 %v74_v24, %v90_v18  ;;  %v91_v35 = vld [vmem:[%s873_s2 + $0x58] sm:$0xff]  ;;  %v263_v36 = vmax.f32 %v231_v25, %v247_v20  ;;  %v280_v38 = vld [vmem:[%s879_s8 + $0x40] sm:$0xff]  ;;  %v154_v40 = vld [vmem:[%s875_s4 + $0x50] sm:$0xff]  ;;  %v75_v41 = vmax.f32 %v43_v33, %v59_v34 }
  0x21   :  { %v169_v39 = vmax.f32 %v137_v27, %v153_v23  ;;  %311 = vst.msk [vmem:[%s880_s9 + $0x30] sm:$0xff] %vm304_vm0, %v294_v30  ;;  %v217_v43 = vld [vmem:[%s877_s6 + $0x48] sm:$0xff]  ;;  %v186_v45 = vld [vmem:[%s876_s5 + $0x50] sm:$0xff]  ;;  %v123_v46 = vld [vmem:[%s874_s3 + $0x58] sm:$0xff] }
  0x22   :  { %v232_v42 = vmax.f32 %v200_v31, %v216_v26  ;;  %v138_v44 = vmax.f32 %v106_v32, %v122_v29  ;;  %v295_v47 = vmax.f32 %v263_v36, %v279_v21  ;;  %v107_v49 = vmax.f32 %v75_v41, %v91_v35  ;;  %v44_v50 = vld [vmem:[%s871_s0 + $0x60] sm:$0xff]  ;;  %v249_v54 = vld [vmem:[%s878_s7 + $0x48] sm:$0xff]  ;;  %v155_v57 = vld [vmem:[%s875_s4 + $0x58] sm:$0xff] }
  0x23   :  { %v201_v48 = vmax.f32 %v169_v39, %v185_v28  ;;  %v60_v51 = vld [vmem:[%s872_s1 + $0x60] sm:$0xff]  ;;  %v281_v55 = vld [vmem:[%s879_s8 + $0x48] sm:$0xff]  ;;  %v218_v60 = vld [vmem:[%s877_s6 + $0x50] sm:$0xff] }
  0x24   :  { %v92_v52 = vld [vmem:[%s873_s2 + $0x60] sm:$0xff]  ;;  %v264_v53 = vmax.f32 %v232_v42, %v248_v37  ;;  %v170_v56 = vmax.f32 %v138_v44, %v154_v40  ;;  %v76_v58 = vmax.f32 %v44_v50, %v60_v51  ;;  %312 = vst.msk [vmem:[%s880_s9 + $0x38] sm:$0xff] %vm304_vm0, %v295_v47  ;;  %v139_v61 = vmax.f32 %v107_v49, %v123_v46  ;;  %v187_v62 = vld [vmem:[%s876_s5 + $0x58] sm:$0xff]  ;;  %v45_v3 = vld [vmem:[%s871_s0 + $0x68] sm:$0xff] }
  0x25   :  { %v233_v59 = vmax.f32 %v201_v48, %v217_v43  ;;  %v124_v63 = vld [vmem:[%s874_s3 + $0x60] sm:$0xff]  ;;  %v61_v4 = vld [vmem:[%s872_s1 + $0x68] sm:$0xff]  ;;  %v250_v7 = vld [vmem:[%s878_s7 + $0x50] sm:$0xff] }
  0x26   :  { %v296_v0 = vmax.f32 %v264_v53, %v280_v38  ;;  %v202_v1 = vmax.f32 %v170_v56, %v186_v45  ;;  %v108_v2 = vmax.f32 %v76_v58, %v92_v52  ;;  %v93_v5 = vld [vmem:[%s873_s2 + $0x68] sm:$0xff]  ;;  %v282_v8 = vld [vmem:[%s879_s8 + $0x50] sm:$0xff]  ;;  %v171_v9 = vmax.f32 %v139_v61, %v155_v57  ;;  %v156_v10 = vld [vmem:[%s875_s4 + $0x60] sm:$0xff] }
  0x27   :  { %v265_v6 = vmax.f32 %v233_v59, %v249_v54  ;;  %v77_v11 = vmax.f32 %v45_v3, %v61_v4  ;;  %v219_v13 = vld [vmem:[%s877_s6 + $0x58] sm:$0xff]  ;;  %v188_v15 = vld [vmem:[%s876_s5 + $0x60] sm:$0xff]  ;;  %v125_v16 = vld [vmem:[%s874_s3 + $0x68] sm:$0xff] }
  0x28   :  { %313 = vst.msk [vmem:[%s880_s9 + $0x40] sm:$0xff] %vm304_vm0, %v296_v0  ;;  %v234_v12 = vmax.f32 %v202_v1, %v218_v60  ;;  %v140_v14 = vmax.f32 %v108_v2, %v124_v63  ;;  %v203_v18 = vmax.f32 %v171_v9, %v187_v62  ;;  %v46_v20 = vld [vmem:[%s871_s0 + $0x70] sm:$0xff]  ;;  %v251_v24 = vld [vmem:[%s878_s7 + $0x58] sm:$0xff]  ;;  %v157_v27 = vld [vmem:[%s875_s4 + $0x68] sm:$0xff] }
  0x29   :  { %v297_v17 = vmax.f32 %v265_v6, %v281_v55  ;;  %v109_v19 = vmax.f32 %v77_v11, %v93_v5  ;;  %v62_v21 = vld [vmem:[%s872_s1 + $0x70] sm:$0xff]  ;;  %v283_v25 = vld [vmem:[%s879_s8 + $0x58] sm:$0xff]  ;;  %v220_v30 = vld [vmem:[%s877_s6 + $0x60] sm:$0xff] }
  0x2a   :  { %v94_v22 = vld [vmem:[%s873_s2 + $0x70] sm:$0xff]  ;;  %v266_v23 = vmax.f32 %v234_v12, %v250_v7  ;;  %v172_v26 = vmax.f32 %v140_v14, %v156_v10  ;;  %v78_v28 = vmax.f32 %v46_v20, %v62_v21  ;;  %v235_v29 = vmax.f32 %v203_v18, %v219_v13  ;;  %v189_v32 = vld [vmem:[%s876_s5 + $0x68] sm:$0xff]  ;;  %v47_v37 = vld [vmem:[%s871_s0 + $0x78] sm:$0xff] }
  0x2b   :  { %314 = vst.msk [vmem:[%s880_s9 + $0x48] sm:$0xff] %vm304_vm0, %v297_v17  ;;  %v141_v31 = vmax.f32 %v109_v19, %v125_v16  ;;  %v126_v33 = vld [vmem:[%s874_s3 + $0x70] sm:$0xff]  ;;  %v63_v38 = vld [vmem:[%s872_s1 + $0x78] sm:$0xff]  ;;  %v252_v41 = vld [vmem:[%s878_s7 + $0x60] sm:$0xff] }
  0x2c   :  { %v298_v34 = vmax.f32 %v266_v23, %v282_v8  ;;  %v204_v35 = vmax.f32 %v172_v26, %v188_v15  ;;  %v110_v36 = vmax.f32 %v78_v28, %v94_v22  ;;  %v95_v39 = vld [vmem:[%s873_s2 + $0x78] sm:$0xff]  ;;  %v267_v40 = vmax.f32 %v235_v29, %v251_v24  ;;  %v158_v43 = vld [vmem:[%s875_s4 + $0x70] sm:$0xff]  ;;  %v221_v46 = vld [vmem:[%s877_s6 + $0x68] sm:$0xff] }
  0x2d   :  { %v173_v42 = vmax.f32 %v141_v31, %v157_v27  ;;  %v79_v44 = vmax.f32 %v47_v37, %v63_v38  ;;  %v127_v48 = vld [vmem:[%s874_s3 + $0x78] sm:$0xff]  ;;  %v284_v50 = vld [vmem:[%s879_s8 + $0x60] sm:$0xff]  ;;  %v190_v52 = vld [vmem:[%s876_s5 + $0x70] sm:$0xff] }
  0x2e   :  { %315 = vst.msk [vmem:[%s880_s9 + $0x50] sm:$0xff] %vm304_vm0, %v298_v34  ;;  %v236_v45 = vmax.f32 %v204_v35, %v220_v30  ;;  %v142_v47 = vmax.f32 %v110_v36, %v126_v33  ;;  %v299_v49 = vmax.f32 %v267_v40, %v283_v25  ;;  %v253_v55 = vld [vmem:[%s878_s7 + $0x68] sm:$0xff]  ;;  %v159_v57 = vld [vmem:[%s875_s4 + $0x78] sm:$0xff]  ;;  %v222_v59 = vld [vmem:[%s877_s6 + $0x70] sm:$0xff] }
  0x2f   :  { %v205_v51 = vmax.f32 %v173_v42, %v189_v32  ;;  %v111_v53 = vmax.f32 %v79_v44, %v95_v39  ;;  %v285_v62 = vld [vmem:[%s879_s8 + $0x68] sm:$0xff]  ;;  %v191_v0 = vld [vmem:[%s876_s5 + $0x78] sm:$0xff]  ;;  %v254_v2 = vld [vmem:[%s878_s7 + $0x70] sm:$0xff] }
  0x30   :  { %v268_v54 = vmax.f32 %v236_v45, %v252_v41  ;;  %v174_v56 = vmax.f32 %v142_v47, %v158_v43  ;;  %316 = vst.msk [vmem:[%s880_s9 + $0x58] sm:$0xff] %vm304_vm0, %v299_v49  ;;  %v223_v5 = vld [vmem:[%s877_s6 + $0x78] sm:$0xff]  ;;  %v286_v7 = vld [vmem:[%s879_s8 + $0x70] sm:$0xff] }
  0x31   :  { %v237_v58 = vmax.f32 %v205_v51, %v221_v46  ;;  %v143_v60 = vmax.f32 %v111_v53, %v127_v48  ;;  %v255_v10 = vld [vmem:[%s878_s7 + $0x78] sm:$0xff] }
  0x32   :  { %v300_v61 = vmax.f32 %v268_v54, %v284_v50  ;;  %v206_v63 = vmax.f32 %v174_v56, %v190_v52  ;;  %v287_v13 = vld [vmem:[%s879_s8 + $0x78] sm:$0xff] }
  0x33   :  { %v269_v1 = vmax.f32 %v237_v58, %v253_v55  ;;  %v175_v3 = vmax.f32 %v143_v60, %v159_v57 }
  0x34   :  { %317 = vst.msk [vmem:[%s880_s9 + $0x60] sm:$0xff] %vm304_vm0, %v300_v61  ;;  %v238_v4 = vmax.f32 %v206_v63, %v222_v59 }
  0x35   :  { %v301_v6 = vmax.f32 %v269_v1, %v285_v62  ;;  %v207_v8 = vmax.f32 %v175_v3, %v191_v0 }
  0x36   :  { %v270_v9 = vmax.f32 %v238_v4, %v254_v2 }
  0x37   :  { %318 = vst.msk [vmem:[%s880_s9 + $0x68] sm:$0xff] %vm304_vm0, %v301_v6  ;;  %v239_v11 = vmax.f32 %v207_v8, %v223_v5 }
  0x38   :  { %v302_v12 = vmax.f32 %v270_v9, %v286_v7 }
  0x39   :  { %v271_v14 = vmax.f32 %v239_v11, %v255_v10 }
  0x3a   :  { %319 = vst.msk [vmem:[%s880_s9 + $0x70] sm:$0xff] %vm304_vm0, %v302_v12 }
  0x3b   :  { %v303_v15 = vmax.f32 %v271_v14, %v287_v13 }
  0x3d   :  { %320 = vst.msk [vmem:[%s880_s9 + $0x78] sm:$0xff] %vm304_vm0, %v303_v15 }

// kernel: featurizer_forward.24
= control target key start
LH: loop header
LB: loop body
LE: loop exit
PB: predicated region body
PF: predicated region fallthrough
CT: control target
= control target key end

     0   :  { %vm554_vm0 = vcmask 523264   ;;  %s1705_s1 = inlined_call_operand.vmem [shape: bf16[576,64], index: 1, kind: input, shape index: {}]   ;;  %s1706_s0 = inlined_call_operand.vmem [shape: bf16[128,576], index: 0, kind: input, shape index: {}]   ;;  %s1707_s2 = inlined_call_operand.vmem [shape: f32[1,64], index: 2, kind: input, shape index: {}]   ;;  %s1708_s3 = inlined_call_operand.vmem [shape: f32[1,64], index: 3, kind: input, shape index: {}]   ;;  %s1709_s4 = inlined_call_operand.vmem [shape: f32[128,64], index: 4, kind: output, shape index: {}]  }
   0x1   :  { %v1210_v0 = vld [vmem:[%s1705_s1 + $0x40] sm:$0xff]   ;;  %v1214_v4 = vld [vmem:[%s1705_s1 + $0x48] sm:$0xff]   ;;  %v1218_v8 = vld [vmem:[%s1705_s1 + $0x50] sm:$0xff]  }
   0x2   :  { %v1211_v1 = vld [vmem:[%s1705_s1 + $0xc0] sm:$0xff]   ;;  %1038 = vmatprep.subr.bf16.mxu0 %v1210_v0  ;;  %v1215_v5 = vld [vmem:[%s1705_s1 + $0xc8] sm:$0xff]   ;;  %v1219_v9 = vld [vmem:[%s1705_s1 + $0xd0] sm:$0xff]  }
   0x3   :  { %v1212_v2 = vld [vmem:[%s1705_s1] sm:$0xff]   ;;  %1102 = vmatprep.subr.bf16.mxu1 %v1211_v1  ;;  %v1216_v6 = vld [vmem:[%s1705_s1 + $0x8] sm:$0xff]   ;;  %v1220_v10 = vld [vmem:[%s1705_s1 + $0x10] sm:$0xff]  }
   0x4   :  { %v1213_v3 = vld [vmem:[%s1705_s1 + $0x80] sm:$0xff]   ;;  %1039 = vmatpush3.bf16.msra.mxu0 %v1212_v2  ;;  %v1217_v7 = vld [vmem:[%s1705_s1 + $0x88] sm:$0xff]   ;;  %v1221_v11 = vld [vmem:[%s1705_s1 + $0x90] sm:$0xff]  }
   0x5   :  { %1103 = vmatpush3.bf16.msra.mxu1 %v1213_v3  ;;  %1040 = vmatprep.subr.bf16.mxu0 %v1214_v4  ;;  %v1222_v12 = vld [vmem:[%s1705_s1 + $0x58] sm:$0xff]   ;;  %v1226_v16 = vld [vmem:[%s1705_s1 + $0x60] sm:$0xff]   ;;  %v1230_v20 = vld [vmem:[%s1705_s1 + $0x68] sm:$0xff]  }
   0x6   :  { %1104 = vmatprep.subr.bf16.mxu1 %v1215_v5  ;;  %v1223_v13 = vld [vmem:[%s1705_s1 + $0xd8] sm:$0xff]   ;;  %v1227_v17 = vld [vmem:[%s1705_s1 + $0xe0] sm:$0xff]   ;;  %v1231_v21 = vld [vmem:[%s1705_s1 + $0xe8] sm:$0xff]  }
   0x7   :  { %v1224_v14 = vld [vmem:[%s1705_s1 + $0x18] sm:$0xff]   ;;  %v1228_v18 = vld [vmem:[%s1705_s1 + $0x20] sm:$0xff]   ;;  %v1232_v22 = vld [vmem:[%s1705_s1 + $0x28] sm:$0xff]  }
   0x8   :  { %1041 = vmatpush3.bf16.msra.mxu0 %v1216_v6  ;;  %v1225_v15 = vld [vmem:[%s1705_s1 + $0x98] sm:$0xff]   ;;  %v1229_v19 = vld [vmem:[%s1705_s1 + $0xa0] sm:$0xff]   ;;  %v1233_v23 = vld [vmem:[%s1705_s1 + $0xa8] sm:$0xff]  }
   0x9   :  { %1105 = vmatpush3.bf16.msra.mxu1 %v1217_v7  ;;  %1042 = vmatprep.subr.bf16.mxu0 %v1218_v8  ;;  %v1234_v24 = vld [vmem:[%s1705_s1 + $0x70] sm:$0xff]   ;;  %v1238_v28 = vld [vmem:[%s1705_s1 + $0x78] sm:$0xff]   ;;  %v1247_v35 = vld [vmem:[%s1706_s0 + $0xc] ss:$20 sps:$4 sm:$0xff]  }
   0xa   :  { %1106 = vmatprep.subr.bf16.mxu1 %v1219_v9  ;;  %v1235_v25 = vld [vmem:[%s1705_s1 + $0xf0] sm:$0xff]   ;;  %v1239_v29 = vld [vmem:[%s1705_s1 + $0xf8] sm:$0xff]   ;;  %v1248_v36 = vld [vmem:[%s1705_s1 + $0x100] sm:$0xff]   ;;  %708 = vmatprep.mubr.bf16.mxu1 %v1247_v35 }
   0xb   :  { %v1236_v26 = vld [vmem:[%s1705_s1 + $0x30] sm:$0xff]   ;;  %v1240_v30 = vld [vmem:[%s1705_s1 + $0x38] sm:$0xff]   ;;  %v1249_v37 = vld [vmem:[%s1706_s0 + $0x2c] ss:$20 sps:$4 sm:$0xff]  }
   0xc   :  { %1043 = vmatpush3.bf16.msra.mxu0 %v1220_v10  ;;  %v1237_v27 = vld [vmem:[%s1705_s1 + $0xb0] sm:$0xff]   ;;  %v1241_v31 = vld [vmem:[%s1705_s1 + $0xb8] sm:$0xff]   ;;  %v1261_v42 = vld [vmem:[%s1705_s1 + $0x108] sm:$0xff]  }
   0xd   :  { %1107 = vmatpush3.bf16.msra.mxu1 %v1221_v11  ;;  %1044 = vmatprep.subr.bf16.mxu0 %v1222_v12  ;;  %v1242_v32 = vld [vmem:[%s1706_s0] ss:$20 sps:$4 sm:$0xff]   ;;  %v1244_v33 = vld [vmem:[%s1706_s0 + $0x4] ss:$20 sps:$4 sm:$0xff]   ;;  %v1245_v34 = vld [vmem:[%s1706_s0 + $0x8] ss:$20 sps:$4 sm:$0xff]  }
   0xe   :  { %1108 = vmatprep.subr.bf16.mxu1 %v1223_v13  ;;  %611 = vmatprep.mubr.bf16.mxu0 %v1244_v33  ;;  %v1251_v38 = vld [vmem:[%s1706_s0 + $0x34] ss:$20 sps:$4 sm:$0xff]   ;;  %v1254_v40 = vld [vmem:[%s1706_s0 + $0x30] ss:$20 sps:$4 sm:$0xff]   ;;  %v1260_v45 = vld [vmem:[%s1706_s0 + $0x58] ss:$20 sps:$4 sm:$0xff]  }
   0xf   :  { %v1253_v39 = vld [vmem:[%s1706_s0 + $0x28] ss:$20 sps:$4 sm:$0xff]   ;;  %v1259_v44 = vld [vmem:[%s1706_s0 + $0x50] ss:$20 sps:$4 sm:$0xff]   ;;  %v1266_v50 = vld [vmem:[%s1706_s0 + $0x78] ss:$20 sps:$4 sm:$0xff]  }
  0x10   :  { %1045 = vmatpush3.bf16.msra.mxu0 %v1224_v14  ;;  %v1255_v41 = vld [vmem:[%s1706_s0 + $0x54] ss:$20 sps:$4 sm:$0xff]   ;;  %v1257_v43 = vld [vmem:[%s1706_s0 + $0x5c] ss:$20 sps:$4 sm:$0xff]   ;;  %v1264_v48 = vld [vmem:[%s1706_s0 + $0x84] ss:$20 sps:$4 sm:$0xff]  }
  0x11   :  { %1109 = vmatpush3.bf16.msra.mxu1 %v1225_v15  ;;  %1046 = vmatprep.subr.bf16.mxu0 %v1226_v16  ;;  %v1274_v46 = vld [vmem:[%s1705_s1 + $0x110] sm:$0xff]   ;;  %v1287_v49 = vld [vmem:[%s1705_s1 + $0x118] sm:$0xff]   ;;  %v1270_v53 = vld [vmem:[%s1706_s0 + $0xac] ss:$20 sps:$4 sm:$0xff]  }
  0x12   :  { %1110 = vmatprep.subr.bf16.mxu1 %v1227_v17  ;;  %v1262_v47 = vld [vmem:[%s1706_s0 + $0x7c] ss:$20 sps:$4 sm:$0xff]   ;;  %v1267_v51 = vld [vmem:[%s1706_s0 + $0x80] ss:$20 sps:$4 sm:$0xff]   ;;  %v1268_v52 = vld [vmem:[%s1706_s0 + $0xa4] ss:$20 sps:$4 sm:$0xff]  }
  0x13   :  { %v1272_v54 = vld [vmem:[%s1706_s0 + $0xa0] ss:$20 sps:$4 sm:$0xff]   ;;  %v1273_v55 = vld [vmem:[%s1706_s0 + $0xa8] ss:$20 sps:$4 sm:$0xff]   ;;  %v1280_v59 = vld [vmem:[%s1706_s0 + $0xd0] ss:$20 sps:$4 sm:$0xff]  }
  0x14   :  { %1047 = vmatpush3.bf16.msra.mxu0 %v1228_v18  ;;  %v1275_v56 = vld [vmem:[%s1706_s0 + $0xcc] ss:$20 sps:$4 sm:$0xff]   ;;  %v1277_v57 = vld [vmem:[%s1706_s0 + $0xd4] ss:$20 sps:$4 sm:$0xff]   ;;  %v1283_v61 = vld [vmem:[%s1706_s0 + $0xfc] ss:$20 sps:$4 sm:$0xff]  }
  0x15   :  { %1111 = vmatpush3.bf16.msra.mxu1 %v1229_v19  ;;  %1048 = vmatprep.subr.bf16.mxu0 %v1230_v20  ;;  %v1279_v58 = vld [vmem:[%s1706_s0 + $0xc8] ss:$20 sps:$4 sm:$0xff]   ;;  %v1285_v62 = vld [vmem:[%s1706_s0 + $0xf0] ss:$20 sps:$4 sm:$0xff]   ;;  %v1286_v63 = vld [vmem:[%s1706_s0 + $0xf8] ss:$20 sps:$4 sm:$0xff]  }
  0x16   :  { %1112 = vmatprep.subr.bf16.mxu1 %v1231_v21  ;;  %v1281_v60 = vld [vmem:[%s1706_s0 + $0xf4] ss:$20 sps:$4 sm:$0xff]   ;;  %v1288_v0 = vld [vmem:[%s1706_s0 + $0x11c] ss:$20 sps:$4 sm:$0xff]   ;;  %v1290_v1 = vld [vmem:[%s1706_s0 + $0x124] ss:$20 sps:$4 sm:$0xff]  }
  0x17   :  { %v1292_v2 = vld [vmem:[%s1706_s0 + $0x118] ss:$20 sps:$4 sm:$0xff]   ;;  %v1293_v3 = vld [vmem:[%s1706_s0 + $0x120] ss:$20 sps:$4 sm:$0xff]   ;;  %v1294_v4 = vld [vmem:[%s1706_s0 + $0x10] ss:$20 sps:$4 sm:$0xff]  }
  0x18   :  { %1049 = vmatpush3.bf16.msra.mxu0 %v1232_v22  ;;  %v1295_v5 = vld [vmem:[%s1706_s0 + $0xb0] ss:$20 sps:$4 sm:$0xff]   ;;  %v1296_v6 = vld [vmem:[%s1706_s0 + $0x38] ss:$20 sps:$4 sm:$0xff]   ;;  %v1298_v8 = vld [vmem:[%s1706_s0 + $0x60] ss:$20 sps:$4 sm:$0xff]  }
  0x19   :  { %1113 = vmatpush3.bf16.msra.mxu1 %v1233_v23  ;;  %1050 = vmatprep.subr.bf16.mxu0 %v1234_v24  ;;  %v1297_v7 = vld [vmem:[%s1706_s0 + $0xd8] ss:$20 sps:$4 sm:$0xff]   ;;  %v1299_v9 = vld [vmem:[%s1706_s0 + $0x100] ss:$20 sps:$4 sm:$0xff]   ;;  %v1300_v10 = vld [vmem:[%s1706_s0 + $0x88] ss:$20 sps:$4 sm:$0xff]  }
  0x1a   :  { %1114 = vmatprep.subr.bf16.mxu1 %v1235_v25  ;;  %v1301_v11 = vld [vmem:[%s1706_s0 + $0x128] ss:$20 sps:$4 sm:$0xff]  }
  0x1c   :  { %1051 = vmatpush3.bf16.msra.mxu0 %v1236_v26 }
  0x1d   :  { %1115 = vmatpush3.bf16.msra.mxu1 %v1237_v27  ;;  %1052 = vmatprep.subr.bf16.mxu0 %v1238_v28 }
  0x1e   :  { %1116 = vmatprep.subr.bf16.mxu1 %v1239_v29 }
  0x20   :  { %1053 = vmatpush3.bf16.msra.mxu0 %v1240_v30 }
  0x21   :  { %1117 = vmatpush3.bf16.msra.mxu1 %v1241_v31  ;;  %1178 = vmatprep.subr.bf16.mxu0 %v1248_v36 }
  0x22   :  { %1202 = vmatprep.subr.bf16.mxu1 %v1248_v36 }
  0x23   :  { %612 = vmatmul.mubr.bf16.vlgmr.msra.gmra.mrb[0].mxu0 %v1242_v32 }
  0x24   :  { %709 = vmatmul.mubr.bf16.vlgmr.msra.gmra.mrb[0].mxu1 %v1245_v34  ;;  %1179 = vmatpush3.bf16.msra.mxu0 %v1248_v36 }
  0x25   :  { %1206 = vmatpush3.bf16.msra.mxu1 %v1248_v36  ;;  %619 = vmatprep.mubr.bf16.mxu0 %v1249_v37 }
  0x26   :  { %716 = vmatprep.mubr.bf16.mxu1 %v1251_v38  ;;  %1180 = vmatprep.subr.bf16.mxu0 %v1261_v42 }
  0x27   :  { %1203 = vmatprep.subr.bf16.mxu1 %v1261_v42 }
  0x28   :  { %1181 = vmatpush3.bf16.msra.mxu0 %v1261_v42 }
  0x29   :  { %1207 = vmatpush3.bf16.msra.mxu1 %v1261_v42  ;;  %1182 = vmatprep.subr.bf16.mxu0 %v1274_v46 }
  0x2a   :  { %1204 = vmatprep.subr.bf16.mxu1 %v1274_v46 }
  0x2b   :  { %620 = vmatmul.mubr.bf16.gmra.mrb[4].mxu0 %v1253_v39 }
  0x2c   :  { %717 = vmatmul.mubr.bf16.gmra.mrb[4].mxu1 %v1254_v40  ;;  %627 = vmatprep.mubr.bf16.mxu0 %v1255_v41 }
  0x2d   :  { %724 = vmatprep.mubr.bf16.mxu1 %v1257_v43  ;;  %1183 = vmatpush3.bf16.msra.mxu0 %v1274_v46 }
  0x2e   :  { %1208 = vmatpush3.bf16.msra.mxu1 %v1274_v46  ;;  %1184 = vmatprep.subr.bf16.mxu0 %v1287_v49 }
  0x2f   :  { %1205 = vmatprep.subr.bf16.mxu1 %v1287_v49 }
  0x31   :  { %1185 = vmatpush3.bf16.msra.mxu0 %v1287_v49 }
  0x32   :  { %1209 = vmatpush3.bf16.msra.mxu1 %v1287_v49 }
  0x33   :  { %628 = vmatmul.mubr.bf16.gmra.mrb[8].mxu0 %v1259_v44 }
  0x34   :  { %725 = vmatmul.mubr.bf16.gmra.mrb[8].mxu1 %v1260_v45  ;;  %635 = vmatprep.mubr.bf16.mxu0 %v1262_v47 }
  0x35   :  { %732 = vmatprep.mubr.bf16.mxu1 %v1264_v48 }
  0x3b   :  { %636 = vmatmul.mubr.bf16.gmra.mrb[12].mxu0 %v1266_v50 }
  0x3c   :  { %733 = vmatmul.mubr.bf16.gmra.mrb[12].mxu1 %v1267_v51  ;;  %643 = vmatprep.mubr.bf16.mxu0 %v1268_v52 }
  0x3d   :  { %740 = vmatprep.mubr.bf16.mxu1 %v1270_v53 }
  0x43   :  { %644 = vmatmul.mubr.bf16.gmra.mrb[16].mxu0 %v1272_v54 }
  0x44   :  { %741 = vmatmul.mubr.bf16.gmra.mrb[16].mxu1 %v1273_v55  ;;  %651 = vmatprep.mubr.bf16.mxu0 %v1275_v56 }
  0x45   :  { %748 = vmatprep.mubr.bf16.mxu1 %v1277_v57 }
  0x4b   :  { %652 = vmatmul.mubr.bf16.gmra.mrb[20].mxu0 %v1279_v58 }
  0x4c   :  { %749 = vmatmul.mubr.bf16.gmra.mrb[20].mxu1 %v1280_v59  ;;  %659 = vmatprep.mubr.bf16.mxu0 %v1281_v60 }
  0x4d   :  { %756 = vmatprep.mubr.bf16.mxu1 %v1283_v61 }
  0x53   :  { %660 = vmatmul.mubr.bf16.gmra.mrb[24].mxu0 %v1285_v62 }
  0x54   :  { %757 = vmatmul.mubr.bf16.gmra.mrb[24].mxu1 %v1286_v63  ;;  %667 = vmatprep.mubr.bf16.mxu0 %v1288_v0 }
  0x55   :  { %764 = vmatprep.mubr.bf16.mxu1 %v1290_v1 }
  0x5b   :  { %668 = vmatmul.mubr.bf16.gmra.mrb[28].mxu0 %v1292_v2 }
  0x5c   :  { %765 = vmatmul.mubr.bf16.gmra.mrb[28].mxu1 %v1293_v3  ;;  %1186 = vmatprep.mubr.msk.bf16.mxu0 %vm554_vm0, %v1294_v4 }
  0x5d   :  { %1194 = vmatprep.mubr.msk.bf16.mxu1 %vm554_vm0, %v1295_v5 }
  0x63   :  { %1187 = vmatmul.mubr.msk.bf16.vlgmr.msra.gmra.mrb[32].mxu0 %vm554_vm0, %v1296_v6 }
  0x64   :  { %1195 = vmatmul.mubr.msk.bf16.vlgmr.msra.gmra.mrb[32].mxu1 %vm554_vm0, %v1297_v7  ;;  %1190 = vmatprep.mubr.msk.bf16.mxu0 %vm554_vm0, %v1298_v8 }
  0x65   :  { %1198 = vmatprep.mubr.msk.bf16.mxu1 %vm554_vm0, %v1299_v9 }
  0x6b   :  { %1191 = vmatmul.mubr.msk.bf16.gmra.mrb[36].mxu0 %vm554_vm0, %v1300_v10 }
  0x6c   :  { %1199 = vmatmul.mubr.msk.bf16.gmra.mrb[36].mxu1 %vm554_vm0, %v1301_v11 }
  0xf6   :  { %v1054_v12 = vpop.f32.mrb[0].mxu0 }
  0xf7   :  { %v1118_v13 = vpop.f32.mrb[0].mxu1  ;;  %v1055_v14 = vpop.f32.mrb[1].mxu0 }
  0xf8   :  { %v1056_v15 = vadd.f32 %v1055_v14, %v1054_v12  ;;  %v1119_v16 = vpop.f32.mrb[1].mxu1  ;;  %v1057_v17 = vpop.f32.mrb[2].mxu0 }
  0xf9   :  { %v1120_v18 = vadd.f32 %v1119_v16, %v1118_v13  ;;  %v1121_v19 = vpop.f32.mrb[2].mxu1  ;;  %v1058_v20 = vpop.f32.mrb[3].mxu0 }
  0xfa   :  { %v1059_v21 = vadd.f32 %v1058_v20, %v1057_v17  ;;  %v1122_v22 = vpop.f32.mrb[3].mxu1 }
  0xfb   :  { %v1123_v23 = vadd.f32 %v1122_v22, %v1121_v19  ;;  %v1563_v24 = vadd.f32 %v1120_v18, %v1056_v15 }
  0xfd   :  { %v1565_v25 = vadd.f32 %v1123_v23, %v1059_v21 }
  0xfe   :  { %v1060_v26 = vpop.f32.mrb[4].mxu0 }
  0xff   :  { %v1124_v27 = vpop.f32.mrb[4].mxu1  ;;  %v1061_v28 = vpop.f32.mrb[5].mxu0 }
 0x100   :  { %v1062_v29 = vadd.f32 %v1061_v28, %v1060_v26  ;;  %v1125_v30 = vpop.f32.mrb[5].mxu1  ;;  %v1063_v31 = vpop.f32.mrb[6].mxu0 }
 0x101   :  { %v1126_v32 = vadd.f32 %v1125_v30, %v1124_v27  ;;  %v1127_v33 = vpop.f32.mrb[6].mxu1  ;;  %v1064_v34 = vpop.f32.mrb[7].mxu0 }
 0x102   :  { %v1065_v35 = vadd.f32 %v1064_v34, %v1063_v31  ;;  %v1128_v36 = vpop.f32.mrb[7].mxu1 }
 0x103   :  { %v1129_v37 = vadd.f32 %v1128_v36, %v1127_v33  ;;  %v1567_v38 = vadd.f32 %v1126_v32, %v1062_v29 }
 0x105   :  { %v1569_v39 = vadd.f32 %v1129_v37, %v1065_v35 }
 0x106   :  { %v1066_v40 = vpop.f32.mrb[8].mxu0 }
 0x107   :  { %v1130_v41 = vpop.f32.mrb[8].mxu1  ;;  %v1067_v42 = vpop.f32.mrb[9].mxu0 }
 0x108   :  { %v1068_v43 = vadd.f32 %v1067_v42, %v1066_v40  ;;  %v1131_v44 = vpop.f32.mrb[9].mxu1  ;;  %v1069_v45 = vpop.f32.mrb[10].mxu0 }
 0x109   :  { %v1132_v46 = vadd.f32 %v1131_v44, %v1130_v41  ;;  %v1133_v47 = vpop.f32.mrb[10].mxu1  ;;  %v1070_v48 = vpop.f32.mrb[11].mxu0 }
 0x10a   :  { %v1071_v49 = vadd.f32 %v1070_v48, %v1069_v45  ;;  %v1134_v50 = vpop.f32.mrb[11].mxu1 }
 0x10b   :  { %v1135_v51 = vadd.f32 %v1134_v50, %v1133_v47  ;;  %v1571_v52 = vadd.f32 %v1132_v46, %v1068_v43 }
 0x10d   :  { %v1573_v53 = vadd.f32 %v1135_v51, %v1071_v49 }
 0x10e   :  { %v1072_v54 = vpop.f32.mrb[12].mxu0 }
 0x10f   :  { %v1136_v55 = vpop.f32.mrb[12].mxu1  ;;  %v1073_v56 = vpop.f32.mrb[13].mxu0 }
 0x110   :  { %v1074_v57 = vadd.f32 %v1073_v56, %v1072_v54  ;;  %v1137_v58 = vpop.f32.mrb[13].mxu1  ;;  %v1075_v59 = vpop.f32.mrb[14].mxu0 }
 0x111   :  { %v1138_v60 = vadd.f32 %v1137_v58, %v1136_v55  ;;  %v1139_v61 = vpop.f32.mrb[14].mxu1  ;;  %v1076_v62 = vpop.f32.mrb[15].mxu0 }
 0x112   :  { %v1077_v63 = vadd.f32 %v1076_v62, %v1075_v59  ;;  %v1140_v0 = vpop.f32.mrb[15].mxu1 }
 0x113   :  { %v1141_v1 = vadd.f32 %v1140_v0, %v1139_v61  ;;  %v1575_v2 = vadd.f32 %v1138_v60, %v1074_v57 }
 0x115   :  { %v1577_v3 = vadd.f32 %v1141_v1, %v1077_v63 }
 0x116   :  { %v1078_v4 = vpop.f32.mrb[16].mxu0 }
 0x117   :  { %v1142_v5 = vpop.f32.mrb[16].mxu1  ;;  %v1079_v6 = vpop.f32.mrb[17].mxu0 }
 0x118   :  { %v1080_v7 = vadd.f32 %v1079_v6, %v1078_v4  ;;  %v1143_v8 = vpop.f32.mrb[17].mxu1  ;;  %v1081_v9 = vpop.f32.mrb[18].mxu0 }
 0x119   :  { %v1144_v10 = vadd.f32 %v1143_v8, %v1142_v5  ;;  %v1145_v11 = vpop.f32.mrb[18].mxu1  ;;  %v1082_v12 = vpop.f32.mrb[19].mxu0  ;;  %v1590_v5 = vld [vmem:[%s1707_s2] ss:$0 sm:$0xff] }
 0x11a   :  { %v1083_v13 = vadd.f32 %v1082_v12, %v1081_v9  ;;  %v1146_v14 = vpop.f32.mrb[19].mxu1  ;;  %v1596_v9 = vld [vmem:[%s1708_s3] ss:$0 sm:$0xff] }
 0x11b   :  { %v1147_v15 = vadd.f32 %v1146_v14, %v1145_v11  ;;  %v743_v16 = vadd.f32 %v1144_v10, %v1080_v7 }
 0x11d   :  { %v1579_v17 = vadd.f32 %v1147_v15, %v1083_v13 }
 0x11e   :  { %v1084_v18 = vpop.f32.mrb[20].mxu0 }
 0x11f   :  { %v1148_v19 = vpop.f32.mrb[20].mxu1  ;;  %v1085_v20 = vpop.f32.mrb[21].mxu0 }
 0x120   :  { %v1086_v21 = vadd.f32 %v1085_v20, %v1084_v18  ;;  %v1149_v22 = vpop.f32.mrb[21].mxu1  ;;  %v1087_v23 = vpop.f32.mrb[22].mxu0 }
 0x121   :  { %v1150_v26 = vadd.f32 %v1149_v22, %v1148_v19  ;;  %v1151_v27 = vpop.f32.mrb[22].mxu1  ;;  %v1088_v28 = vpop.f32.mrb[23].mxu0 }
 0x122   :  { %v1089_v29 = vadd.f32 %v1088_v28, %v1087_v23  ;;  %v1152_v30 = vpop.f32.mrb[23].mxu1 }
 0x123   :  { %v1153_v31 = vadd.f32 %v1152_v30, %v1151_v27  ;;  %v751_v32 = vadd.f32 %v1150_v26, %v1086_v21 }
 0x125   :  { %v754_v33 = vadd.f32 %v1153_v31, %v1089_v29 }
 0x126   :  { %v1090_v34 = vpop.f32.mrb[24].mxu0 }
 0x127   :  { %v1154_v35 = vpop.f32.mrb[24].mxu1  ;;  %v1091_v36 = vpop.f32.mrb[25].mxu0 }
 0x128   :  { %v1092_v37 = vadd.f32 %v1091_v36, %v1090_v34  ;;  %v1155_v40 = vpop.f32.mrb[25].mxu1  ;;  %v1093_v41 = vpop.f32.mrb[26].mxu0 }
 0x129   :  { %v1156_v42 = vadd.f32 %v1155_v40, %v1154_v35  ;;  %v1157_v43 = vpop.f32.mrb[26].mxu1  ;;  %v1094_v44 = vpop.f32.mrb[27].mxu0 }
 0x12a   :  { %v1095_v45 = vadd.f32 %v1094_v44, %v1093_v41  ;;  %v1158_v46 = vpop.f32.mrb[27].mxu1 }
 0x12b   :  { %v1159_v47 = vadd.f32 %v1158_v46, %v1157_v43  ;;  %v1581_v48 = vadd.f32 %v1156_v42, %v1092_v37 }
 0x12d   :  { %v1583_v49 = vadd.f32 %v1159_v47, %v1095_v45 }
 0x12e   :  { %v1096_v50 = vpop.f32.mrb[28].mxu0 }
 0x12f   :  { %v1160_v51 = vpop.f32.mrb[28].mxu1  ;;  %v1097_v54 = vpop.f32.mrb[29].mxu0 }
 0x130   :  { %v1098_v55 = vadd.f32 %v1097_v54, %v1096_v50  ;;  %v1161_v56 = vpop.f32.mrb[29].mxu1  ;;  %v1099_v57 = vpop.f32.mrb[30].mxu0 }
 0x131   :  { %v1162_v58 = vadd.f32 %v1161_v56, %v1160_v51  ;;  %v1163_v59 = vpop.f32.mrb[30].mxu1  ;;  %v1100_v60 = vpop.f32.mrb[31].mxu0 }
 0x132   :  { %v1101_v61 = vadd.f32 %v1100_v60, %v1099_v57  ;;  %v1164_v62 = vpop.f32.mrb[31].mxu1 }
 0x133   :  { %v1165_v63 = vadd.f32 %v1164_v62, %v1163_v59  ;;  %v767_v0 = vadd.f32 %v1162_v58, %v1098_v55 }
 0x135   :  { %v1585_v1 = vadd.f32 %v1165_v63, %v1101_v61 }
 0x136   :  { %v1188_v4 = vpop.f32.mrb[32].mxu0 }
 0x137   :  { %v816_v6 = vadd.f32 %v1188_v4, %v1567_v38  ;;  %v1196_v7 = vpop.f32.mrb[32].mxu1  ;;  %v807_v8 = vpop.f32.mrb[33].mxu0 }
 0x138   :  { %v848_v10 = vadd.f32 %v1196_v7, %v751_v32  ;;  %v808_v11 = vadd.f32 %v807_v8, %v1563_v24  ;;  %v839_v12 = vpop.f32.mrb[33].mxu1  ;;  %v1189_v13 = vpop.f32.mrb[34].mxu0 }
 0x139   :  { %v879_v14 = vmul.f32 %v1590_v5, %v816_v6  ;;  %v840_v15 = vadd.f32 %v839_v12, %v743_v16  ;;  %v819_v18 = vadd.f32 %v1189_v13, %v1569_v39  ;;  %v1197_v19 = vpop.f32.mrb[34].mxu1  ;;  %v810_v20 = vpop.f32.mrb[35].mxu0 }
 0x13a   :  { %v887_v38 = vmul.f32 %v1590_v5, %v848_v10  ;;  %v877_v21 = vmul.f32 %v1590_v5, %v808_v11  ;;  %v851_v22 = vadd.f32 %v1197_v19, %v754_v33  ;;  %v811_v23 = vadd.f32 %v810_v20, %v1565_v25  ;;  %v842_v26 = vpop.f32.mrb[35].mxu1 }
 0x13b   :  { %v902_v27 = vadd.f32 %v1596_v9, %v879_v14  ;;  %v885_v24 = vmul.f32 %v1590_v5, %v840_v15  ;;  %v880_v28 = vmul.f32 %v1590_v5, %v819_v18  ;;  %v843_v16 = vadd.f32 %v842_v26, %v1579_v17 }
 0x13c   :  { %v910_v39 = vadd.f32 %v1596_v9, %v887_v38  ;;  %v900_v29 = vadd.f32 %v1596_v9, %v877_v21  ;;  %v888_v30 = vmul.f32 %v1590_v5, %v851_v22  ;;  %v878_v31 = vmul.f32 %v1590_v5, %v811_v23 }
 0x13d   :  { %v918_v32 = vmax.f32 %v902_v27, 0.0  ;;  %v908_v25 = vadd.f32 %v1596_v9, %v885_v24  ;;  %v903_v33 = vadd.f32 %v1596_v9, %v880_v28  ;;  %v886_v34 = vmul.f32 %v1590_v5, %v843_v16 }
 0x13e   :  { %v926_v35 = vmax.f32 %v910_v39, 0.0  ;;  %v916_v36 = vmax.f32 %v900_v29, 0.0  ;;  %v911_v37 = vadd.f32 %v1596_v9, %v888_v30  ;;  %v901_v17 = vadd.f32 %v1596_v9, %v878_v31  ;;  %v1192_v40 = vpop.f32.mrb[36].mxu0 }
 0x13f   :  { %934 = vst.msk [vmem:[%s1709_s4 + $0x10] sm:$0xff] %vm554_vm0, %v918_v32  ;;  %v924_v41 = vmax.f32 %v908_v25, 0.0  ;;  %v919_v42 = vmax.f32 %v903_v33, 0.0  ;;  %v909_v43 = vadd.f32 %v1596_v9, %v886_v34  ;;  %v832_v44 = vadd.f32 %v1192_v40, %v1575_v2  ;;  %v1200_v45 = vpop.f32.mrb[36].mxu1  ;;  %v823_v46 = vpop.f32.mrb[37].mxu0 }
 0x140   :  { %942 = vst.msk [vmem:[%s1709_s4 + $0x50] sm:$0xff] %vm554_vm0, %v926_v35  ;;  %932 = vst.msk [vmem:[%s1709_s4] sm:$0xff] %vm554_vm0, %v916_v36  ;;  %v927_v47 = vmax.f32 %v911_v37, 0.0  ;;  %v917_v50 = vmax.f32 %v901_v17, 0.0  ;;  %v864_v51 = vadd.f32 %v1200_v45, %v767_v0  ;;  %v824_v54 = vadd.f32 %v823_v46, %v1571_v52  ;;  %v855_v55 = vpop.f32.mrb[37].mxu1  ;;  %v1193_v56 = vpop.f32.mrb[38].mxu0 }
 0x141   :  { %940 = vst.msk [vmem:[%s1709_s4 + $0x40] sm:$0xff] %vm554_vm0, %v924_v41  ;;  %935 = vst.msk [vmem:[%s1709_s4 + $0x18] sm:$0xff] %vm554_vm0, %v919_v42  ;;  %v925_v2 = vmax.f32 %v909_v43, 0.0  ;;  %v883_v57 = vmul.f32 %v1590_v5, %v832_v44  ;;  %v856_v58 = vadd.f32 %v855_v55, %v1581_v48  ;;  %v835_v59 = vadd.f32 %v1193_v56, %v1577_v3  ;;  %v1201_v52 = vpop.f32.mrb[38].mxu1  ;;  %v826_v60 = vpop.f32.mrb[39].mxu0 }
 0x142   :  { %943 = vst.msk [vmem:[%s1709_s4 + $0x58] sm:$0xff] %vm554_vm0, %v927_v47  ;;  %933 = vst.msk [vmem:[%s1709_s4 + $0x8] sm:$0xff] %vm554_vm0, %v917_v50  ;;  %v891_v61 = vmul.f32 %v1590_v5, %v864_v51  ;;  %v881_v62 = vmul.f32 %v1590_v5, %v824_v54  ;;  %v867_v48 = vadd.f32 %v1201_v52, %v1585_v1  ;;  %v858_v63 = vpop.f32.mrb[39].mxu1 }
 0x143   :  { %v827_v3 = vadd.f32 %v826_v60, %v1573_v53  ;;  %941 = vst.msk [vmem:[%s1709_s4 + $0x48] sm:$0xff] %vm554_vm0, %v925_v2  ;;  %v906_v0 = vadd.f32 %v1596_v9, %v883_v57  ;;  %v889_v4 = vmul.f32 %v1590_v5, %v856_v58  ;;  %v884_v6 = vmul.f32 %v1590_v5, %v835_v59 }
 0x144   :  { %v859_v7 = vadd.f32 %v858_v63, %v1583_v49  ;;  %v914_v8 = vadd.f32 %v1596_v9, %v891_v61  ;;  %v904_v1 = vadd.f32 %v1596_v9, %v881_v62  ;;  %v892_v53 = vmul.f32 %v1590_v5, %v867_v48 }
 0x145   :  { %v882_v10 = vmul.f32 %v1590_v5, %v827_v3  ;;  %v922_v11 = vmax.f32 %v906_v0, 0.0  ;;  %v912_v12 = vadd.f32 %v1596_v9, %v889_v4  ;;  %v907_v13 = vadd.f32 %v1596_v9, %v884_v6 }
 0x146   :  { %v890_v14 = vmul.f32 %v1590_v5, %v859_v7  ;;  %v930_v15 = vmax.f32 %v914_v8, 0.0  ;;  %v920_v18 = vmax.f32 %v904_v1, 0.0  ;;  %v915_v19 = vadd.f32 %v1596_v9, %v892_v53 }
 0x147   :  { %v905_v49 = vadd.f32 %v1596_v9, %v882_v10  ;;  %938 = vst.msk [vmem:[%s1709_s4 + $0x30] sm:$0xff] %vm554_vm0, %v922_v11  ;;  %v928_v20 = vmax.f32 %v912_v12, 0.0  ;;  %v923_v38 = vmax.f32 %v907_v13, 0.0 }
 0x148   :  { %v913_v21 = vadd.f32 %v1596_v9, %v890_v14  ;;  %946 = vst.msk [vmem:[%s1709_s4 + $0x70] sm:$0xff] %vm554_vm0, %v930_v15  ;;  %936 = vst.msk [vmem:[%s1709_s4 + $0x20] sm:$0xff] %vm554_vm0, %v920_v18  ;;  %v931_v5 = vmax.f32 %v915_v19, 0.0 }
 0x149   :  { %v921_v22 = vmax.f32 %v905_v49, 0.0  ;;  %944 = vst.msk [vmem:[%s1709_s4 + $0x60] sm:$0xff] %vm554_vm0, %v928_v20  ;;  %939 = vst.msk [vmem:[%s1709_s4 + $0x38] sm:$0xff] %vm554_vm0, %v923_v38 }
 0x14a   :  { %v929_v9 = vmax.f32 %v913_v21, 0.0  ;;  %947 = vst.msk [vmem:[%s1709_s4 + $0x78] sm:$0xff] %vm554_vm0, %v931_v5 }
 0x14b   :  { %937 = vst.msk [vmem:[%s1709_s4 + $0x28] sm:$0xff] %vm554_vm0, %v921_v22 }
 0x14c   :  { %945 = vst.msk [vmem:[%s1709_s4 + $0x68] sm:$0xff] %vm554_vm0, %v929_v9 }

// kernel: featurizer_forward.25
= control target key start
LH: loop header
LB: loop body
LE: loop exit
PB: predicated region body
PF: predicated region fallthrough
CT: control target
= control target key end

     0   :  { %vm557_vm0 = vcmask 523264   ;;  %s1796_s1 = inlined_call_operand.vmem [shape: bf16[576,64], index: 1, kind: input, shape index: {}]   ;;  %s1797_s0 = inlined_call_operand.vmem [shape: bf16[128,576], index: 0, kind: input, shape index: {}]   ;;  %s1798_s2 = inlined_call_operand.vmem [shape: f32[1,64], index: 2, kind: input, shape index: {}]   ;;  %s1799_s3 = inlined_call_operand.vmem [shape: f32[1,64], index: 3, kind: input, shape index: {}]   ;;  %s1800_s4 = inlined_call_operand.vmem [shape: f32[128,64], index: 4, kind: input, shape index: {}]   ;;  %s1801_s5 = inlined_call_operand.vmem [shape: f32[128,64], index: 5, kind: output, shape index: {}]  }
   0x1   :  { %v1245_v0 = vld [vmem:[%s1796_s1 + $0x40] sm:$0xff]   ;;  %v1249_v4 = vld [vmem:[%s1796_s1 + $0x48] sm:$0xff]   ;;  %v1253_v8 = vld [vmem:[%s1796_s1 + $0x50] sm:$0xff]  }
   0x2   :  { %v1246_v1 = vld [vmem:[%s1796_s1 + $0xc0] sm:$0xff]   ;;  %1073 = vmatprep.subr.bf16.mxu0 %v1245_v0  ;;  %v1250_v5 = vld [vmem:[%s1796_s1 + $0xc8] sm:$0xff]   ;;  %v1254_v9 = vld [vmem:[%s1796_s1 + $0xd0] sm:$0xff]  }
   0x3   :  { %v1247_v2 = vld [vmem:[%s1796_s1] sm:$0xff]   ;;  %1137 = vmatprep.subr.bf16.mxu1 %v1246_v1  ;;  %v1251_v6 = vld [vmem:[%s1796_s1 + $0x8] sm:$0xff]   ;;  %v1255_v10 = vld [vmem:[%s1796_s1 + $0x10] sm:$0xff]  }
   0x4   :  { %v1248_v3 = vld [vmem:[%s1796_s1 + $0x80] sm:$0xff]   ;;  %1074 = vmatpush3.bf16.msra.mxu0 %v1247_v2  ;;  %v1252_v7 = vld [vmem:[%s1796_s1 + $0x88] sm:$0xff]   ;;  %v1256_v11 = vld [vmem:[%s1796_s1 + $0x90] sm:$0xff]  }
   0x5   :  { %1138 = vmatpush3.bf16.msra.mxu1 %v1248_v3  ;;  %1075 = vmatprep.subr.bf16.mxu0 %v1249_v4  ;;  %v1257_v12 = vld [vmem:[%s1796_s1 + $0x58] sm:$0xff]   ;;  %v1261_v16 = vld [vmem:[%s1796_s1 + $0x60] sm:$0xff]   ;;  %v1265_v20 = vld [vmem:[%s1796_s1 + $0x68] sm:$0xff]  }
   0x6   :  { %1139 = vmatprep.subr.bf16.mxu1 %v1250_v5  ;;  %v1258_v13 = vld [vmem:[%s1796_s1 + $0xd8] sm:$0xff]   ;;  %v1262_v17 = vld [vmem:[%s1796_s1 + $0xe0] sm:$0xff]   ;;  %v1266_v21 = vld [vmem:[%s1796_s1 + $0xe8] sm:$0xff]  }
   0x7   :  { %v1259_v14 = vld [vmem:[%s1796_s1 + $0x18] sm:$0xff]   ;;  %v1263_v18 = vld [vmem:[%s1796_s1 + $0x20] sm:$0xff]   ;;  %v1267_v22 = vld [vmem:[%s1796_s1 + $0x28] sm:$0xff]  }
   0x8   :  { %1076 = vmatpush3.bf16.msra.mxu0 %v1251_v6  ;;  %v1260_v15 = vld [vmem:[%s1796_s1 + $0x98] sm:$0xff]   ;;  %v1264_v19 = vld [vmem:[%s1796_s1 + $0xa0] sm:$0xff]   ;;  %v1268_v23 = vld [vmem:[%s1796_s1 + $0xa8] sm:$0xff]  }
   0x9   :  { %1140 = vmatpush3.bf16.msra.mxu1 %v1252_v7  ;;  %1077 = vmatprep.subr.bf16.mxu0 %v1253_v8  ;;  %v1269_v24 = vld [vmem:[%s1796_s1 + $0x70] sm:$0xff]   ;;  %v1273_v28 = vld [vmem:[%s1796_s1 + $0x78] sm:$0xff]   ;;  %v1282_v35 = vld [vmem:[%s1797_s0 + $0xc] ss:$20 sps:$4 sm:$0xff]  }
   0xa   :  { %1141 = vmatprep.subr.bf16.mxu1 %v1254_v9  ;;  %v1270_v25 = vld [vmem:[%s1796_s1 + $0xf0] sm:$0xff]   ;;  %v1274_v29 = vld [vmem:[%s1796_s1 + $0xf8] sm:$0xff]   ;;  %v1283_v36 = vld [vmem:[%s1796_s1 + $0x100] sm:$0xff]   ;;  %711 = vmatprep.mubr.bf16.mxu1 %v1282_v35 }
   0xb   :  { %v1271_v26 = vld [vmem:[%s1796_s1 + $0x30] sm:$0xff]   ;;  %v1275_v30 = vld [vmem:[%s1796_s1 + $0x38] sm:$0xff]   ;;  %v1284_v37 = vld [vmem:[%s1797_s0 + $0x2c] ss:$20 sps:$4 sm:$0xff]  }
   0xc   :  { %1078 = vmatpush3.bf16.msra.mxu0 %v1255_v10  ;;  %v1272_v27 = vld [vmem:[%s1796_s1 + $0xb0] sm:$0xff]   ;;  %v1276_v31 = vld [vmem:[%s1796_s1 + $0xb8] sm:$0xff]   ;;  %v1296_v42 = vld [vmem:[%s1796_s1 + $0x108] sm:$0xff]  }
   0xd   :  { %1142 = vmatpush3.bf16.msra.mxu1 %v1256_v11  ;;  %1079 = vmatprep.subr.bf16.mxu0 %v1257_v12  ;;  %v1277_v32 = vld [vmem:[%s1797_s0] ss:$20 sps:$4 sm:$0xff]   ;;  %v1279_v33 = vld [vmem:[%s1797_s0 + $0x4] ss:$20 sps:$4 sm:$0xff]   ;;  %v1280_v34 = vld [vmem:[%s1797_s0 + $0x8] ss:$20 sps:$4 sm:$0xff]  }
   0xe   :  { %1143 = vmatprep.subr.bf16.mxu1 %v1258_v13  ;;  %614 = vmatprep.mubr.bf16.mxu0 %v1279_v33  ;;  %v1286_v38 = vld [vmem:[%s1797_s0 + $0x34] ss:$20 sps:$4 sm:$0xff]   ;;  %v1289_v40 = vld [vmem:[%s1797_s0 + $0x30] ss:$20 sps:$4 sm:$0xff]   ;;  %v1295_v45 = vld [vmem:[%s1797_s0 + $0x58] ss:$20 sps:$4 sm:$0xff]  }
   0xf   :  { %v1288_v39 = vld [vmem:[%s1797_s0 + $0x28] ss:$20 sps:$4 sm:$0xff]   ;;  %v1294_v44 = vld [vmem:[%s1797_s0 + $0x50] ss:$20 sps:$4 sm:$0xff]   ;;  %v1301_v50 = vld [vmem:[%s1797_s0 + $0x78] ss:$20 sps:$4 sm:$0xff]  }
  0x10   :  { %1080 = vmatpush3.bf16.msra.mxu0 %v1259_v14  ;;  %v1290_v41 = vld [vmem:[%s1797_s0 + $0x54] ss:$20 sps:$4 sm:$0xff]   ;;  %v1292_v43 = vld [vmem:[%s1797_s0 + $0x5c] ss:$20 sps:$4 sm:$0xff]   ;;  %v1299_v48 = vld [vmem:[%s1797_s0 + $0x84] ss:$20 sps:$4 sm:$0xff]  }
  0x11   :  { %1144 = vmatpush3.bf16.msra.mxu1 %v1260_v15  ;;  %1081 = vmatprep.subr.bf16.mxu0 %v1261_v16  ;;  %v1309_v46 = vld [vmem:[%s1796_s1 + $0x110] sm:$0xff]   ;;  %v1322_v49 = vld [vmem:[%s1796_s1 + $0x118] sm:$0xff]   ;;  %v1305_v53 = vld [vmem:[%s1797_s0 + $0xac] ss:$20 sps:$4 sm:$0xff]  }
  0x12   :  { %1145 = vmatprep.subr.bf16.mxu1 %v1262_v17  ;;  %v1297_v47 = vld [vmem:[%s1797_s0 + $0x7c] ss:$20 sps:$4 sm:$0xff]   ;;  %v1302_v51 = vld [vmem:[%s1797_s0 + $0x80] ss:$20 sps:$4 sm:$0xff]   ;;  %v1303_v52 = vld [vmem:[%s1797_s0 + $0xa4] ss:$20 sps:$4 sm:$0xff]  }
  0x13   :  { %v1307_v54 = vld [vmem:[%s1797_s0 + $0xa0] ss:$20 sps:$4 sm:$0xff]   ;;  %v1308_v55 = vld [vmem:[%s1797_s0 + $0xa8] ss:$20 sps:$4 sm:$0xff]   ;;  %v1315_v59 = vld [vmem:[%s1797_s0 + $0xd0] ss:$20 sps:$4 sm:$0xff]  }
  0x14   :  { %1082 = vmatpush3.bf16.msra.mxu0 %v1263_v18  ;;  %v1310_v56 = vld [vmem:[%s1797_s0 + $0xcc] ss:$20 sps:$4 sm:$0xff]   ;;  %v1312_v57 = vld [vmem:[%s1797_s0 + $0xd4] ss:$20 sps:$4 sm:$0xff]   ;;  %v1318_v61 = vld [vmem:[%s1797_s0 + $0xfc] ss:$20 sps:$4 sm:$0xff]  }
  0x15   :  { %1146 = vmatpush3.bf16.msra.mxu1 %v1264_v19  ;;  %1083 = vmatprep.subr.bf16.mxu0 %v1265_v20  ;;  %v1314_v58 = vld [vmem:[%s1797_s0 + $0xc8] ss:$20 sps:$4 sm:$0xff]   ;;  %v1320_v62 = vld [vmem:[%s1797_s0 + $0xf0] ss:$20 sps:$4 sm:$0xff]   ;;  %v1321_v63 = vld [vmem:[%s1797_s0 + $0xf8] ss:$20 sps:$4 sm:$0xff]  }
  0x16   :  { %1147 = vmatprep.subr.bf16.mxu1 %v1266_v21  ;;  %v1316_v60 = vld [vmem:[%s1797_s0 + $0xf4] ss:$20 sps:$4 sm:$0xff]   ;;  %v1323_v0 = vld [vmem:[%s1797_s0 + $0x11c] ss:$20 sps:$4 sm:$0xff]   ;;  %v1325_v1 = vld [vmem:[%s1797_s0 + $0x124] ss:$20 sps:$4 sm:$0xff]  }
  0x17   :  { %v1327_v2 = vld [vmem:[%s1797_s0 + $0x118] ss:$20 sps:$4 sm:$0xff]   ;;  %v1328_v3 = vld [vmem:[%s1797_s0 + $0x120] ss:$20 sps:$4 sm:$0xff]   ;;  %v1329_v4 = vld [vmem:[%s1797_s0 + $0x10] ss:$20 sps:$4 sm:$0xff]  }
  0x18   :  { %1084 = vmatpush3.bf16.msra.mxu0 %v1267_v22  ;;  %v1330_v5 = vld [vmem:[%s1797_s0 + $0xb0] ss:$20 sps:$4 sm:$0xff]   ;;  %v1331_v6 = vld [vmem:[%s1797_s0 + $0x38] ss:$20 sps:$4 sm:$0xff]   ;;  %v1333_v8 = vld [vmem:[%s1797_s0 + $0x60] ss:$20 sps:$4 sm:$0xff]  }
  0x19   :  { %1148 = vmatpush3.bf16.msra.mxu1 %v1268_v23  ;;  %1085 = vmatprep.subr.bf16.mxu0 %v1269_v24  ;;  %v1332_v7 = vld [vmem:[%s1797_s0 + $0xd8] ss:$20 sps:$4 sm:$0xff]   ;;  %v1334_v9 = vld [vmem:[%s1797_s0 + $0x100] ss:$20 sps:$4 sm:$0xff]   ;;  %v1335_v10 = vld [vmem:[%s1797_s0 + $0x88] ss:$20 sps:$4 sm:$0xff]  }
  0x1a   :  { %1149 = vmatprep.subr.bf16.mxu1 %v1270_v25  ;;  %v1336_v11 = vld [vmem:[%s1797_s0 + $0x128] ss:$20 sps:$4 sm:$0xff]  }
  0x1c   :  { %1086 = vmatpush3.bf16.msra.mxu0 %v1271_v26 }
  0x1d   :  { %1150 = vmatpush3.bf16.msra.mxu1 %v1272_v27  ;;  %1087 = vmatprep.subr.bf16.mxu0 %v1273_v28 }
  0x1e   :  { %1151 = vmatprep.subr.bf16.mxu1 %v1274_v29 }
  0x20   :  { %1088 = vmatpush3.bf16.msra.mxu0 %v1275_v30 }
  0x21   :  { %1152 = vmatpush3.bf16.msra.mxu1 %v1276_v31  ;;  %1213 = vmatprep.subr.bf16.mxu0 %v1283_v36 }
  0x22   :  { %1237 = vmatprep.subr.bf16.mxu1 %v1283_v36 }
  0x23   :  { %615 = vmatmul.mubr.bf16.vlgmr.msra.gmra.mrb[0].mxu0 %v1277_v32 }
  0x24   :  { %712 = vmatmul.mubr.bf16.vlgmr.msra.gmra.mrb[0].mxu1 %v1280_v34  ;;  %1214 = vmatpush3.bf16.msra.mxu0 %v1283_v36 }
  0x25   :  { %1241 = vmatpush3.bf16.msra.mxu1 %v1283_v36  ;;  %622 = vmatprep.mubr.bf16.mxu0 %v1284_v37 }
  0x26   :  { %719 = vmatprep.mubr.bf16.mxu1 %v1286_v38  ;;  %1215 = vmatprep.subr.bf16.mxu0 %v1296_v42 }
  0x27   :  { %1238 = vmatprep.subr.bf16.mxu1 %v1296_v42 }
  0x28   :  { %1216 = vmatpush3.bf16.msra.mxu0 %v1296_v42 }
  0x29   :  { %1242 = vmatpush3.bf16.msra.mxu1 %v1296_v42  ;;  %1217 = vmatprep.subr.bf16.mxu0 %v1309_v46 }
  0x2a   :  { %1239 = vmatprep.subr.bf16.mxu1 %v1309_v46 }
  0x2b   :  { %623 = vmatmul.mubr.bf16.gmra.mrb[4].mxu0 %v1288_v39 }
  0x2c   :  { %720 = vmatmul.mubr.bf16.gmra.mrb[4].mxu1 %v1289_v40  ;;  %630 = vmatprep.mubr.bf16.mxu0 %v1290_v41 }
  0x2d   :  { %727 = vmatprep.mubr.bf16.mxu1 %v1292_v43  ;;  %1218 = vmatpush3.bf16.msra.mxu0 %v1309_v46 }
  0x2e   :  { %1243 = vmatpush3.bf16.msra.mxu1 %v1309_v46  ;;  %1219 = vmatprep.subr.bf16.mxu0 %v1322_v49 }
  0x2f   :  { %1240 = vmatprep.subr.bf16.mxu1 %v1322_v49 }
  0x31   :  { %1220 = vmatpush3.bf16.msra.mxu0 %v1322_v49 }
  0x32   :  { %1244 = vmatpush3.bf16.msra.mxu1 %v1322_v49 }
  0x33   :  { %631 = vmatmul.mubr.bf16.gmra.mrb[8].mxu0 %v1294_v44 }
  0x34   :  { %728 = vmatmul.mubr.bf16.gmra.mrb[8].mxu1 %v1295_v45  ;;  %638 = vmatprep.mubr.bf16.mxu0 %v1297_v47 }
  0x35   :  { %735 = vmatprep.mubr.bf16.mxu1 %v1299_v48 }
  0x3b   :  { %639 = vmatmul.mubr.bf16.gmra.mrb[12].mxu0 %v1301_v50 }
  0x3c   :  { %736 = vmatmul.mubr.bf16.gmra.mrb[12].mxu1 %v1302_v51  ;;  %646 = vmatprep.mubr.bf16.mxu0 %v1303_v52 }
  0x3d   :  { %743 = vmatprep.mubr.bf16.mxu1 %v1305_v53 }
  0x43   :  { %647 = vmatmul.mubr.bf16.gmra.mrb[16].mxu0 %v1307_v54 }
  0x44   :  { %744 = vmatmul.mubr.bf16.gmra.mrb[16].mxu1 %v1308_v55  ;;  %654 = vmatprep.mubr.bf16.mxu0 %v1310_v56 }
  0x45   :  { %751 = vmatprep.mubr.bf16.mxu1 %v1312_v57 }
  0x4b   :  { %655 = vmatmul.mubr.bf16.gmra.mrb[20].mxu0 %v1314_v58 }
  0x4c   :  { %752 = vmatmul.mubr.bf16.gmra.mrb[20].mxu1 %v1315_v59  ;;  %662 = vmatprep.mubr.bf16.mxu0 %v1316_v60 }
  0x4d   :  { %759 = vmatprep.mubr.bf16.mxu1 %v1318_v61 }
  0x53   :  { %663 = vmatmul.mubr.bf16.gmra.mrb[24].mxu0 %v1320_v62 }
  0x54   :  { %760 = vmatmul.mubr.bf16.gmra.mrb[24].mxu1 %v1321_v63  ;;  %670 = vmatprep.mubr.bf16.mxu0 %v1323_v0 }
  0x55   :  { %767 = vmatprep.mubr.bf16.mxu1 %v1325_v1 }
  0x5b   :  { %671 = vmatmul.mubr.bf16.gmra.mrb[28].mxu0 %v1327_v2 }
  0x5c   :  { %768 = vmatmul.mubr.bf16.gmra.mrb[28].mxu1 %v1328_v3  ;;  %1221 = vmatprep.mubr.msk.bf16.mxu0 %vm557_vm0, %v1329_v4 }
  0x5d   :  { %1229 = vmatprep.mubr.msk.bf16.mxu1 %vm557_vm0, %v1330_v5 }
  0x63   :  { %1222 = vmatmul.mubr.msk.bf16.vlgmr.msra.gmra.mrb[32].mxu0 %vm557_vm0, %v1331_v6 }
  0x64   :  { %1230 = vmatmul.mubr.msk.bf16.vlgmr.msra.gmra.mrb[32].mxu1 %vm557_vm0, %v1332_v7  ;;  %1225 = vmatprep.mubr.msk.bf16.mxu0 %vm557_vm0, %v1333_v8 }
  0x65   :  { %1233 = vmatprep.mubr.msk.bf16.mxu1 %vm557_vm0, %v1334_v9 }
  0x6b   :  { %1226 = vmatmul.mubr.msk.bf16.gmra.mrb[36].mxu0 %vm557_vm0, %v1335_v10 }
  0x6c   :  { %1234 = vmatmul.mubr.msk.bf16.gmra.mrb[36].mxu1 %vm557_vm0, %v1336_v11 }
  0xf6   :  { %v1089_v12 = vpop.f32.mrb[0].mxu0 }
  0xf7   :  { %v1153_v13 = vpop.f32.mrb[0].mxu1  ;;  %v1090_v14 = vpop.f32.mrb[1].mxu0 }
  0xf8   :  { %v1091_v15 = vadd.f32 %v1090_v14, %v1089_v12  ;;  %v1154_v16 = vpop.f32.mrb[1].mxu1  ;;  %v1092_v17 = vpop.f32.mrb[2].mxu0 }
  0xf9   :  { %v1155_v18 = vadd.f32 %v1154_v16, %v1153_v13  ;;  %v1156_v19 = vpop.f32.mrb[2].mxu1  ;;  %v1093_v20 = vpop.f32.mrb[3].mxu0 }
  0xfa   :  { %v1094_v21 = vadd.f32 %v1093_v20, %v1092_v17  ;;  %v1157_v22 = vpop.f32.mrb[3].mxu1 }
  0xfb   :  { %v1158_v23 = vadd.f32 %v1157_v22, %v1156_v19  ;;  %v1603_v24 = vadd.f32 %v1155_v18, %v1091_v15 }
  0xfd   :  { %v1605_v25 = vadd.f32 %v1158_v23, %v1094_v21 }
  0xfe   :  { %v1095_v26 = vpop.f32.mrb[4].mxu0 }
  0xff   :  { %v1159_v27 = vpop.f32.mrb[4].mxu1  ;;  %v1096_v28 = vpop.f32.mrb[5].mxu0 }
 0x100   :  { %v1097_v29 = vadd.f32 %v1096_v28, %v1095_v26  ;;  %v1160_v30 = vpop.f32.mrb[5].mxu1  ;;  %v1098_v31 = vpop.f32.mrb[6].mxu0 }
 0x101   :  { %v1161_v32 = vadd.f32 %v1160_v30, %v1159_v27  ;;  %v1162_v33 = vpop.f32.mrb[6].mxu1  ;;  %v1099_v34 = vpop.f32.mrb[7].mxu0 }
 0x102   :  { %v1100_v35 = vadd.f32 %v1099_v34, %v1098_v31  ;;  %v1163_v36 = vpop.f32.mrb[7].mxu1 }
 0x103   :  { %v1164_v37 = vadd.f32 %v1163_v36, %v1162_v33  ;;  %v1607_v38 = vadd.f32 %v1161_v32, %v1097_v29 }
 0x105   :  { %v1609_v39 = vadd.f32 %v1164_v37, %v1100_v35 }
 0x106   :  { %v1101_v40 = vpop.f32.mrb[8].mxu0 }
 0x107   :  { %v1165_v41 = vpop.f32.mrb[8].mxu1  ;;  %v1102_v42 = vpop.f32.mrb[9].mxu0 }
 0x108   :  { %v1103_v43 = vadd.f32 %v1102_v42, %v1101_v40  ;;  %v1166_v44 = vpop.f32.mrb[9].mxu1  ;;  %v1104_v45 = vpop.f32.mrb[10].mxu0 }
 0x109   :  { %v1167_v46 = vadd.f32 %v1166_v44, %v1165_v41  ;;  %v1168_v47 = vpop.f32.mrb[10].mxu1  ;;  %v1105_v48 = vpop.f32.mrb[11].mxu0 }
 0x10a   :  { %v1106_v49 = vadd.f32 %v1105_v48, %v1104_v45  ;;  %v1169_v50 = vpop.f32.mrb[11].mxu1 }
 0x10b   :  { %v1170_v51 = vadd.f32 %v1169_v50, %v1168_v47  ;;  %v1611_v52 = vadd.f32 %v1167_v46, %v1103_v43 }
 0x10d   :  { %v1613_v53 = vadd.f32 %v1170_v51, %v1106_v49 }
 0x10e   :  { %v1107_v54 = vpop.f32.mrb[12].mxu0 }
 0x10f   :  { %v1171_v55 = vpop.f32.mrb[12].mxu1  ;;  %v1108_v56 = vpop.f32.mrb[13].mxu0 }
 0x110   :  { %v1109_v57 = vadd.f32 %v1108_v56, %v1107_v54  ;;  %v1172_v58 = vpop.f32.mrb[13].mxu1  ;;  %v1110_v59 = vpop.f32.mrb[14].mxu0 }
 0x111   :  { %v1173_v60 = vadd.f32 %v1172_v58, %v1171_v55  ;;  %v1174_v61 = vpop.f32.mrb[14].mxu1  ;;  %v1111_v62 = vpop.f32.mrb[15].mxu0 }
 0x112   :  { %v1112_v63 = vadd.f32 %v1111_v62, %v1110_v59  ;;  %v1175_v0 = vpop.f32.mrb[15].mxu1 }
 0x113   :  { %v1176_v1 = vadd.f32 %v1175_v0, %v1174_v61  ;;  %v1615_v2 = vadd.f32 %v1173_v60, %v1109_v57 }
 0x115   :  { %v1617_v3 = vadd.f32 %v1176_v1, %v1112_v63 }
 0x116   :  { %v1113_v4 = vpop.f32.mrb[16].mxu0 }
 0x117   :  { %v1177_v5 = vpop.f32.mrb[16].mxu1  ;;  %v1114_v6 = vpop.f32.mrb[17].mxu0 }
 0x118   :  { %v1115_v7 = vadd.f32 %v1114_v6, %v1113_v4  ;;  %v1178_v8 = vpop.f32.mrb[17].mxu1  ;;  %v1116_v9 = vpop.f32.mrb[18].mxu0 }
 0x119   :  { %v1179_v10 = vadd.f32 %v1178_v8, %v1177_v5  ;;  %v1180_v11 = vpop.f32.mrb[18].mxu1  ;;  %v1117_v12 = vpop.f32.mrb[19].mxu0  ;;  %v1632_v5 = vld [vmem:[%s1798_s2] ss:$0 sm:$0xff] }
 0x11a   :  { %v1118_v13 = vadd.f32 %v1117_v12, %v1116_v9  ;;  %v1181_v14 = vpop.f32.mrb[19].mxu1  ;;  %v1638_v9 = vld [vmem:[%s1799_s3] ss:$0 sm:$0xff] }
 0x11b   :  { %v1182_v15 = vadd.f32 %v1181_v14, %v1180_v11  ;;  %v746_v16 = vadd.f32 %v1179_v10, %v1115_v7 }
 0x11d   :  { %v1619_v17 = vadd.f32 %v1182_v15, %v1118_v13 }
 0x11e   :  { %v1119_v18 = vpop.f32.mrb[20].mxu0 }
 0x11f   :  { %v1183_v19 = vpop.f32.mrb[20].mxu1  ;;  %v1120_v20 = vpop.f32.mrb[21].mxu0 }
 0x120   :  { %v1121_v21 = vadd.f32 %v1120_v20, %v1119_v18  ;;  %v1184_v22 = vpop.f32.mrb[21].mxu1  ;;  %v1122_v23 = vpop.f32.mrb[22].mxu0 }
 0x121   :  { %v1185_v26 = vadd.f32 %v1184_v22, %v1183_v19  ;;  %v1186_v27 = vpop.f32.mrb[22].mxu1  ;;  %v1123_v28 = vpop.f32.mrb[23].mxu0 }
 0x122   :  { %v1124_v29 = vadd.f32 %v1123_v28, %v1122_v23  ;;  %v1187_v30 = vpop.f32.mrb[23].mxu1 }
 0x123   :  { %v1188_v31 = vadd.f32 %v1187_v30, %v1186_v27  ;;  %v754_v32 = vadd.f32 %v1185_v26, %v1121_v21 }
 0x125   :  { %v757_v33 = vadd.f32 %v1188_v31, %v1124_v29 }
 0x126   :  { %v1125_v34 = vpop.f32.mrb[24].mxu0 }
 0x127   :  { %v1189_v35 = vpop.f32.mrb[24].mxu1  ;;  %v1126_v36 = vpop.f32.mrb[25].mxu0 }
 0x128   :  { %v1127_v37 = vadd.f32 %v1126_v36, %v1125_v34  ;;  %v1190_v40 = vpop.f32.mrb[25].mxu1  ;;  %v1128_v41 = vpop.f32.mrb[26].mxu0 }
 0x129   :  { %v1191_v42 = vadd.f32 %v1190_v40, %v1189_v35  ;;  %v1192_v43 = vpop.f32.mrb[26].mxu1  ;;  %v1129_v44 = vpop.f32.mrb[27].mxu0  ;;  %v930_v40 = vld [vmem:[%s1800_s4 + $0x58] sm:$0xff] }
 0x12a   :  { %v1130_v45 = vadd.f32 %v1129_v44, %v1128_v41  ;;  %v1193_v46 = vpop.f32.mrb[27].mxu1  ;;  %v920_v41 = vld [vmem:[%s1800_s4 + $0x8] sm:$0xff] }
 0x12b   :  { %v1194_v47 = vadd.f32 %v1193_v46, %v1192_v43  ;;  %v1621_v48 = vadd.f32 %v1191_v42, %v1127_v37 }
 0x12d   :  { %v1623_v49 = vadd.f32 %v1194_v47, %v1130_v45  ;;  %v928_v47 = vld [vmem:[%s1800_s4 + $0x48] sm:$0xff] }
 0x12e   :  { %v1131_v50 = vpop.f32.mrb[28].mxu0 }
 0x12f   :  { %v1195_v51 = vpop.f32.mrb[28].mxu1  ;;  %v1132_v54 = vpop.f32.mrb[29].mxu0 }
 0x130   :  { %v1133_v55 = vadd.f32 %v1132_v54, %v1131_v50  ;;  %v1196_v56 = vpop.f32.mrb[29].mxu1  ;;  %v1134_v57 = vpop.f32.mrb[30].mxu0 }
 0x131   :  { %v1197_v58 = vadd.f32 %v1196_v56, %v1195_v51  ;;  %v1198_v59 = vpop.f32.mrb[30].mxu1  ;;  %v1135_v60 = vpop.f32.mrb[31].mxu0 }
 0x132   :  { %v1136_v61 = vadd.f32 %v1135_v60, %v1134_v57  ;;  %v1199_v62 = vpop.f32.mrb[31].mxu1 }
 0x133   :  { %v1200_v63 = vadd.f32 %v1199_v62, %v1198_v59  ;;  %v1625_v0 = vadd.f32 %v1197_v58, %v1133_v55 }
 0x135   :  { %v1627_v1 = vadd.f32 %v1200_v63, %v1136_v61 }
 0x136   :  { %v1223_v4 = vpop.f32.mrb[32].mxu0 }
 0x137   :  { %v819_v6 = vadd.f32 %v1223_v4, %v1607_v38  ;;  %v1231_v7 = vpop.f32.mrb[32].mxu1  ;;  %v810_v8 = vpop.f32.mrb[33].mxu0  ;;  %v921_v38 = vld [vmem:[%s1800_s4 + $0x10] sm:$0xff] }
 0x138   :  { %v851_v10 = vadd.f32 %v1231_v7, %v754_v32  ;;  %v811_v11 = vadd.f32 %v810_v8, %v1603_v24  ;;  %v842_v12 = vpop.f32.mrb[33].mxu1  ;;  %v1224_v13 = vpop.f32.mrb[34].mxu0  ;;  %v927_v32 = vld [vmem:[%s1800_s4 + $0x40] sm:$0xff] }
 0x139   :  { %v882_v14 = vmul.f32 %v1632_v5, %v819_v6  ;;  %v843_v15 = vadd.f32 %v842_v12, %v746_v16  ;;  %v822_v18 = vadd.f32 %v1224_v13, %v1609_v39  ;;  %v1232_v19 = vpop.f32.mrb[34].mxu1  ;;  %v813_v20 = vpop.f32.mrb[35].mxu0  ;;  %v929_v39 = vld [vmem:[%s1800_s4 + $0x50] sm:$0xff]  ;;  %v919_v16 = vld [vmem:[%s1800_s4] sm:$0xff] }
 0x13a   :  { %v890_v21 = vmul.f32 %v1632_v5, %v851_v10  ;;  %v880_v22 = vmul.f32 %v1632_v5, %v811_v11  ;;  %v854_v23 = vadd.f32 %v1232_v19, %v757_v33  ;;  %v814_v24 = vadd.f32 %v813_v20, %v1605_v25  ;;  %v845_v26 = vpop.f32.mrb[35].mxu1  ;;  %v922_v33 = vld [vmem:[%s1800_s4 + $0x18] sm:$0xff] }
 0x13b   :  { %v905_v27 = vadd.f32 %v1638_v9, %v882_v14  ;;  %v888_v28 = vmul.f32 %v1632_v5, %v843_v15  ;;  %v883_v29 = vmul.f32 %v1632_v5, %v822_v18  ;;  %v846_v30 = vadd.f32 %v845_v26, %v1619_v17  ;;  %v923_v26 = vld [vmem:[%s1800_s4 + $0x20] sm:$0xff] }
 0x13c   :  { %v913_v31 = vadd.f32 %v1638_v9, %v890_v21  ;;  %v903_v25 = vadd.f32 %v1638_v9, %v880_v22  ;;  %v891_v34 = vmul.f32 %v1632_v5, %v854_v23  ;;  %v881_v35 = vmul.f32 %v1632_v5, %v814_v24  ;;  %v933_v24 = vld [vmem:[%s1800_s4 + $0x70] sm:$0xff] }
 0x13d   :  { %v937_v36 = vadd.f32 %v921_v38, %v905_v27  ;;  %v911_v37 = vadd.f32 %v1638_v9, %v888_v28  ;;  %v906_v17 = vadd.f32 %v1638_v9, %v883_v29  ;;  %v889_v42 = vmul.f32 %v1632_v5, %v846_v30  ;;  %v931_v28 = vld [vmem:[%s1800_s4 + $0x60] sm:$0xff]  ;;  %v926_v29 = vld [vmem:[%s1800_s4 + $0x38] sm:$0xff] }
 0x13e   :  { %v945_v43 = vadd.f32 %v929_v39, %v913_v31  ;;  %v935_v44 = vadd.f32 %v919_v16, %v903_v25  ;;  %v914_v45 = vadd.f32 %v1638_v9, %v891_v34  ;;  %v904_v46 = vadd.f32 %v1638_v9, %v881_v35  ;;  %v1227_v50 = vpop.f32.mrb[36].mxu0  ;;  %v924_v34 = vld [vmem:[%s1800_s4 + $0x28] sm:$0xff] }
 0x13f   :  { %v953_v51 = vmax.f32 %v937_v36, 0.0  ;;  %v943_v54 = vadd.f32 %v927_v32, %v911_v37  ;;  %v938_v55 = vadd.f32 %v922_v33, %v906_v17  ;;  %v912_v56 = vadd.f32 %v1638_v9, %v889_v42  ;;  %v1235_v57 = vpop.f32.mrb[36].mxu1  ;;  %v826_v58 = vpop.f32.mrb[37].mxu0  ;;  %v934_v33 = vld [vmem:[%s1800_s4 + $0x78] sm:$0xff] }
 0x140   :  { %v961_v59 = vmax.f32 %v945_v43, 0.0  ;;  %v951_v60 = vmax.f32 %v935_v44, 0.0  ;;  %v946_v61 = vadd.f32 %v930_v40, %v914_v45  ;;  %v936_v62 = vadd.f32 %v920_v41, %v904_v46  ;;  %v858_v63 = vpop.f32.mrb[37].mxu1  ;;  %v1228_v4 = vpop.f32.mrb[38].mxu0  ;;  %v932_v41 = vld [vmem:[%s1800_s4 + $0x68] sm:$0xff] }
 0x141   :  { %969 = vst.msk [vmem:[%s1801_s5 + $0x10] sm:$0xff] %vm557_vm0, %v953_v51  ;;  %v959_v6 = vmax.f32 %v943_v54, 0.0  ;;  %v954_v7 = vmax.f32 %v938_v55, 0.0  ;;  %v944_v8 = vadd.f32 %v928_v47, %v912_v56  ;;  %v835_v10 = vadd.f32 %v1227_v50, %v1615_v2  ;;  %v1236_v11 = vpop.f32.mrb[38].mxu1  ;;  %v829_v12 = vpop.f32.mrb[39].mxu0 }
 0x142   :  { %977 = vst.msk [vmem:[%s1801_s5 + $0x50] sm:$0xff] %vm557_vm0, %v961_v59  ;;  %967 = vst.msk [vmem:[%s1801_s5] sm:$0xff] %vm557_vm0, %v951_v60  ;;  %v962_v13 = vmax.f32 %v946_v61, 0.0  ;;  %v952_v14 = vmax.f32 %v936_v62, 0.0  ;;  %v867_v15 = vadd.f32 %v1235_v57, %v1625_v0  ;;  %v827_v18 = vadd.f32 %v826_v58, %v1611_v52  ;;  %v861_v19 = vpop.f32.mrb[39].mxu1  ;;  %v925_v52 = vld [vmem:[%s1800_s4 + $0x30] sm:$0xff] }
 0x143   :  { %975 = vst.msk [vmem:[%s1801_s5 + $0x40] sm:$0xff] %vm557_vm0, %v959_v6  ;;  %970 = vst.msk [vmem:[%s1801_s5 + $0x18] sm:$0xff] %vm557_vm0, %v954_v7  ;;  %v960_v2 = vmax.f32 %v944_v8, 0.0  ;;  %v886_v20 = vmul.f32 %v1632_v5, %v835_v10  ;;  %v859_v38 = vadd.f32 %v858_v63, %v1621_v48  ;;  %v838_v0 = vadd.f32 %v1228_v4, %v1617_v3 }
 0x144   :  { %978 = vst.msk [vmem:[%s1801_s5 + $0x58] sm:$0xff] %vm557_vm0, %v962_v13  ;;  %968 = vst.msk [vmem:[%s1801_s5 + $0x8] sm:$0xff] %vm557_vm0, %v952_v14  ;;  %v894_v21 = vmul.f32 %v1632_v5, %v867_v15  ;;  %v884_v48 = vmul.f32 %v1632_v5, %v827_v18  ;;  %v870_v3 = vadd.f32 %v1236_v11, %v1627_v1 }
 0x145   :  { %v830_v22 = vadd.f32 %v829_v12, %v1613_v53  ;;  %976 = vst.msk [vmem:[%s1801_s5 + $0x48] sm:$0xff] %vm557_vm0, %v960_v2  ;;  %v909_v23 = vadd.f32 %v1638_v9, %v886_v20  ;;  %v892_v27 = vmul.f32 %v1632_v5, %v859_v38  ;;  %v887_v1 = vmul.f32 %v1632_v5, %v838_v0 }
 0x146   :  { %v862_v53 = vadd.f32 %v861_v19, %v1623_v49  ;;  %v917_v39 = vadd.f32 %v1638_v9, %v894_v21  ;;  %v907_v16 = vadd.f32 %v1638_v9, %v884_v48  ;;  %v895_v30 = vmul.f32 %v1632_v5, %v870_v3 }
 0x147   :  { %v885_v31 = vmul.f32 %v1632_v5, %v830_v22  ;;  %v941_v25 = vadd.f32 %v925_v52, %v909_v23  ;;  %v915_v32 = vadd.f32 %v1638_v9, %v892_v27  ;;  %v910_v49 = vadd.f32 %v1638_v9, %v887_v1 }
 0x148   :  { %v893_v35 = vmul.f32 %v1632_v5, %v862_v53  ;;  %v949_v36 = vadd.f32 %v933_v24, %v917_v39  ;;  %v939_v37 = vadd.f32 %v923_v26, %v907_v16  ;;  %v918_v17 = vadd.f32 %v1638_v9, %v895_v30 }
 0x149   :  { %v908_v40 = vadd.f32 %v1638_v9, %v885_v31  ;;  %v957_v42 = vmax.f32 %v941_v25, 0.0  ;;  %v947_v43 = vadd.f32 %v931_v28, %v915_v32  ;;  %v942_v44 = vadd.f32 %v926_v29, %v910_v49 }
 0x14a   :  { %v916_v45 = vadd.f32 %v1638_v9, %v893_v35  ;;  %v965_v46 = vmax.f32 %v949_v36, 0.0  ;;  %v955_v47 = vmax.f32 %v939_v37, 0.0  ;;  %v950_v50 = vadd.f32 %v934_v33, %v918_v17 }
 0x14b   :  { %v940_v51 = vadd.f32 %v924_v34, %v908_v40  ;;  %973 = vst.msk [vmem:[%s1801_s5 + $0x30] sm:$0xff] %vm557_vm0, %v957_v42  ;;  %v963_v5 = vmax.f32 %v947_v43, 0.0  ;;  %v958_v54 = vmax.f32 %v942_v44, 0.0 }
 0x14c   :  { %v948_v55 = vadd.f32 %v932_v41, %v916_v45  ;;  %981 = vst.msk [vmem:[%s1801_s5 + $0x70] sm:$0xff] %vm557_vm0, %v965_v46  ;;  %971 = vst.msk [vmem:[%s1801_s5 + $0x20] sm:$0xff] %vm557_vm0, %v955_v47  ;;  %v966_v9 = vmax.f32 %v950_v50, 0.0 }
 0x14d   :  { %v956_v56 = vmax.f32 %v940_v51, 0.0  ;;  %979 = vst.msk [vmem:[%s1801_s5 + $0x60] sm:$0xff] %vm557_vm0, %v963_v5  ;;  %974 = vst.msk [vmem:[%s1801_s5 + $0x38] sm:$0xff] %vm557_vm0, %v958_v54 }
 0x14e   :  { %v964_v57 = vmax.f32 %v948_v55, 0.0  ;;  %982 = vst.msk [vmem:[%s1801_s5 + $0x78] sm:$0xff] %vm557_vm0, %v966_v9 }
 0x14f   :  { %972 = vst.msk [vmem:[%s1801_s5 + $0x28] sm:$0xff] %vm557_vm0, %v956_v56 }
 0x150   :  { %980 = vst.msk [vmem:[%s1801_s5 + $0x68] sm:$0xff] %vm557_vm0, %v964_v57 }

// kernel: featurizer_forward.28
= control target key start
LH: loop header
LB: loop body
LE: loop exit
PB: predicated region body
PF: predicated region fallthrough
CT: control target
= control target key end

     0   :  { %vm368_vm0 = vcmask 523264   ;;  %s911_s1 = inlined_call_operand.vmem [shape: bf16[576,128], index: 1, kind: input, shape index: {}]   ;;  %s912_s0 = inlined_call_operand.vmem [shape: bf16[32,576], index: 0, kind: input, shape index: {}]   ;;  %s913_s2 = inlined_call_operand.vmem [shape: f32[1,128], index: 2, kind: input, shape index: {}]   ;;  %s914_s3 = inlined_call_operand.vmem [shape: f32[1,128], index: 3, kind: input, shape index: {}]   ;;  %s915_s4 = inlined_call_operand.vmem [shape: f32[32,128], index: 4, kind: output, shape index: {}]  }
   0x1   :  { %v680_v0 = vld [vmem:[%s911_s1 + $0x40] sm:$0xff]   ;;  %v684_v4 = vld [vmem:[%s911_s1 + $0x48] sm:$0xff]   ;;  %v688_v8 = vld [vmem:[%s911_s1 + $0x50] sm:$0xff]  }
   0x2   :  { %v681_v1 = vld [vmem:[%s911_s1 + $0xc0] sm:$0xff]   ;;  %606 = vmatprep.subr.bf16.mxu0 %v680_v0  ;;  %v685_v5 = vld [vmem:[%s911_s1 + $0xc8] sm:$0xff]   ;;  %v689_v9 = vld [vmem:[%s911_s1 + $0xd0] sm:$0xff]  }
   0x3   :  { %v682_v2 = vld [vmem:[%s911_s1] sm:$0xff]   ;;  %634 = vmatprep.subr.bf16.mxu1 %v681_v1  ;;  %v686_v6 = vld [vmem:[%s911_s1 + $0x8] sm:$0xff]   ;;  %v690_v10 = vld [vmem:[%s911_s1 + $0x10] sm:$0xff]  }
   0x4   :  { %v683_v3 = vld [vmem:[%s911_s1 + $0x80] sm:$0xff]   ;;  %607 = vmatpush3.bf16.msra.mxu0 %v682_v2  ;;  %v687_v7 = vld [vmem:[%s911_s1 + $0x88] sm:$0xff]   ;;  %v691_v11 = vld [vmem:[%s911_s1 + $0x90] sm:$0xff]  }
   0x5   :  { %635 = vmatpush3.bf16.msra.mxu1 %v683_v3  ;;  %608 = vmatprep.subr.bf16.mxu0 %v684_v4  ;;  %v692_v12 = vld [vmem:[%s911_s1 + $0x58] sm:$0xff]   ;;  %v696_v16 = vld [vmem:[%s911_s1 + $0x60] sm:$0xff]   ;;  %v700_v20 = vld [vmem:[%s911_s1 + $0x68] sm:$0xff]  }
   0x6   :  { %636 = vmatprep.subr.bf16.mxu1 %v685_v5  ;;  %v693_v13 = vld [vmem:[%s911_s1 + $0xd8] sm:$0xff]   ;;  %v697_v17 = vld [vmem:[%s911_s1 + $0xe0] sm:$0xff]   ;;  %v701_v21 = vld [vmem:[%s911_s1 + $0xe8] sm:$0xff]  }
   0x7   :  { %v694_v14 = vld [vmem:[%s911_s1 + $0x18] sm:$0xff]   ;;  %v698_v18 = vld [vmem:[%s911_s1 + $0x20] sm:$0xff]   ;;  %v702_v22 = vld [vmem:[%s911_s1 + $0x28] sm:$0xff]  }
   0x8   :  { %609 = vmatpush3.bf16.msra.mxu0 %v686_v6  ;;  %v695_v15 = vld [vmem:[%s911_s1 + $0x98] sm:$0xff]   ;;  %v699_v19 = vld [vmem:[%s911_s1 + $0xa0] sm:$0xff]   ;;  %v703_v23 = vld [vmem:[%s911_s1 + $0xa8] sm:$0xff]  }
   0x9   :  { %637 = vmatpush3.bf16.msra.mxu1 %v687_v7  ;;  %610 = vmatprep.subr.bf16.mxu0 %v688_v8  ;;  %v704_v24 = vld [vmem:[%s911_s1 + $0x70] sm:$0xff]   ;;  %v708_v28 = vld [vmem:[%s911_s1 + $0x78] sm:$0xff]   ;;  %v717_v35 = vld [vmem:[%s912_s0 + $0xc] ss:$20 sps:$4 sm:$0xff]  }
   0xa   :  { %638 = vmatprep.subr.bf16.mxu1 %v689_v9  ;;  %v705_v25 = vld [vmem:[%s911_s1 + $0xf0] sm:$0xff]   ;;  %v709_v29 = vld [vmem:[%s911_s1 + $0xf8] sm:$0xff]   ;;  %v718_v36 = vld [vmem:[%s911_s1 + $0x100] sm:$0xff]   ;;  %456 = vmatprep.mubr.bf16.mxu1 %v717_v35 }
   0xb   :  { %v706_v26 = vld [vmem:[%s911_s1 + $0x30] sm:$0xff]   ;;  %v710_v30 = vld [vmem:[%s911_s1 + $0x38] sm:$0xff]   ;;  %v719_v37 = vld [vmem:[%s911_s1 + $0x108] sm:$0xff]  }
   0xc   :  { %611 = vmatpush3.bf16.msra.mxu0 %v690_v10  ;;  %v707_v27 = vld [vmem:[%s911_s1 + $0xb0] sm:$0xff]   ;;  %v711_v31 = vld [vmem:[%s911_s1 + $0xb8] sm:$0xff]   ;;  %v720_v38 = vld [vmem:[%s912_s0 + $0x2c] ss:$20 sps:$4 sm:$0xff]  }
   0xd   :  { %639 = vmatpush3.bf16.msra.mxu1 %v691_v11  ;;  %612 = vmatprep.subr.bf16.mxu0 %v692_v12  ;;  %v712_v32 = vld [vmem:[%s912_s0] ss:$20 sps:$4 sm:$0xff]   ;;  %v714_v33 = vld [vmem:[%s912_s0 + $0x4] ss:$20 sps:$4 sm:$0xff]   ;;  %v715_v34 = vld [vmem:[%s912_s0 + $0x8] ss:$20 sps:$4 sm:$0xff]  }
   0xe   :  { %640 = vmatprep.subr.bf16.mxu1 %v693_v13  ;;  %407 = vmatprep.mubr.bf16.mxu0 %v714_v33  ;;  %v722_v39 = vld [vmem:[%s912_s0 + $0x34] ss:$20 sps:$4 sm:$0xff]   ;;  %v725_v42 = vld [vmem:[%s912_s0 + $0x30] ss:$20 sps:$4 sm:$0xff]   ;;  %v727_v44 = vld [vmem:[%s911_s1 + $0x118] sm:$0xff]  }
   0xf   :  { %v724_v40 = vld [vmem:[%s912_s0 + $0x28] ss:$20 sps:$4 sm:$0xff]   ;;  %v726_v41 = vld [vmem:[%s911_s1 + $0x110] sm:$0xff]   ;;  %v729_v45 = vld [vmem:[%s912_s0 + $0x38] ss:$20 sps:$4 sm:$0xff]  }
  0x10   :  { %613 = vmatpush3.bf16.msra.mxu0 %v694_v14  ;;  %v728_v43 = vld [vmem:[%s912_s0 + $0x10] ss:$20 sps:$4 sm:$0xff]   ;;  %v604_v11 = vld [vmem:[%s913_s2] ss:$0 sm:$0xff] }
  0x11   :  { %641 = vmatpush3.bf16.msra.mxu1 %v695_v15  ;;  %614 = vmatprep.subr.bf16.mxu0 %v696_v16  ;;  %v605_v14 = vld [vmem:[%s914_s3] ss:$0 sm:$0xff] }
  0x12   :  { %642 = vmatprep.subr.bf16.mxu1 %v697_v17 }
  0x14   :  { %615 = vmatpush3.bf16.msra.mxu0 %v698_v18 }
  0x15   :  { %643 = vmatpush3.bf16.msra.mxu1 %v699_v19  ;;  %616 = vmatprep.subr.bf16.mxu0 %v700_v20 }
  0x16   :  { %644 = vmatprep.subr.bf16.mxu1 %v701_v21 }
  0x18   :  { %617 = vmatpush3.bf16.msra.mxu0 %v702_v22 }
  0x19   :  { %645 = vmatpush3.bf16.msra.mxu1 %v703_v23  ;;  %618 = vmatprep.subr.bf16.mxu0 %v704_v24 }
  0x1a   :  { %646 = vmatprep.subr.bf16.mxu1 %v705_v25 }
  0x1c   :  { %619 = vmatpush3.bf16.msra.mxu0 %v706_v26 }
  0x1d   :  { %647 = vmatpush3.bf16.msra.mxu1 %v707_v27  ;;  %620 = vmatprep.subr.bf16.mxu0 %v708_v28 }
  0x1e   :  { %648 = vmatprep.subr.bf16.mxu1 %v709_v29 }
  0x20   :  { %621 = vmatpush3.bf16.msra.mxu0 %v710_v30 }
  0x21   :  { %649 = vmatpush3.bf16.msra.mxu1 %v711_v31  ;;  %668 = vmatprep.subr.bf16.mxu0 %v718_v36 }
  0x23   :  { %408 = vmatmul.mubr.bf16.vlgmr.msra.gmra.mrb[0].mxu0 %v712_v32 }
  0x24   :  { %457 = vmatmul.mubr.bf16.vlgmr.msra.gmra.mrb[0].mxu1 %v715_v34  ;;  %669 = vmatpush3.bf16.msra.mxu0 %v718_v36 }
  0x25   :  { %670 = vmatprep.subr.bf16.mxu0 %v719_v37  ;;  %415 = vmatprep.mubr.bf16.mxu0 %v720_v38 }
  0x26   :  { %464 = vmatprep.mubr.bf16.mxu1 %v722_v39 }
  0x28   :  { %671 = vmatpush3.bf16.msra.mxu0 %v719_v37 }
  0x29   :  { %672 = vmatprep.subr.bf16.mxu0 %v726_v41 }
  0x2b   :  { %416 = vmatmul.mubr.bf16.gmra.mrb[4].mxu0 %v724_v40 }
  0x2c   :  { %465 = vmatmul.mubr.bf16.gmra.mrb[4].mxu1 %v725_v42  ;;  %676 = vmatprep.mubr.msk.bf16.mxu0 %vm368_vm0, %v728_v43 }
  0x2d   :  { %673 = vmatpush3.bf16.msra.mxu0 %v726_v41 }
  0x2e   :  { %674 = vmatprep.subr.bf16.mxu0 %v727_v44 }
  0x31   :  { %675 = vmatpush3.bf16.msra.mxu0 %v727_v44 }
  0x34   :  { %677 = vmatmul.mubr.msk.bf16.vlgmr.msra.gmra.mrb[8].mxu0 %vm368_vm0, %v729_v45 }
  0xf6   :  { %v622_v46 = vpop.f32.mrb[0].mxu0 }
  0xf7   :  { %v650_v47 = vpop.f32.mrb[0].mxu1  ;;  %v623_v48 = vpop.f32.mrb[1].mxu0 }
  0xf8   :  { %v624_v49 = vadd.f32 %v623_v48, %v622_v46  ;;  %v651_v50 = vpop.f32.mrb[1].mxu1  ;;  %v625_v51 = vpop.f32.mrb[2].mxu0 }
  0xf9   :  { %v652_v52 = vadd.f32 %v651_v50, %v650_v47  ;;  %v653_v53 = vpop.f32.mrb[2].mxu1  ;;  %v626_v54 = vpop.f32.mrb[3].mxu0 }
  0xfa   :  { %v627_v55 = vadd.f32 %v626_v54, %v625_v51  ;;  %v654_v56 = vpop.f32.mrb[3].mxu1 }
  0xfb   :  { %v655_v57 = vadd.f32 %v654_v56, %v653_v53  ;;  %v459_v58 = vadd.f32 %v652_v52, %v624_v49 }
  0xfd   :  { %v462_v59 = vadd.f32 %v655_v57, %v627_v55 }
  0xfe   :  { %v628_v60 = vpop.f32.mrb[4].mxu0 }
  0xff   :  { %v656_v61 = vpop.f32.mrb[4].mxu1  ;;  %v629_v62 = vpop.f32.mrb[5].mxu0 }
 0x100   :  { %v630_v63 = vadd.f32 %v629_v62, %v628_v60  ;;  %v657_v0 = vpop.f32.mrb[5].mxu1  ;;  %v631_v1 = vpop.f32.mrb[6].mxu0 }
 0x101   :  { %v658_v2 = vadd.f32 %v657_v0, %v656_v61  ;;  %v659_v3 = vpop.f32.mrb[6].mxu1  ;;  %v632_v4 = vpop.f32.mrb[7].mxu0 }
 0x102   :  { %v633_v5 = vadd.f32 %v632_v4, %v631_v1  ;;  %v660_v6 = vpop.f32.mrb[7].mxu1 }
 0x103   :  { %v661_v7 = vadd.f32 %v660_v6, %v659_v3  ;;  %v467_v8 = vadd.f32 %v658_v2, %v630_v63 }
 0x105   :  { %v470_v9 = vadd.f32 %v661_v7, %v633_v5 }
 0x107   :  { %v678_v10 = vpop.f32.mrb[8].mxu0 }
 0x108   :  { %v516_v12 = vadd.f32 %v678_v10, %v467_v8  ;;  %v507_v13 = vpop.f32.mrb[9].mxu0 }
 0x109   :  { %v508_v15 = vadd.f32 %v507_v13, %v459_v58  ;;  %v679_v16 = vpop.f32.mrb[10].mxu0 }
 0x10a   :  { %v531_v17 = vmul.f32 %v604_v11, %v516_v12  ;;  %v519_v18 = vadd.f32 %v679_v16, %v470_v9  ;;  %v510_v19 = vpop.f32.mrb[11].mxu0 }
 0x10b   :  { %v529_v20 = vmul.f32 %v604_v11, %v508_v15  ;;  %v511_v21 = vadd.f32 %v510_v19, %v462_v59 }
 0x10c   :  { %v542_v22 = vadd.f32 %v605_v14, %v531_v17  ;;  %v532_v23 = vmul.f32 %v604_v11, %v519_v18 }
 0x10d   :  { %v540_v24 = vadd.f32 %v605_v14, %v529_v20  ;;  %v530_v25 = vmul.f32 %v604_v11, %v511_v21 }
 0x10e   :  { %v546_v26 = vmax.f32 %v542_v22, 0.0  ;;  %v543_v27 = vadd.f32 %v605_v14, %v532_v23 }
 0x10f   :  { %v544_v28 = vmax.f32 %v540_v24, 0.0  ;;  %v541_v29 = vadd.f32 %v605_v14, %v530_v25 }
 0x110   :  { %550 = vst [vmem:[%s915_s4 + $0x10] sm:$0xff] %v546_v26  ;;  %v547_v30 = vmax.f32 %v543_v27, 0.0 }
 0x111   :  { %548 = vst [vmem:[%s915_s4] sm:$0xff] %v544_v28  ;;  %v545_v31 = vmax.f32 %v541_v29, 0.0 }
 0x112   :  { %551 = vst [vmem:[%s915_s4 + $0x18] sm:$0xff] %v547_v30 }
 0x113   :  { %549 = vst [vmem:[%s915_s4 + $0x8] sm:$0xff] %v545_v31 }

// kernel: featurizer_forward.29
= control target key start
LH: loop header
LB: loop body
LE: loop exit
PB: predicated region body
PF: predicated region fallthrough
CT: control target
= control target key end

     0   :  { %vm64_vm0 = vcmask 523264   ;;  %s245_s1 = inlined_call_operand.vmem [shape: bf16[64,128], index: 1, kind: input, shape index: {}]   ;;  %s246_s0 = inlined_call_operand.vmem [shape: bf16[32,64], index: 0, kind: input, shape index: {}]   ;;  %s247_s2 = inlined_call_operand.vmem [shape: f32[1,128], index: 2, kind: input, shape index: {}]   ;;  %s248_s3 = inlined_call_operand.vmem [shape: f32[1,128], index: 3, kind: input, shape index: {}]   ;;  %s249_s4 = inlined_call_operand.vmem [shape: f32[32,128], index: 4, kind: output, shape index: {}]  }
   0x1   :  { %v178_v0 = vld [vmem:[%s245_s1] sm:$0xff]   ;;  %v179_v1 = vld [vmem:[%s245_s1 + $0x8] sm:$0xff]   ;;  %v180_v2 = vld [vmem:[%s245_s1 + $0x10] sm:$0xff]  }
   0x2   :  { %166 = vmatprep.subr.bf16.mxu0 %v178_v0  ;;  %v182_v3 = vld [vmem:[%s246_s0] sm:$0xff]   ;;  %v181_v4 = vld [vmem:[%s245_s1 + $0x18] sm:$0xff]   ;;  %v183_v5 = vld [vmem:[%s246_s0 + $0x8] sm:$0xff]  }
   0x3   :  { %167 = vmatpush3.bf16.msra.mxu0 %v178_v0  ;;  %174 = vmatprep.mubr.msk.bf16.mxu0 %vm64_vm0, %v182_v3  ;;  %v158_v6 = vld [vmem:[%s247_s2] ss:$0 sm:$0xff] }
   0x4   :  { %168 = vmatprep.subr.bf16.mxu0 %v179_v1  ;;  %v159_v8 = vld [vmem:[%s248_s3] ss:$0 sm:$0xff] }
   0x7   :  { %169 = vmatpush3.bf16.msra.mxu0 %v179_v1 }
   0x8   :  { %170 = vmatprep.subr.bf16.mxu0 %v180_v2 }
   0xb   :  { %171 = vmatpush3.bf16.msra.mxu0 %v180_v2 }
   0xc   :  { %172 = vmatprep.subr.bf16.mxu0 %v181_v4 }
   0xf   :  { %173 = vmatpush3.bf16.msra.mxu0 %v181_v4 }
  0x12   :  { %175 = vmatmul.mubr.msk.bf16.vlgmr.msra.gmra.mrb[0].mxu0 %vm64_vm0, %v183_v5 }
  0xe5   :  { %v176_v7 = vpop.f32.mrb[0].mxu0 }
  0xe6   :  { %v129_v9 = vmul.f32 %v176_v7, %v158_v6  ;;  %v105_v10 = vpop.f32.mrb[1].mxu0 }
  0xe7   :  { %v127_v11 = vmul.f32 %v158_v6, %v105_v10  ;;  %v177_v12 = vpop.f32.mrb[2].mxu0 }
  0xe8   :  { %v140_v13 = vadd.f32 %v159_v8, %v129_v9  ;;  %v130_v14 = vmul.f32 %v177_v12, %v158_v6  ;;  %v108_v15 = vpop.f32.mrb[3].mxu0 }
  0xe9   :  { %v138_v16 = vadd.f32 %v159_v8, %v127_v11  ;;  %v128_v17 = vmul.f32 %v158_v6, %v108_v15 }
  0xea   :  { %144 = vst [vmem:[%s249_s4 + $0x10] sm:$0xff] %v140_v13  ;;  %v141_v18 = vadd.f32 %v159_v8, %v130_v14 }
  0xeb   :  { %142 = vst [vmem:[%s249_s4] sm:$0xff] %v138_v16  ;;  %v139_v19 = vadd.f32 %v159_v8, %v128_v17 }
  0xec   :  { %145 = vst [vmem:[%s249_s4 + $0x18] sm:$0xff] %v141_v18 }
  0xed   :  { %143 = vst [vmem:[%s249_s4 + $0x8] sm:$0xff] %v139_v19 }

// kernel: featurizer_forward.30
= control target key start
LH: loop header
LB: loop body
LE: loop exit
PB: predicated region body
PF: predicated region fallthrough
CT: control target
= control target key end

     0   :  { %s1658_s1 = inlined_call_operand.vmem [shape: bf16[1152,128], index: 1, kind: input, shape index: {}]   ;;  %s1659_s0 = inlined_call_operand.vmem [shape: bf16[32,1152], index: 0, kind: input, shape index: {}]   ;;  %s1660_s2 = inlined_call_operand.vmem [shape: f32[1,128], index: 2, kind: input, shape index: {}]   ;;  %s1661_s3 = inlined_call_operand.vmem [shape: f32[1,128], index: 3, kind: input, shape index: {}]   ;;  %s1662_s4 = inlined_call_operand.vmem [shape: f32[32,128], index: 4, kind: input, shape index: {}]   ;;  %s1663_s5 = inlined_call_operand.vmem [shape: f32[32,128], index: 5, kind: output, shape index: {}]  }
   0x1   :  { %v1230_v0 = vld [vmem:[%s1658_s1 + $0x40] sm:$0xff]   ;;  %v1234_v4 = vld [vmem:[%s1658_s1 + $0x48] sm:$0xff]   ;;  %v1238_v8 = vld [vmem:[%s1658_s1 + $0x50] sm:$0xff]  }
   0x2   :  { %v1231_v1 = vld [vmem:[%s1658_s1 + $0xc0] sm:$0xff]   ;;  %1088 = vmatprep.subr.bf16.mxu0 %v1230_v0  ;;  %v1235_v5 = vld [vmem:[%s1658_s1 + $0xc8] sm:$0xff]   ;;  %v1239_v9 = vld [vmem:[%s1658_s1 + $0xd0] sm:$0xff]  }
   0x3   :  { %v1232_v2 = vld [vmem:[%s1658_s1] sm:$0xff]   ;;  %1116 = vmatprep.subr.bf16.mxu1 %v1231_v1  ;;  %v1236_v6 = vld [vmem:[%s1658_s1 + $0x8] sm:$0xff]   ;;  %v1240_v10 = vld [vmem:[%s1658_s1 + $0x10] sm:$0xff]  }
   0x4   :  { %v1233_v3 = vld [vmem:[%s1658_s1 + $0x80] sm:$0xff]   ;;  %1089 = vmatpush3.bf16.msra.mxu0 %v1232_v2  ;;  %v1237_v7 = vld [vmem:[%s1658_s1 + $0x88] sm:$0xff]   ;;  %v1241_v11 = vld [vmem:[%s1658_s1 + $0x90] sm:$0xff]  }
   0x5   :  { %1117 = vmatpush3.bf16.msra.mxu1 %v1233_v3  ;;  %1090 = vmatprep.subr.bf16.mxu0 %v1234_v4  ;;  %v1242_v12 = vld [vmem:[%s1658_s1 + $0x58] sm:$0xff]   ;;  %v1246_v16 = vld [vmem:[%s1658_s1 + $0x60] sm:$0xff]   ;;  %v1250_v20 = vld [vmem:[%s1658_s1 + $0x68] sm:$0xff]  }
   0x6   :  { %1118 = vmatprep.subr.bf16.mxu1 %v1235_v5  ;;  %v1243_v13 = vld [vmem:[%s1658_s1 + $0xd8] sm:$0xff]   ;;  %v1247_v17 = vld [vmem:[%s1658_s1 + $0xe0] sm:$0xff]   ;;  %v1251_v21 = vld [vmem:[%s1658_s1 + $0xe8] sm:$0xff]  }
   0x7   :  { %v1244_v14 = vld [vmem:[%s1658_s1 + $0x18] sm:$0xff]   ;;  %v1248_v18 = vld [vmem:[%s1658_s1 + $0x20] sm:$0xff]   ;;  %v1252_v22 = vld [vmem:[%s1658_s1 + $0x28] sm:$0xff]  }
   0x8   :  { %1091 = vmatpush3.bf16.msra.mxu0 %v1236_v6  ;;  %v1245_v15 = vld [vmem:[%s1658_s1 + $0x98] sm:$0xff]   ;;  %v1249_v19 = vld [vmem:[%s1658_s1 + $0xa0] sm:$0xff]   ;;  %v1253_v23 = vld [vmem:[%s1658_s1 + $0xa8] sm:$0xff]  }
   0x9   :  { %1119 = vmatpush3.bf16.msra.mxu1 %v1237_v7  ;;  %1092 = vmatprep.subr.bf16.mxu0 %v1238_v8  ;;  %v1254_v24 = vld [vmem:[%s1658_s1 + $0x70] sm:$0xff]   ;;  %v1258_v28 = vld [vmem:[%s1658_s1 + $0x78] sm:$0xff]   ;;  %v1262_v32 = vld [vmem:[%s1659_s0] ss:$36 sps:$4 sm:$0xff]  }
   0xa   :  { %1120 = vmatprep.subr.bf16.mxu1 %v1239_v9  ;;  %v1255_v25 = vld [vmem:[%s1658_s1 + $0xf0] sm:$0xff]   ;;  %v1259_v29 = vld [vmem:[%s1658_s1 + $0xf8] sm:$0xff]   ;;  %v1264_v33 = vld [vmem:[%s1659_s0 + $0x4] ss:$36 sps:$4 sm:$0xff]  }
   0xb   :  { %v1256_v26 = vld [vmem:[%s1658_s1 + $0x30] sm:$0xff]   ;;  %v1260_v30 = vld [vmem:[%s1658_s1 + $0x38] sm:$0xff]   ;;  %v1265_v34 = vld [vmem:[%s1659_s0 + $0x8] ss:$36 sps:$4 sm:$0xff]   ;;  %741 = vmatprep.mubr.bf16.mxu0 %v1264_v33 }
   0xc   :  { %1093 = vmatpush3.bf16.msra.mxu0 %v1240_v10  ;;  %v1257_v27 = vld [vmem:[%s1658_s1 + $0xb0] sm:$0xff]   ;;  %v1261_v31 = vld [vmem:[%s1658_s1 + $0xb8] sm:$0xff]   ;;  %v1268_v36 = vld [vmem:[%s1658_s1 + $0x140] sm:$0xff]  }
   0xd   :  { %1121 = vmatpush3.bf16.msra.mxu1 %v1241_v11  ;;  %1094 = vmatprep.subr.bf16.mxu0 %v1242_v12  ;;  %v1267_v35 = vld [vmem:[%s1659_s0 + $0xc] ss:$36 sps:$4 sm:$0xff]   ;;  %v1269_v37 = vld [vmem:[%s1658_s1 + $0x100] sm:$0xff]   ;;  %v1280_v48 = vld [vmem:[%s1658_s1 + $0x158] sm:$0xff]  }
   0xe   :  { %1122 = vmatprep.subr.bf16.mxu1 %v1243_v13  ;;  %790 = vmatprep.mubr.bf16.mxu1 %v1267_v35  ;;  %v1270_v38 = vld [vmem:[%s1658_s1 + $0x1c0] sm:$0xff]   ;;  %v1272_v40 = vld [vmem:[%s1658_s1 + $0x148] sm:$0xff]   ;;  %v1276_v44 = vld [vmem:[%s1658_s1 + $0x150] sm:$0xff]  }
   0xf   :  { %v1271_v39 = vld [vmem:[%s1658_s1 + $0x180] sm:$0xff]   ;;  %v1273_v41 = vld [vmem:[%s1658_s1 + $0x108] sm:$0xff]   ;;  %v1277_v45 = vld [vmem:[%s1658_s1 + $0x110] sm:$0xff]  }
  0x10   :  { %1095 = vmatpush3.bf16.msra.mxu0 %v1244_v14  ;;  %v1274_v42 = vld [vmem:[%s1658_s1 + $0x1c8] sm:$0xff]   ;;  %v1278_v46 = vld [vmem:[%s1658_s1 + $0x1d0] sm:$0xff]   ;;  %v1281_v49 = vld [vmem:[%s1658_s1 + $0x118] sm:$0xff]  }
  0x11   :  { %1123 = vmatpush3.bf16.msra.mxu1 %v1245_v15  ;;  %1096 = vmatprep.subr.bf16.mxu0 %v1246_v16  ;;  %v1275_v43 = vld [vmem:[%s1658_s1 + $0x188] sm:$0xff]   ;;  %v1279_v47 = vld [vmem:[%s1658_s1 + $0x190] sm:$0xff]   ;;  %v1282_v50 = vld [vmem:[%s1658_s1 + $0x1d8] sm:$0xff]  }
  0x12   :  { %1124 = vmatprep.subr.bf16.mxu1 %v1247_v17  ;;  %v1283_v51 = vld [vmem:[%s1658_s1 + $0x198] sm:$0xff]   ;;  %v1284_v52 = vld [vmem:[%s1658_s1 + $0x160] sm:$0xff]   ;;  %v1288_v56 = vld [vmem:[%s1658_s1 + $0x168] sm:$0xff]  }
  0x13   :  { %v1285_v53 = vld [vmem:[%s1658_s1 + $0x120] sm:$0xff]   ;;  %v1289_v57 = vld [vmem:[%s1659_s0 + $0x4c] ss:$36 sps:$4 sm:$0xff]   ;;  %v1291_v58 = vld [vmem:[%s1659_s0 + $0x54] ss:$36 sps:$4 sm:$0xff]  }
  0x14   :  { %1097 = vmatpush3.bf16.msra.mxu0 %v1248_v18  ;;  %v1286_v54 = vld [vmem:[%s1658_s1 + $0x1e0] sm:$0xff]   ;;  %v1293_v59 = vld [vmem:[%s1658_s1 + $0x128] sm:$0xff]   ;;  %v1295_v61 = vld [vmem:[%s1659_s0 + $0x50] ss:$36 sps:$4 sm:$0xff]  }
  0x15   :  { %1125 = vmatpush3.bf16.msra.mxu1 %v1249_v19  ;;  %1098 = vmatprep.subr.bf16.mxu0 %v1250_v20  ;;  %v1287_v55 = vld [vmem:[%s1658_s1 + $0x1a0] sm:$0xff]   ;;  %v1294_v60 = vld [vmem:[%s1659_s0 + $0x48] ss:$36 sps:$4 sm:$0xff]   ;;  %v1298_v0 = vld [vmem:[%s1658_s1 + $0x170] sm:$0xff]  }
  0x16   :  { %1126 = vmatprep.subr.bf16.mxu1 %v1251_v21  ;;  %v1296_v62 = vld [vmem:[%s1658_s1 + $0x1e8] sm:$0xff]   ;;  %v1299_v1 = vld [vmem:[%s1658_s1 + $0x130] sm:$0xff]   ;;  %v1302_v4 = vld [vmem:[%s1658_s1 + $0x178] sm:$0xff]  }
  0x17   :  { %v1297_v63 = vld [vmem:[%s1658_s1 + $0x1a8] sm:$0xff]   ;;  %v1300_v2 = vld [vmem:[%s1658_s1 + $0x1f0] sm:$0xff]   ;;  %v1303_v5 = vld [vmem:[%s1658_s1 + $0x138] sm:$0xff]  }
  0x18   :  { %1099 = vmatpush3.bf16.msra.mxu0 %v1252_v22  ;;  %v1301_v3 = vld [vmem:[%s1658_s1 + $0x1b0] sm:$0xff]   ;;  %v1304_v6 = vld [vmem:[%s1658_s1 + $0x1f8] sm:$0xff]   ;;  %v1309_v10 = vld [vmem:[%s1658_s1 + $0x200] sm:$0xff]  }
  0x19   :  { %1127 = vmatpush3.bf16.msra.mxu1 %v1253_v23  ;;  %1100 = vmatprep.subr.bf16.mxu0 %v1254_v24  ;;  %v1305_v7 = vld [vmem:[%s1659_s0 + $0x10] ss:$36 sps:$4 sm:$0xff]   ;;  %v1308_v9 = vld [vmem:[%s1658_s1 + $0x1b8] sm:$0xff]   ;;  %v1313_v13 = vld [vmem:[%s1658_s1 + $0x208] sm:$0xff]  }
  0x1a   :  { %1128 = vmatprep.subr.bf16.mxu1 %v1255_v25  ;;  %v1307_v8 = vld [vmem:[%s1659_s0 + $0x14] ss:$36 sps:$4 sm:$0xff]   ;;  %v1312_v12 = vld [vmem:[%s1659_s0 + $0x1c] ss:$36 sps:$4 sm:$0xff]   ;;  %v1318_v17 = vld [vmem:[%s1659_s0 + $0x64] ss:$36 sps:$4 sm:$0xff]  }
  0x1b   :  { %v1310_v11 = vld [vmem:[%s1659_s0 + $0x18] ss:$36 sps:$4 sm:$0xff]   ;;  %v1317_v16 = vld [vmem:[%s1658_s1 + $0x210] sm:$0xff]   ;;  %v1320_v18 = vld [vmem:[%s1659_s0 + $0x60] ss:$36 sps:$4 sm:$0xff]  }
  0x1c   :  { %1101 = vmatpush3.bf16.msra.mxu0 %v1256_v26  ;;  %v1314_v14 = vld [vmem:[%s1659_s0 + $0x5c] ss:$36 sps:$4 sm:$0xff]   ;;  %v1323_v22 = vld [vmem:[%s1658_s1 + $0x228] sm:$0xff]   ;;  %v1324_v23 = vld [vmem:[%s1658_s1 + $0x230] sm:$0xff]  }
  0x1d   :  { %1129 = vmatpush3.bf16.msra.mxu1 %v1257_v27  ;;  %1102 = vmatprep.subr.bf16.mxu0 %v1258_v28  ;;  %v1316_v15 = vld [vmem:[%s1659_s0 + $0x58] ss:$36 sps:$4 sm:$0xff]   ;;  %v1322_v20 = vld [vmem:[%s1658_s1 + $0x220] sm:$0xff]   ;;  %v1327_v25 = vld [vmem:[%s1659_s0 + $0x68] ss:$36 sps:$4 sm:$0xff]  }
  0x1e   :  { %1130 = vmatprep.subr.bf16.mxu1 %v1259_v29  ;;  %v1321_v19 = vld [vmem:[%s1658_s1 + $0x218] sm:$0xff]   ;;  %v1326_v21 = vld [vmem:[%s1659_s0 + $0x20] ss:$36 sps:$4 sm:$0xff]  }
  0x1f   :  { %v1325_v24 = vld [vmem:[%s1658_s1 + $0x238] sm:$0xff]  }
  0x20   :  { %1103 = vmatpush3.bf16.msra.mxu0 %v1260_v30 }
  0x21   :  { %1131 = vmatpush3.bf16.msra.mxu1 %v1261_v31  ;;  %1144 = vmatprep.subr.bf16.mxu0 %v1268_v36 }
  0x22   :  { %1172 = vmatprep.subr.bf16.mxu1 %v1270_v38 }
  0x23   :  { %742 = vmatmul.mubr.bf16.vlgmr.msra.gmra.mrb[0].mxu0 %v1262_v32 }
  0x24   :  { %791 = vmatmul.mubr.bf16.vlgmr.msra.gmra.mrb[0].mxu1 %v1265_v34  ;;  %1145 = vmatpush3.bf16.msra.mxu0 %v1269_v37 }
  0x25   :  { %1173 = vmatpush3.bf16.msra.mxu1 %v1271_v39  ;;  %1146 = vmatprep.subr.bf16.mxu0 %v1272_v40 }
  0x26   :  { %1174 = vmatprep.subr.bf16.mxu1 %v1274_v42  ;;  %749 = vmatprep.mubr.bf16.mxu0 %v1289_v57 }
  0x27   :  { %798 = vmatprep.mubr.bf16.mxu1 %v1291_v58 }
  0x28   :  { %1147 = vmatpush3.bf16.msra.mxu0 %v1273_v41 }
  0x29   :  { %1175 = vmatpush3.bf16.msra.mxu1 %v1275_v43  ;;  %1148 = vmatprep.subr.bf16.mxu0 %v1276_v44 }
  0x2a   :  { %1176 = vmatprep.subr.bf16.mxu1 %v1278_v46 }
  0x2b   :  { %750 = vmatmul.mubr.bf16.gmra.mrb[4].mxu0 %v1294_v60 }
  0x2c   :  { %1149 = vmatpush3.bf16.msra.mxu0 %v1277_v45  ;;  %799 = vmatmul.mubr.bf16.gmra.mrb[4].mxu1 %v1295_v61 }
  0x2d   :  { %1177 = vmatpush3.bf16.msra.mxu1 %v1279_v47  ;;  %1150 = vmatprep.subr.bf16.mxu0 %v1280_v48 }
  0x2e   :  { %1178 = vmatprep.subr.bf16.mxu1 %v1282_v50  ;;  %839 = vmatprep.mubr.bf16.mxu0 %v1307_v8 }
  0x2f   :  { %888 = vmatprep.mubr.bf16.mxu1 %v1312_v12 }
  0x30   :  { %1151 = vmatpush3.bf16.msra.mxu0 %v1281_v49 }
  0x31   :  { %1179 = vmatpush3.bf16.msra.mxu1 %v1283_v51  ;;  %1152 = vmatprep.subr.bf16.mxu0 %v1284_v52 }
  0x32   :  { %1180 = vmatprep.subr.bf16.mxu1 %v1286_v54 }
  0x34   :  { %1153 = vmatpush3.bf16.msra.mxu0 %v1285_v53 }
  0x35   :  { %1181 = vmatpush3.bf16.msra.mxu1 %v1287_v55  ;;  %1154 = vmatprep.subr.bf16.mxu0 %v1288_v56 }
  0x36   :  { %1182 = vmatprep.subr.bf16.mxu1 %v1296_v62 }
  0x38   :  { %1155 = vmatpush3.bf16.msra.mxu0 %v1293_v59 }
  0x39   :  { %1183 = vmatpush3.bf16.msra.mxu1 %v1297_v63  ;;  %1156 = vmatprep.subr.bf16.mxu0 %v1298_v0 }
  0x3a   :  { %1184 = vmatprep.subr.bf16.mxu1 %v1300_v2 }
  0x3c   :  { %1157 = vmatpush3.bf16.msra.mxu0 %v1299_v1 }
  0x3d   :  { %1185 = vmatpush3.bf16.msra.mxu1 %v1301_v3  ;;  %1158 = vmatprep.subr.bf16.mxu0 %v1302_v4 }
  0x3e   :  { %1186 = vmatprep.subr.bf16.mxu1 %v1304_v6 }
  0x40   :  { %1159 = vmatpush3.bf16.msra.mxu0 %v1303_v5 }
  0x41   :  { %1187 = vmatpush3.bf16.msra.mxu1 %v1308_v9  ;;  %1210 = vmatprep.subr.bf16.mxu0 %v1309_v10 }
  0x43   :  { %840 = vmatmul.mubr.bf16.vlgmr.msra.gmra.mrb[8].mxu0 %v1305_v7 }
  0x44   :  { %1211 = vmatpush3.bf16.msra.mxu0 %v1309_v10  ;;  %889 = vmatmul.mubr.bf16.vlgmr.msra.gmra.mrb[8].mxu1 %v1310_v11 }
  0x45   :  { %1212 = vmatprep.subr.bf16.mxu0 %v1313_v13  ;;  %847 = vmatprep.mubr.bf16.mxu0 %v1314_v14 }
  0x46   :  { %896 = vmatprep.mubr.bf16.mxu1 %v1318_v17 }
  0x48   :  { %1213 = vmatpush3.bf16.msra.mxu0 %v1313_v13 }
  0x49   :  { %1214 = vmatprep.subr.bf16.mxu0 %v1317_v16 }
  0x4b   :  { %848 = vmatmul.mubr.bf16.gmra.mrb[12].mxu0 %v1316_v15 }
  0x4c   :  { %1215 = vmatpush3.bf16.msra.mxu0 %v1317_v16  ;;  %897 = vmatmul.mubr.bf16.gmra.mrb[12].mxu1 %v1320_v18 }
  0x4d   :  { %1216 = vmatprep.subr.bf16.mxu0 %v1321_v19  ;;  %1226 = vmatprep.mubr.bf16.mxu0 %v1326_v21 }
  0x50   :  { %1217 = vmatpush3.bf16.msra.mxu0 %v1321_v19 }
  0x51   :  { %1218 = vmatprep.subr.bf16.mxu0 %v1322_v20 }
  0x54   :  { %1219 = vmatpush3.bf16.msra.mxu0 %v1322_v20 }
  0x55   :  { %1220 = vmatprep.subr.bf16.mxu0 %v1323_v22 }
  0x58   :  { %1221 = vmatpush3.bf16.msra.mxu0 %v1323_v22 }
  0x59   :  { %1222 = vmatprep.subr.bf16.mxu0 %v1324_v23 }
  0x5c   :  { %1223 = vmatpush3.bf16.msra.mxu0 %v1324_v23  ;;  %v1086_v23 = vld [vmem:[%s1660_s2] ss:$0 sm:$0xff] }
  0x5d   :  { %1224 = vmatprep.subr.bf16.mxu0 %v1325_v24 }
  0x60   :  { %1225 = vmatpush3.bf16.msra.mxu0 %v1325_v24 }
  0x63   :  { %1227 = vmatmul.mubr.bf16.vlgmr.msra.gmra.mrb[16].mxu0 %v1327_v25 }
  0xf6   :  { %v1104_v26 = vpop.f32.mrb[0].mxu0 }
  0xf7   :  { %v1132_v27 = vpop.f32.mrb[0].mxu1  ;;  %v1105_v28 = vpop.f32.mrb[1].mxu0 }
  0xf8   :  { %v1106_v29 = vadd.f32 %v1105_v28, %v1104_v26  ;;  %v1133_v30 = vpop.f32.mrb[1].mxu1  ;;  %v1107_v31 = vpop.f32.mrb[2].mxu0  ;;  %v1087_v26 = vld [vmem:[%s1661_s3] ss:$0 sm:$0xff] }
  0xf9   :  { %v1134_v32 = vadd.f32 %v1133_v30, %v1132_v27  ;;  %v1135_v33 = vpop.f32.mrb[2].mxu1  ;;  %v1108_v34 = vpop.f32.mrb[3].mxu0 }
  0xfa   :  { %v1109_v35 = vadd.f32 %v1108_v34, %v1107_v31  ;;  %v1136_v36 = vpop.f32.mrb[3].mxu1 }
  0xfb   :  { %v793_v37 = vadd.f32 %v1134_v32, %v1106_v29  ;;  %v1137_v38 = vadd.f32 %v1136_v36, %v1135_v33  ;;  %v978_v32 = vld [vmem:[%s1662_s4 + $0x10] sm:$0xff]  ;;  %v976_v36 = vld [vmem:[%s1662_s4] sm:$0xff] }
  0xfd   :  { %v796_v39 = vadd.f32 %v1137_v38, %v1109_v35 }
  0xfe   :  { %v1110_v40 = vpop.f32.mrb[4].mxu0 }
  0xff   :  { %v1138_v41 = vpop.f32.mrb[4].mxu1  ;;  %v1111_v42 = vpop.f32.mrb[5].mxu0 }
 0x100   :  { %v1139_v43 = vpop.f32.mrb[5].mxu1  ;;  %v1112_v44 = vadd.f32 %v1111_v42, %v1110_v40  ;;  %v1113_v46 = vpop.f32.mrb[6].mxu0 }
 0x101   :  { %v1140_v45 = vadd.f32 %v1139_v43, %v1138_v41  ;;  %v1141_v47 = vpop.f32.mrb[6].mxu1  ;;  %v1114_v48 = vpop.f32.mrb[7].mxu0  ;;  %v977_v43 = vld [vmem:[%s1662_s4 + $0x8] sm:$0xff] }
 0x102   :  { %v1142_v49 = vpop.f32.mrb[7].mxu1  ;;  %v1115_v51 = vadd.f32 %v1114_v48, %v1113_v46 }
 0x103   :  { %v801_v50 = vadd.f32 %v1140_v45, %v1112_v44  ;;  %v1143_v52 = vadd.f32 %v1142_v49, %v1141_v47 }
 0x105   :  { %v804_v53 = vadd.f32 %v1143_v52, %v1115_v51 }
 0x116   :  { %v1160_v54 = vpop.f32.mrb[8].mxu0 }
 0x117   :  { %v1161_v55 = vpop.f32.mrb[9].mxu0  ;;  %v1188_v58 = vpop.f32.mrb[8].mxu1 }
 0x118   :  { %v1162_v56 = vadd.f32 %v1161_v55, %v1160_v54  ;;  %v1163_v57 = vpop.f32.mrb[10].mxu0  ;;  %v1189_v62 = vpop.f32.mrb[9].mxu1 }
 0x119   :  { %v1164_v59 = vpop.f32.mrb[11].mxu0  ;;  %v1190_v63 = vadd.f32 %v1189_v62, %v1188_v58  ;;  %v1191_v0 = vpop.f32.mrb[10].mxu1 }
 0x11a   :  { %v842_v60 = vadd.f32 %v1162_v56, %v793_v37  ;;  %v1165_v61 = vadd.f32 %v1164_v59, %v1163_v57  ;;  %v1192_v2 = vpop.f32.mrb[11].mxu1 }
 0x11b   :  { %v1193_v3 = vadd.f32 %v1192_v2, %v1191_v0 }
 0x11c   :  { %v845_v1 = vadd.f32 %v1165_v61, %v796_v39  ;;  %v891_v4 = vadd.f32 %v1190_v63, %v842_v60  ;;  %v979_v39 = vld [vmem:[%s1662_s4 + $0x18] sm:$0xff] }
 0x11e   :  { %v1166_v5 = vpop.f32.mrb[12].mxu0  ;;  %v894_v7 = vadd.f32 %v1193_v3, %v845_v1 }
 0x11f   :  { %v1167_v6 = vpop.f32.mrb[13].mxu0  ;;  %v1194_v10 = vpop.f32.mrb[12].mxu1 }
 0x120   :  { %v1168_v8 = vadd.f32 %v1167_v6, %v1166_v5  ;;  %v1169_v9 = vpop.f32.mrb[14].mxu0  ;;  %v1195_v14 = vpop.f32.mrb[13].mxu1 }
 0x121   :  { %v1170_v11 = vpop.f32.mrb[15].mxu0  ;;  %v1196_v15 = vadd.f32 %v1195_v14, %v1194_v10  ;;  %v1197_v16 = vpop.f32.mrb[14].mxu1 }
 0x122   :  { %v850_v12 = vadd.f32 %v1168_v8, %v801_v50  ;;  %v1171_v13 = vadd.f32 %v1170_v11, %v1169_v9  ;;  %v1198_v18 = vpop.f32.mrb[15].mxu1 }
 0x123   :  { %v1199_v19 = vadd.f32 %v1198_v18, %v1197_v16 }
 0x124   :  { %v853_v17 = vadd.f32 %v1171_v13, %v804_v53  ;;  %v899_v20 = vadd.f32 %v1196_v15, %v850_v12 }
 0x126   :  { %v902_v21 = vadd.f32 %v1199_v19, %v853_v17 }
 0x136   :  { %v1228_v22 = vpop.f32.mrb[16].mxu0 }
 0x137   :  { %v948_v24 = vadd.f32 %v1228_v22, %v899_v20  ;;  %v939_v25 = vpop.f32.mrb[17].mxu0 }
 0x138   :  { %v940_v27 = vadd.f32 %v939_v25, %v891_v4  ;;  %v1229_v28 = vpop.f32.mrb[18].mxu0 }
 0x139   :  { %v963_v29 = vmul.f32 %v1086_v23, %v948_v24  ;;  %v951_v30 = vadd.f32 %v1229_v28, %v902_v21  ;;  %v942_v31 = vpop.f32.mrb[19].mxu0 }
 0x13a   :  { %v961_v33 = vmul.f32 %v1086_v23, %v940_v27  ;;  %v943_v34 = vadd.f32 %v942_v31, %v894_v7 }
 0x13b   :  { %v974_v35 = vadd.f32 %v1087_v26, %v963_v29  ;;  %v964_v37 = vmul.f32 %v1086_v23, %v951_v30 }
 0x13c   :  { %v972_v38 = vadd.f32 %v1087_v26, %v961_v33  ;;  %v962_v40 = vmul.f32 %v1086_v23, %v943_v34 }
 0x13d   :  { %v982_v41 = vadd.f32 %v978_v32, %v974_v35  ;;  %v975_v42 = vadd.f32 %v1087_v26, %v964_v37 }
 0x13e   :  { %v980_v44 = vadd.f32 %v976_v36, %v972_v38  ;;  %v973_v45 = vadd.f32 %v1087_v26, %v962_v40 }
 0x13f   :  { %v986_v46 = vmax.f32 %v982_v41, 0.0  ;;  %v983_v47 = vadd.f32 %v979_v39, %v975_v42 }
 0x140   :  { %v984_v48 = vmax.f32 %v980_v44, 0.0  ;;  %v981_v49 = vadd.f32 %v977_v43, %v973_v45 }
 0x141   :  { %990 = vst [vmem:[%s1663_s5 + $0x10] sm:$0xff] %v986_v46  ;;  %v987_v50 = vmax.f32 %v983_v47, 0.0 }
 0x142   :  { %988 = vst [vmem:[%s1663_s5] sm:$0xff] %v984_v48  ;;  %v985_v51 = vmax.f32 %v981_v49, 0.0 }
 0x143   :  { %991 = vst [vmem:[%s1663_s5 + $0x18] sm:$0xff] %v987_v50 }
 0x144   :  { %989 = vst [vmem:[%s1663_s5 + $0x8] sm:$0xff] %v985_v51 }

// kernel: featurizer_forward.31
= control target key start
LH: loop header
LB: loop body
LE: loop exit
PB: predicated region body
PF: predicated region fallthrough
CT: control target
= control target key end

     0   :  { %s1630_s1 = inlined_call_operand.vmem [shape: bf16[1152,128], index: 1, kind: input, shape index: {}]   ;;  %s1631_s0 = inlined_call_operand.vmem [shape: bf16[32,1152], index: 0, kind: input, shape index: {}]   ;;  %s1632_s2 = inlined_call_operand.vmem [shape: f32[1,128], index: 2, kind: input, shape index: {}]   ;;  %s1633_s3 = inlined_call_operand.vmem [shape: f32[1,128], index: 3, kind: input, shape index: {}]   ;;  %s1634_s4 = inlined_call_operand.vmem [shape: f32[32,128], index: 4, kind: output, shape index: {}]  }
   0x1   :  { %v1219_v0 = vld [vmem:[%s1630_s1 + $0x40] sm:$0xff]   ;;  %v1223_v4 = vld [vmem:[%s1630_s1 + $0x48] sm:$0xff]   ;;  %v1227_v8 = vld [vmem:[%s1630_s1 + $0x50] sm:$0xff]  }
   0x2   :  { %v1220_v1 = vld [vmem:[%s1630_s1 + $0xc0] sm:$0xff]   ;;  %1077 = vmatprep.subr.bf16.mxu0 %v1219_v0  ;;  %v1224_v5 = vld [vmem:[%s1630_s1 + $0xc8] sm:$0xff]   ;;  %v1228_v9 = vld [vmem:[%s1630_s1 + $0xd0] sm:$0xff]  }
   0x3   :  { %v1221_v2 = vld [vmem:[%s1630_s1] sm:$0xff]   ;;  %1105 = vmatprep.subr.bf16.mxu1 %v1220_v1  ;;  %v1225_v6 = vld [vmem:[%s1630_s1 + $0x8] sm:$0xff]   ;;  %v1229_v10 = vld [vmem:[%s1630_s1 + $0x10] sm:$0xff]  }
   0x4   :  { %v1222_v3 = vld [vmem:[%s1630_s1 + $0x80] sm:$0xff]   ;;  %1078 = vmatpush3.bf16.msra.mxu0 %v1221_v2  ;;  %v1226_v7 = vld [vmem:[%s1630_s1 + $0x88] sm:$0xff]   ;;  %v1230_v11 = vld [vmem:[%s1630_s1 + $0x90] sm:$0xff]  }
   0x5   :  { %1106 = vmatpush3.bf16.msra.mxu1 %v1222_v3  ;;  %1079 = vmatprep.subr.bf16.mxu0 %v1223_v4  ;;  %v1231_v12 = vld [vmem:[%s1630_s1 + $0x58] sm:$0xff]   ;;  %v1235_v16 = vld [vmem:[%s1630_s1 + $0x60] sm:$0xff]   ;;  %v1239_v20 = vld [vmem:[%s1630_s1 + $0x68] sm:$0xff]  }
   0x6   :  { %1107 = vmatprep.subr.bf16.mxu1 %v1224_v5  ;;  %v1232_v13 = vld [vmem:[%s1630_s1 + $0xd8] sm:$0xff]   ;;  %v1236_v17 = vld [vmem:[%s1630_s1 + $0xe0] sm:$0xff]   ;;  %v1240_v21 = vld [vmem:[%s1630_s1 + $0xe8] sm:$0xff]  }
   0x7   :  { %v1233_v14 = vld [vmem:[%s1630_s1 + $0x18] sm:$0xff]   ;;  %v1237_v18 = vld [vmem:[%s1630_s1 + $0x20] sm:$0xff]   ;;  %v1241_v22 = vld [vmem:[%s1630_s1 + $0x28] sm:$0xff]  }
   0x8   :  { %1080 = vmatpush3.bf16.msra.mxu0 %v1225_v6  ;;  %v1234_v15 = vld [vmem:[%s1630_s1 + $0x98] sm:$0xff]   ;;  %v1238_v19 = vld [vmem:[%s1630_s1 + $0xa0] sm:$0xff]   ;;  %v1242_v23 = vld [vmem:[%s1630_s1 + $0xa8] sm:$0xff]  }
   0x9   :  { %1108 = vmatpush3.bf16.msra.mxu1 %v1226_v7  ;;  %1081 = vmatprep.subr.bf16.mxu0 %v1227_v8  ;;  %v1243_v24 = vld [vmem:[%s1630_s1 + $0x70] sm:$0xff]   ;;  %v1247_v28 = vld [vmem:[%s1630_s1 + $0x78] sm:$0xff]   ;;  %v1251_v32 = vld [vmem:[%s1631_s0] ss:$36 sps:$4 sm:$0xff]  }
   0xa   :  { %1109 = vmatprep.subr.bf16.mxu1 %v1228_v9  ;;  %v1244_v25 = vld [vmem:[%s1630_s1 + $0xf0] sm:$0xff]   ;;  %v1248_v29 = vld [vmem:[%s1630_s1 + $0xf8] sm:$0xff]   ;;  %v1253_v33 = vld [vmem:[%s1631_s0 + $0x4] ss:$36 sps:$4 sm:$0xff]  }
   0xb   :  { %v1245_v26 = vld [vmem:[%s1630_s1 + $0x30] sm:$0xff]   ;;  %v1249_v30 = vld [vmem:[%s1630_s1 + $0x38] sm:$0xff]   ;;  %v1254_v34 = vld [vmem:[%s1631_s0 + $0x8] ss:$36 sps:$4 sm:$0xff]   ;;  %738 = vmatprep.mubr.bf16.mxu0 %v1253_v33 }
   0xc   :  { %1082 = vmatpush3.bf16.msra.mxu0 %v1229_v10  ;;  %v1246_v27 = vld [vmem:[%s1630_s1 + $0xb0] sm:$0xff]   ;;  %v1250_v31 = vld [vmem:[%s1630_s1 + $0xb8] sm:$0xff]   ;;  %v1257_v36 = vld [vmem:[%s1630_s1 + $0x140] sm:$0xff]  }
   0xd   :  { %1110 = vmatpush3.bf16.msra.mxu1 %v1230_v11  ;;  %1083 = vmatprep.subr.bf16.mxu0 %v1231_v12  ;;  %v1256_v35 = vld [vmem:[%s1631_s0 + $0xc] ss:$36 sps:$4 sm:$0xff]   ;;  %v1258_v37 = vld [vmem:[%s1630_s1 + $0x100] sm:$0xff]   ;;  %v1269_v48 = vld [vmem:[%s1630_s1 + $0x158] sm:$0xff]  }
   0xe   :  { %1111 = vmatprep.subr.bf16.mxu1 %v1232_v13  ;;  %787 = vmatprep.mubr.bf16.mxu1 %v1256_v35  ;;  %v1259_v38 = vld [vmem:[%s1630_s1 + $0x1c0] sm:$0xff]   ;;  %v1261_v40 = vld [vmem:[%s1630_s1 + $0x148] sm:$0xff]   ;;  %v1265_v44 = vld [vmem:[%s1630_s1 + $0x150] sm:$0xff]  }
   0xf   :  { %v1260_v39 = vld [vmem:[%s1630_s1 + $0x180] sm:$0xff]   ;;  %v1262_v41 = vld [vmem:[%s1630_s1 + $0x108] sm:$0xff]   ;;  %v1266_v45 = vld [vmem:[%s1630_s1 + $0x110] sm:$0xff]  }
  0x10   :  { %1084 = vmatpush3.bf16.msra.mxu0 %v1233_v14  ;;  %v1263_v42 = vld [vmem:[%s1630_s1 + $0x1c8] sm:$0xff]   ;;  %v1267_v46 = vld [vmem:[%s1630_s1 + $0x1d0] sm:$0xff]   ;;  %v1270_v49 = vld [vmem:[%s1630_s1 + $0x118] sm:$0xff]  }
  0x11   :  { %1112 = vmatpush3.bf16.msra.mxu1 %v1234_v15  ;;  %1085 = vmatprep.subr.bf16.mxu0 %v1235_v16  ;;  %v1264_v43 = vld [vmem:[%s1630_s1 + $0x188] sm:$0xff]   ;;  %v1268_v47 = vld [vmem:[%s1630_s1 + $0x190] sm:$0xff]   ;;  %v1271_v50 = vld [vmem:[%s1630_s1 + $0x1d8] sm:$0xff]  }
  0x12   :  { %1113 = vmatprep.subr.bf16.mxu1 %v1236_v17  ;;  %v1272_v51 = vld [vmem:[%s1630_s1 + $0x198] sm:$0xff]   ;;  %v1273_v52 = vld [vmem:[%s1630_s1 + $0x160] sm:$0xff]   ;;  %v1277_v56 = vld [vmem:[%s1630_s1 + $0x168] sm:$0xff]  }
  0x13   :  { %v1274_v53 = vld [vmem:[%s1630_s1 + $0x120] sm:$0xff]   ;;  %v1278_v57 = vld [vmem:[%s1631_s0 + $0x4c] ss:$36 sps:$4 sm:$0xff]   ;;  %v1280_v58 = vld [vmem:[%s1631_s0 + $0x54] ss:$36 sps:$4 sm:$0xff]  }
  0x14   :  { %1086 = vmatpush3.bf16.msra.mxu0 %v1237_v18  ;;  %v1275_v54 = vld [vmem:[%s1630_s1 + $0x1e0] sm:$0xff]   ;;  %v1282_v59 = vld [vmem:[%s1630_s1 + $0x128] sm:$0xff]   ;;  %v1284_v61 = vld [vmem:[%s1631_s0 + $0x50] ss:$36 sps:$4 sm:$0xff]  }
  0x15   :  { %1114 = vmatpush3.bf16.msra.mxu1 %v1238_v19  ;;  %1087 = vmatprep.subr.bf16.mxu0 %v1239_v20  ;;  %v1276_v55 = vld [vmem:[%s1630_s1 + $0x1a0] sm:$0xff]   ;;  %v1283_v60 = vld [vmem:[%s1631_s0 + $0x48] ss:$36 sps:$4 sm:$0xff]   ;;  %v1287_v0 = vld [vmem:[%s1630_s1 + $0x170] sm:$0xff]  }
  0x16   :  { %1115 = vmatprep.subr.bf16.mxu1 %v1240_v21  ;;  %v1285_v62 = vld [vmem:[%s1630_s1 + $0x1e8] sm:$0xff]   ;;  %v1288_v1 = vld [vmem:[%s1630_s1 + $0x130] sm:$0xff]   ;;  %v1291_v4 = vld [vmem:[%s1630_s1 + $0x178] sm:$0xff]  }
  0x17   :  { %v1286_v63 = vld [vmem:[%s1630_s1 + $0x1a8] sm:$0xff]   ;;  %v1289_v2 = vld [vmem:[%s1630_s1 + $0x1f0] sm:$0xff]   ;;  %v1292_v5 = vld [vmem:[%s1630_s1 + $0x138] sm:$0xff]  }
  0x18   :  { %1088 = vmatpush3.bf16.msra.mxu0 %v1241_v22  ;;  %v1290_v3 = vld [vmem:[%s1630_s1 + $0x1b0] sm:$0xff]   ;;  %v1293_v6 = vld [vmem:[%s1630_s1 + $0x1f8] sm:$0xff]   ;;  %v1298_v10 = vld [vmem:[%s1630_s1 + $0x200] sm:$0xff]  }
  0x19   :  { %1116 = vmatpush3.bf16.msra.mxu1 %v1242_v23  ;;  %1089 = vmatprep.subr.bf16.mxu0 %v1243_v24  ;;  %v1294_v7 = vld [vmem:[%s1631_s0 + $0x10] ss:$36 sps:$4 sm:$0xff]   ;;  %v1297_v9 = vld [vmem:[%s1630_s1 + $0x1b8] sm:$0xff]   ;;  %v1302_v13 = vld [vmem:[%s1630_s1 + $0x208] sm:$0xff]  }
  0x1a   :  { %1117 = vmatprep.subr.bf16.mxu1 %v1244_v25  ;;  %v1296_v8 = vld [vmem:[%s1631_s0 + $0x14] ss:$36 sps:$4 sm:$0xff]   ;;  %v1301_v12 = vld [vmem:[%s1631_s0 + $0x1c] ss:$36 sps:$4 sm:$0xff]   ;;  %v1307_v17 = vld [vmem:[%s1631_s0 + $0x64] ss:$36 sps:$4 sm:$0xff]  }
  0x1b   :  { %v1299_v11 = vld [vmem:[%s1631_s0 + $0x18] ss:$36 sps:$4 sm:$0xff]   ;;  %v1306_v16 = vld [vmem:[%s1630_s1 + $0x210] sm:$0xff]   ;;  %v1309_v18 = vld [vmem:[%s1631_s0 + $0x60] ss:$36 sps:$4 sm:$0xff]  }
  0x1c   :  { %1090 = vmatpush3.bf16.msra.mxu0 %v1245_v26  ;;  %v1303_v14 = vld [vmem:[%s1631_s0 + $0x5c] ss:$36 sps:$4 sm:$0xff]   ;;  %v1312_v22 = vld [vmem:[%s1630_s1 + $0x228] sm:$0xff]   ;;  %v1313_v23 = vld [vmem:[%s1630_s1 + $0x230] sm:$0xff]  }
  0x1d   :  { %1118 = vmatpush3.bf16.msra.mxu1 %v1246_v27  ;;  %1091 = vmatprep.subr.bf16.mxu0 %v1247_v28  ;;  %v1305_v15 = vld [vmem:[%s1631_s0 + $0x58] ss:$36 sps:$4 sm:$0xff]   ;;  %v1311_v20 = vld [vmem:[%s1630_s1 + $0x220] sm:$0xff]   ;;  %v1316_v25 = vld [vmem:[%s1631_s0 + $0x68] ss:$36 sps:$4 sm:$0xff]  }
  0x1e   :  { %1119 = vmatprep.subr.bf16.mxu1 %v1248_v29  ;;  %v1310_v19 = vld [vmem:[%s1630_s1 + $0x218] sm:$0xff]   ;;  %v1315_v21 = vld [vmem:[%s1631_s0 + $0x20] ss:$36 sps:$4 sm:$0xff]  }
  0x1f   :  { %v1314_v24 = vld [vmem:[%s1630_s1 + $0x238] sm:$0xff]  }
  0x20   :  { %1092 = vmatpush3.bf16.msra.mxu0 %v1249_v30 }
  0x21   :  { %1120 = vmatpush3.bf16.msra.mxu1 %v1250_v31  ;;  %1133 = vmatprep.subr.bf16.mxu0 %v1257_v36 }
  0x22   :  { %1161 = vmatprep.subr.bf16.mxu1 %v1259_v38 }
  0x23   :  { %739 = vmatmul.mubr.bf16.vlgmr.msra.gmra.mrb[0].mxu0 %v1251_v32 }
  0x24   :  { %788 = vmatmul.mubr.bf16.vlgmr.msra.gmra.mrb[0].mxu1 %v1254_v34  ;;  %1134 = vmatpush3.bf16.msra.mxu0 %v1258_v37 }
  0x25   :  { %1162 = vmatpush3.bf16.msra.mxu1 %v1260_v39  ;;  %1135 = vmatprep.subr.bf16.mxu0 %v1261_v40 }
  0x26   :  { %1163 = vmatprep.subr.bf16.mxu1 %v1263_v42  ;;  %746 = vmatprep.mubr.bf16.mxu0 %v1278_v57 }
  0x27   :  { %795 = vmatprep.mubr.bf16.mxu1 %v1280_v58 }
  0x28   :  { %1136 = vmatpush3.bf16.msra.mxu0 %v1262_v41 }
  0x29   :  { %1164 = vmatpush3.bf16.msra.mxu1 %v1264_v43  ;;  %1137 = vmatprep.subr.bf16.mxu0 %v1265_v44 }
  0x2a   :  { %1165 = vmatprep.subr.bf16.mxu1 %v1267_v46 }
  0x2b   :  { %747 = vmatmul.mubr.bf16.gmra.mrb[4].mxu0 %v1283_v60 }
  0x2c   :  { %1138 = vmatpush3.bf16.msra.mxu0 %v1266_v45  ;;  %796 = vmatmul.mubr.bf16.gmra.mrb[4].mxu1 %v1284_v61 }
  0x2d   :  { %1166 = vmatpush3.bf16.msra.mxu1 %v1268_v47  ;;  %1139 = vmatprep.subr.bf16.mxu0 %v1269_v48 }
  0x2e   :  { %1167 = vmatprep.subr.bf16.mxu1 %v1271_v50  ;;  %836 = vmatprep.mubr.bf16.mxu0 %v1296_v8 }
  0x2f   :  { %885 = vmatprep.mubr.bf16.mxu1 %v1301_v12 }
  0x30   :  { %1140 = vmatpush3.bf16.msra.mxu0 %v1270_v49 }
  0x31   :  { %1168 = vmatpush3.bf16.msra.mxu1 %v1272_v51  ;;  %1141 = vmatprep.subr.bf16.mxu0 %v1273_v52 }
  0x32   :  { %1169 = vmatprep.subr.bf16.mxu1 %v1275_v54 }
  0x34   :  { %1142 = vmatpush3.bf16.msra.mxu0 %v1274_v53 }
  0x35   :  { %1170 = vmatpush3.bf16.msra.mxu1 %v1276_v55  ;;  %1143 = vmatprep.subr.bf16.mxu0 %v1277_v56 }
  0x36   :  { %1171 = vmatprep.subr.bf16.mxu1 %v1285_v62 }
  0x38   :  { %1144 = vmatpush3.bf16.msra.mxu0 %v1282_v59 }
  0x39   :  { %1172 = vmatpush3.bf16.msra.mxu1 %v1286_v63  ;;  %1145 = vmatprep.subr.bf16.mxu0 %v1287_v0 }
  0x3a   :  { %1173 = vmatprep.subr.bf16.mxu1 %v1289_v2 }
  0x3c   :  { %1146 = vmatpush3.bf16.msra.mxu0 %v1288_v1 }
  0x3d   :  { %1174 = vmatpush3.bf16.msra.mxu1 %v1290_v3  ;;  %1147 = vmatprep.subr.bf16.mxu0 %v1291_v4 }
  0x3e   :  { %1175 = vmatprep.subr.bf16.mxu1 %v1293_v6 }
  0x40   :  { %1148 = vmatpush3.bf16.msra.mxu0 %v1292_v5 }
  0x41   :  { %1176 = vmatpush3.bf16.msra.mxu1 %v1297_v9  ;;  %1199 = vmatprep.subr.bf16.mxu0 %v1298_v10 }
  0x43   :  { %837 = vmatmul.mubr.bf16.vlgmr.msra.gmra.mrb[8].mxu0 %v1294_v7 }
  0x44   :  { %1200 = vmatpush3.bf16.msra.mxu0 %v1298_v10  ;;  %886 = vmatmul.mubr.bf16.vlgmr.msra.gmra.mrb[8].mxu1 %v1299_v11 }
  0x45   :  { %1201 = vmatprep.subr.bf16.mxu0 %v1302_v13  ;;  %844 = vmatprep.mubr.bf16.mxu0 %v1303_v14 }
  0x46   :  { %893 = vmatprep.mubr.bf16.mxu1 %v1307_v17 }
  0x48   :  { %1202 = vmatpush3.bf16.msra.mxu0 %v1302_v13 }
  0x49   :  { %1203 = vmatprep.subr.bf16.mxu0 %v1306_v16 }
  0x4b   :  { %845 = vmatmul.mubr.bf16.gmra.mrb[12].mxu0 %v1305_v15 }
  0x4c   :  { %1204 = vmatpush3.bf16.msra.mxu0 %v1306_v16  ;;  %894 = vmatmul.mubr.bf16.gmra.mrb[12].mxu1 %v1309_v18 }
  0x4d   :  { %1205 = vmatprep.subr.bf16.mxu0 %v1310_v19  ;;  %1215 = vmatprep.mubr.bf16.mxu0 %v1315_v21 }
  0x50   :  { %1206 = vmatpush3.bf16.msra.mxu0 %v1310_v19 }
  0x51   :  { %1207 = vmatprep.subr.bf16.mxu0 %v1311_v20 }
  0x54   :  { %1208 = vmatpush3.bf16.msra.mxu0 %v1311_v20 }
  0x55   :  { %1209 = vmatprep.subr.bf16.mxu0 %v1312_v22 }
  0x58   :  { %1210 = vmatpush3.bf16.msra.mxu0 %v1312_v22 }
  0x59   :  { %1211 = vmatprep.subr.bf16.mxu0 %v1313_v23 }
  0x5c   :  { %1212 = vmatpush3.bf16.msra.mxu0 %v1313_v23  ;;  %v1075_v23 = vld [vmem:[%s1632_s2] ss:$0 sm:$0xff] }
  0x5d   :  { %1213 = vmatprep.subr.bf16.mxu0 %v1314_v24 }
  0x60   :  { %1214 = vmatpush3.bf16.msra.mxu0 %v1314_v24 }
  0x63   :  { %1216 = vmatmul.mubr.bf16.vlgmr.msra.gmra.mrb[16].mxu0 %v1316_v25 }
  0xf6   :  { %v1093_v26 = vpop.f32.mrb[0].mxu0 }
  0xf7   :  { %v1121_v27 = vpop.f32.mrb[0].mxu1  ;;  %v1094_v28 = vpop.f32.mrb[1].mxu0 }
  0xf8   :  { %v1095_v29 = vadd.f32 %v1094_v28, %v1093_v26  ;;  %v1122_v30 = vpop.f32.mrb[1].mxu1  ;;  %v1096_v31 = vpop.f32.mrb[2].mxu0  ;;  %v1076_v26 = vld [vmem:[%s1633_s3] ss:$0 sm:$0xff] }
  0xf9   :  { %v1123_v32 = vadd.f32 %v1122_v30, %v1121_v27  ;;  %v1124_v33 = vpop.f32.mrb[2].mxu1  ;;  %v1097_v34 = vpop.f32.mrb[3].mxu0 }
  0xfa   :  { %v1098_v35 = vadd.f32 %v1097_v34, %v1096_v31  ;;  %v1125_v36 = vpop.f32.mrb[3].mxu1 }
  0xfb   :  { %v790_v37 = vadd.f32 %v1123_v32, %v1095_v29  ;;  %v1126_v38 = vadd.f32 %v1125_v36, %v1124_v33 }
  0xfd   :  { %v793_v39 = vadd.f32 %v1126_v38, %v1098_v35 }
  0xfe   :  { %v1099_v40 = vpop.f32.mrb[4].mxu0 }
  0xff   :  { %v1127_v41 = vpop.f32.mrb[4].mxu1  ;;  %v1100_v42 = vpop.f32.mrb[5].mxu0 }
 0x100   :  { %v1128_v43 = vpop.f32.mrb[5].mxu1  ;;  %v1101_v44 = vadd.f32 %v1100_v42, %v1099_v40  ;;  %v1102_v46 = vpop.f32.mrb[6].mxu0 }
 0x101   :  { %v1129_v45 = vadd.f32 %v1128_v43, %v1127_v41  ;;  %v1130_v47 = vpop.f32.mrb[6].mxu1  ;;  %v1103_v48 = vpop.f32.mrb[7].mxu0 }
 0x102   :  { %v1131_v49 = vpop.f32.mrb[7].mxu1  ;;  %v1104_v51 = vadd.f32 %v1103_v48, %v1102_v46 }
 0x103   :  { %v798_v50 = vadd.f32 %v1129_v45, %v1101_v44  ;;  %v1132_v52 = vadd.f32 %v1131_v49, %v1130_v47 }
 0x105   :  { %v801_v53 = vadd.f32 %v1132_v52, %v1104_v51 }
 0x116   :  { %v1149_v54 = vpop.f32.mrb[8].mxu0 }
 0x117   :  { %v1150_v55 = vpop.f32.mrb[9].mxu0  ;;  %v1177_v58 = vpop.f32.mrb[8].mxu1 }
 0x118   :  { %v1151_v56 = vadd.f32 %v1150_v55, %v1149_v54  ;;  %v1152_v57 = vpop.f32.mrb[10].mxu0  ;;  %v1178_v62 = vpop.f32.mrb[9].mxu1 }
 0x119   :  { %v1153_v59 = vpop.f32.mrb[11].mxu0  ;;  %v1179_v63 = vadd.f32 %v1178_v62, %v1177_v58  ;;  %v1180_v0 = vpop.f32.mrb[10].mxu1 }
 0x11a   :  { %v839_v60 = vadd.f32 %v1151_v56, %v790_v37  ;;  %v1154_v61 = vadd.f32 %v1153_v59, %v1152_v57  ;;  %v1181_v2 = vpop.f32.mrb[11].mxu1 }
 0x11b   :  { %v1182_v3 = vadd.f32 %v1181_v2, %v1180_v0 }
 0x11c   :  { %v842_v1 = vadd.f32 %v1154_v61, %v793_v39  ;;  %v888_v4 = vadd.f32 %v1179_v63, %v839_v60 }
 0x11e   :  { %v1155_v5 = vpop.f32.mrb[12].mxu0  ;;  %v891_v7 = vadd.f32 %v1182_v3, %v842_v1 }
 0x11f   :  { %v1156_v6 = vpop.f32.mrb[13].mxu0  ;;  %v1183_v10 = vpop.f32.mrb[12].mxu1 }
 0x120   :  { %v1157_v8 = vadd.f32 %v1156_v6, %v1155_v5  ;;  %v1158_v9 = vpop.f32.mrb[14].mxu0  ;;  %v1184_v14 = vpop.f32.mrb[13].mxu1 }
 0x121   :  { %v1159_v11 = vpop.f32.mrb[15].mxu0  ;;  %v1185_v15 = vadd.f32 %v1184_v14, %v1183_v10  ;;  %v1186_v16 = vpop.f32.mrb[14].mxu1 }
 0x122   :  { %v847_v12 = vadd.f32 %v1157_v8, %v798_v50  ;;  %v1160_v13 = vadd.f32 %v1159_v11, %v1158_v9  ;;  %v1187_v18 = vpop.f32.mrb[15].mxu1 }
 0x123   :  { %v1188_v19 = vadd.f32 %v1187_v18, %v1186_v16 }
 0x124   :  { %v850_v17 = vadd.f32 %v1160_v13, %v801_v53  ;;  %v896_v20 = vadd.f32 %v1185_v15, %v847_v12 }
 0x126   :  { %v899_v21 = vadd.f32 %v1188_v19, %v850_v17 }
 0x136   :  { %v1217_v22 = vpop.f32.mrb[16].mxu0 }
 0x137   :  { %v945_v24 = vadd.f32 %v1217_v22, %v896_v20  ;;  %v936_v25 = vpop.f32.mrb[17].mxu0 }
 0x138   :  { %v937_v27 = vadd.f32 %v936_v25, %v888_v4  ;;  %v1218_v28 = vpop.f32.mrb[18].mxu0 }
 0x139   :  { %v960_v29 = vmul.f32 %v1075_v23, %v945_v24  ;;  %v948_v30 = vadd.f32 %v1218_v28, %v899_v21  ;;  %v939_v31 = vpop.f32.mrb[19].mxu0 }
 0x13a   :  { %v958_v32 = vmul.f32 %v1075_v23, %v937_v27  ;;  %v940_v33 = vadd.f32 %v939_v31, %v891_v7 }
 0x13b   :  { %v971_v34 = vadd.f32 %v1076_v26, %v960_v29  ;;  %v961_v35 = vmul.f32 %v1075_v23, %v948_v30 }
 0x13c   :  { %v969_v36 = vadd.f32 %v1076_v26, %v958_v32  ;;  %v959_v37 = vmul.f32 %v1075_v23, %v940_v33 }
 0x13d   :  { %v975_v38 = vmax.f32 %v971_v34, 0.0  ;;  %v972_v39 = vadd.f32 %v1076_v26, %v961_v35 }
 0x13e   :  { %v973_v40 = vmax.f32 %v969_v36, 0.0  ;;  %v970_v41 = vadd.f32 %v1076_v26, %v959_v37 }
 0x13f   :  { %979 = vst [vmem:[%s1634_s4 + $0x10] sm:$0xff] %v975_v38  ;;  %v976_v42 = vmax.f32 %v972_v39, 0.0 }
 0x140   :  { %977 = vst [vmem:[%s1634_s4] sm:$0xff] %v973_v40  ;;  %v974_v43 = vmax.f32 %v970_v41, 0.0 }
 0x141   :  { %980 = vst [vmem:[%s1634_s4 + $0x18] sm:$0xff] %v976_v42 }
 0x142   :  { %978 = vst [vmem:[%s1634_s4 + $0x8] sm:$0xff] %v974_v43 }

// kernel: featurizer_forward.33
= control target key start
LH: loop header
LB: loop body
LE: loop exit
PB: predicated region body
PF: predicated region fallthrough
CT: control target
= control target key end

     0   :  { %s2099_s1 = inlined_call_operand.vmem [shape: bf16[1152,256], index: 1, kind: input, shape index: {}]   ;;  %s2100_s0 = inlined_call_operand.vmem [shape: bf16[16,1152], index: 0, kind: input, shape index: {}]   ;;  %s2101_s2 = inlined_call_operand.vmem [shape: f32[1,256], index: 2, kind: input, shape index: {}]   ;;  %s2102_s3 = inlined_call_operand.vmem [shape: f32[1,256], index: 3, kind: input, shape index: {}]   ;;  %s2103_s4 = inlined_call_operand.vmem [shape: f32[16,256], index: 4, kind: output, shape index: {}]  }
   0x1   :  { %v1367_v0 = vld [vmem:[%s2099_s1 + $0x4] ss:$8 sps:$4 sm:$0xff]   ;;  %v1371_v2 = vld [vmem:[%s2099_s1] ss:$8 sps:$4 sm:$0xff]   ;;  %v1373_v4 = vld [vmem:[%s2099_s1 + $0x14] ss:$8 sps:$4 sm:$0xff]  }
   0x2   :  { %v1369_v1 = vld [vmem:[%s2099_s1 + $0x204] ss:$8 sps:$4 sm:$0xff]   ;;  %938 = vmatprep.subr.bf16.mxu1 %v1367_v0  ;;  %v1372_v3 = vld [vmem:[%s2099_s1 + $0x200] ss:$8 sps:$4 sm:$0xff]   ;;  %v1375_v5 = vld [vmem:[%s2099_s1 + $0x214] ss:$8 sps:$4 sm:$0xff]  }
   0x3   :  { %1024 = vmatprep.subr.bf16.mxu0 %v1369_v1  ;;  %939 = vmatpush1.bf16.msra.mxu1 %v1371_v2  ;;  %v1377_v6 = vld [vmem:[%s2099_s1 + $0x10] ss:$8 sps:$4 sm:$0xff]   ;;  %v1379_v8 = vld [vmem:[%s2099_s1 + $0x24] ss:$8 sps:$4 sm:$0xff]   ;;  %v1383_v10 = vld [vmem:[%s2099_s1 + $0x20] ss:$8 sps:$4 sm:$0xff]  }
   0x4   :  { %1025 = vmatpush1.bf16.msra.mxu0 %v1372_v3  ;;  %940 = vmatprep.subr.bf16.mxu1 %v1373_v4  ;;  %v1378_v7 = vld [vmem:[%s2099_s1 + $0x210] ss:$8 sps:$4 sm:$0xff]   ;;  %v1381_v9 = vld [vmem:[%s2099_s1 + $0x224] ss:$8 sps:$4 sm:$0xff]   ;;  %v1384_v11 = vld [vmem:[%s2099_s1 + $0x220] ss:$8 sps:$4 sm:$0xff]  }
   0x5   :  { %1026 = vmatprep.subr.bf16.mxu0 %v1375_v5  ;;  %v1385_v12 = vld [vmem:[%s2099_s1 + $0x34] ss:$8 sps:$4 sm:$0xff]   ;;  %v1389_v14 = vld [vmem:[%s2099_s1 + $0x30] ss:$8 sps:$4 sm:$0xff]   ;;  %v1391_v16 = vld [vmem:[%s2099_s1 + $0x44] ss:$8 sps:$4 sm:$0xff]  }
   0x6   :  { %v1387_v13 = vld [vmem:[%s2099_s1 + $0x234] ss:$8 sps:$4 sm:$0xff]   ;;  %v1390_v15 = vld [vmem:[%s2099_s1 + $0x230] ss:$8 sps:$4 sm:$0xff]   ;;  %v1393_v17 = vld [vmem:[%s2099_s1 + $0x244] ss:$8 sps:$4 sm:$0xff]  }
   0x7   :  { %941 = vmatpush1.bf16.msra.mxu1 %v1377_v6  ;;  %v1395_v18 = vld [vmem:[%s2099_s1 + $0x40] ss:$8 sps:$4 sm:$0xff]   ;;  %v1397_v20 = vld [vmem:[%s2099_s1 + $0x54] ss:$8 sps:$4 sm:$0xff]   ;;  %v1401_v22 = vld [vmem:[%s2099_s1 + $0x50] ss:$8 sps:$4 sm:$0xff]  }
   0x8   :  { %1027 = vmatpush1.bf16.msra.mxu0 %v1378_v7  ;;  %942 = vmatprep.subr.bf16.mxu1 %v1379_v8  ;;  %v1396_v19 = vld [vmem:[%s2099_s1 + $0x240] ss:$8 sps:$4 sm:$0xff]   ;;  %v1399_v21 = vld [vmem:[%s2099_s1 + $0x254] ss:$8 sps:$4 sm:$0xff]   ;;  %v1402_v23 = vld [vmem:[%s2099_s1 + $0x250] ss:$8 sps:$4 sm:$0xff]  }
   0x9   :  { %1028 = vmatprep.subr.bf16.mxu0 %v1381_v9  ;;  %v1403_v24 = vld [vmem:[%s2099_s1 + $0x64] ss:$8 sps:$4 sm:$0xff]   ;;  %v1407_v26 = vld [vmem:[%s2099_s1 + $0x60] ss:$8 sps:$4 sm:$0xff]   ;;  %v1409_v28 = vld [vmem:[%s2099_s1 + $0x74] ss:$8 sps:$4 sm:$0xff]  }
   0xa   :  { %v1405_v25 = vld [vmem:[%s2099_s1 + $0x264] ss:$8 sps:$4 sm:$0xff]   ;;  %v1408_v27 = vld [vmem:[%s2099_s1 + $0x260] ss:$8 sps:$4 sm:$0xff]   ;;  %v1411_v29 = vld [vmem:[%s2099_s1 + $0x274] ss:$8 sps:$4 sm:$0xff]  }
   0xb   :  { %943 = vmatpush1.bf16.msra.mxu1 %v1383_v10  ;;  %v1413_v30 = vld [vmem:[%s2099_s1 + $0x70] ss:$8 sps:$4 sm:$0xff]   ;;  %v1415_v32 = vld [vmem:[%s2099_s1 + $0x84] ss:$8 sps:$4 sm:$0xff]   ;;  %v1419_v34 = vld [vmem:[%s2099_s1 + $0x80] ss:$8 sps:$4 sm:$0xff]  }
   0xc   :  { %1029 = vmatpush1.bf16.msra.mxu0 %v1384_v11  ;;  %944 = vmatprep.subr.bf16.mxu1 %v1385_v12  ;;  %v1414_v31 = vld [vmem:[%s2099_s1 + $0x270] ss:$8 sps:$4 sm:$0xff]   ;;  %v1417_v33 = vld [vmem:[%s2099_s1 + $0x284] ss:$8 sps:$4 sm:$0xff]   ;;  %v1420_v35 = vld [vmem:[%s2099_s1 + $0x280] ss:$8 sps:$4 sm:$0xff]  }
   0xd   :  { %1030 = vmatprep.subr.bf16.mxu0 %v1387_v13  ;;  %v1421_v36 = vld [vmem:[%s2099_s1 + $0x94] ss:$8 sps:$4 sm:$0xff]   ;;  %v1425_v38 = vld [vmem:[%s2099_s1 + $0x90] ss:$8 sps:$4 sm:$0xff]   ;;  %v1427_v40 = vld [vmem:[%s2099_s1 + $0xa4] ss:$8 sps:$4 sm:$0xff]  }
   0xe   :  { %v1423_v37 = vld [vmem:[%s2099_s1 + $0x294] ss:$8 sps:$4 sm:$0xff]   ;;  %v1426_v39 = vld [vmem:[%s2099_s1 + $0x290] ss:$8 sps:$4 sm:$0xff]   ;;  %v1429_v41 = vld [vmem:[%s2099_s1 + $0x2a4] ss:$8 sps:$4 sm:$0xff]  }
   0xf   :  { %945 = vmatpush1.bf16.msra.mxu1 %v1389_v14  ;;  %v1431_v42 = vld [vmem:[%s2099_s1 + $0xa0] ss:$8 sps:$4 sm:$0xff]   ;;  %v1433_v44 = vld [vmem:[%s2099_s1 + $0xb4] ss:$8 sps:$4 sm:$0xff]   ;;  %v1437_v46 = vld [vmem:[%s2099_s1 + $0xb0] ss:$8 sps:$4 sm:$0xff]  }
  0x10   :  { %1031 = vmatpush1.bf16.msra.mxu0 %v1390_v15  ;;  %946 = vmatprep.subr.bf16.mxu1 %v1391_v16  ;;  %v1432_v43 = vld [vmem:[%s2099_s1 + $0x2a0] ss:$8 sps:$4 sm:$0xff]   ;;  %v1435_v45 = vld [vmem:[%s2099_s1 + $0x2b4] ss:$8 sps:$4 sm:$0xff]   ;;  %v1438_v47 = vld [vmem:[%s2099_s1 + $0x2b0] ss:$8 sps:$4 sm:$0xff]  }
  0x11   :  { %1032 = vmatprep.subr.bf16.mxu0 %v1393_v17  ;;  %v1465_v48 = vld [vmem:[%s2100_s0 + $0x4] ss:$36 sps:$4 sm:$0xff]   ;;  %v1471_v51 = vld [vmem:[%s2100_s0 + $0x14] ss:$36 sps:$4 sm:$0xff]  }
  0x12   :  { %v1439_v49 = vld [vmem:[%s2099_s1 + $0xc4] ss:$8 sps:$4 sm:$0xff]   ;;  %970 = vmatprep.mubr.bf16.mxu1 %v1465_v48  ;;  %v1443_v52 = vld [vmem:[%s2099_s1 + $0xc0] ss:$8 sps:$4 sm:$0xff]   ;;  %v1445_v54 = vld [vmem:[%s2099_s1 + $0xd4] ss:$8 sps:$4 sm:$0xff]   ;;  %1056 = vmatprep.mubr.bf16.mxu0 %v1471_v51 }
  0x13   :  { %947 = vmatpush1.bf16.msra.mxu1 %v1395_v18  ;;  %v1441_v50 = vld [vmem:[%s2099_s1 + $0x2c4] ss:$8 sps:$4 sm:$0xff]   ;;  %v1444_v53 = vld [vmem:[%s2099_s1 + $0x2c0] ss:$8 sps:$4 sm:$0xff]   ;;  %v1447_v55 = vld [vmem:[%s2099_s1 + $0x2d4] ss:$8 sps:$4 sm:$0xff]  }
  0x14   :  { %1033 = vmatpush1.bf16.msra.mxu0 %v1396_v19  ;;  %948 = vmatprep.subr.bf16.mxu1 %v1397_v20  ;;  %v1449_v56 = vld [vmem:[%s2099_s1 + $0xd0] ss:$8 sps:$4 sm:$0xff]   ;;  %v1451_v58 = vld [vmem:[%s2099_s1 + $0xe4] ss:$8 sps:$4 sm:$0xff]   ;;  %v1455_v60 = vld [vmem:[%s2099_s1 + $0xe0] ss:$8 sps:$4 sm:$0xff]  }
  0x15   :  { %1034 = vmatprep.subr.bf16.mxu0 %v1399_v21  ;;  %v1450_v57 = vld [vmem:[%s2099_s1 + $0x2d0] ss:$8 sps:$4 sm:$0xff]   ;;  %v1453_v59 = vld [vmem:[%s2099_s1 + $0x2e4] ss:$8 sps:$4 sm:$0xff]   ;;  %v1456_v61 = vld [vmem:[%s2099_s1 + $0x2e0] ss:$8 sps:$4 sm:$0xff]  }
  0x16   :  { %v1457_v62 = vld [vmem:[%s2099_s1 + $0xf4] ss:$8 sps:$4 sm:$0xff]   ;;  %v1461_v0 = vld [vmem:[%s2099_s1 + $0xf0] ss:$8 sps:$4 sm:$0xff]   ;;  %v1468_v2 = vld [vmem:[%s2099_s1 + $0x104] ss:$8 sps:$4 sm:$0xff]  }
  0x17   :  { %949 = vmatpush1.bf16.msra.mxu1 %v1401_v22  ;;  %v1459_v63 = vld [vmem:[%s2099_s1 + $0x2f4] ss:$8 sps:$4 sm:$0xff]   ;;  %v1462_v1 = vld [vmem:[%s2099_s1 + $0x2f0] ss:$8 sps:$4 sm:$0xff]   ;;  %v1474_v3 = vld [vmem:[%s2099_s1 + $0x304] ss:$8 sps:$4 sm:$0xff]  }
  0x18   :  { %1035 = vmatpush1.bf16.msra.mxu0 %v1402_v23  ;;  %950 = vmatprep.subr.bf16.mxu1 %v1403_v24  ;;  %v1463_v4 = vld [vmem:[%s2100_s0] ss:$36 sps:$4 sm:$0xff]   ;;  %v1469_v6 = vld [vmem:[%s2100_s0 + $0x10] ss:$36 sps:$4 sm:$0xff]  }
  0x19   :  { %1036 = vmatprep.subr.bf16.mxu0 %v1405_v25  ;;  %v1466_v5 = vld [vmem:[%s2099_s1 + $0x100] ss:$8 sps:$4 sm:$0xff]   ;;  %v1477_v8 = vld [vmem:[%s2099_s1 + $0x114] ss:$8 sps:$4 sm:$0xff]   ;;  %v1475_v10 = vld [vmem:[%s2099_s1 + $0x110] ss:$8 sps:$4 sm:$0xff]  }
  0x1a   :  { %v1472_v7 = vld [vmem:[%s2099_s1 + $0x300] ss:$8 sps:$4 sm:$0xff]   ;;  %v1480_v9 = vld [vmem:[%s2099_s1 + $0x314] ss:$8 sps:$4 sm:$0xff]   ;;  %v1478_v11 = vld [vmem:[%s2099_s1 + $0x310] ss:$8 sps:$4 sm:$0xff]  }
  0x1b   :  { %951 = vmatpush1.bf16.msra.mxu1 %v1407_v26  ;;  %v1483_v12 = vld [vmem:[%s2099_s1 + $0x124] ss:$8 sps:$4 sm:$0xff]   ;;  %v1481_v14 = vld [vmem:[%s2099_s1 + $0x120] ss:$8 sps:$4 sm:$0xff]   ;;  %v1489_v16 = vld [vmem:[%s2099_s1 + $0x134] ss:$8 sps:$4 sm:$0xff]  }
  0x1c   :  { %1037 = vmatpush1.bf16.msra.mxu0 %v1408_v27  ;;  %952 = vmatprep.subr.bf16.mxu1 %v1409_v28  ;;  %v1486_v13 = vld [vmem:[%s2099_s1 + $0x324] ss:$8 sps:$4 sm:$0xff]   ;;  %v1484_v15 = vld [vmem:[%s2099_s1 + $0x320] ss:$8 sps:$4 sm:$0xff]   ;;  %v1492_v17 = vld [vmem:[%s2099_s1 + $0x334] ss:$8 sps:$4 sm:$0xff]  }
  0x1d   :  { %1038 = vmatprep.subr.bf16.mxu0 %v1411_v29  ;;  %v1487_v18 = vld [vmem:[%s2099_s1 + $0x130] ss:$8 sps:$4 sm:$0xff]   ;;  %v1495_v20 = vld [vmem:[%s2099_s1 + $0x144] ss:$8 sps:$4 sm:$0xff]   ;;  %v1493_v22 = vld [vmem:[%s2099_s1 + $0x140] ss:$8 sps:$4 sm:$0xff]  }
  0x1e   :  { %v1490_v19 = vld [vmem:[%s2099_s1 + $0x330] ss:$8 sps:$4 sm:$0xff]   ;;  %v1498_v21 = vld [vmem:[%s2099_s1 + $0x344] ss:$8 sps:$4 sm:$0xff]   ;;  %v1496_v23 = vld [vmem:[%s2099_s1 + $0x340] ss:$8 sps:$4 sm:$0xff]  }
  0x1f   :  { %953 = vmatpush1.bf16.msra.mxu1 %v1413_v30  ;;  %v1501_v24 = vld [vmem:[%s2099_s1 + $0x154] ss:$8 sps:$4 sm:$0xff]   ;;  %v1499_v26 = vld [vmem:[%s2099_s1 + $0x150] ss:$8 sps:$4 sm:$0xff]   ;;  %v1507_v28 = vld [vmem:[%s2099_s1 + $0x164] ss:$8 sps:$4 sm:$0xff]  }
  0x20   :  { %1039 = vmatpush1.bf16.msra.mxu0 %v1414_v31  ;;  %954 = vmatprep.subr.bf16.mxu1 %v1415_v32  ;;  %v1504_v25 = vld [vmem:[%s2099_s1 + $0x354] ss:$8 sps:$4 sm:$0xff]   ;;  %v1502_v27 = vld [vmem:[%s2099_s1 + $0x350] ss:$8 sps:$4 sm:$0xff]   ;;  %v1510_v29 = vld [vmem:[%s2099_s1 + $0x364] ss:$8 sps:$4 sm:$0xff]  }
  0x21   :  { %1040 = vmatprep.subr.bf16.mxu0 %v1417_v33  ;;  %v1505_v30 = vld [vmem:[%s2099_s1 + $0x160] ss:$8 sps:$4 sm:$0xff]   ;;  %v1513_v32 = vld [vmem:[%s2099_s1 + $0x174] ss:$8 sps:$4 sm:$0xff]  }
  0x22   :  { %v1508_v31 = vld [vmem:[%s2099_s1 + $0x360] ss:$8 sps:$4 sm:$0xff]   ;;  %v1516_v33 = vld [vmem:[%s2099_s1 + $0x374] ss:$8 sps:$4 sm:$0xff]  }
  0x23   :  { %955 = vmatpush1.bf16.msra.mxu1 %v1419_v34  ;;  %v1567_v34 = vld [vmem:[%s2100_s0 + $0xc] ss:$36 sps:$4 sm:$0xff]   ;;  %v1529_v48 = vld [vmem:[%s2099_s1 + $0x1a0] ss:$8 sps:$4 sm:$0xff]   ;;  %v1540_v51 = vld [vmem:[%s2099_s1 + $0x3b4] ss:$8 sps:$4 sm:$0xff]  }
  0x24   :  { %1041 = vmatpush1.bf16.msra.mxu0 %v1420_v35  ;;  %956 = vmatprep.subr.bf16.mxu1 %v1421_v36  ;;  %v1570_v35 = vld [vmem:[%s2100_s0 + $0x1c] ss:$36 sps:$4 sm:$0xff]   ;;  %v1511_v36 = vld [vmem:[%s2099_s1 + $0x170] ss:$8 sps:$4 sm:$0xff]  }
  0x25   :  { %1042 = vmatprep.subr.bf16.mxu0 %v1423_v37  ;;  %v1514_v37 = vld [vmem:[%s2099_s1 + $0x370] ss:$8 sps:$4 sm:$0xff]  }
  0x27   :  { %957 = vmatpush1.bf16.msra.mxu1 %v1425_v38  ;;  %v1519_v38 = vld [vmem:[%s2099_s1 + $0x184] ss:$8 sps:$4 sm:$0xff]  }
  0x28   :  { %1043 = vmatpush1.bf16.msra.mxu0 %v1426_v39  ;;  %958 = vmatprep.subr.bf16.mxu1 %v1427_v40  ;;  %v1522_v39 = vld [vmem:[%s2099_s1 + $0x384] ss:$8 sps:$4 sm:$0xff]   ;;  %v1517_v40 = vld [vmem:[%s2099_s1 + $0x180] ss:$8 sps:$4 sm:$0xff]  }
  0x29   :  { %1044 = vmatprep.subr.bf16.mxu0 %v1429_v41  ;;  %v1520_v41 = vld [vmem:[%s2099_s1 + $0x380] ss:$8 sps:$4 sm:$0xff]  }
  0x2b   :  { %959 = vmatpush1.bf16.msra.mxu1 %v1431_v42  ;;  %v1525_v42 = vld [vmem:[%s2099_s1 + $0x194] ss:$8 sps:$4 sm:$0xff]  }
  0x2c   :  { %1045 = vmatpush1.bf16.msra.mxu0 %v1432_v43  ;;  %960 = vmatprep.subr.bf16.mxu1 %v1433_v44  ;;  %v1528_v43 = vld [vmem:[%s2099_s1 + $0x394] ss:$8 sps:$4 sm:$0xff]   ;;  %v1523_v44 = vld [vmem:[%s2099_s1 + $0x190] ss:$8 sps:$4 sm:$0xff]  }
  0x2d   :  { %1046 = vmatprep.subr.bf16.mxu0 %v1435_v45  ;;  %v1526_v45 = vld [vmem:[%s2099_s1 + $0x390] ss:$8 sps:$4 sm:$0xff]  }
  0x2f   :  { %961 = vmatpush1.bf16.msra.mxu1 %v1437_v46  ;;  %v1531_v46 = vld [vmem:[%s2099_s1 + $0x1a4] ss:$8 sps:$4 sm:$0xff]  }
  0x30   :  { %1047 = vmatpush1.bf16.msra.mxu0 %v1438_v47  ;;  %962 = vmatprep.subr.bf16.mxu1 %v1439_v49  ;;  %v1534_v47 = vld [vmem:[%s2099_s1 + $0x3a4] ss:$8 sps:$4 sm:$0xff]   ;;  %v1532_v49 = vld [vmem:[%s2099_s1 + $0x3a0] ss:$8 sps:$4 sm:$0xff]  }
  0x31   :  { %1048 = vmatprep.subr.bf16.mxu0 %v1441_v50  ;;  %v1537_v50 = vld [vmem:[%s2099_s1 + $0x1b4] ss:$8 sps:$4 sm:$0xff]  }
  0x33   :  { %963 = vmatpush1.bf16.msra.mxu1 %v1443_v52  ;;  %v1535_v52 = vld [vmem:[%s2099_s1 + $0x1b0] ss:$8 sps:$4 sm:$0xff]  }
  0x34   :  { %1049 = vmatpush1.bf16.msra.mxu0 %v1444_v53  ;;  %964 = vmatprep.subr.bf16.mxu1 %v1445_v54  ;;  %v1538_v53 = vld [vmem:[%s2099_s1 + $0x3b0] ss:$8 sps:$4 sm:$0xff]   ;;  %v1543_v54 = vld [vmem:[%s2099_s1 + $0x1c4] ss:$8 sps:$4 sm:$0xff]  }
  0x35   :  { %1050 = vmatprep.subr.bf16.mxu0 %v1447_v55  ;;  %v1546_v55 = vld [vmem:[%s2099_s1 + $0x3c4] ss:$8 sps:$4 sm:$0xff]  }
  0x37   :  { %965 = vmatpush1.bf16.msra.mxu1 %v1449_v56  ;;  %v1541_v56 = vld [vmem:[%s2099_s1 + $0x1c0] ss:$8 sps:$4 sm:$0xff]  }
  0x38   :  { %1051 = vmatpush1.bf16.msra.mxu0 %v1450_v57  ;;  %966 = vmatprep.subr.bf16.mxu1 %v1451_v58  ;;  %v1544_v57 = vld [vmem:[%s2099_s1 + $0x3c0] ss:$8 sps:$4 sm:$0xff]   ;;  %v1549_v58 = vld [vmem:[%s2099_s1 + $0x1d4] ss:$8 sps:$4 sm:$0xff]  }
  0x39   :  { %1052 = vmatprep.subr.bf16.mxu0 %v1453_v59  ;;  %v1552_v59 = vld [vmem:[%s2099_s1 + $0x3d4] ss:$8 sps:$4 sm:$0xff]  }
  0x3b   :  { %967 = vmatpush1.bf16.msra.mxu1 %v1455_v60  ;;  %v1547_v60 = vld [vmem:[%s2099_s1 + $0x1d0] ss:$8 sps:$4 sm:$0xff]  }
  0x3c   :  { %1053 = vmatpush1.bf16.msra.mxu0 %v1456_v61  ;;  %968 = vmatprep.subr.bf16.mxu1 %v1457_v62  ;;  %v1550_v61 = vld [vmem:[%s2099_s1 + $0x3d0] ss:$8 sps:$4 sm:$0xff]   ;;  %v1555_v62 = vld [vmem:[%s2099_s1 + $0x1e4] ss:$8 sps:$4 sm:$0xff]  }
  0x3d   :  { %1054 = vmatprep.subr.bf16.mxu0 %v1459_v63  ;;  %v1558_v63 = vld [vmem:[%s2099_s1 + $0x3e4] ss:$8 sps:$4 sm:$0xff]  }
  0x3f   :  { %969 = vmatpush1.bf16.msra.mxu1 %v1461_v0  ;;  %v1553_v0 = vld [vmem:[%s2099_s1 + $0x1e0] ss:$8 sps:$4 sm:$0xff]  }
  0x40   :  { %1055 = vmatpush1.bf16.msra.mxu0 %v1462_v1  ;;  %981 = vmatprep.subr.bf16.mxu1 %v1468_v2  ;;  %v1556_v1 = vld [vmem:[%s2099_s1 + $0x3e0] ss:$8 sps:$4 sm:$0xff]   ;;  %v1561_v2 = vld [vmem:[%s2099_s1 + $0x1f4] ss:$8 sps:$4 sm:$0xff]  }
  0x41   :  { %1067 = vmatprep.subr.bf16.mxu0 %v1474_v3  ;;  %v1564_v3 = vld [vmem:[%s2099_s1 + $0x3f4] ss:$8 sps:$4 sm:$0xff]  }
  0x42   :  { %971 = vmatmul.mubr.bf16.vlgmr.msra.gmra.mrb[0].mxu1 %v1463_v4  ;;  %v1559_v4 = vld [vmem:[%s2099_s1 + $0x1f0] ss:$8 sps:$4 sm:$0xff]  }
  0x43   :  { %1057 = vmatmul.mubr.bf16.vlgmr.msra.gmra.mrb[0].mxu0 %v1469_v6  ;;  %982 = vmatpush1.bf16.msra.mxu1 %v1466_v5  ;;  %v1562_v5 = vld [vmem:[%s2099_s1 + $0x3f0] ss:$8 sps:$4 sm:$0xff]   ;;  %v1573_v6 = vld [vmem:[%s2099_s1 + $0x404] ss:$8 sps:$4 sm:$0xff]  }
  0x44   :  { %1068 = vmatpush1.bf16.msra.mxu0 %v1472_v7  ;;  %983 = vmatprep.subr.bf16.mxu1 %v1477_v8  ;;  %v1565_v7 = vld [vmem:[%s2100_s0 + $0x8] ss:$36 sps:$4 sm:$0xff]   ;;  %v1568_v8 = vld [vmem:[%s2100_s0 + $0x18] ss:$36 sps:$4 sm:$0xff]  }
  0x45   :  { %1069 = vmatprep.subr.bf16.mxu0 %v1480_v9  ;;  %1013 = vmatprep.mubr.bf16.mxu1 %v1567_v34  ;;  %v1571_v9 = vld [vmem:[%s2099_s1 + $0x400] ss:$8 sps:$4 sm:$0xff]  }
  0x46   :  { %1099 = vmatprep.mubr.bf16.mxu0 %v1570_v35  ;;  %v1169_v35 = vld [vmem:[%s2102_s3] sm:$0x3] }
  0x47   :  { %984 = vmatpush1.bf16.msra.mxu1 %v1475_v10  ;;  %v1576_v10 = vld [vmem:[%s2099_s1 + $0x414] ss:$8 sps:$4 sm:$0xff]  }
  0x48   :  { %1070 = vmatpush1.bf16.msra.mxu0 %v1478_v11  ;;  %985 = vmatprep.subr.bf16.mxu1 %v1483_v12  ;;  %v1574_v11 = vld [vmem:[%s2099_s1 + $0x410] ss:$8 sps:$4 sm:$0xff]   ;;  %v1596_v12 = vmov 0  }
  0x49   :  { %1071 = vmatprep.subr.bf16.mxu0 %v1486_v13  ;;  %v1579_v13 = vld [vmem:[%s2099_s1 + $0x424] ss:$8 sps:$4 sm:$0xff]  }
  0x4b   :  { %986 = vmatpush1.bf16.msra.mxu1 %v1481_v14  ;;  %v1577_v14 = vld [vmem:[%s2099_s1 + $0x420] ss:$8 sps:$4 sm:$0xff]  }
  0x4c   :  { %1072 = vmatpush1.bf16.msra.mxu0 %v1484_v15  ;;  %987 = vmatprep.subr.bf16.mxu1 %v1489_v16  ;;  %v1582_v15 = vld [vmem:[%s2099_s1 + $0x434] ss:$8 sps:$4 sm:$0xff]   ;;  %v1580_v16 = vld [vmem:[%s2099_s1 + $0x430] ss:$8 sps:$4 sm:$0xff]  }
  0x4d   :  { %1073 = vmatprep.subr.bf16.mxu0 %v1492_v17  ;;  %v1585_v17 = vld [vmem:[%s2099_s1 + $0x444] ss:$8 sps:$4 sm:$0xff]  }
  0x4f   :  { %988 = vmatpush1.bf16.msra.mxu1 %v1487_v18  ;;  %v1583_v18 = vld [vmem:[%s2099_s1 + $0x440] ss:$8 sps:$4 sm:$0xff]  }
  0x50   :  { %1074 = vmatpush1.bf16.msra.mxu0 %v1490_v19  ;;  %989 = vmatprep.subr.bf16.mxu1 %v1495_v20  ;;  %v1588_v19 = vld [vmem:[%s2099_s1 + $0x454] ss:$8 sps:$4 sm:$0xff]   ;;  %v1586_v20 = vld [vmem:[%s2099_s1 + $0x450] ss:$8 sps:$4 sm:$0xff]  }
  0x51   :  { %1075 = vmatprep.subr.bf16.mxu0 %v1498_v21  ;;  %v1591_v21 = vld [vmem:[%s2099_s1 + $0x464] ss:$8 sps:$4 sm:$0xff]  }
  0x53   :  { %990 = vmatpush1.bf16.msra.mxu1 %v1493_v22  ;;  %v1589_v22 = vld [vmem:[%s2099_s1 + $0x460] ss:$8 sps:$4 sm:$0xff]  }
  0x54   :  { %1076 = vmatpush1.bf16.msra.mxu0 %v1496_v23  ;;  %991 = vmatprep.subr.bf16.mxu1 %v1501_v24  ;;  %v1594_v23 = vld [vmem:[%s2099_s1 + $0x474] ss:$8 sps:$4 sm:$0xff]   ;;  %v1592_v24 = vld [vmem:[%s2099_s1 + $0x470] ss:$8 sps:$4 sm:$0xff]  }
  0x55   :  { %1077 = vmatprep.subr.bf16.mxu0 %v1504_v25  ;;  %v1595_v25 = vld [vmem:[%s2100_s0 + $0x20] ss:$36 sps:$4 sm:$0xff]  }
  0x57   :  { %992 = vmatpush1.bf16.msra.mxu1 %v1499_v26 }
  0x58   :  { %1078 = vmatpush1.bf16.msra.mxu0 %v1502_v27  ;;  %993 = vmatprep.subr.bf16.mxu1 %v1507_v28 }
  0x59   :  { %1079 = vmatprep.subr.bf16.mxu0 %v1510_v29 }
  0x5b   :  { %994 = vmatpush1.bf16.msra.mxu1 %v1505_v30  ;;  %v1155_v30 = vlaneseq }
  0x5c   :  { %1080 = vmatpush1.bf16.msra.mxu0 %v1508_v31  ;;  %995 = vmatprep.subr.bf16.mxu1 %v1513_v32 }
  0x5d   :  { %1081 = vmatprep.subr.bf16.mxu0 %v1516_v33  ;;  %v1156_v31 = vshrl.u32 %v1155_v30, 7  ;;  %v1153_v33 = vld [vmem:[%s2101_s2] sm:$0x3] }
  0x5f   :  { %996 = vmatpush1.bf16.msra.mxu1 %v1511_v36  ;;  %v1157_v32 = vsub.s32 0, %v1156_v31  ;;  %v1161_v34 = vsub.s32 1, %v1156_v31 }
  0x60   :  { %1082 = vmatpush1.bf16.msra.mxu0 %v1514_v37  ;;  %997 = vmatprep.subr.bf16.mxu1 %v1519_v38 }
  0x61   :  { %1083 = vmatprep.subr.bf16.mxu0 %v1522_v39  ;;  %v1158_v36 = vrot.slane %v1153_v33, %v1157_v32  ;;  %v1162_v38 = vrot.slane %v1153_v33, %v1161_v34 }
  0x63   :  { %998 = vmatpush1.bf16.msra.mxu1 %v1517_v40  ;;  %v1174_v40 = vrot.slane %v1169_v35, %v1157_v32 }
  0x64   :  { %1084 = vmatpush1.bf16.msra.mxu0 %v1520_v41  ;;  %999 = vmatprep.subr.bf16.mxu1 %v1525_v42 }
  0x65   :  { %1085 = vmatprep.subr.bf16.mxu0 %v1528_v43  ;;  %v1178_v43 = vrot.slane %v1169_v35, %v1161_v34 }
  0x67   :  { %1000 = vmatpush1.bf16.msra.mxu1 %v1523_v44 }
  0x68   :  { %1086 = vmatpush1.bf16.msra.mxu0 %v1526_v45  ;;  %1001 = vmatprep.subr.bf16.mxu1 %v1531_v46 }
  0x69   :  { %1087 = vmatprep.subr.bf16.mxu0 %v1534_v47 }
  0x6b   :  { %1002 = vmatpush1.bf16.msra.mxu1 %v1529_v48 }
  0x6c   :  { %1088 = vmatpush1.bf16.msra.mxu0 %v1532_v49  ;;  %1003 = vmatprep.subr.bf16.mxu1 %v1537_v50 }
  0x6d   :  { %1089 = vmatprep.subr.bf16.mxu0 %v1540_v51 }
  0x6f   :  { %1004 = vmatpush1.bf16.msra.mxu1 %v1535_v52 }
  0x70   :  { %1090 = vmatpush1.bf16.msra.mxu0 %v1538_v53  ;;  %1005 = vmatprep.subr.bf16.mxu1 %v1543_v54 }
  0x71   :  { %1091 = vmatprep.subr.bf16.mxu0 %v1546_v55 }
  0x73   :  { %1006 = vmatpush1.bf16.msra.mxu1 %v1541_v56 }
  0x74   :  { %1092 = vmatpush1.bf16.msra.mxu0 %v1544_v57  ;;  %1007 = vmatprep.subr.bf16.mxu1 %v1549_v58 }
  0x75   :  { %1093 = vmatprep.subr.bf16.mxu0 %v1552_v59 }
  0x77   :  { %1008 = vmatpush1.bf16.msra.mxu1 %v1547_v60 }
  0x78   :  { %1094 = vmatpush1.bf16.msra.mxu0 %v1550_v61  ;;  %1009 = vmatprep.subr.bf16.mxu1 %v1555_v62 }
  0x79   :  { %1095 = vmatprep.subr.bf16.mxu0 %v1558_v63 }
  0x7b   :  { %1010 = vmatpush1.bf16.msra.mxu1 %v1553_v0 }
  0x7c   :  { %1096 = vmatpush1.bf16.msra.mxu0 %v1556_v1  ;;  %1011 = vmatprep.subr.bf16.mxu1 %v1561_v2 }
  0x7d   :  { %1097 = vmatprep.subr.bf16.mxu0 %v1564_v3 }
  0x7f   :  { %1012 = vmatpush1.bf16.msra.mxu1 %v1559_v4 }
  0x80   :  { %1098 = vmatpush1.bf16.msra.mxu0 %v1562_v5 }
  0x81   :  { %1110 = vmatprep.subr.bf16.mxu0 %v1573_v6 }
  0x82   :  { %1014 = vmatmul.mubr.bf16.vlgmr.msra.gmra.mrb[0].mxu1 %v1565_v7 }
  0x83   :  { %1100 = vmatmul.mubr.bf16.vlgmr.msra.gmra.mrb[0].mxu0 %v1568_v8 }
  0x84   :  { %1111 = vmatpush1.bf16.msra.mxu0 %v1571_v9  ;;  %1142 = vmatprep.mubr.bf16.mxu0 %v1596_v12 }
  0x85   :  { %1112 = vmatprep.subr.bf16.mxu0 %v1576_v10 }
  0x88   :  { %1113 = vmatpush1.bf16.msra.mxu0 %v1574_v11 }
  0x89   :  { %1114 = vmatprep.subr.bf16.mxu0 %v1579_v13 }
  0x8c   :  { %1115 = vmatpush1.bf16.msra.mxu0 %v1577_v14 }
  0x8d   :  { %1116 = vmatprep.subr.bf16.mxu0 %v1582_v15 }
  0x90   :  { %1117 = vmatpush1.bf16.msra.mxu0 %v1580_v16 }
  0x91   :  { %1118 = vmatprep.subr.bf16.mxu0 %v1585_v17 }
  0x94   :  { %1119 = vmatpush1.bf16.msra.mxu0 %v1583_v18 }
  0x95   :  { %1120 = vmatprep.subr.bf16.mxu0 %v1588_v19 }
  0x98   :  { %1121 = vmatpush1.bf16.msra.mxu0 %v1586_v20 }
  0x99   :  { %1122 = vmatprep.subr.bf16.mxu0 %v1591_v21 }
  0x9c   :  { %1123 = vmatpush1.bf16.msra.mxu0 %v1589_v22 }
  0x9d   :  { %1124 = vmatprep.subr.bf16.mxu0 %v1594_v23 }
  0xa0   :  { %1125 = vmatpush1.bf16.msra.mxu0 %v1592_v24 }
  0xa3   :  { %1143 = vmatmul.mubr.bf16.vlgmr.msra.gmra.mrb[0].mxu0 %v1595_v25 }
 0x155   :  { %v1015_v26 = vpop.f32.mrb[0].mxu1 }
 0x156   :  { %v1017_v27 = vpop.f32.mrb[1].mxu1 }
 0x157   :  { %v1019_v28 = vpop.f32.mrb[2].mxu1 }
 0x158   :  { %v1021_v29 = vpop.f32.mrb[3].mxu1 }
 0x176   :  { %v1144_v37 = vpop.f32.mrb[0].mxu0 }
 0x177   :  { %v1350_v39 = vadd.f32 %v1144_v37, %v1015_v26  ;;  %v1146_v41 = vpop.f32.mrb[1].mxu0 }
 0x178   :  { %v1351_v42 = vadd.f32 %v1146_v41, %v1017_v27  ;;  %v1148_v44 = vpop.f32.mrb[2].mxu0 }
 0x179   :  { %v1165_v45 = vmul.f32 %v1350_v39, %v1158_v36  ;;  %v1352_v46 = vadd.f32 %v1148_v44, %v1019_v28  ;;  %v1150_v47 = vpop.f32.mrb[3].mxu0 }
 0x17a   :  { %v1166_v48 = vmul.f32 %v1351_v42, %v1162_v38  ;;  %v1353_v49 = vadd.f32 %v1150_v47, %v1021_v29 }
 0x17b   :  { %v1181_v50 = vadd.f32 %v1174_v40, %v1165_v45  ;;  %v1167_v51 = vmul.f32 %v1352_v46, %v1158_v36 }
 0x17c   :  { %v1182_v52 = vadd.f32 %v1178_v43, %v1166_v48  ;;  %v1168_v53 = vmul.f32 %v1353_v49, %v1162_v38 }
 0x17d   :  { %v1185_v54 = vmax.f32 %v1181_v50, 0.0  ;;  %v1183_v55 = vadd.f32 %v1174_v40, %v1167_v51 }
 0x17e   :  { %v1186_v56 = vmax.f32 %v1182_v52, 0.0  ;;  %v1184_v57 = vadd.f32 %v1178_v43, %v1168_v53 }
 0x17f   :  { %1189 = vst [vmem:[%s2103_s4] sm:$0xff] %v1185_v54  ;;  %v1187_v58 = vmax.f32 %v1183_v55, 0.0 }
 0x180   :  { %1190 = vst [vmem:[%s2103_s4 + $0x8] sm:$0xff] %v1186_v56  ;;  %v1188_v59 = vmax.f32 %v1184_v57, 0.0 }
 0x181   :  { %1191 = vst [vmem:[%s2103_s4 + $0x10] sm:$0xff] %v1187_v58 }
 0x182   :  { %1192 = vst [vmem:[%s2103_s4 + $0x18] sm:$0xff] %v1188_v59 }

// kernel: featurizer_forward.34
= control target key start
LH: loop header
LB: loop body
LE: loop exit
PB: predicated region body
PF: predicated region fallthrough
CT: control target
= control target key end

     0   :  { %v248_v1 = vmov 0   ;;  %v167_v18 = vlaneseq  ;;  %s343_s1 = inlined_call_operand.vmem [shape: bf16[128,256], index: 1, kind: input, shape index: {}]   ;;  %s344_s0 = inlined_call_operand.vmem [shape: bf16[16,128], index: 0, kind: input, shape index: {}]   ;;  %s345_s2 = inlined_call_operand.vmem [shape: f32[1,256], index: 2, kind: input, shape index: {}]   ;;  %s346_s3 = inlined_call_operand.vmem [shape: f32[1,256], index: 3, kind: input, shape index: {}]   ;;  %s347_s4 = inlined_call_operand.vmem [shape: f32[16,256], index: 4, kind: output, shape index: {}]  }
   0x1   :  { %v223_v0 = vld [vmem:[%s343_s1 + $0x4] ss:$8 sps:$4 sm:$0xff]   ;;  %154 = vmatprep.mubr.bf16.mxu0 %v248_v1  ;;  %v225_v2 = vld [vmem:[%s343_s1] ss:$8 sps:$4 sm:$0xff]   ;;  %v226_v3 = vld [vmem:[%s343_s1 + $0x14] ss:$8 sps:$4 sm:$0xff]  }
   0x2   :  { %122 = vmatprep.subr.bf16.mxu0 %v223_v0  ;;  %v228_v4 = vld [vmem:[%s343_s1 + $0x10] ss:$8 sps:$4 sm:$0xff]   ;;  %v229_v5 = vld [vmem:[%s343_s1 + $0x24] ss:$8 sps:$4 sm:$0xff]   ;;  %v231_v6 = vld [vmem:[%s343_s1 + $0x20] ss:$8 sps:$4 sm:$0xff]  }
   0x3   :  { %123 = vmatpush1.bf16.msra.mxu0 %v225_v2  ;;  %v232_v7 = vld [vmem:[%s343_s1 + $0x34] ss:$8 sps:$4 sm:$0xff]   ;;  %v234_v8 = vld [vmem:[%s343_s1 + $0x30] ss:$8 sps:$4 sm:$0xff]   ;;  %v235_v9 = vld [vmem:[%s343_s1 + $0x44] ss:$8 sps:$4 sm:$0xff]  }
   0x4   :  { %124 = vmatprep.subr.bf16.mxu0 %v226_v3  ;;  %v237_v10 = vld [vmem:[%s343_s1 + $0x40] ss:$8 sps:$4 sm:$0xff]   ;;  %v238_v11 = vld [vmem:[%s343_s1 + $0x54] ss:$8 sps:$4 sm:$0xff]   ;;  %v240_v12 = vld [vmem:[%s343_s1 + $0x50] ss:$8 sps:$4 sm:$0xff]  }
   0x5   :  { %v241_v13 = vld [vmem:[%s343_s1 + $0x64] ss:$8 sps:$4 sm:$0xff]   ;;  %v243_v14 = vld [vmem:[%s343_s1 + $0x60] ss:$8 sps:$4 sm:$0xff]   ;;  %v244_v15 = vld [vmem:[%s343_s1 + $0x74] ss:$8 sps:$4 sm:$0xff]  }
   0x6   :  { %v246_v16 = vld [vmem:[%s343_s1 + $0x70] ss:$8 sps:$4 sm:$0xff]   ;;  %v247_v17 = vld [vmem:[%s344_s0] sm:$0xff]   ;;  %v168_v19 = vshrl.u32 %v167_v18, 7 }
   0x7   :  { %125 = vmatpush1.bf16.msra.mxu0 %v228_v4  ;;  %v165_v21 = vld [vmem:[%s345_s2] sm:$0x3] }
   0x8   :  { %126 = vmatprep.subr.bf16.mxu0 %v229_v5  ;;  %v169_v20 = vsub.s32 0, %v168_v19  ;;  %v173_v22 = vsub.s32 1, %v168_v19  ;;  %v181_v23 = vld [vmem:[%s346_s3] sm:$0x3] }
   0xa   :  { %v170_v24 = vrot.slane %v165_v21, %v169_v20  ;;  %v174_v25 = vrot.slane %v165_v21, %v173_v22  ;;  %v186_v26 = vrot.slane %v181_v23, %v169_v20  ;;  %v190_v28 = vrot.slane %v181_v23, %v173_v22 }
   0xb   :  { %127 = vmatpush1.bf16.msra.mxu0 %v231_v6 }
   0xc   :  { %128 = vmatprep.subr.bf16.mxu0 %v232_v7 }
   0xf   :  { %129 = vmatpush1.bf16.msra.mxu0 %v234_v8 }
  0x10   :  { %130 = vmatprep.subr.bf16.mxu0 %v235_v9 }
  0x13   :  { %131 = vmatpush1.bf16.msra.mxu0 %v237_v10 }
  0x14   :  { %132 = vmatprep.subr.bf16.mxu0 %v238_v11 }
  0x17   :  { %133 = vmatpush1.bf16.msra.mxu0 %v240_v12 }
  0x18   :  { %134 = vmatprep.subr.bf16.mxu0 %v241_v13 }
  0x1b   :  { %135 = vmatpush1.bf16.msra.mxu0 %v243_v14 }
  0x1c   :  { %136 = vmatprep.subr.bf16.mxu0 %v244_v15 }
  0x1f   :  { %137 = vmatpush1.bf16.msra.mxu0 %v246_v16 }
  0x22   :  { %155 = vmatmul.mubr.bf16.vlgmr.msra.gmra.mrb[0].mxu0 %v247_v17 }
  0xf5   :  { %v156_v27 = vpop.f32.mrb[0].mxu0 }
  0xf6   :  { %v177_v29 = vmul.f32 %v170_v24, %v156_v27  ;;  %v158_v30 = vpop.f32.mrb[1].mxu0 }
  0xf7   :  { %v178_v31 = vmul.f32 %v174_v25, %v158_v30  ;;  %v160_v32 = vpop.f32.mrb[2].mxu0 }
  0xf8   :  { %v193_v33 = vadd.f32 %v186_v26, %v177_v29  ;;  %v179_v34 = vmul.f32 %v170_v24, %v160_v32  ;;  %v162_v35 = vpop.f32.mrb[3].mxu0 }
  0xf9   :  { %v194_v36 = vadd.f32 %v190_v28, %v178_v31  ;;  %v180_v37 = vmul.f32 %v174_v25, %v162_v35 }
  0xfa   :  { %197 = vst [vmem:[%s347_s4] sm:$0xff] %v193_v33  ;;  %v195_v38 = vadd.f32 %v186_v26, %v179_v34 }
  0xfb   :  { %198 = vst [vmem:[%s347_s4 + $0x8] sm:$0xff] %v194_v36  ;;  %v196_v39 = vadd.f32 %v190_v28, %v180_v37 }
  0xfc   :  { %199 = vst [vmem:[%s347_s4 + $0x10] sm:$0xff] %v195_v38 }
  0xfd   :  { %200 = vst [vmem:[%s347_s4 + $0x18] sm:$0xff] %v196_v39 }

// kernel: featurizer_forward.35
= control target key start
LH: loop header
LB: loop body
LE: loop exit
PB: predicated region body
PF: predicated region fallthrough
CT: control target
= control target key end

     0   :  { %s1122_s18 = smov 0   ;;  %s1124_s19 = smov 0   ;;  %s1308_s0 = inlined_call_operand.vmem [shape: bf16[16,2304], index: 0, kind: input, shape index: {}]   ;;  %s1309_s1 = inlined_call_operand.vmem [shape: bf16[2304,256], index: 1, kind: input, shape index: {}]   ;;  %s1310_s2 = inlined_call_operand.vmem [shape: f32[1,256], index: 2, kind: input, shape index: {}]   ;;  %s1311_s3 = inlined_call_operand.vmem [shape: f32[1,256], index: 3, kind: input, shape index: {}]   ;;  %s1312_s4 = inlined_call_operand.vmem [shape: f32[16,256], index: 4, kind: input, shape index: {}]   ;;  %s1313_s5 = inlined_call_operand.vmem [shape: f32[16,256], index: 5, kind: output, shape index: {}]  }
   0x1   :  { %s1126_s20 = smov 0   ;;  %s1128_s21 = smov 0  }
   0x2   :  { %s1130_s22 = smov 0  }
   0x3 LB: > { %s27_s23 = sadd.s32 1, %s1085_s21  ;;  %p50_p1 = scmp.ne.s32.totalorder %s1077_s19, %s1073_s18  ;;  %s1089_s22 = sphi %s1130_s22, %s15_s22   ;;  %s1085_s21 = sphi %s1128_s21, %s1317_s21   ;;  %s1081_s20 = sphi %s1126_s20, %s1316_s20   ;;  %s1077_s19 = sphi %s1124_s19, %s1315_s19   ;;  %s1073_s18 = sphi %s1122_s18, %s1314_s18  }
   0x4   : > { %p28_p0 = scmp.ge.s32.totalorder %s27_s23, 9  ;;  %p51_p2 = scmp.eq.s32.totalorder %s1089_s22, 0 }
   0x5   : > { %s43_s25 = sadd.s32 1, %s1077_s19  ;;  %p908_p5 = scmp.ge.s32.totalorder %s1089_s22, 9 }
   0x6   : > { %s1319_s23 = smov (%p28_p0, %s27_s23), 0  ;;  %p52_p3 = por %p51_p2, %p50_p1 }
   0x7   : > { %s39_s24 = ssub.s32 %s1085_s21, %s1319_s23  ;;  %243 = sbr.rel (%p908_p5) target bundleno = 21 (0x15), region = 28 }
   0x8   : > { %p41_p4 = scmp.eq.s32.totalorder %s39_s24, 0 }
   0xa   : > { %s1157_s26 = scalar_select %p41_p4, %s1077_s19, %s43_s25  }
   0xe   : > { %246 = sbr.rel (!%p52_p3) target bundleno = 21 (0x15), region = 32  ;;  %s248_s27 = sand.u32 (%p52_p3), 1, %s1077_s19  }
   0xf   : > { %s957_s28 = sshll.u32 (%p52_p3), %s1085_s21, 3  ;;  %s909_s29 = sshll.u32 (%p52_p3), %s248_s27, 4 }
  0x10   : > { %s256_s7 = scalar_lea.vmem (%p52_p3), %s1308_s0, %s957_s28  ;;  %s250_s8 = scalar_lea.vmem (%p52_p3), [#allocation2], %s909_s29 }
  0x11   : > { %v286_v0 = vld [vmem:[%s256_s7] sm:$0xff] (%p52_p3)  ;;  %v288_v1 = vld [vmem:[%s256_s7 + $0x48] sm:$0xff] (%p52_p3) }
  0x12   : > { %287 = vst [vmem:[%s250_s8] sm:$0xff] (%p52_p3), %v286_v0  ;;  %289 = vst [vmem:[%s250_s8 + $0x8] sm:$0xff] (%p52_p3), %v288_v1 }
  0x15 PF: > { %p912_p6 = scmp.ge.s32.totalorder %s1089_s22, 1  ;;  %p309_p7 = scmp.lt.s32.totalorder %s1089_s22, 10 }
  0x17   : > { %p310_p8 = pnand %p912_p6, %p309_p7 }
  0x18   : > { %s316_s9 = sand.u32 (!%p310_p8), 1, %s1073_s18   ;;  %s914_s10 = sshll.u32 (!%p310_p8), %s1081_s20, 5 }
  0x19   : > { %313 = sbr.rel (%p310_p8) target bundleno = 338 (0x152), region = 74  ;;  %s1169_s11 = sshll.u32 (!%p310_p8), %s316_s9, 4 }
  0x1a   : > { %p380_p9 = scmp.lt.s32.totalorder (!%p310_p8), %s914_s10, 287  ;;  %s318_s16 = scalar_lea.vmem (!%p310_p8), [#allocation2], %s1169_s11 }
  0x1b   : > { %p917_p10 = scmp.ne.s32.totalorder (!%p310_p8), %s1081_s20, 0 }
  0x20   : > { %s1321_s10 = smov (!%p380_p9, %s914_s10), 287  ;;  %427 = sbr.rel (%p917_p10) target bundleno = 39 (0x27), region = 82 }
  0x21   : > { %s958_s12 = sshll.u32 %s1321_s10, 3  ;;  %v1091_v2 = vmov (!%p917_p10), 0.0  }
  0x22   : > { %s1174_s15 = scalar_lea.vmem %s1309_s1, %s958_s12  ;;  %428 = vst [vmem:[%s1313_s5] sm:$0xff] (!%p917_p10), %v1091_v2  ;;  %429 = vst [vmem:[%s1313_s5 + $0x8] sm:$0xff] (!%p917_p10), %v1091_v2 }
  0x23   : > { %430 = vst [vmem:[%s1313_s5 + $0x10] sm:$0xff] (!%p917_p10), %v1091_v2  ;;  %431 = vst [vmem:[%s1313_s5 + $0x18] sm:$0xff] (!%p917_p10), %v1091_v2 }
  0x27 PF: > { %v1000_v3 = vld [vmem:[%s1174_s15 + $0x4] ss:$8 sps:$4 sm:$0xff]   ;;  %v1002_v4 = vld [vmem:[%s1174_s15] ss:$8 sps:$4 sm:$0xff]   ;;  %v1003_v5 = vld [vmem:[%s1174_s15 + $0x14] ss:$8 sps:$4 sm:$0xff]  }
  0x28   : > { %640 = vmatprep.subr.bf16.mxu0 %v1000_v3  ;;  %v1005_v6 = vld [vmem:[%s1174_s15 + $0x10] ss:$8 sps:$4 sm:$0xff]   ;;  %v1006_v7 = vld [vmem:[%s1174_s15 + $0x24] ss:$8 sps:$4 sm:$0xff]   ;;  %v1008_v8 = vld [vmem:[%s1174_s15 + $0x20] ss:$8 sps:$4 sm:$0xff]  }
  0x29   : > { %641 = vmatpush1.bf16.msra.mxu0 %v1002_v4  ;;  %v1009_v9 = vld [vmem:[%s1174_s15 + $0x34] ss:$8 sps:$4 sm:$0xff]   ;;  %v1011_v10 = vld [vmem:[%s1174_s15 + $0x30] ss:$8 sps:$4 sm:$0xff]   ;;  %v1012_v11 = vld [vmem:[%s1174_s15 + $0x44] ss:$8 sps:$4 sm:$0xff]  }
  0x2a   : > { %642 = vmatprep.subr.bf16.mxu0 %v1003_v5  ;;  %v1014_v12 = vld [vmem:[%s1174_s15 + $0x40] ss:$8 sps:$4 sm:$0xff]   ;;  %v1015_v13 = vld [vmem:[%s1174_s15 + $0x54] ss:$8 sps:$4 sm:$0xff]   ;;  %v1017_v14 = vld [vmem:[%s1174_s15 + $0x50] ss:$8 sps:$4 sm:$0xff]  }
  0x2b   : > { %v1018_v15 = vld [vmem:[%s1174_s15 + $0x64] ss:$8 sps:$4 sm:$0xff]   ;;  %v1020_v17 = vld [vmem:[%s1174_s15 + $0x60] ss:$8 sps:$4 sm:$0xff]   ;;  %v1021_v18 = vld [vmem:[%s1174_s15 + $0x74] ss:$8 sps:$4 sm:$0xff]  }
  0x2c   : > { %v1050_v16 = vld [vmem:[%s318_s16 + $0x4] ss:$8 sps:$4 sm:$0xff]   ;;  %v1023_v19 = vld [vmem:[%s1174_s15 + $0x70] ss:$8 sps:$4 sm:$0xff]   ;;  %v1026_v21 = vld [vmem:[%s1174_s15 + $0x80] ss:$8 sps:$4 sm:$0xff]  }
  0x2d   : > { %643 = vmatpush1.bf16.msra.mxu0 %v1005_v6  ;;  %672 = vmatprep.mubr.bf16.mxu0 %v1050_v16  ;;  %v1024_v20 = vld [vmem:[%s1174_s15 + $0x84] ss:$8 sps:$4 sm:$0xff]   ;;  %v1027_v22 = vld [vmem:[%s1174_s15 + $0x94] ss:$8 sps:$4 sm:$0xff]   ;;  %v1029_v23 = vld [vmem:[%s1174_s15 + $0x90] ss:$8 sps:$4 sm:$0xff]  }
  0x2e   : > { %644 = vmatprep.subr.bf16.mxu0 %v1006_v7  ;;  %v1030_v24 = vld [vmem:[%s1174_s15 + $0xa4] ss:$8 sps:$4 sm:$0xff]   ;;  %v1032_v25 = vld [vmem:[%s1174_s15 + $0xa0] ss:$8 sps:$4 sm:$0xff]   ;;  %v1033_v26 = vld [vmem:[%s1174_s15 + $0xb4] ss:$8 sps:$4 sm:$0xff]  }
  0x2f   : > { %v1035_v27 = vld [vmem:[%s1174_s15 + $0xb0] ss:$8 sps:$4 sm:$0xff]   ;;  %v1036_v28 = vld [vmem:[%s1174_s15 + $0xc4] ss:$8 sps:$4 sm:$0xff]   ;;  %v1038_v29 = vld [vmem:[%s1174_s15 + $0xc0] ss:$8 sps:$4 sm:$0xff]  }
  0x30   : > { %v1039_v30 = vld [vmem:[%s1174_s15 + $0xd4] ss:$8 sps:$4 sm:$0xff]   ;;  %v1041_v31 = vld [vmem:[%s1174_s15 + $0xd0] ss:$8 sps:$4 sm:$0xff]   ;;  %v1042_v32 = vld [vmem:[%s1174_s15 + $0xe4] ss:$8 sps:$4 sm:$0xff]  }
  0x31   : > { %645 = vmatpush1.bf16.msra.mxu0 %v1008_v8  ;;  %v1044_v33 = vld [vmem:[%s1174_s15 + $0xe0] ss:$8 sps:$4 sm:$0xff]   ;;  %v1045_v34 = vld [vmem:[%s1174_s15 + $0xf4] ss:$8 sps:$4 sm:$0xff]   ;;  %v1047_v35 = vld [vmem:[%s1174_s15 + $0xf0] ss:$8 sps:$4 sm:$0xff]  }
  0x32   : > { %646 = vmatprep.subr.bf16.mxu0 %v1009_v9  ;;  %v1048_v36 = vld [vmem:[%s318_s16] ss:$8 sps:$4 sm:$0xff]   ;;  %p952_p11 = scmp.ne.s32.totalorder %s1081_s20, 8 }
  0x33   : > { %v432_v37 = vld [vmem:[%s1313_s5] sm:$0xff]  ;;  %v433_v38 = vld [vmem:[%s1313_s5 + $0x8] sm:$0xff]  ;;  %v434_v40 = vld [vmem:[%s1313_s5 + $0x10] sm:$0xff]  ;;  %v701_v49 = vlaneseq (!%p952_p11) }
  0x34   : > { %v435_v43 = vld [vmem:[%s1313_s5 + $0x18] sm:$0xff]  ;;  %v699_v51 = vld [vmem:[%s1310_s2] sm:$0x3] (!%p952_p11)  ;;  %v732_v4 = vld [vmem:[%s1312_s4 + $0x8] sm:$0xff] (!%p952_p11) }
  0x35   : > { %647 = vmatpush1.bf16.msra.mxu0 %v1011_v10  ;;  %v702_v50 = vshrl.u32 (!%p952_p11), %v701_v49, 7  ;;  %v715_v52 = vld [vmem:[%s1311_s3] sm:$0x3] (!%p952_p11)  ;;  %v733_v5 = vld [vmem:[%s1312_s4 + $0x10] sm:$0xff] (!%p952_p11)  ;;  %v734_v6 = vld [vmem:[%s1312_s4 + $0x18] sm:$0xff] (!%p952_p11) }
  0x36   : > { %648 = vmatprep.subr.bf16.mxu0 %v1012_v11  ;;  %v731_v0 = vld [vmem:[%s1312_s4] sm:$0xff] (!%p952_p11) }
  0x37   : > { %v703_v54 = vsub.s32 (!%p952_p11), 0, %v702_v50  ;;  %v707_v55 = vsub.s32 (!%p952_p11), 1, %v702_v50 }
  0x39   : > { %649 = vmatpush1.bf16.msra.mxu0 %v1014_v12  ;;  %v704_v59 = vrot.slane (!%p952_p11), %v699_v51, %v703_v54  ;;  %v720_v60 = vrot.slane (!%p952_p11), %v715_v52, %v703_v54  ;;  %v708_v61 = vrot.slane (!%p952_p11), %v699_v51, %v707_v55  ;;  %v724_v62 = vrot.slane (!%p952_p11), %v715_v52, %v707_v55 }
  0x3a   : > { %650 = vmatprep.subr.bf16.mxu0 %v1015_v13 }
  0x3d   : > { %651 = vmatpush1.bf16.msra.mxu0 %v1017_v14 }
  0x3e   : > { %652 = vmatprep.subr.bf16.mxu0 %v1018_v15 }
  0x41   : > { %653 = vmatpush1.bf16.msra.mxu0 %v1020_v17 }
  0x42   : > { %654 = vmatprep.subr.bf16.mxu0 %v1021_v18 }
  0x45   : > { %655 = vmatpush1.bf16.msra.mxu0 %v1023_v19 }
  0x46   : > { %656 = vmatprep.subr.bf16.mxu0 %v1024_v20 }
  0x49   : > { %657 = vmatpush1.bf16.msra.mxu0 %v1026_v21 }
  0x4a   : > { %658 = vmatprep.subr.bf16.mxu0 %v1027_v22 }
  0x4d   : > { %659 = vmatpush1.bf16.msra.mxu0 %v1029_v23 }
  0x4e   : > { %660 = vmatprep.subr.bf16.mxu0 %v1030_v24 }
  0x51   : > { %661 = vmatpush1.bf16.msra.mxu0 %v1032_v25 }
  0x52   : > { %662 = vmatprep.subr.bf16.mxu0 %v1033_v26 }
  0x55   : > { %663 = vmatpush1.bf16.msra.mxu0 %v1035_v27 }
  0x56   : > { %664 = vmatprep.subr.bf16.mxu0 %v1036_v28 }
  0x59   : > { %665 = vmatpush1.bf16.msra.mxu0 %v1038_v29 }
  0x5a   : > { %666 = vmatprep.subr.bf16.mxu0 %v1039_v30 }
  0x5d   : > { %667 = vmatpush1.bf16.msra.mxu0 %v1041_v31 }
  0x5e   : > { %668 = vmatprep.subr.bf16.mxu0 %v1042_v32 }
  0x61   : > { %669 = vmatpush1.bf16.msra.mxu0 %v1044_v33 }
  0x62   : > { %670 = vmatprep.subr.bf16.mxu0 %v1045_v34 }
  0x65   : > { %671 = vmatpush1.bf16.msra.mxu0 %v1047_v35 }
  0x68   : > { %673 = vmatmul.mubr.bf16.vlgmr.msra.gmra.mrb[0].mxu0 %v1048_v36 }
 0x13b   : > { %v674_v39 = vpop.f32.mrb[0].mxu0  ;;  %694 = sbr.rel (%p952_p11) target bundleno = 338 (0x152), region = 86 }
 0x13c   : > { %v683_v41 = vadd.f32 %v674_v39, %v432_v37  ;;  %v676_v42 = vpop.f32.mrb[1].mxu0 }
 0x13d   : > { %v684_v44 = vadd.f32 %v676_v42, %v433_v38  ;;  %v678_v45 = vpop.f32.mrb[2].mxu0 }
 0x13e   : > { %687 = vst [vmem:[%s1313_s5] sm:$0xff] %v683_v41  ;;  %v685_v46 = vadd.f32 %v678_v45, %v434_v40  ;;  %v680_v47 = vpop.f32.mrb[3].mxu0 }
 0x13f   : > { %688 = vst [vmem:[%s1313_s5 + $0x8] sm:$0xff] %v684_v44  ;;  %v686_v48 = vadd.f32 %v680_v47, %v435_v43 }
 0x140   : > { %689 = vst [vmem:[%s1313_s5 + $0x10] sm:$0xff] %v685_v46 }
 0x141   : > { %690 = vst [vmem:[%s1313_s5 + $0x18] sm:$0xff] %v686_v48 }
 0x145   : > { %v695_v53 = vld [vmem:[%s1313_s5] sm:$0xff] }
 0x146   : > { %v696_v56 = vld [vmem:[%s1313_s5 + $0x8] sm:$0xff]  ;;  %v711_v63 = vmul.f32 %v704_v59, %v695_v53 }
 0x147   : > { %v697_v57 = vld [vmem:[%s1313_s5 + $0x10] sm:$0xff]  ;;  %v712_v1 = vmul.f32 %v708_v61, %v696_v56 }
 0x148   : > { %v698_v58 = vld [vmem:[%s1313_s5 + $0x18] sm:$0xff]  ;;  %v713_v2 = vmul.f32 %v704_v59, %v697_v57  ;;  %v727_v7 = vadd.f32 %v720_v60, %v711_v63 }
 0x149   : > { %v714_v3 = vmul.f32 %v708_v61, %v698_v58  ;;  %v728_v8 = vadd.f32 %v724_v62, %v712_v1 }
 0x14a   : > { %v729_v9 = vadd.f32 %v720_v60, %v713_v2  ;;  %v735_v11 = vadd.f32 %v731_v0, %v727_v7 }
 0x14b   : > { %v730_v10 = vadd.f32 %v724_v62, %v714_v3  ;;  %v736_v12 = vadd.f32 %v732_v4, %v728_v8 }
 0x14c   : > { %v737_v13 = vadd.f32 %v733_v5, %v729_v9  ;;  %v739_v15 = vmax.f32 %v735_v11, 0.0 }
 0x14d   : > { %v738_v14 = vadd.f32 %v734_v6, %v730_v10  ;;  %v740_v16 = vmax.f32 %v736_v12, 0.0 }
 0x14e   : > { %v741_v17 = vmax.f32 %v737_v13, 0.0  ;;  %743 = vst [vmem:[%s1313_s5] sm:$0xff] %v739_v15 }
 0x14f   : > { %v742_v18 = vmax.f32 %v738_v14, 0.0  ;;  %744 = vst [vmem:[%s1313_s5 + $0x8] sm:$0xff] %v740_v16 }
 0x150   : > { %745 = vst [vmem:[%s1313_s5 + $0x10] sm:$0xff] %v741_v17 }
 0x151   : > { %746 = vst [vmem:[%s1313_s5 + $0x18] sm:$0xff] %v742_v18 }
 0x152 PF: > { %s15_s22 = sadd.s32 1, %s1089_s22   ;;  %s1314_s18 = smov %s1077_s19 }
 0x153   : > { %p12_p12 = scmp.ge.s32.totalorder %s15_s22, 11   ;;  %s1315_s19 = smov %s1157_s26 }
 0x154   : > { %s1316_s20 = smov %s1085_s21  ;;  %s1317_s21 = smov %s1319_s23 }
 0x155   :  { %14 = sbr.rel (!%p12_p12) target bundleno = 3 (0x3), region = 133 }

// kernel: featurizer_forward.36
= control target key start
LH: loop header
LB: loop body
LE: loop exit
PB: predicated region body
PF: predicated region fallthrough
CT: control target
= control target key end

     0   :  { %s1019_s15 = smov 0   ;;  %s1021_s16 = smov 0   ;;  %s1193_s0 = inlined_call_operand.vmem [shape: bf16[16,2304], index: 0, kind: input, shape index: {}]   ;;  %s1194_s1 = inlined_call_operand.vmem [shape: bf16[2304,256], index: 1, kind: input, shape index: {}]   ;;  %s1195_s2 = inlined_call_operand.vmem [shape: f32[1,256], index: 2, kind: input, shape index: {}]   ;;  %s1196_s3 = inlined_call_operand.vmem [shape: f32[1,256], index: 3, kind: input, shape index: {}]   ;;  %s1197_s4 = inlined_call_operand.vmem [shape: f32[16,256], index: 4, kind: output, shape index: {}]  }
   0x1   :  { %s1023_s17 = smov 0   ;;  %s1025_s18 = smov 0  }
   0x2   :  { %s1027_s19 = smov 0  }
   0x3 LB: > { %s26_s20 = sadd.s32 1, %s987_s18  ;;  %p49_p1 = scmp.ne.s32.totalorder %s979_s16, %s975_s15  ;;  %s991_s19 = sphi %s1027_s19, %s14_s19   ;;  %s987_s18 = sphi %s1025_s18, %s1201_s18   ;;  %s983_s17 = sphi %s1023_s17, %s1200_s17   ;;  %s979_s16 = sphi %s1021_s16, %s1199_s16   ;;  %s975_s15 = sphi %s1019_s15, %s1198_s15  }
   0x4   : > { %p27_p0 = scmp.ge.s32.totalorder %s26_s20, 9  ;;  %p50_p2 = scmp.eq.s32.totalorder %s991_s19, 0 }
   0x5   : > { %s42_s22 = sadd.s32 1, %s979_s16  ;;  %p810_p5 = scmp.ge.s32.totalorder %s991_s19, 9 }
   0x6   : > { %s1203_s20 = smov (%p27_p0, %s26_s20), 0  ;;  %p51_p3 = por %p50_p2, %p49_p1 }
   0x7   : > { %s38_s21 = ssub.s32 %s987_s18, %s1203_s20  ;;  %199 = sbr.rel (%p810_p5) target bundleno = 21 (0x15), region = 24 }
   0x8   : > { %p40_p4 = scmp.eq.s32.totalorder %s38_s21, 0 }
   0xa   : > { %s1054_s23 = scalar_select %p40_p4, %s979_s16, %s42_s22  }
   0xe   : > { %202 = sbr.rel (!%p51_p3) target bundleno = 21 (0x15), region = 28  ;;  %s204_s24 = sand.u32 (%p51_p3), 1, %s979_s16  }
   0xf   : > { %s859_s25 = sshll.u32 (%p51_p3), %s987_s18, 3  ;;  %s811_s26 = sshll.u32 (%p51_p3), %s204_s24, 4 }
  0x10   : > { %s212_s29 = scalar_lea.vmem (%p51_p3), %s1193_s0, %s859_s25  ;;  %s206_s30 = scalar_lea.vmem (%p51_p3), [#allocation2], %s811_s26 }
  0x11   : > { %v242_v0 = vld [vmem:[%s212_s29] sm:$0xff] (%p51_p3)  ;;  %v244_v1 = vld [vmem:[%s212_s29 + $0x48] sm:$0xff] (%p51_p3) }
  0x12   : > { %243 = vst [vmem:[%s206_s30] sm:$0xff] (%p51_p3), %v242_v0  ;;  %245 = vst [vmem:[%s206_s30 + $0x8] sm:$0xff] (%p51_p3), %v244_v1 }
  0x15 PF: > { %p814_p6 = scmp.ge.s32.totalorder %s991_s19, 1  ;;  %p265_p7 = scmp.lt.s32.totalorder %s991_s19, 10 }
  0x17   : > { %p266_p8 = pnand %p814_p6, %p265_p7 }
  0x18   : > { %s272_s5 = sand.u32 (!%p266_p8), 1, %s975_s15   ;;  %s816_s6 = sshll.u32 (!%p266_p8), %s983_s17, 5 }
  0x19   : > { %269 = sbr.rel (%p266_p8) target bundleno = 336 (0x150), region = 70  ;;  %s1066_s7 = sshll.u32 (!%p266_p8), %s272_s5, 4 }
  0x1a   : > { %p324_p9 = scmp.lt.s32.totalorder (!%p266_p8), %s816_s6, 287  ;;  %s274_s12 = scalar_lea.vmem (!%p266_p8), [#allocation2], %s1066_s7 }
  0x1b   : > { %p819_p10 = scmp.ne.s32.totalorder (!%p266_p8), %s983_s17, 0 }
  0x20   : > { %s1205_s6 = smov (!%p324_p9, %s816_s6), 287  ;;  %359 = sbr.rel (%p819_p10) target bundleno = 39 (0x27), region = 78 }
  0x21   : > { %s860_s8 = sshll.u32 %s1205_s6, 3  ;;  %v993_v2 = vmov (!%p819_p10), 0.0  }
  0x22   : > { %s1071_s11 = scalar_lea.vmem %s1194_s1, %s860_s8  ;;  %360 = vst [vmem:[%s1197_s4] sm:$0xff] (!%p819_p10), %v993_v2  ;;  %361 = vst [vmem:[%s1197_s4 + $0x8] sm:$0xff] (!%p819_p10), %v993_v2 }
  0x23   : > { %362 = vst [vmem:[%s1197_s4 + $0x10] sm:$0xff] (!%p819_p10), %v993_v2  ;;  %363 = vst [vmem:[%s1197_s4 + $0x18] sm:$0xff] (!%p819_p10), %v993_v2 }
  0x27 PF: > { %v902_v3 = vld [vmem:[%s1071_s11 + $0x4] ss:$8 sps:$4 sm:$0xff]   ;;  %v904_v4 = vld [vmem:[%s1071_s11] ss:$8 sps:$4 sm:$0xff]   ;;  %v905_v5 = vld [vmem:[%s1071_s11 + $0x14] ss:$8 sps:$4 sm:$0xff]  }
  0x28   : > { %572 = vmatprep.subr.bf16.mxu0 %v902_v3  ;;  %v907_v6 = vld [vmem:[%s1071_s11 + $0x10] ss:$8 sps:$4 sm:$0xff]   ;;  %v908_v7 = vld [vmem:[%s1071_s11 + $0x24] ss:$8 sps:$4 sm:$0xff]   ;;  %v910_v8 = vld [vmem:[%s1071_s11 + $0x20] ss:$8 sps:$4 sm:$0xff]  }
  0x29   : > { %573 = vmatpush1.bf16.msra.mxu0 %v904_v4  ;;  %v911_v9 = vld [vmem:[%s1071_s11 + $0x34] ss:$8 sps:$4 sm:$0xff]   ;;  %v913_v10 = vld [vmem:[%s1071_s11 + $0x30] ss:$8 sps:$4 sm:$0xff]   ;;  %v914_v11 = vld [vmem:[%s1071_s11 + $0x44] ss:$8 sps:$4 sm:$0xff]  }
  0x2a   : > { %574 = vmatprep.subr.bf16.mxu0 %v905_v5  ;;  %v916_v12 = vld [vmem:[%s1071_s11 + $0x40] ss:$8 sps:$4 sm:$0xff]   ;;  %v917_v13 = vld [vmem:[%s1071_s11 + $0x54] ss:$8 sps:$4 sm:$0xff]   ;;  %v919_v14 = vld [vmem:[%s1071_s11 + $0x50] ss:$8 sps:$4 sm:$0xff]  }
  0x2b   : > { %v920_v15 = vld [vmem:[%s1071_s11 + $0x64] ss:$8 sps:$4 sm:$0xff]   ;;  %v922_v17 = vld [vmem:[%s1071_s11 + $0x60] ss:$8 sps:$4 sm:$0xff]   ;;  %v923_v18 = vld [vmem:[%s1071_s11 + $0x74] ss:$8 sps:$4 sm:$0xff]  }
  0x2c   : > { %v952_v16 = vld [vmem:[%s274_s12 + $0x4] ss:$8 sps:$4 sm:$0xff]   ;;  %v925_v19 = vld [vmem:[%s1071_s11 + $0x70] ss:$8 sps:$4 sm:$0xff]   ;;  %v928_v21 = vld [vmem:[%s1071_s11 + $0x80] ss:$8 sps:$4 sm:$0xff]  }
  0x2d   : > { %575 = vmatpush1.bf16.msra.mxu0 %v907_v6  ;;  %604 = vmatprep.mubr.bf16.mxu0 %v952_v16  ;;  %v926_v20 = vld [vmem:[%s1071_s11 + $0x84] ss:$8 sps:$4 sm:$0xff]   ;;  %v929_v22 = vld [vmem:[%s1071_s11 + $0x94] ss:$8 sps:$4 sm:$0xff]   ;;  %v931_v23 = vld [vmem:[%s1071_s11 + $0x90] ss:$8 sps:$4 sm:$0xff]  }
  0x2e   : > { %576 = vmatprep.subr.bf16.mxu0 %v908_v7  ;;  %v932_v24 = vld [vmem:[%s1071_s11 + $0xa4] ss:$8 sps:$4 sm:$0xff]   ;;  %v934_v25 = vld [vmem:[%s1071_s11 + $0xa0] ss:$8 sps:$4 sm:$0xff]   ;;  %v935_v26 = vld [vmem:[%s1071_s11 + $0xb4] ss:$8 sps:$4 sm:$0xff]  }
  0x2f   : > { %v937_v27 = vld [vmem:[%s1071_s11 + $0xb0] ss:$8 sps:$4 sm:$0xff]   ;;  %v938_v28 = vld [vmem:[%s1071_s11 + $0xc4] ss:$8 sps:$4 sm:$0xff]   ;;  %v940_v29 = vld [vmem:[%s1071_s11 + $0xc0] ss:$8 sps:$4 sm:$0xff]  }
  0x30   : > { %v941_v30 = vld [vmem:[%s1071_s11 + $0xd4] ss:$8 sps:$4 sm:$0xff]   ;;  %v943_v31 = vld [vmem:[%s1071_s11 + $0xd0] ss:$8 sps:$4 sm:$0xff]   ;;  %v944_v32 = vld [vmem:[%s1071_s11 + $0xe4] ss:$8 sps:$4 sm:$0xff]  }
  0x31   : > { %577 = vmatpush1.bf16.msra.mxu0 %v910_v8  ;;  %v946_v33 = vld [vmem:[%s1071_s11 + $0xe0] ss:$8 sps:$4 sm:$0xff]   ;;  %v947_v34 = vld [vmem:[%s1071_s11 + $0xf4] ss:$8 sps:$4 sm:$0xff]   ;;  %v949_v35 = vld [vmem:[%s1071_s11 + $0xf0] ss:$8 sps:$4 sm:$0xff]  }
  0x32   : > { %578 = vmatprep.subr.bf16.mxu0 %v911_v9  ;;  %v950_v36 = vld [vmem:[%s274_s12] ss:$8 sps:$4 sm:$0xff]   ;;  %p854_p11 = scmp.ne.s32.totalorder %s983_s17, 8 }
  0x33   : > { %v364_v37 = vld [vmem:[%s1197_s4] sm:$0xff]  ;;  %v365_v38 = vld [vmem:[%s1197_s4 + $0x8] sm:$0xff]  ;;  %v366_v40 = vld [vmem:[%s1197_s4 + $0x10] sm:$0xff]  ;;  %v633_v49 = vlaneseq (!%p854_p11) }
  0x34   : > { %v367_v43 = vld [vmem:[%s1197_s4 + $0x18] sm:$0xff]  ;;  %v631_v51 = vld [vmem:[%s1195_s2] sm:$0x3] (!%p854_p11) }
  0x35   : > { %579 = vmatpush1.bf16.msra.mxu0 %v913_v10  ;;  %v634_v50 = vshrl.u32 (!%p854_p11), %v633_v49, 7  ;;  %v647_v52 = vld [vmem:[%s1196_s3] sm:$0x3] (!%p854_p11) }
  0x36   : > { %580 = vmatprep.subr.bf16.mxu0 %v914_v11 }
  0x37   : > { %v635_v54 = vsub.s32 (!%p854_p11), 0, %v634_v50  ;;  %v639_v55 = vsub.s32 (!%p854_p11), 1, %v634_v50 }
  0x39   : > { %581 = vmatpush1.bf16.msra.mxu0 %v916_v12  ;;  %v636_v59 = vrot.slane (!%p854_p11), %v631_v51, %v635_v54  ;;  %v652_v60 = vrot.slane (!%p854_p11), %v647_v52, %v635_v54  ;;  %v640_v61 = vrot.slane (!%p854_p11), %v631_v51, %v639_v55  ;;  %v656_v62 = vrot.slane (!%p854_p11), %v647_v52, %v639_v55 }
  0x3a   : > { %582 = vmatprep.subr.bf16.mxu0 %v917_v13 }
  0x3d   : > { %583 = vmatpush1.bf16.msra.mxu0 %v919_v14 }
  0x3e   : > { %584 = vmatprep.subr.bf16.mxu0 %v920_v15 }
  0x41   : > { %585 = vmatpush1.bf16.msra.mxu0 %v922_v17 }
  0x42   : > { %586 = vmatprep.subr.bf16.mxu0 %v923_v18 }
  0x45   : > { %587 = vmatpush1.bf16.msra.mxu0 %v925_v19 }
  0x46   : > { %588 = vmatprep.subr.bf16.mxu0 %v926_v20 }
  0x49   : > { %589 = vmatpush1.bf16.msra.mxu0 %v928_v21 }
  0x4a   : > { %590 = vmatprep.subr.bf16.mxu0 %v929_v22 }
  0x4d   : > { %591 = vmatpush1.bf16.msra.mxu0 %v931_v23 }
  0x4e   : > { %592 = vmatprep.subr.bf16.mxu0 %v932_v24 }
  0x51   : > { %593 = vmatpush1.bf16.msra.mxu0 %v934_v25 }
  0x52   : > { %594 = vmatprep.subr.bf16.mxu0 %v935_v26 }
  0x55   : > { %595 = vmatpush1.bf16.msra.mxu0 %v937_v27 }
  0x56   : > { %596 = vmatprep.subr.bf16.mxu0 %v938_v28 }
  0x59   : > { %597 = vmatpush1.bf16.msra.mxu0 %v940_v29 }
  0x5a   : > { %598 = vmatprep.subr.bf16.mxu0 %v941_v30 }
  0x5d   : > { %599 = vmatpush1.bf16.msra.mxu0 %v943_v31 }
  0x5e   : > { %600 = vmatprep.subr.bf16.mxu0 %v944_v32 }
  0x61   : > { %601 = vmatpush1.bf16.msra.mxu0 %v946_v33 }
  0x62   : > { %602 = vmatprep.subr.bf16.mxu0 %v947_v34 }
  0x65   : > { %603 = vmatpush1.bf16.msra.mxu0 %v949_v35 }
  0x68   : > { %605 = vmatmul.mubr.bf16.vlgmr.msra.gmra.mrb[0].mxu0 %v950_v36 }
 0x13b   : > { %v606_v39 = vpop.f32.mrb[0].mxu0  ;;  %626 = sbr.rel (%p854_p11) target bundleno = 336 (0x150), region = 82 }
 0x13c   : > { %v615_v41 = vadd.f32 %v606_v39, %v364_v37  ;;  %v608_v42 = vpop.f32.mrb[1].mxu0 }
 0x13d   : > { %v616_v44 = vadd.f32 %v608_v42, %v365_v38  ;;  %v610_v45 = vpop.f32.mrb[2].mxu0 }
 0x13e   : > { %619 = vst [vmem:[%s1197_s4] sm:$0xff] %v615_v41  ;;  %v617_v46 = vadd.f32 %v610_v45, %v366_v40  ;;  %v612_v47 = vpop.f32.mrb[3].mxu0 }
 0x13f   : > { %620 = vst [vmem:[%s1197_s4 + $0x8] sm:$0xff] %v616_v44  ;;  %v618_v48 = vadd.f32 %v612_v47, %v367_v43 }
 0x140   : > { %621 = vst [vmem:[%s1197_s4 + $0x10] sm:$0xff] %v617_v46 }
 0x141   : > { %622 = vst [vmem:[%s1197_s4 + $0x18] sm:$0xff] %v618_v48 }
 0x145   : > { %v627_v53 = vld [vmem:[%s1197_s4] sm:$0xff] }
 0x146   : > { %v628_v56 = vld [vmem:[%s1197_s4 + $0x8] sm:$0xff]  ;;  %v643_v63 = vmul.f32 %v636_v59, %v627_v53 }
 0x147   : > { %v629_v57 = vld [vmem:[%s1197_s4 + $0x10] sm:$0xff]  ;;  %v644_v0 = vmul.f32 %v640_v61, %v628_v56 }
 0x148   : > { %v630_v58 = vld [vmem:[%s1197_s4 + $0x18] sm:$0xff]  ;;  %v645_v1 = vmul.f32 %v636_v59, %v629_v57  ;;  %v659_v3 = vadd.f32 %v652_v60, %v643_v63 }
 0x149   : > { %v646_v2 = vmul.f32 %v640_v61, %v630_v58  ;;  %v660_v4 = vadd.f32 %v656_v62, %v644_v0 }
 0x14a   : > { %v661_v5 = vadd.f32 %v652_v60, %v645_v1  ;;  %v663_v7 = vmax.f32 %v659_v3, 0.0 }
 0x14b   : > { %v662_v6 = vadd.f32 %v656_v62, %v646_v2  ;;  %v664_v8 = vmax.f32 %v660_v4, 0.0 }
 0x14c   : > { %v665_v9 = vmax.f32 %v661_v5, 0.0  ;;  %667 = vst [vmem:[%s1197_s4] sm:$0xff] %v663_v7 }
 0x14d   : > { %v666_v10 = vmax.f32 %v662_v6, 0.0  ;;  %668 = vst [vmem:[%s1197_s4 + $0x8] sm:$0xff] %v664_v8 }
 0x14e   : > { %669 = vst [vmem:[%s1197_s4 + $0x10] sm:$0xff] %v665_v9 }
 0x14f   : > { %670 = vst [vmem:[%s1197_s4 + $0x18] sm:$0xff] %v666_v10 }
 0x150 PF: > { %s14_s19 = sadd.s32 1, %s991_s19   ;;  %s1198_s15 = smov %s979_s16 }
 0x151   : > { %p11_p12 = scmp.ge.s32.totalorder %s14_s19, 11   ;;  %s1199_s16 = smov %s1054_s23 }
 0x152   : > { %s1200_s17 = smov %s987_s18  ;;  %s1201_s18 = smov %s1203_s20 }
 0x153   :  { %13 = sbr.rel (!%p11_p12) target bundleno = 3 (0x3), region = 126 }

// kernel: featurizer_forward.38
= control target key start
LH: loop header
LB: loop body
LE: loop exit
PB: predicated region body
PF: predicated region fallthrough
CT: control target
= control target key end

     0   :  { %s1268_s15 = smov 0   ;;  %s1270_s16 = smov 0   ;;  %s1584_s0 = inlined_call_operand.vmem [shape: bf16[16,2304], index: 0, kind: input, shape index: {}]   ;;  %s1585_s1 = inlined_call_operand.vmem [shape: bf16[2304,512], index: 1, kind: input, shape index: {}]   ;;  %s1586_s2 = inlined_call_operand.vmem [shape: f32[1,512], index: 2, kind: input, shape index: {}]   ;;  %s1587_s3 = inlined_call_operand.vmem [shape: f32[1,512], index: 3, kind: input, shape index: {}]   ;;  %s1588_s4 = inlined_call_operand.vmem [shape: f32[16,512], index: 4, kind: output, shape index: {}]  }
   0x1   :  { %s1272_s17 = smov 0   ;;  %s1274_s18 = smov 0  }
   0x2   :  { %s1276_s19 = smov 0   ;;  %s1278_s20 = smov 0  }
   0x3   :  { %s1280_s21 = smov 0   ;;  %s1282_s22 = smov 0  }
   0x4   :  { %s1284_s23 = smov 0   ;;  %s1286_s24 = smov 0  }
   0x5   :  { %s1288_s25 = smov 0  }
   0x6 LB: > { %1592 = sst [smem:[#allocation5_spill]] %s1220_s20  ;;  %s952_s26 = sadd.s32 4294967295, %s1240_s25   ;;  %s1240_s25 = sphi %s1288_s25, %s14_s25   ;;  %s1236_s24 = sphi %s1286_s24, %s1610_s24   ;;  %s1232_s23 = sphi %s1284_s23, %s1609_s23   ;;  %s1228_s22 = sphi %s1282_s22, %s1608_s22   ;;  %s1224_s21 = sphi %s1280_s21, %s1607_s21   ;;  %s1220_s20 = sphi %s1278_s20, %s1600_s20   ;;  %s1216_s19 = sphi %s1276_s19, %s1599_s19   ;;  %s1212_s18 = sphi %s1274_s18, %s1606_s18   ;;  %s1208_s17 = sphi %s1272_s17, %s1605_s17   ;;  %s1204_s16 = sphi %s1270_s16, %s1604_s16   ;;  %s1200_s15 = sphi %s1268_s15, %s1603_s15  }
   0x7   : > { %s26_s27 = sadd.s32 1, %s1232_s23  ;;  %s29_s28 = sadd.s32 1, %s1236_s24 }
   0x8   : > { %p27_p0 = scmp.ge.s32.totalorder %s26_s27, 9  ;;  %s42_s29 = sadd.s32 1, %s1220_s20 }
   0x9   : > { %p49_p1 = scmp.ne.s32.totalorder %s1220_s20, %s1216_s19  ;;  %p50_p2 = scmp.eq.s32.totalorder %s1240_s25, 0 }
   0xa   : > { %s1612_s27 = smov (%p27_p0, %s26_s27), 0  ;;  %s1614_s28 = smov (!%p27_p0, %s29_s28), %s1236_s24 }
   0xb   : > { %1593 = sst [smem:[#allocation6_spill]] %s1612_s27  ;;  %s38_s30 = ssub.s32 %s1232_s23, %s1612_s27 }
   0xc   : > { %p31_p3 = scmp.ge.s32.totalorder %s1614_s28, 2  ;;  %p40_p4 = scmp.eq.s32.totalorder %s38_s30, 0 }
   0xd   : > { %p1335_p5 = por %p50_p2, %p49_p1  ;;  %s70_s6 = sadd.s32 1, %s1212_s18 }
   0xe   : > { %s1616_s28 = smov (%p31_p3, %s1614_s28), 0  ;;  %p77_p6 = scmp.ne.s32.totalorder %s1212_s18, %s1208_s17 }
   0xf   : > { %1595 = sst [smem:[#allocation7_spill]] %s1616_s28  ;;  %s66_s8 = ssub.s32 %s1236_s24, %s1616_s28 }
  0x10   : > { %s1343_s7 = scalar_select %p40_p4, %s1220_s20, %s42_s29  }
  0x11   : > { %s67_s9 = sor.u32 %s66_s8, %s38_s30  ;;  %p148_p7 = scmp.eq.s32.totalorder %s66_s8, 0 }
  0x12   : > { %1596 = sst [smem:[#allocation8_spill]] %s1343_s7  ;;  %p68_p8 = scmp.eq.s32.totalorder %s67_s9, 0 }
  0x13   : > { %p1349_p9 = por %p77_p6, %p50_p2  ;;  %s150_s11 = sadd.s32 1, %s1204_s16 }
  0x14   : > { %p160_p10 = scmp.ne.s32.totalorder %s1204_s16, %s1200_s15  ;;  %p161_p11 = scmp.eq.s32.totalorder %s952_s26, 17 }
  0x15   : > { %s1357_s12 = scalar_select %p68_p8, %s1212_s18, %s70_s6  }
  0x16   : > { %s1360_s13 = scalar_select %p148_p7, %s1204_s16, %s150_s11  }
  0x17   : > { %p1362_p12 = por %p161_p11, %p160_p10  ;;  %p955_p13 = scmp.ge.s32.totalorder %s1240_s25, 18 }
  0x19   : > { %183 = sbr.rel (%p955_p13) target bundleno = 62 (0x3e), region = 16 }
  0x20   : > { %186 = sbr.rel (!%p1335_p5) target bundleno = 39 (0x27), region = 20  ;;  %s188_s29 = sand.u32 (%p1335_p5), 1, %s1220_s20  }
  0x21   : > { %s1011_s30 = sshll.u32 (%p1335_p5), %s1232_s23, 3  ;;  %s956_s8 = sshll.u32 (%p1335_p5), %s188_s29, 4 }
  0x22   : > { %s196_s11 = scalar_lea.vmem (%p1335_p5), %s1584_s0, %s1011_s30  ;;  %s190_s26 = scalar_lea.vmem (%p1335_p5), [#allocation2], %s956_s8 }
  0x23   : > { %v226_v0 = vld [vmem:[%s196_s11] sm:$0xff] (%p1335_p5)  ;;  %v228_v1 = vld [vmem:[%s196_s11 + $0x48] sm:$0xff] (%p1335_p5) }
  0x24   : > { %227 = vst [vmem:[%s190_s26] sm:$0xff] (%p1335_p5), %v226_v0  ;;  %229 = vst [vmem:[%s190_s26 + $0x8] sm:$0xff] (%p1335_p5), %v228_v1 }
  0x27 PF: > { %235 = sbr.rel (!%p1349_p9) target bundleno = 62 (0x3e), region = 58  ;;  %s237_s5 = sand.u32 (%p1349_p9), 1, %s1212_s18  }
  0x28   : > { %s961_s28 = sshll.u32 (%p1349_p9), %s1236_s24, 1  ;;  %s959_s27 = sshll.u32 (%p1349_p9), %s237_s5, 8 }
  0x29   : > { %s1012_s29 = sshll.u32 (%p1349_p9), %s1232_s23, 7  ;;  %s1387_s10 = scalar_lea.vmem (%p1349_p9), [#allocation3], %s959_s27 }
  0x2a   : > { %s243_s7 = sadd.s32 (%p1349_p9), %s1012_s29, %s961_s28 }
  0x2b   : > { %s963_s20 = sshll.u32 (%p1349_p9), %s243_s7, 2 }
  0x2c   : > { %s1382_s9 = scalar_lea.vmem (%p1349_p9), %s1585_s1, %s963_s20 }
  0x2d   : > { %v335_v2 = vld [vmem:[%s1382_s9] sm:$0xff] (%p1349_p9)  ;;  %v337_v3 = vld [vmem:[%s1382_s9 + $0x10] sm:$0xff] (%p1349_p9) }
  0x2e   : > { %v339_v4 = vld [vmem:[%s1382_s9 + $0x20] sm:$0xff]  ;;  %336 = vst [vmem:[%s1387_s10] sm:$0xff] %v335_v2  ;;  %338 = vst [vmem:[%s1387_s10 + $0x8] sm:$0xff] %v337_v3  ;;  %v341_v5 = vld [vmem:[%s1382_s9 + $0x30] sm:$0xff] }
  0x2f   : > { %340 = vst [vmem:[%s1387_s10 + $0x10] sm:$0xff] %v339_v4  ;;  %v343_v6 = vld [vmem:[%s1382_s9 + $0x40] sm:$0xff]  ;;  %v345_v7 = vld [vmem:[%s1382_s9 + $0x50] sm:$0xff]  ;;  %342 = vst [vmem:[%s1387_s10 + $0x18] sm:$0xff] %v341_v5 }
  0x30   : > { %344 = vst [vmem:[%s1387_s10 + $0x20] sm:$0xff] %v343_v6  ;;  %346 = vst [vmem:[%s1387_s10 + $0x28] sm:$0xff] %v345_v7  ;;  %v347_v8 = vld [vmem:[%s1382_s9 + $0x60] sm:$0xff]  ;;  %v349_v9 = vld [vmem:[%s1382_s9 + $0x70] sm:$0xff] }
  0x31   : > { %v351_v10 = vld [vmem:[%s1382_s9 + $0x80] sm:$0xff]  ;;  %348 = vst [vmem:[%s1387_s10 + $0x30] sm:$0xff] %v347_v8  ;;  %350 = vst [vmem:[%s1387_s10 + $0x38] sm:$0xff] %v349_v9  ;;  %v353_v11 = vld [vmem:[%s1382_s9 + $0x90] sm:$0xff] }
  0x32   : > { %352 = vst [vmem:[%s1387_s10 + $0x40] sm:$0xff] %v351_v10  ;;  %v355_v12 = vld [vmem:[%s1382_s9 + $0xa0] sm:$0xff]  ;;  %v357_v13 = vld [vmem:[%s1382_s9 + $0xb0] sm:$0xff]  ;;  %354 = vst [vmem:[%s1387_s10 + $0x48] sm:$0xff] %v353_v11 }
  0x33   : > { %356 = vst [vmem:[%s1387_s10 + $0x50] sm:$0xff] %v355_v12  ;;  %358 = vst [vmem:[%s1387_s10 + $0x58] sm:$0xff] %v357_v13  ;;  %v359_v14 = vld [vmem:[%s1382_s9 + $0xc0] sm:$0xff]  ;;  %v361_v15 = vld [vmem:[%s1382_s9 + $0xd0] sm:$0xff] }
  0x34   : > { %v363_v16 = vld [vmem:[%s1382_s9 + $0xe0] sm:$0xff]  ;;  %360 = vst [vmem:[%s1387_s10 + $0x60] sm:$0xff] %v359_v14  ;;  %362 = vst [vmem:[%s1387_s10 + $0x68] sm:$0xff] %v361_v15  ;;  %v365_v17 = vld [vmem:[%s1382_s9 + $0xf0] sm:$0xff] }
  0x35   : > { %364 = vst [vmem:[%s1387_s10 + $0x70] sm:$0xff] %v363_v16  ;;  %v367_v18 = vld [vmem:[%s1382_s9 + $0x100] sm:$0xff]  ;;  %v369_v19 = vld [vmem:[%s1382_s9 + $0x110] sm:$0xff]  ;;  %366 = vst [vmem:[%s1387_s10 + $0x78] sm:$0xff] %v365_v17 }
  0x36   : > { %368 = vst [vmem:[%s1387_s10 + $0x80] sm:$0xff] %v367_v18  ;;  %370 = vst [vmem:[%s1387_s10 + $0x88] sm:$0xff] %v369_v19  ;;  %v371_v20 = vld [vmem:[%s1382_s9 + $0x120] sm:$0xff]  ;;  %v373_v21 = vld [vmem:[%s1382_s9 + $0x130] sm:$0xff] }
  0x37   : > { %v375_v22 = vld [vmem:[%s1382_s9 + $0x140] sm:$0xff]  ;;  %372 = vst [vmem:[%s1387_s10 + $0x90] sm:$0xff] %v371_v20  ;;  %374 = vst [vmem:[%s1387_s10 + $0x98] sm:$0xff] %v373_v21  ;;  %v377_v23 = vld [vmem:[%s1382_s9 + $0x150] sm:$0xff] }
  0x38   : > { %376 = vst [vmem:[%s1387_s10 + $0xa0] sm:$0xff] %v375_v22  ;;  %v379_v24 = vld [vmem:[%s1382_s9 + $0x160] sm:$0xff]  ;;  %v381_v25 = vld [vmem:[%s1382_s9 + $0x170] sm:$0xff]  ;;  %378 = vst [vmem:[%s1387_s10 + $0xa8] sm:$0xff] %v377_v23 }
  0x39   : > { %380 = vst [vmem:[%s1387_s10 + $0xb0] sm:$0xff] %v379_v24  ;;  %382 = vst [vmem:[%s1387_s10 + $0xb8] sm:$0xff] %v381_v25  ;;  %v383_v26 = vld [vmem:[%s1382_s9 + $0x180] sm:$0xff]  ;;  %v385_v27 = vld [vmem:[%s1382_s9 + $0x190] sm:$0xff] }
  0x3a   : > { %v387_v28 = vld [vmem:[%s1382_s9 + $0x1a0] sm:$0xff]  ;;  %384 = vst [vmem:[%s1387_s10 + $0xc0] sm:$0xff] %v383_v26  ;;  %386 = vst [vmem:[%s1387_s10 + $0xc8] sm:$0xff] %v385_v27  ;;  %v389_v29 = vld [vmem:[%s1382_s9 + $0x1b0] sm:$0xff] }
  0x3b   : > { %388 = vst [vmem:[%s1387_s10 + $0xd0] sm:$0xff] %v387_v28  ;;  %v391_v30 = vld [vmem:[%s1382_s9 + $0x1c0] sm:$0xff]  ;;  %v393_v31 = vld [vmem:[%s1382_s9 + $0x1d0] sm:$0xff]  ;;  %390 = vst [vmem:[%s1387_s10 + $0xd8] sm:$0xff] %v389_v29 }
  0x3c   : > { %392 = vst [vmem:[%s1387_s10 + $0xe0] sm:$0xff] %v391_v30  ;;  %394 = vst [vmem:[%s1387_s10 + $0xe8] sm:$0xff] %v393_v31  ;;  %v395_v32 = vld [vmem:[%s1382_s9 + $0x1e0] sm:$0xff]  ;;  %v397_v33 = vld [vmem:[%s1382_s9 + $0x1f0] sm:$0xff] }
  0x3d   : > { %396 = vst [vmem:[%s1387_s10 + $0xf0] sm:$0xff] %v395_v32  ;;  %398 = vst [vmem:[%s1387_s10 + $0xf8] sm:$0xff] %v397_v33 }
  0x3e PF: > { %p964_p0 = scmp.ge.s32.totalorder %s1240_s25, 1  ;;  %p419_p1 = scmp.lt.s32.totalorder %s1240_s25, 19 }
  0x40   : > { %p420_p2 = pnand %p964_p0, %p419_p1 }
  0x41   : > { %s426_s20 = sand.u32 (!%p420_p2), 1, %s1216_s19   ;;  %s433_s27 = sand.u32 (!%p420_p2), 1, %s1208_s17  }
  0x42   : > { %423 = sbr.rel (%p420_p2) target bundleno = 385 (0x181), region = 104  ;;  %s1454_s28 = sshll.u32 (!%p420_p2), %s426_s20, 4 }
  0x43   : > { %s966_s7 = sshll.u32 (!%p420_p2), %s433_s27, 8  ;;  %s466_s8 = sand.u32 (!%p420_p2), 1, %s1200_s15  }
  0x44   : > { %s968_s11 = sshll.u32 (!%p420_p2), %s1228_s22, 1  ;;  %s967_s26 = sshll.u32 (!%p420_p2), %s466_s8, 5 }
  0x45   : > { %p474_p3 = scmp.lt.s32.totalorder (!%p420_p2), %s968_s11, 3  ;;  %s428_s19 = scalar_lea.vmem (!%p420_p2), [#allocation2], %s1454_s28 }
  0x46   : > { %s1469_s10 = scalar_lea.vmem (!%p420_p2), [#allocation3], %s966_s7  ;;  %s1471_s20 = scalar_lea.vmem (!%p420_p2), [#allocation4], %s967_s26 }
  0x47   : > { %p970_p4 = scmp.ne.s32.totalorder (!%p420_p2), %s1224_s21, 0 }
  0x49   : > { %s1618_s11 = smov (!%p474_p3, %s968_s11), 3  ;;  %488 = sbr.rel (%p970_p4) target bundleno = 80 (0x50), region = 116 }
  0x4a   : > { %s476_s6 = scalar_lea.vmem %s1586_s2, %s1618_s11  ;;  %s481_s17 = scalar_lea.vmem %s1587_s3, %s1618_s11  ;;  %v1242_v34 = vmov (!%p970_p4), 0.0  }
  0x4b   : > { %489 = vst [vmem:[%s1471_s20] sm:$0xff] (!%p970_p4), %v1242_v34  ;;  %490 = vst [vmem:[%s1471_s20 + $0x8] sm:$0xff] (!%p970_p4), %v1242_v34 }
  0x4c   : > { %491 = vst [vmem:[%s1471_s20 + $0x10] sm:$0xff] (!%p970_p4), %v1242_v34  ;;  %492 = vst [vmem:[%s1471_s20 + $0x18] sm:$0xff] (!%p970_p4), %v1242_v34 }
  0x50 PF: > { %v1103_v35 = vld [vmem:[%s1469_s10 + $0x4] ss:$8 sps:$4 sm:$0xff]   ;;  %v1105_v36 = vld [vmem:[%s1469_s10] ss:$8 sps:$4 sm:$0xff]   ;;  %v1106_v37 = vld [vmem:[%s1469_s10 + $0x14] ss:$8 sps:$4 sm:$0xff]  }
  0x51   : > { %701 = vmatprep.subr.bf16.mxu0 %v1103_v35  ;;  %v1108_v38 = vld [vmem:[%s1469_s10 + $0x10] ss:$8 sps:$4 sm:$0xff]   ;;  %v1109_v39 = vld [vmem:[%s1469_s10 + $0x24] ss:$8 sps:$4 sm:$0xff]   ;;  %v1111_v40 = vld [vmem:[%s1469_s10 + $0x20] ss:$8 sps:$4 sm:$0xff]  }
  0x52   : > { %702 = vmatpush1.bf16.msra.mxu0 %v1105_v36  ;;  %v1112_v41 = vld [vmem:[%s1469_s10 + $0x34] ss:$8 sps:$4 sm:$0xff]   ;;  %v1114_v42 = vld [vmem:[%s1469_s10 + $0x30] ss:$8 sps:$4 sm:$0xff]   ;;  %v1115_v43 = vld [vmem:[%s1469_s10 + $0x44] ss:$8 sps:$4 sm:$0xff]  }
  0x53   : > { %703 = vmatprep.subr.bf16.mxu0 %v1106_v37  ;;  %v1117_v44 = vld [vmem:[%s1469_s10 + $0x40] ss:$8 sps:$4 sm:$0xff]   ;;  %v1118_v45 = vld [vmem:[%s1469_s10 + $0x54] ss:$8 sps:$4 sm:$0xff]   ;;  %v1120_v46 = vld [vmem:[%s1469_s10 + $0x50] ss:$8 sps:$4 sm:$0xff]  }
  0x54   : > { %v1121_v47 = vld [vmem:[%s1469_s10 + $0x64] ss:$8 sps:$4 sm:$0xff]   ;;  %v1123_v49 = vld [vmem:[%s1469_s10 + $0x60] ss:$8 sps:$4 sm:$0xff]   ;;  %v1124_v50 = vld [vmem:[%s1469_s10 + $0x74] ss:$8 sps:$4 sm:$0xff]  }
  0x55   : > { %v1153_v48 = vld [vmem:[%s428_s19 + $0x4] ss:$8 sps:$4 sm:$0xff]   ;;  %v1126_v51 = vld [vmem:[%s1469_s10 + $0x70] ss:$8 sps:$4 sm:$0xff]   ;;  %v1129_v53 = vld [vmem:[%s1469_s10 + $0x80] ss:$8 sps:$4 sm:$0xff]  }
  0x56   : > { %704 = vmatpush1.bf16.msra.mxu0 %v1108_v38  ;;  %733 = vmatprep.mubr.bf16.mxu0 %v1153_v48  ;;  %v1127_v52 = vld [vmem:[%s1469_s10 + $0x84] ss:$8 sps:$4 sm:$0xff]   ;;  %v1130_v54 = vld [vmem:[%s1469_s10 + $0x94] ss:$8 sps:$4 sm:$0xff]   ;;  %v1132_v55 = vld [vmem:[%s1469_s10 + $0x90] ss:$8 sps:$4 sm:$0xff]  }
  0x57   : > { %705 = vmatprep.subr.bf16.mxu0 %v1109_v39  ;;  %v1133_v56 = vld [vmem:[%s1469_s10 + $0xa4] ss:$8 sps:$4 sm:$0xff]   ;;  %v1135_v57 = vld [vmem:[%s1469_s10 + $0xa0] ss:$8 sps:$4 sm:$0xff]   ;;  %v1136_v58 = vld [vmem:[%s1469_s10 + $0xb4] ss:$8 sps:$4 sm:$0xff]  }
  0x58   : > { %v1138_v59 = vld [vmem:[%s1469_s10 + $0xb0] ss:$8 sps:$4 sm:$0xff]   ;;  %v1139_v60 = vld [vmem:[%s1469_s10 + $0xc4] ss:$8 sps:$4 sm:$0xff]   ;;  %v1141_v61 = vld [vmem:[%s1469_s10 + $0xc0] ss:$8 sps:$4 sm:$0xff]  }
  0x59   : > { %v1142_v62 = vld [vmem:[%s1469_s10 + $0xd4] ss:$8 sps:$4 sm:$0xff]   ;;  %v1144_v63 = vld [vmem:[%s1469_s10 + $0xd0] ss:$8 sps:$4 sm:$0xff]   ;;  %v1145_v0 = vld [vmem:[%s1469_s10 + $0xe4] ss:$8 sps:$4 sm:$0xff]  }
  0x5a   : > { %706 = vmatpush1.bf16.msra.mxu0 %v1111_v40  ;;  %v1147_v1 = vld [vmem:[%s1469_s10 + $0xe0] ss:$8 sps:$4 sm:$0xff]   ;;  %v1148_v2 = vld [vmem:[%s1469_s10 + $0xf4] ss:$8 sps:$4 sm:$0xff]   ;;  %v1150_v3 = vld [vmem:[%s1469_s10 + $0xf0] ss:$8 sps:$4 sm:$0xff]  }
  0x5b   : > { %707 = vmatprep.subr.bf16.mxu0 %v1112_v41  ;;  %v1151_v4 = vld [vmem:[%s428_s19] ss:$8 sps:$4 sm:$0xff]   ;;  %p1005_p5 = scmp.ne.s32.totalorder %s1224_s21, 8 }
  0x5c   : > { %v493_v5 = vld [vmem:[%s1471_s20] sm:$0xff]  ;;  %v494_v6 = vld [vmem:[%s1471_s20 + $0x8] sm:$0xff]  ;;  %v495_v8 = vld [vmem:[%s1471_s20 + $0x10] sm:$0xff]  ;;  %v762_v17 = vlaneseq (!%p1005_p5) }
  0x5d   : > { %v496_v11 = vld [vmem:[%s1471_s20 + $0x18] sm:$0xff]  ;;  %v760_v19 = vld [vmem:[%s476_s6] sm:$0x3] (!%p1005_p5) }
  0x5e   : > { %708 = vmatpush1.bf16.msra.mxu0 %v1114_v42  ;;  %v763_v18 = vshrl.u32 (!%p1005_p5), %v762_v17, 7  ;;  %v776_v20 = vld [vmem:[%s481_s17] sm:$0x3] (!%p1005_p5) }
  0x5f   : > { %709 = vmatprep.subr.bf16.mxu0 %v1115_v43 }
  0x60   : > { %v764_v22 = vsub.s32 (!%p1005_p5), 0, %v763_v18  ;;  %v768_v23 = vsub.s32 (!%p1005_p5), 1, %v763_v18 }
  0x62   : > { %710 = vmatpush1.bf16.msra.mxu0 %v1117_v44  ;;  %v765_v27 = vrot.slane (!%p1005_p5), %v760_v19, %v764_v22  ;;  %v781_v28 = vrot.slane (!%p1005_p5), %v776_v20, %v764_v22  ;;  %v769_v29 = vrot.slane (!%p1005_p5), %v760_v19, %v768_v23  ;;  %v785_v30 = vrot.slane (!%p1005_p5), %v776_v20, %v768_v23 }
  0x63   : > { %711 = vmatprep.subr.bf16.mxu0 %v1118_v45 }
  0x66   : > { %712 = vmatpush1.bf16.msra.mxu0 %v1120_v46 }
  0x67   : > { %713 = vmatprep.subr.bf16.mxu0 %v1121_v47 }
  0x6a   : > { %714 = vmatpush1.bf16.msra.mxu0 %v1123_v49 }
  0x6b   : > { %715 = vmatprep.subr.bf16.mxu0 %v1124_v50 }
  0x6e   : > { %716 = vmatpush1.bf16.msra.mxu0 %v1126_v51 }
  0x6f   : > { %717 = vmatprep.subr.bf16.mxu0 %v1127_v52 }
  0x72   : > { %718 = vmatpush1.bf16.msra.mxu0 %v1129_v53 }
  0x73   : > { %719 = vmatprep.subr.bf16.mxu0 %v1130_v54 }
  0x76   : > { %720 = vmatpush1.bf16.msra.mxu0 %v1132_v55 }
  0x77   : > { %721 = vmatprep.subr.bf16.mxu0 %v1133_v56 }
  0x7a   : > { %722 = vmatpush1.bf16.msra.mxu0 %v1135_v57 }
  0x7b   : > { %723 = vmatprep.subr.bf16.mxu0 %v1136_v58 }
  0x7e   : > { %724 = vmatpush1.bf16.msra.mxu0 %v1138_v59 }
  0x7f   : > { %725 = vmatprep.subr.bf16.mxu0 %v1139_v60 }
  0x82   : > { %726 = vmatpush1.bf16.msra.mxu0 %v1141_v61 }
  0x83   : > { %727 = vmatprep.subr.bf16.mxu0 %v1142_v62 }
  0x86   : > { %728 = vmatpush1.bf16.msra.mxu0 %v1144_v63 }
  0x87   : > { %729 = vmatprep.subr.bf16.mxu0 %v1145_v0 }
  0x8a   : > { %730 = vmatpush1.bf16.msra.mxu0 %v1147_v1 }
  0x8b   : > { %731 = vmatprep.subr.bf16.mxu0 %v1148_v2 }
  0x8e   : > { %732 = vmatpush1.bf16.msra.mxu0 %v1150_v3 }
  0x91   : > { %734 = vmatmul.mubr.bf16.vlgmr.msra.gmra.mrb[0].mxu0 %v1151_v4 }
 0x164   : > { %v735_v7 = vpop.f32.mrb[0].mxu0  ;;  %755 = sbr.rel (%p1005_p5) target bundleno = 377 (0x179), region = 120 }
 0x165   : > { %v744_v9 = vadd.f32 %v735_v7, %v493_v5  ;;  %v737_v10 = vpop.f32.mrb[1].mxu0 }
 0x166   : > { %v745_v12 = vadd.f32 %v737_v10, %v494_v6  ;;  %v739_v13 = vpop.f32.mrb[2].mxu0 }
 0x167   : > { %748 = vst [vmem:[%s1471_s20] sm:$0xff] %v744_v9  ;;  %v746_v14 = vadd.f32 %v739_v13, %v495_v8  ;;  %v741_v15 = vpop.f32.mrb[3].mxu0 }
 0x168   : > { %749 = vst [vmem:[%s1471_s20 + $0x8] sm:$0xff] %v745_v12  ;;  %v747_v16 = vadd.f32 %v741_v15, %v496_v11 }
 0x169   : > { %750 = vst [vmem:[%s1471_s20 + $0x10] sm:$0xff] %v746_v14 }
 0x16a   : > { %751 = vst [vmem:[%s1471_s20 + $0x18] sm:$0xff] %v747_v16 }
 0x16e   : > { %v756_v21 = vld [vmem:[%s1471_s20] sm:$0xff] }
 0x16f   : > { %v757_v24 = vld [vmem:[%s1471_s20 + $0x8] sm:$0xff]  ;;  %v772_v31 = vmul.f32 %v765_v27, %v756_v21 }
 0x170   : > { %v758_v25 = vld [vmem:[%s1471_s20 + $0x10] sm:$0xff]  ;;  %v773_v32 = vmul.f32 %v769_v29, %v757_v24 }
 0x171   : > { %v759_v26 = vld [vmem:[%s1471_s20 + $0x18] sm:$0xff]  ;;  %v774_v33 = vmul.f32 %v765_v27, %v758_v25  ;;  %v788_v35 = vadd.f32 %v781_v28, %v772_v31 }
 0x172   : > { %v775_v34 = vmul.f32 %v769_v29, %v759_v26  ;;  %v789_v36 = vadd.f32 %v785_v30, %v773_v32 }
 0x173   : > { %v790_v37 = vadd.f32 %v781_v28, %v774_v33  ;;  %v792_v39 = vmax.f32 %v788_v35, 0.0 }
 0x174   : > { %v791_v38 = vadd.f32 %v785_v30, %v775_v34  ;;  %v793_v40 = vmax.f32 %v789_v36, 0.0 }
 0x175   : > { %v794_v41 = vmax.f32 %v790_v37, 0.0  ;;  %796 = vst [vmem:[%s1471_s20] sm:$0xff] %v792_v39 }
 0x176   : > { %v795_v42 = vmax.f32 %v791_v38, 0.0  ;;  %797 = vst [vmem:[%s1471_s20 + $0x8] sm:$0xff] %v793_v40 }
 0x177   : > { %798 = vst [vmem:[%s1471_s20 + $0x10] sm:$0xff] %v794_v41 }
 0x178   : > { %799 = vst [vmem:[%s1471_s20 + $0x18] sm:$0xff] %v795_v42 }
 0x179 PF: > { %806 = sbr.rel (!%p1362_p12) target bundleno = 385 (0x181), region = 124  ;;  %s1013_s21 = sshll.u32 (%p1362_p12), %s1228_s22, 4 }
 0x17a   : > { %s812_s26 = scalar_lea.vmem (%p1362_p12), %s1588_s4, %s1013_s21 }
 0x17c   : > { %v825_v43 = vld [vmem:[%s1471_s20] sm:$0xff] (%p1362_p12) }
 0x17d   : > { %v827_v44 = vld [vmem:[%s1471_s20 + $0x8] sm:$0xff] (%p1362_p12)  ;;  %826 = vst [vmem:[%s812_s26] sm:$0xff] (%p1362_p12), %v825_v43 }
 0x17e   : > { %v829_v45 = vld [vmem:[%s1471_s20 + $0x10] sm:$0xff] (%p1362_p12)  ;;  %828 = vst [vmem:[%s812_s26 + $0x8] sm:$0xff] (%p1362_p12), %v827_v44 }
 0x17f   : > { %v831_v46 = vld [vmem:[%s1471_s20 + $0x18] sm:$0xff] (%p1362_p12)  ;;  %830 = vst [vmem:[%s812_s26 + $0x20] sm:$0xff] (%p1362_p12), %v829_v45 }
 0x180   : > { %832 = vst [vmem:[%s812_s26 + $0x28] sm:$0xff] %v831_v46 }
 0x181 PF: > { %s14_s25 = sadd.s32 1, %s1240_s25   ;;  %s1599_s19 = sld [smem:[#allocation5_spill]] }
 0x182   : > { %p11_p6 = scmp.ge.s32.totalorder %s14_s25, 20   ;;  %s1600_s20 = sld [smem:[#allocation8_spill]] }
 0x183   : > { %s1601_s14 = sld [smem:[#allocation6_spill]]  ;;  %s1602_s5 = sld [smem:[#allocation7_spill]] }
 0x184   : > { %s1603_s15 = smov %s1204_s16  ;;  %s1604_s16 = smov %s1360_s13 }
 0x185   : > { %s1605_s17 = smov %s1212_s18  ;;  %s1606_s18 = smov %s1357_s12 }
 0x186   : > { %s1607_s21 = smov %s1232_s23  ;;  %s1608_s22 = smov %s1236_s24 }
 0x187   :  { %13 = sbr.rel (!%p11_p6) target bundleno = 6 (0x6), region = 192 }
 0x189   : > { %s1609_s23 = smov %s1601_s14  ;;  %s1610_s24 = smov %s1602_s5 }

// kernel: featurizer_forward.39
= control target key start
LH: loop header
LB: loop body
LE: loop exit
PB: predicated region body
PF: predicated region fallthrough
CT: control target
= control target key end

     0   :  { %s1102_s15 = smov 0   ;;  %s1104_s16 = smov 0   ;;  %s1293_s0 = inlined_call_operand.vmem [shape: bf16[16,256], index: 0, kind: input, shape index: {}]   ;;  %s1294_s1 = inlined_call_operand.vmem [shape: bf16[256,512], index: 1, kind: input, shape index: {}]   ;;  %s1295_s2 = inlined_call_operand.vmem [shape: f32[1,512], index: 2, kind: input, shape index: {}]   ;;  %s1296_s3 = inlined_call_operand.vmem [shape: f32[1,512], index: 3, kind: input, shape index: {}]   ;;  %s1297_s4 = inlined_call_operand.vmem [shape: f32[16,512], index: 4, kind: output, shape index: {}]  }
   0x1   :  { %s1106_s17 = smov 0   ;;  %s1108_s18 = smov 0  }
   0x2   :  { %s1110_s19 = smov 0  }
   0x3 LB: > { %s29_s20 = sadd.s32 1, %s1071_s18  ;;  %s892_s21 = sadd.s32 4294967295, %s1075_s19   ;;  %s1075_s19 = sphi %s1110_s19, %s14_s19   ;;  %s1071_s18 = sphi %s1108_s18, %s1302_s18   ;;  %s1067_s17 = sphi %s1106_s17, %s1301_s17   ;;  %s1063_s16 = sphi %s1104_s16, %s1300_s16   ;;  %s1059_s15 = sphi %s1102_s15, %s1299_s15  }
   0x4   : > { %p31_p0 = scmp.ge.s32.totalorder %s29_s20, 2  ;;  %p77_p1 = scmp.ne.s32.totalorder %s1063_s16, %s1059_s15 }
   0x5   : > { %p78_p2 = scmp.eq.s32.totalorder %s1075_s19, 0  ;;  %p161_p4 = scmp.eq.s32.totalorder %s892_s21, 1 }
   0x6   : > { %s1304_s20 = smov (%p31_p0, %s29_s20), 0  ;;  %s70_s23 = sadd.s32 1, %s1063_s16 }
   0x7   : > { %p79_p3 = por %p78_p2, %p77_p1  ;;  %s66_s22 = ssub.s32 %s1071_s18, %s1304_s20 }
   0x8   : > { %p68_p5 = scmp.eq.s32.totalorder %s66_s22, 0  ;;  %p1137_p6 = por %p161_p4, %p77_p1 }
   0x9   : > { %p896_p7 = scmp.ge.s32.totalorder %s1075_s19, 2 }
   0xa   : > { %s1142_s25 = scalar_select %p68_p5, %s1063_s16, %s70_s23  }
   0xb   : > { %198 = sbr.rel (%p896_p7) target bundleno = 38 (0x26), region = 20 }
  0x12   : > { %201 = sbr.rel (!%p79_p3) target bundleno = 38 (0x26), region = 24  ;;  %s203_s26 = sand.u32 (%p79_p3), 1, %s1063_s16  }
  0x13   : > { %s944_s27 = sshll.u32 (%p79_p3), %s1071_s18, 3  ;;  %s897_s28 = sshll.u32 (%p79_p3), %s203_s26, 8 }
  0x14   : > { %s1150_s5 = scalar_lea.vmem (%p79_p3), %s1294_s1, %s944_s27  ;;  %s1155_s6 = scalar_lea.vmem (%p79_p3), [#allocation2], %s897_s28 }
  0x15   : > { %v301_v0 = vld [vmem:[%s1150_s5] sm:$0xff] (%p79_p3)  ;;  %v303_v1 = vld [vmem:[%s1150_s5 + $0x10] sm:$0xff] (%p79_p3) }
  0x16   : > { %v305_v2 = vld [vmem:[%s1150_s5 + $0x20] sm:$0xff] (%p79_p3)  ;;  %302 = vst [vmem:[%s1155_s6] sm:$0xff] (%p79_p3), %v301_v0  ;;  %304 = vst [vmem:[%s1155_s6 + $0x8] sm:$0xff] (%p79_p3), %v303_v1  ;;  %v307_v3 = vld [vmem:[%s1150_s5 + $0x30] sm:$0xff] (%p79_p3) }
  0x17   : > { %306 = vst [vmem:[%s1155_s6 + $0x10] sm:$0xff] (%p79_p3), %v305_v2  ;;  %v309_v4 = vld [vmem:[%s1150_s5 + $0x40] sm:$0xff] (%p79_p3)  ;;  %v311_v5 = vld [vmem:[%s1150_s5 + $0x50] sm:$0xff] (%p79_p3)  ;;  %308 = vst [vmem:[%s1155_s6 + $0x18] sm:$0xff] (%p79_p3), %v307_v3 }
  0x18   : > { %310 = vst [vmem:[%s1155_s6 + $0x20] sm:$0xff] (%p79_p3), %v309_v4  ;;  %312 = vst [vmem:[%s1155_s6 + $0x28] sm:$0xff] (%p79_p3), %v311_v5  ;;  %v313_v6 = vld [vmem:[%s1150_s5 + $0x60] sm:$0xff] (%p79_p3)  ;;  %v315_v7 = vld [vmem:[%s1150_s5 + $0x70] sm:$0xff] (%p79_p3) }
  0x19   : > { %v317_v8 = vld [vmem:[%s1150_s5 + $0x80] sm:$0xff]  ;;  %314 = vst [vmem:[%s1155_s6 + $0x30] sm:$0xff] %v313_v6  ;;  %316 = vst [vmem:[%s1155_s6 + $0x38] sm:$0xff] %v315_v7  ;;  %v319_v9 = vld [vmem:[%s1150_s5 + $0x90] sm:$0xff] }
  0x1a   : > { %318 = vst [vmem:[%s1155_s6 + $0x40] sm:$0xff] %v317_v8  ;;  %v321_v10 = vld [vmem:[%s1150_s5 + $0xa0] sm:$0xff]  ;;  %v323_v11 = vld [vmem:[%s1150_s5 + $0xb0] sm:$0xff]  ;;  %320 = vst [vmem:[%s1155_s6 + $0x48] sm:$0xff] %v319_v9 }
  0x1b   : > { %322 = vst [vmem:[%s1155_s6 + $0x50] sm:$0xff] %v321_v10  ;;  %324 = vst [vmem:[%s1155_s6 + $0x58] sm:$0xff] %v323_v11  ;;  %v325_v12 = vld [vmem:[%s1150_s5 + $0xc0] sm:$0xff]  ;;  %v327_v13 = vld [vmem:[%s1150_s5 + $0xd0] sm:$0xff] }
  0x1c   : > { %v329_v14 = vld [vmem:[%s1150_s5 + $0xe0] sm:$0xff]  ;;  %326 = vst [vmem:[%s1155_s6 + $0x60] sm:$0xff] %v325_v12  ;;  %328 = vst [vmem:[%s1155_s6 + $0x68] sm:$0xff] %v327_v13  ;;  %v331_v15 = vld [vmem:[%s1150_s5 + $0xf0] sm:$0xff] }
  0x1d   : > { %330 = vst [vmem:[%s1155_s6 + $0x70] sm:$0xff] %v329_v14  ;;  %v333_v16 = vld [vmem:[%s1150_s5 + $0x100] sm:$0xff]  ;;  %v335_v17 = vld [vmem:[%s1150_s5 + $0x110] sm:$0xff]  ;;  %332 = vst [vmem:[%s1155_s6 + $0x78] sm:$0xff] %v331_v15 }
  0x1e   : > { %334 = vst [vmem:[%s1155_s6 + $0x80] sm:$0xff] %v333_v16  ;;  %336 = vst [vmem:[%s1155_s6 + $0x88] sm:$0xff] %v335_v17  ;;  %v337_v18 = vld [vmem:[%s1150_s5 + $0x120] sm:$0xff]  ;;  %v339_v19 = vld [vmem:[%s1150_s5 + $0x130] sm:$0xff] }
  0x1f   : > { %v341_v20 = vld [vmem:[%s1150_s5 + $0x140] sm:$0xff]  ;;  %338 = vst [vmem:[%s1155_s6 + $0x90] sm:$0xff] %v337_v18  ;;  %340 = vst [vmem:[%s1155_s6 + $0x98] sm:$0xff] %v339_v19  ;;  %v343_v21 = vld [vmem:[%s1150_s5 + $0x150] sm:$0xff] }
  0x20   : > { %342 = vst [vmem:[%s1155_s6 + $0xa0] sm:$0xff] %v341_v20  ;;  %v345_v22 = vld [vmem:[%s1150_s5 + $0x160] sm:$0xff]  ;;  %v347_v23 = vld [vmem:[%s1150_s5 + $0x170] sm:$0xff]  ;;  %344 = vst [vmem:[%s1155_s6 + $0xa8] sm:$0xff] %v343_v21 }
  0x21   : > { %346 = vst [vmem:[%s1155_s6 + $0xb0] sm:$0xff] %v345_v22  ;;  %348 = vst [vmem:[%s1155_s6 + $0xb8] sm:$0xff] %v347_v23  ;;  %v349_v24 = vld [vmem:[%s1150_s5 + $0x180] sm:$0xff]  ;;  %v351_v25 = vld [vmem:[%s1150_s5 + $0x190] sm:$0xff] }
  0x22   : > { %v353_v26 = vld [vmem:[%s1150_s5 + $0x1a0] sm:$0xff]  ;;  %350 = vst [vmem:[%s1155_s6 + $0xc0] sm:$0xff] %v349_v24  ;;  %352 = vst [vmem:[%s1155_s6 + $0xc8] sm:$0xff] %v351_v25  ;;  %v355_v27 = vld [vmem:[%s1150_s5 + $0x1b0] sm:$0xff] }
  0x23   : > { %354 = vst [vmem:[%s1155_s6 + $0xd0] sm:$0xff] %v353_v26  ;;  %v357_v28 = vld [vmem:[%s1150_s5 + $0x1c0] sm:$0xff]  ;;  %v359_v29 = vld [vmem:[%s1150_s5 + $0x1d0] sm:$0xff]  ;;  %356 = vst [vmem:[%s1155_s6 + $0xd8] sm:$0xff] %v355_v27 }
  0x24   : > { %358 = vst [vmem:[%s1155_s6 + $0xe0] sm:$0xff] %v357_v28  ;;  %360 = vst [vmem:[%s1155_s6 + $0xe8] sm:$0xff] %v359_v29  ;;  %v361_v30 = vld [vmem:[%s1150_s5 + $0x1e0] sm:$0xff]  ;;  %v363_v31 = vld [vmem:[%s1150_s5 + $0x1f0] sm:$0xff] }
  0x25   : > { %362 = vst [vmem:[%s1155_s6 + $0xf0] sm:$0xff] %v361_v30  ;;  %364 = vst [vmem:[%s1155_s6 + $0xf8] sm:$0xff] %v363_v31 }
  0x26 PF: > { %p900_p8 = scmp.ge.s32.totalorder %s1075_s19, 1  ;;  %p385_p9 = scmp.lt.s32.totalorder %s1075_s19, 3 }
  0x28   : > { %p386_p10 = pnand %p900_p8, %p385_p9 }
  0x29   : > { %s392_s7 = sand.u32 (!%p386_p10), 1, %s1059_s15   ;;  %v1036_v32 = vld [vmem:[%s1293_s0 + $0x4] ss:$8 sps:$4 sm:$0xff] (!%p386_p10)   ;;  %v1034_v1 = vld [vmem:[%s1293_s0] ss:$8 sps:$4 sm:$0xff] (!%p386_p10)   ;;  %s903_s14 = sshll.u32 (!%p386_p10), %s1067_s17, 1  ;;  %v709_v2 = vlaneseq (!%p386_p10) }
  0x2a   : > { %389 = sbr.rel (%p386_p10) target bundleno = 337 (0x151), region = 70  ;;  %s901_s8 = sshll.u32 (!%p386_p10), %s392_s7, 8  ;;  %696 = vmatprep.mubr.bf16.mxu0 (!%p386_p10), %v1036_v32 }
  0x2b   : > { %s1226_s11 = scalar_lea.vmem (!%p386_p10), [#allocation2], %s901_s8  ;;  %p449_p11 = scmp.lt.s32.totalorder (!%p386_p10), %s903_s14, 3  ;;  %v710_v3 = vshrl.u32 (!%p386_p10), %v709_v2, 7 }
  0x2c   : > { %v986_v33 = vld [vmem:[%s1226_s11 + $0x4] ss:$8 sps:$4 sm:$0xff] (!%p386_p10)   ;;  %v988_v34 = vld [vmem:[%s1226_s11] ss:$8 sps:$4 sm:$0xff] (!%p386_p10)   ;;  %v989_v35 = vld [vmem:[%s1226_s11 + $0x14] ss:$8 sps:$4 sm:$0xff] (!%p386_p10)  }
  0x2d   : > { %664 = vmatprep.subr.bf16.mxu0 (!%p386_p10), %v986_v33  ;;  %v991_v36 = vld [vmem:[%s1226_s11 + $0x10] ss:$8 sps:$4 sm:$0xff] (!%p386_p10)   ;;  %v992_v37 = vld [vmem:[%s1226_s11 + $0x24] ss:$8 sps:$4 sm:$0xff] (!%p386_p10)   ;;  %v994_v38 = vld [vmem:[%s1226_s11 + $0x20] ss:$8 sps:$4 sm:$0xff] (!%p386_p10)  }
  0x2e   : > { %665 = vmatpush1.bf16.msra.mxu0 (!%p386_p10), %v988_v34  ;;  %v995_v39 = vld [vmem:[%s1226_s11 + $0x34] ss:$8 sps:$4 sm:$0xff] (!%p386_p10)   ;;  %v997_v40 = vld [vmem:[%s1226_s11 + $0x30] ss:$8 sps:$4 sm:$0xff] (!%p386_p10)   ;;  %v998_v41 = vld [vmem:[%s1226_s11 + $0x44] ss:$8 sps:$4 sm:$0xff] (!%p386_p10)  }
  0x2f   : > { %666 = vmatprep.subr.bf16.mxu0 (!%p386_p10), %v989_v35  ;;  %v1000_v42 = vld [vmem:[%s1226_s11 + $0x40] ss:$8 sps:$4 sm:$0xff] (!%p386_p10)   ;;  %v1001_v43 = vld [vmem:[%s1226_s11 + $0x54] ss:$8 sps:$4 sm:$0xff] (!%p386_p10)   ;;  %v1003_v44 = vld [vmem:[%s1226_s11 + $0x50] ss:$8 sps:$4 sm:$0xff] (!%p386_p10)  }
  0x30   : > { %v1004_v45 = vld [vmem:[%s1226_s11 + $0x64] ss:$8 sps:$4 sm:$0xff] (!%p386_p10)   ;;  %v1006_v46 = vld [vmem:[%s1226_s11 + $0x60] ss:$8 sps:$4 sm:$0xff] (!%p386_p10)   ;;  %v1007_v47 = vld [vmem:[%s1226_s11 + $0x74] ss:$8 sps:$4 sm:$0xff] (!%p386_p10)  }
  0x31   : > { %v1009_v48 = vld [vmem:[%s1226_s11 + $0x70] ss:$8 sps:$4 sm:$0xff]   ;;  %v1010_v49 = vld [vmem:[%s1226_s11 + $0x84] ss:$8 sps:$4 sm:$0xff]   ;;  %v1012_v50 = vld [vmem:[%s1226_s11 + $0x80] ss:$8 sps:$4 sm:$0xff]  }
  0x32   : > { %667 = vmatpush1.bf16.msra.mxu0 %v991_v36  ;;  %v1013_v51 = vld [vmem:[%s1226_s11 + $0x94] ss:$8 sps:$4 sm:$0xff]   ;;  %v1015_v52 = vld [vmem:[%s1226_s11 + $0x90] ss:$8 sps:$4 sm:$0xff]   ;;  %v1016_v53 = vld [vmem:[%s1226_s11 + $0xa4] ss:$8 sps:$4 sm:$0xff]  }
  0x33   : > { %668 = vmatprep.subr.bf16.mxu0 %v992_v37  ;;  %v1018_v54 = vld [vmem:[%s1226_s11 + $0xa0] ss:$8 sps:$4 sm:$0xff]   ;;  %v1019_v55 = vld [vmem:[%s1226_s11 + $0xb4] ss:$8 sps:$4 sm:$0xff]   ;;  %v1021_v56 = vld [vmem:[%s1226_s11 + $0xb0] ss:$8 sps:$4 sm:$0xff]  }
  0x34   : > { %v1022_v57 = vld [vmem:[%s1226_s11 + $0xc4] ss:$8 sps:$4 sm:$0xff]   ;;  %v1024_v58 = vld [vmem:[%s1226_s11 + $0xc0] ss:$8 sps:$4 sm:$0xff]   ;;  %v1025_v59 = vld [vmem:[%s1226_s11 + $0xd4] ss:$8 sps:$4 sm:$0xff]  }
  0x35   : > { %v1027_v60 = vld [vmem:[%s1226_s11 + $0xd0] ss:$8 sps:$4 sm:$0xff]   ;;  %v1028_v61 = vld [vmem:[%s1226_s11 + $0xe4] ss:$8 sps:$4 sm:$0xff]   ;;  %v1030_v62 = vld [vmem:[%s1226_s11 + $0xe0] ss:$8 sps:$4 sm:$0xff]  }
  0x36   : > { %669 = vmatpush1.bf16.msra.mxu0 %v994_v38  ;;  %v1031_v63 = vld [vmem:[%s1226_s11 + $0xf4] ss:$8 sps:$4 sm:$0xff]   ;;  %v1033_v0 = vld [vmem:[%s1226_s11 + $0xf0] ss:$8 sps:$4 sm:$0xff]   ;;  %s1306_s14 = smov (!%p449_p11, %s903_s14), 3  ;;  %v711_v4 = vsub.s32 0, %v710_v3 }
  0x37   : > { %670 = vmatprep.subr.bf16.mxu0 %v995_v39  ;;  %s451_s23 = scalar_lea.vmem %s1295_s2, %s1306_s14  ;;  %s456_s28 = scalar_lea.vmem %s1296_s3, %s1306_s14  ;;  %v715_v6 = vsub.s32 1, %v710_v3 }
  0x38   : > { %v707_v5 = vld [vmem:[%s451_s23] sm:$0x3]  ;;  %s902_s29 = sshll.u32 %s392_s7, 5  ;;  %s945_s15 = sshll.u32 (%p1137_p6), %s1067_s17, 4 }
  0x39   : > { %v723_v7 = vld [vmem:[%s456_s28] sm:$0x3]  ;;  %v712_v8 = vrot.slane %v707_v5, %v711_v4  ;;  %v716_v9 = vrot.slane %v707_v5, %v715_v6  ;;  %s433_s30 = scalar_lea.vmem [#allocation3], %s902_s29  ;;  %s755_s7 = scalar_lea.vmem (%p1137_p6), %s1297_s4, %s945_s15 }
  0x3a   : > { %671 = vmatpush1.bf16.msra.mxu0 %v997_v40  ;;  %v728_v10 = vrot.slane %v723_v7, %v711_v4  ;;  %v732_v12 = vrot.slane %v723_v7, %v715_v6 }
  0x3b   : > { %672 = vmatprep.subr.bf16.mxu0 %v998_v41 }
  0x3e   : > { %673 = vmatpush1.bf16.msra.mxu0 %v1000_v42 }
  0x3f   : > { %674 = vmatprep.subr.bf16.mxu0 %v1001_v43 }
  0x42   : > { %675 = vmatpush1.bf16.msra.mxu0 %v1003_v44 }
  0x43   : > { %676 = vmatprep.subr.bf16.mxu0 %v1004_v45 }
  0x46   : > { %677 = vmatpush1.bf16.msra.mxu0 %v1006_v46 }
  0x47   : > { %678 = vmatprep.subr.bf16.mxu0 %v1007_v47 }
  0x4a   : > { %679 = vmatpush1.bf16.msra.mxu0 %v1009_v48 }
  0x4b   : > { %680 = vmatprep.subr.bf16.mxu0 %v1010_v49 }
  0x4e   : > { %681 = vmatpush1.bf16.msra.mxu0 %v1012_v50 }
  0x4f   : > { %682 = vmatprep.subr.bf16.mxu0 %v1013_v51 }
  0x52   : > { %683 = vmatpush1.bf16.msra.mxu0 %v1015_v52 }
  0x53   : > { %684 = vmatprep.subr.bf16.mxu0 %v1016_v53 }
  0x56   : > { %685 = vmatpush1.bf16.msra.mxu0 %v1018_v54 }
  0x57   : > { %686 = vmatprep.subr.bf16.mxu0 %v1019_v55 }
  0x5a   : > { %687 = vmatpush1.bf16.msra.mxu0 %v1021_v56 }
  0x5b   : > { %688 = vmatprep.subr.bf16.mxu0 %v1022_v57 }
  0x5e   : > { %689 = vmatpush1.bf16.msra.mxu0 %v1024_v58 }
  0x5f   : > { %690 = vmatprep.subr.bf16.mxu0 %v1025_v59 }
  0x62   : > { %691 = vmatpush1.bf16.msra.mxu0 %v1027_v60 }
  0x63   : > { %692 = vmatprep.subr.bf16.mxu0 %v1028_v61 }
  0x66   : > { %693 = vmatpush1.bf16.msra.mxu0 %v1030_v62 }
  0x67   : > { %694 = vmatprep.subr.bf16.mxu0 %v1031_v63 }
  0x6a   : > { %695 = vmatpush1.bf16.msra.mxu0 %v1033_v0 }
  0x6d   : > { %697 = vmatmul.mubr.bf16.vlgmr.msra.gmra.mrb[0].mxu0 %v1034_v1 }
 0x140   : > { %v698_v11 = vpop.f32.mrb[0].mxu0 }
 0x141   : > { %v719_v13 = vmul.f32 %v712_v8, %v698_v11  ;;  %v700_v14 = vpop.f32.mrb[1].mxu0 }
 0x142   : > { %v720_v15 = vmul.f32 %v716_v9, %v700_v14  ;;  %v702_v16 = vpop.f32.mrb[2].mxu0  ;;  %749 = sbr.rel (!%p1137_p6) target bundleno = 337 (0x151), region = 78 }
 0x143   : > { %v735_v17 = vadd.f32 %v728_v10, %v719_v13  ;;  %v721_v18 = vmul.f32 %v712_v8, %v702_v16  ;;  %v704_v19 = vpop.f32.mrb[3].mxu0 }
 0x144   : > { %v736_v20 = vadd.f32 %v732_v12, %v720_v15  ;;  %v722_v21 = vmul.f32 %v716_v9, %v704_v19 }
 0x145   : > { %739 = vst [vmem:[%s433_s30] sm:$0xff] %v735_v17  ;;  %v737_v22 = vadd.f32 %v728_v10, %v721_v18 }
 0x146   : > { %740 = vst [vmem:[%s433_s30 + $0x8] sm:$0xff] %v736_v20  ;;  %v738_v23 = vadd.f32 %v732_v12, %v722_v21 }
 0x147   : > { %741 = vst [vmem:[%s433_s30 + $0x10] sm:$0xff] %v737_v22 }
 0x148   : > { %742 = vst [vmem:[%s433_s30 + $0x18] sm:$0xff] %v738_v23 }
 0x14c   : > { %v768_v24 = vld [vmem:[%s433_s30] sm:$0xff] }
 0x14d   : > { %v770_v25 = vld [vmem:[%s433_s30 + $0x8] sm:$0xff]  ;;  %769 = vst [vmem:[%s755_s7] sm:$0xff] %v768_v24 }
 0x14e   : > { %v772_v26 = vld [vmem:[%s433_s30 + $0x10] sm:$0xff]  ;;  %771 = vst [vmem:[%s755_s7 + $0x8] sm:$0xff] %v770_v25 }
 0x14f   : > { %v774_v27 = vld [vmem:[%s433_s30 + $0x18] sm:$0xff]  ;;  %773 = vst [vmem:[%s755_s7 + $0x20] sm:$0xff] %v772_v26 }
 0x150   : > { %775 = vst [vmem:[%s755_s7 + $0x28] sm:$0xff] %v774_v27 }
 0x151 PF: > { %s14_s19 = sadd.s32 1, %s1075_s19   ;;  %s1299_s15 = smov %s1063_s16 }
 0x152   : > { %p11_p12 = scmp.ge.s32.totalorder %s14_s19, 4   ;;  %s1300_s16 = smov %s1142_s25 }
 0x153   : > { %s1301_s17 = smov %s1071_s18  ;;  %s1302_s18 = smov %s1304_s20 }
 0x154   :  { %13 = sbr.rel (!%p11_p12) target bundleno = 3 (0x3), region = 141 }

// kernel: featurizer_forward.40
= control target key start
LH: loop header
LB: loop body
LE: loop exit
PB: predicated region body
PF: predicated region fallthrough
CT: control target
= control target key end

     0   :  { %s2272_s0 = inlined_call_operand.vmem [shape: bf16[16,4608], index: 0, kind: input, shape index: {}]   ;;  %s2273_s1 = inlined_call_operand.vmem [shape: bf16[4608,512], index: 1, kind: input, shape index: {}]   ;;  %s2274_s2 = inlined_call_operand.vmem [shape: f32[1,512], index: 2, kind: input, shape index: {}]   ;;  %s2275_s3 = inlined_call_operand.vmem [shape: f32[1,512], index: 3, kind: input, shape index: {}]   ;;  %s2276_s4 = inlined_call_operand.vmem [shape: f32[16,512], index: 4, kind: input, shape index: {}]   ;;  %s2277_s5 = inlined_call_operand.vmem [shape: f32[16,512], index: 5, kind: output, shape index: {}]  }
   0x1   :  { %2281 = sst [smem:[#allocation10_spill]] %s2272_s0 }
   0x2   :  { %s1838_s18 = smov 0   ;;  %s1840_s19 = smov 0  }
   0x3   :  { %s1842_s20 = smov 0   ;;  %s1844_s21 = smov 0  }
   0x4   :  { %s1846_s22 = smov 0   ;;  %s1848_s23 = smov 0  }
   0x5   :  { %s1850_s24 = smov 0   ;;  %s1852_s25 = smov 0  }
   0x6   :  { %s1854_s26 = smov 0   ;;  %s1856_s27 = smov 0  }
   0x7   :  { %s1858_s28 = smov 0  }
   0x8 LB: > { %2282 = sst [smem:[#allocation6_spill]] %s1785_s23  ;;  %s1423_s29 = sadd.s32 4294967295, %s1805_s28   ;;  %s1805_s28 = sphi %s1858_s28, %s15_s28   ;;  %s1801_s27 = sphi %s1856_s27, %s2302_s27   ;;  %s1797_s26 = sphi %s1854_s26, %s2301_s26   ;;  %s1793_s25 = sphi %s1852_s25, %s2300_s25   ;;  %s1789_s24 = sphi %s1850_s24, %s2299_s24   ;;  %s1785_s23 = sphi %s1848_s23, %s2292_s23   ;;  %s1781_s22 = sphi %s1846_s22, %s2291_s22   ;;  %s1777_s21 = sphi %s1844_s21, %s2298_s21   ;;  %s1773_s20 = sphi %s1842_s20, %s2297_s20   ;;  %s1769_s19 = sphi %s1840_s19, %s2296_s19   ;;  %s1765_s18 = sphi %s1838_s18, %s2295_s18  }
   0x9   : > { %s27_s30 = sadd.s32 1, %s1797_s26  ;;  %s30_s6 = sadd.s32 1, %s1801_s27 }
   0xa   : > { %p28_p0 = scmp.ge.s32.totalorder %s27_s30, 9  ;;  %s43_s7 = sadd.s32 1, %s1785_s23 }
   0xb   : > { %p50_p1 = scmp.ne.s32.totalorder %s1785_s23, %s1781_s22  ;;  %p51_p2 = scmp.eq.s32.totalorder %s1805_s28, 0 }
   0xc   : > { %s2304_s30 = smov (%p28_p0, %s27_s30), 0  ;;  %s2306_s6 = smov (!%p28_p0, %s30_s6), %s1801_s27 }
   0xd   : > { %2283 = sst [smem:[#allocation7_spill]] %s2304_s30  ;;  %s39_s8 = ssub.s32 %s1797_s26, %s2304_s30 }
   0xe   : > { %p32_p3 = scmp.ge.s32.totalorder %s2306_s6, 2  ;;  %p41_p4 = scmp.eq.s32.totalorder %s39_s8, 0 }
   0xf   : > { %p1907_p5 = por %p51_p2, %p50_p1  ;;  %s71_s10 = sadd.s32 1, %s1777_s21 }
  0x10   : > { %s2308_s6 = smov (%p32_p3, %s2306_s6), 0  ;;  %p78_p6 = scmp.ne.s32.totalorder %s1777_s21, %s1773_s20 }
  0x11   : > { %2285 = sst [smem:[#allocation8_spill]] %s2308_s6  ;;  %s67_s12 = ssub.s32 %s1801_s27, %s2308_s6 }
  0x12   : > { %s1915_s11 = scalar_select %p41_p4, %s1785_s23, %s43_s7  }
  0x13   : > { %s68_s13 = sor.u32 %s67_s12, %s39_s8  ;;  %p149_p7 = scmp.eq.s32.totalorder %s67_s12, 0 }
  0x14   : > { %2286 = sst [smem:[#allocation9_spill]] %s1915_s11  ;;  %p69_p8 = scmp.eq.s32.totalorder %s68_s13, 0 }
  0x15   : > { %p1923_p9 = por %p78_p6, %p51_p2  ;;  %s151_s15 = sadd.s32 1, %s1769_s19 }
  0x16   : > { %p158_p10 = scmp.ne.s32.totalorder %s1769_s19, %s1765_s18  ;;  %p190_p12 = scmp.eq.s32.totalorder %s1423_s29, 17 }
  0x17   : > { %s1931_s16 = scalar_select %p69_p8, %s1777_s21, %s71_s10  }
  0x18   : > { %s1934_s17 = scalar_select %p149_p7, %s1769_s19, %s151_s15  }
  0x19   : > { %p1938_p11 = por %p158_p10, %p51_p2  ;;  %p1942_p13 = por %p190_p12, %p158_p10 }
  0x1a   : > { %p1426_p0 = scmp.ge.s32.totalorder %s1805_s28, 18 }
  0x1c   : > { %212 = sbr.rel (%p1426_p0) target bundleno = 93 (0x5d), region = 16 }
  0x23   : > { %215 = sbr.rel (!%p1907_p5) target bundleno = 47 (0x2f), region = 20  ;;  %s217_s10 = sand.u32 (%p1907_p5), 1, %s1785_s23  }
  0x24   : > { %s1520_s12 = sshll.u32 (%p1907_p5), %s1797_s26, 4  ;;  %s1427_s13 = sshll.u32 (%p1907_p5), %s217_s10, 5 }
  0x25   : > { %s2290_s0 = sld [smem:[#allocation10_spill]] (%p1907_p5)  ;;  %s219_s29 = scalar_lea.vmem (%p1907_p5), [#allocation2], %s1427_s13 }
  0x2b   : > { %s225_s30 = scalar_lea.vmem %s2290_s0, %s1520_s12 }
  0x2c   : > { %v238_v0 = vld [vmem:[%s225_s30] sm:$0xff]  ;;  %v240_v1 = vld [vmem:[%s225_s30 + $0x8] sm:$0xff]  ;;  %v242_v2 = vld [vmem:[%s225_s30 + $0x90] sm:$0xff] }
  0x2d   : > { %239 = vst [vmem:[%s219_s29] sm:$0xff] %v238_v0  ;;  %241 = vst [vmem:[%s219_s29 + $0x8] sm:$0xff] %v240_v1  ;;  %v244_v3 = vld [vmem:[%s225_s30 + $0x98] sm:$0xff] }
  0x2e   : > { %243 = vst [vmem:[%s219_s29 + $0x10] sm:$0xff] %v242_v2  ;;  %245 = vst [vmem:[%s219_s29 + $0x18] sm:$0xff] %v244_v3 }
  0x2f PF: > { %251 = sbr.rel (!%p1923_p9) target bundleno = 86 (0x56), region = 43  ;;  %s253_s9 = sand.u32 (%p1923_p9), 1, %s1777_s21  }
  0x30   : > { %s1432_s10 = sshll.u32 (%p1923_p9), %s1801_s27, 1  ;;  %s1430_s6 = sshll.u32 (%p1923_p9), %s253_s9, 9 }
  0x31   : > { %s1521_s12 = sshll.u32 (%p1923_p9), %s1797_s26, 8  ;;  %s1967_s30 = scalar_lea.vmem (%p1923_p9), [#allocation3], %s1430_s6 }
  0x32   : > { %s259_s15 = sadd.s32 (%p1923_p9), %s1521_s12, %s1432_s10 }
  0x33   : > { %s1434_s0 = sshll.u32 (%p1923_p9), %s259_s15, 2 }
  0x34   : > { %s1962_s23 = scalar_lea.vmem (%p1923_p9), %s2273_s1, %s1434_s0 }
  0x35   : > { %v415_v4 = vld [vmem:[%s1962_s23] sm:$0xff] (%p1923_p9)  ;;  %v417_v5 = vld [vmem:[%s1962_s23 + $0x10] sm:$0xff] (%p1923_p9) }
  0x36   : > { %v419_v6 = vld [vmem:[%s1962_s23 + $0x20] sm:$0xff]  ;;  %416 = vst [vmem:[%s1967_s30] sm:$0xff] %v415_v4  ;;  %418 = vst [vmem:[%s1967_s30 + $0x8] sm:$0xff] %v417_v5  ;;  %v421_v7 = vld [vmem:[%s1962_s23 + $0x30] sm:$0xff] }
  0x37   : > { %420 = vst [vmem:[%s1967_s30 + $0x10] sm:$0xff] %v419_v6  ;;  %v423_v8 = vld [vmem:[%s1962_s23 + $0x40] sm:$0xff]  ;;  %v425_v9 = vld [vmem:[%s1962_s23 + $0x50] sm:$0xff]  ;;  %422 = vst [vmem:[%s1967_s30 + $0x18] sm:$0xff] %v421_v7 }
  0x38   : > { %424 = vst [vmem:[%s1967_s30 + $0x20] sm:$0xff] %v423_v8  ;;  %426 = vst [vmem:[%s1967_s30 + $0x28] sm:$0xff] %v425_v9  ;;  %v427_v10 = vld [vmem:[%s1962_s23 + $0x60] sm:$0xff]  ;;  %v429_v11 = vld [vmem:[%s1962_s23 + $0x70] sm:$0xff] }
  0x39   : > { %v431_v12 = vld [vmem:[%s1962_s23 + $0x80] sm:$0xff]  ;;  %428 = vst [vmem:[%s1967_s30 + $0x30] sm:$0xff] %v427_v10  ;;  %430 = vst [vmem:[%s1967_s30 + $0x38] sm:$0xff] %v429_v11  ;;  %v433_v13 = vld [vmem:[%s1962_s23 + $0x90] sm:$0xff] }
  0x3a   : > { %432 = vst [vmem:[%s1967_s30 + $0x40] sm:$0xff] %v431_v12  ;;  %v435_v14 = vld [vmem:[%s1962_s23 + $0xa0] sm:$0xff]  ;;  %v437_v15 = vld [vmem:[%s1962_s23 + $0xb0] sm:$0xff]  ;;  %434 = vst [vmem:[%s1967_s30 + $0x48] sm:$0xff] %v433_v13 }
  0x3b   : > { %436 = vst [vmem:[%s1967_s30 + $0x50] sm:$0xff] %v435_v14  ;;  %438 = vst [vmem:[%s1967_s30 + $0x58] sm:$0xff] %v437_v15  ;;  %v439_v16 = vld [vmem:[%s1962_s23 + $0xc0] sm:$0xff]  ;;  %v441_v17 = vld [vmem:[%s1962_s23 + $0xd0] sm:$0xff] }
  0x3c   : > { %v443_v18 = vld [vmem:[%s1962_s23 + $0xe0] sm:$0xff]  ;;  %440 = vst [vmem:[%s1967_s30 + $0x60] sm:$0xff] %v439_v16  ;;  %442 = vst [vmem:[%s1967_s30 + $0x68] sm:$0xff] %v441_v17  ;;  %v445_v19 = vld [vmem:[%s1962_s23 + $0xf0] sm:$0xff] }
  0x3d   : > { %444 = vst [vmem:[%s1967_s30 + $0x70] sm:$0xff] %v443_v18  ;;  %v447_v20 = vld [vmem:[%s1962_s23 + $0x100] sm:$0xff]  ;;  %v449_v21 = vld [vmem:[%s1962_s23 + $0x110] sm:$0xff]  ;;  %446 = vst [vmem:[%s1967_s30 + $0x78] sm:$0xff] %v445_v19 }
  0x3e   : > { %448 = vst [vmem:[%s1967_s30 + $0x80] sm:$0xff] %v447_v20  ;;  %450 = vst [vmem:[%s1967_s30 + $0x88] sm:$0xff] %v449_v21  ;;  %v451_v22 = vld [vmem:[%s1962_s23 + $0x120] sm:$0xff]  ;;  %v453_v23 = vld [vmem:[%s1962_s23 + $0x130] sm:$0xff] }
  0x3f   : > { %v455_v24 = vld [vmem:[%s1962_s23 + $0x140] sm:$0xff]  ;;  %452 = vst [vmem:[%s1967_s30 + $0x90] sm:$0xff] %v451_v22  ;;  %454 = vst [vmem:[%s1967_s30 + $0x98] sm:$0xff] %v453_v23  ;;  %v457_v25 = vld [vmem:[%s1962_s23 + $0x150] sm:$0xff] }
  0x40   : > { %456 = vst [vmem:[%s1967_s30 + $0xa0] sm:$0xff] %v455_v24  ;;  %v459_v26 = vld [vmem:[%s1962_s23 + $0x160] sm:$0xff]  ;;  %v461_v27 = vld [vmem:[%s1962_s23 + $0x170] sm:$0xff]  ;;  %458 = vst [vmem:[%s1967_s30 + $0xa8] sm:$0xff] %v457_v25 }
  0x41   : > { %460 = vst [vmem:[%s1967_s30 + $0xb0] sm:$0xff] %v459_v26  ;;  %462 = vst [vmem:[%s1967_s30 + $0xb8] sm:$0xff] %v461_v27  ;;  %v463_v28 = vld [vmem:[%s1962_s23 + $0x180] sm:$0xff]  ;;  %v465_v29 = vld [vmem:[%s1962_s23 + $0x190] sm:$0xff] }
  0x42   : > { %v467_v30 = vld [vmem:[%s1962_s23 + $0x1a0] sm:$0xff]  ;;  %464 = vst [vmem:[%s1967_s30 + $0xc0] sm:$0xff] %v463_v28  ;;  %466 = vst [vmem:[%s1967_s30 + $0xc8] sm:$0xff] %v465_v29  ;;  %v469_v31 = vld [vmem:[%s1962_s23 + $0x1b0] sm:$0xff] }
  0x43   : > { %468 = vst [vmem:[%s1967_s30 + $0xd0] sm:$0xff] %v467_v30  ;;  %v471_v32 = vld [vmem:[%s1962_s23 + $0x1c0] sm:$0xff]  ;;  %v473_v33 = vld [vmem:[%s1962_s23 + $0x1d0] sm:$0xff]  ;;  %470 = vst [vmem:[%s1967_s30 + $0xd8] sm:$0xff] %v469_v31 }
  0x44   : > { %472 = vst [vmem:[%s1967_s30 + $0xe0] sm:$0xff] %v471_v32  ;;  %474 = vst [vmem:[%s1967_s30 + $0xe8] sm:$0xff] %v473_v33  ;;  %v475_v34 = vld [vmem:[%s1962_s23 + $0x1e0] sm:$0xff]  ;;  %v477_v35 = vld [vmem:[%s1962_s23 + $0x1f0] sm:$0xff] }
  0x45   : > { %v479_v36 = vld [vmem:[%s1962_s23 + $0x200] sm:$0xff]  ;;  %476 = vst [vmem:[%s1967_s30 + $0xf0] sm:$0xff] %v475_v34  ;;  %478 = vst [vmem:[%s1967_s30 + $0xf8] sm:$0xff] %v477_v35  ;;  %v481_v37 = vld [vmem:[%s1962_s23 + $0x210] sm:$0xff] }
  0x46   : > { %480 = vst [vmem:[%s1967_s30 + $0x100] sm:$0xff] %v479_v36  ;;  %v483_v38 = vld [vmem:[%s1962_s23 + $0x220] sm:$0xff]  ;;  %v485_v39 = vld [vmem:[%s1962_s23 + $0x230] sm:$0xff]  ;;  %482 = vst [vmem:[%s1967_s30 + $0x108] sm:$0xff] %v481_v37 }
  0x47   : > { %484 = vst [vmem:[%s1967_s30 + $0x110] sm:$0xff] %v483_v38  ;;  %486 = vst [vmem:[%s1967_s30 + $0x118] sm:$0xff] %v485_v39  ;;  %v487_v40 = vld [vmem:[%s1962_s23 + $0x240] sm:$0xff]  ;;  %v489_v41 = vld [vmem:[%s1962_s23 + $0x250] sm:$0xff] }
  0x48   : > { %v491_v42 = vld [vmem:[%s1962_s23 + $0x260] sm:$0xff]  ;;  %488 = vst [vmem:[%s1967_s30 + $0x120] sm:$0xff] %v487_v40  ;;  %490 = vst [vmem:[%s1967_s30 + $0x128] sm:$0xff] %v489_v41  ;;  %v493_v43 = vld [vmem:[%s1962_s23 + $0x270] sm:$0xff] }
  0x49   : > { %492 = vst [vmem:[%s1967_s30 + $0x130] sm:$0xff] %v491_v42  ;;  %v495_v44 = vld [vmem:[%s1962_s23 + $0x280] sm:$0xff]  ;;  %v497_v45 = vld [vmem:[%s1962_s23 + $0x290] sm:$0xff]  ;;  %494 = vst [vmem:[%s1967_s30 + $0x138] sm:$0xff] %v493_v43 }
  0x4a   : > { %496 = vst [vmem:[%s1967_s30 + $0x140] sm:$0xff] %v495_v44  ;;  %498 = vst [vmem:[%s1967_s30 + $0x148] sm:$0xff] %v497_v45  ;;  %v499_v46 = vld [vmem:[%s1962_s23 + $0x2a0] sm:$0xff]  ;;  %v501_v47 = vld [vmem:[%s1962_s23 + $0x2b0] sm:$0xff] }
  0x4b   : > { %v503_v48 = vld [vmem:[%s1962_s23 + $0x2c0] sm:$0xff]  ;;  %500 = vst [vmem:[%s1967_s30 + $0x150] sm:$0xff] %v499_v46  ;;  %502 = vst [vmem:[%s1967_s30 + $0x158] sm:$0xff] %v501_v47  ;;  %v505_v49 = vld [vmem:[%s1962_s23 + $0x2d0] sm:$0xff] }
  0x4c   : > { %504 = vst [vmem:[%s1967_s30 + $0x160] sm:$0xff] %v503_v48  ;;  %v507_v50 = vld [vmem:[%s1962_s23 + $0x2e0] sm:$0xff]  ;;  %v509_v51 = vld [vmem:[%s1962_s23 + $0x2f0] sm:$0xff]  ;;  %506 = vst [vmem:[%s1967_s30 + $0x168] sm:$0xff] %v505_v49 }
  0x4d   : > { %508 = vst [vmem:[%s1967_s30 + $0x170] sm:$0xff] %v507_v50  ;;  %510 = vst [vmem:[%s1967_s30 + $0x178] sm:$0xff] %v509_v51  ;;  %v511_v52 = vld [vmem:[%s1962_s23 + $0x300] sm:$0xff]  ;;  %v513_v53 = vld [vmem:[%s1962_s23 + $0x310] sm:$0xff] }
  0x4e   : > { %v515_v54 = vld [vmem:[%s1962_s23 + $0x320] sm:$0xff]  ;;  %512 = vst [vmem:[%s1967_s30 + $0x180] sm:$0xff] %v511_v52  ;;  %514 = vst [vmem:[%s1967_s30 + $0x188] sm:$0xff] %v513_v53  ;;  %v517_v55 = vld [vmem:[%s1962_s23 + $0x330] sm:$0xff] }
  0x4f   : > { %516 = vst [vmem:[%s1967_s30 + $0x190] sm:$0xff] %v515_v54  ;;  %v519_v56 = vld [vmem:[%s1962_s23 + $0x340] sm:$0xff]  ;;  %v521_v57 = vld [vmem:[%s1962_s23 + $0x350] sm:$0xff]  ;;  %518 = vst [vmem:[%s1967_s30 + $0x198] sm:$0xff] %v517_v55 }
  0x50   : > { %520 = vst [vmem:[%s1967_s30 + $0x1a0] sm:$0xff] %v519_v56  ;;  %522 = vst [vmem:[%s1967_s30 + $0x1a8] sm:$0xff] %v521_v57  ;;  %v523_v58 = vld [vmem:[%s1962_s23 + $0x360] sm:$0xff]  ;;  %v525_v59 = vld [vmem:[%s1962_s23 + $0x370] sm:$0xff] }
  0x51   : > { %v527_v60 = vld [vmem:[%s1962_s23 + $0x380] sm:$0xff]  ;;  %524 = vst [vmem:[%s1967_s30 + $0x1b0] sm:$0xff] %v523_v58  ;;  %526 = vst [vmem:[%s1967_s30 + $0x1b8] sm:$0xff] %v525_v59  ;;  %v529_v61 = vld [vmem:[%s1962_s23 + $0x390] sm:$0xff] }
  0x52   : > { %528 = vst [vmem:[%s1967_s30 + $0x1c0] sm:$0xff] %v527_v60  ;;  %v531_v62 = vld [vmem:[%s1962_s23 + $0x3a0] sm:$0xff]  ;;  %v533_v63 = vld [vmem:[%s1962_s23 + $0x3b0] sm:$0xff]  ;;  %530 = vst [vmem:[%s1967_s30 + $0x1c8] sm:$0xff] %v529_v61 }
  0x53   : > { %532 = vst [vmem:[%s1967_s30 + $0x1d0] sm:$0xff] %v531_v62  ;;  %534 = vst [vmem:[%s1967_s30 + $0x1d8] sm:$0xff] %v533_v63  ;;  %v535_v0 = vld [vmem:[%s1962_s23 + $0x3c0] sm:$0xff]  ;;  %v537_v1 = vld [vmem:[%s1962_s23 + $0x3d0] sm:$0xff] }
  0x54   : > { %v539_v2 = vld [vmem:[%s1962_s23 + $0x3e0] sm:$0xff]  ;;  %536 = vst [vmem:[%s1967_s30 + $0x1e0] sm:$0xff] %v535_v0  ;;  %538 = vst [vmem:[%s1967_s30 + $0x1e8] sm:$0xff] %v537_v1  ;;  %v541_v3 = vld [vmem:[%s1962_s23 + $0x3f0] sm:$0xff] }
  0x55   : > { %540 = vst [vmem:[%s1967_s30 + $0x1f0] sm:$0xff] %v539_v2  ;;  %542 = vst [vmem:[%s1967_s30 + $0x1f8] sm:$0xff] %v541_v3 }
  0x56 PF: > { %564 = sbr.rel (!%p1938_p11) target bundleno = 93 (0x5d), region = 89  ;;  %s566_s0 = sand.u32 (%p1938_p11), 1, %s1769_s19  }
  0x57   : > { %s1522_s11 = sshll.u32 (%p1938_p11), %s1801_s27, 4  ;;  %s1435_s14 = sshll.u32 (%p1938_p11), %s566_s0, 5 }
  0x58   : > { %s574_s10 = scalar_lea.vmem (%p1938_p11), %s2276_s4, %s1522_s11  ;;  %s568_s6 = scalar_lea.vmem (%p1938_p11), [#allocation4], %s1435_s14 }
  0x59   : > { %v587_v4 = vld [vmem:[%s574_s10] sm:$0xff] (%p1938_p11)  ;;  %v589_v5 = vld [vmem:[%s574_s10 + $0x8] sm:$0xff] (%p1938_p11) }
  0x5a   : > { %v591_v6 = vld [vmem:[%s574_s10 + $0x20] sm:$0xff] (%p1938_p11)  ;;  %588 = vst [vmem:[%s568_s6] sm:$0xff] (%p1938_p11), %v587_v4  ;;  %590 = vst [vmem:[%s568_s6 + $0x8] sm:$0xff] (%p1938_p11), %v589_v5  ;;  %v593_v7 = vld [vmem:[%s574_s10 + $0x28] sm:$0xff] (%p1938_p11) }
  0x5b   : > { %592 = vst [vmem:[%s568_s6 + $0x10] sm:$0xff] (%p1938_p11), %v591_v6  ;;  %594 = vst [vmem:[%s568_s6 + $0x18] sm:$0xff] (%p1938_p11), %v593_v7 }
  0x5d PF: > { %p1438_p1 = scmp.ge.s32.totalorder %s1805_s28, 1  ;;  %p599_p2 = scmp.lt.s32.totalorder %s1805_s28, 19 }
  0x5f   : > { %p600_p3 = pnand %p1438_p1, %p599_p2 }
  0x60   : > { %s606_s23 = sand.u32 (!%p600_p3), 1, %s1781_s22   ;;  %s613_s7 = sand.u32 (!%p600_p3), 1, %s1773_s20  }
  0x61   : > { %603 = sbr.rel (%p600_p3) target bundleno = 421 (0x1a5), region = 112  ;;  %s1439_s12 = sshll.u32 (!%p600_p3), %s606_s23, 5 }
  0x62   : > { %s1440_s15 = sshll.u32 (!%p600_p3), %s613_s7, 9  ;;  %s620_s13 = sand.u32 (!%p600_p3), 1, %s1765_s18  }
  0x63   : > { %s1443_s30 = sshll.u32 (!%p600_p3), %s1793_s25, 1  ;;  %s1441_s0 = sshll.u32 (!%p600_p3), %s620_s13, 5 }
  0x64   : > { %p667_p4 = scmp.lt.s32.totalorder (!%p600_p3), %s1443_s30, 3  ;;  %s2117_s22 = scalar_lea.vmem (!%p600_p3), [#allocation2], %s1439_s12 }
  0x65   : > { %s2119_s20 = scalar_lea.vmem (!%p600_p3), [#allocation3], %s1440_s15  ;;  %s2121_s18 = scalar_lea.vmem (!%p600_p3), [#allocation4], %s1441_s0 }
  0x66   : > { %s2123_s23 = scalar_lea.vmem (!%p600_p3), [#allocation5], %s1441_s0  ;;  %p1445_p5 = scmp.ne.s32.totalorder (!%p600_p3), %s1789_s24, 0 }
  0x68   : > { %s2310_s30 = smov (!%p667_p4, %s1443_s30), 3  ;;  %683 = sbr.rel (%p1445_p5) target bundleno = 111 (0x6f), region = 128 }
  0x69   : > { %s669_s29 = scalar_lea.vmem %s2274_s2, %s2310_s30  ;;  %s674_s6 = scalar_lea.vmem %s2275_s3, %s2310_s30  ;;  %v1807_v8 = vmov (!%p1445_p5), 0.0  }
  0x6a   : > { %684 = vst [vmem:[%s2123_s23] sm:$0xff] (!%p1445_p5), %v1807_v8  ;;  %685 = vst [vmem:[%s2123_s23 + $0x8] sm:$0xff] (!%p1445_p5), %v1807_v8 }
  0x6b   : > { %686 = vst [vmem:[%s2123_s23 + $0x10] sm:$0xff] (!%p1445_p5), %v1807_v8  ;;  %687 = vst [vmem:[%s2123_s23 + $0x18] sm:$0xff] (!%p1445_p5), %v1807_v8 }
  0x6f PF: > { %v1617_v9 = vld [vmem:[%s2119_s20 + $0x4] ss:$8 sps:$4 sm:$0xff]   ;;  %v1621_v11 = vld [vmem:[%s2119_s20] ss:$8 sps:$4 sm:$0xff]   ;;  %v1623_v13 = vld [vmem:[%s2119_s20 + $0x14] ss:$8 sps:$4 sm:$0xff]  }
  0x70   : > { %v1619_v10 = vld [vmem:[%s2119_s20 + $0x104] ss:$8 sps:$4 sm:$0xff]   ;;  %1100 = vmatprep.subr.bf16.mxu1 %v1617_v9  ;;  %v1622_v12 = vld [vmem:[%s2119_s20 + $0x100] ss:$8 sps:$4 sm:$0xff]   ;;  %v1625_v14 = vld [vmem:[%s2119_s20 + $0x114] ss:$8 sps:$4 sm:$0xff]  }
  0x71   : > { %1143 = vmatprep.subr.bf16.mxu0 %v1619_v10  ;;  %1101 = vmatpush1.bf16.msra.mxu1 %v1621_v11  ;;  %v1627_v15 = vld [vmem:[%s2119_s20 + $0x10] ss:$8 sps:$4 sm:$0xff]   ;;  %v1629_v17 = vld [vmem:[%s2119_s20 + $0x24] ss:$8 sps:$4 sm:$0xff]   ;;  %v1633_v19 = vld [vmem:[%s2119_s20 + $0x20] ss:$8 sps:$4 sm:$0xff]  }
  0x72   : > { %1144 = vmatpush1.bf16.msra.mxu0 %v1622_v12  ;;  %1102 = vmatprep.subr.bf16.mxu1 %v1623_v13  ;;  %v1628_v16 = vld [vmem:[%s2119_s20 + $0x110] ss:$8 sps:$4 sm:$0xff]   ;;  %v1631_v18 = vld [vmem:[%s2119_s20 + $0x124] ss:$8 sps:$4 sm:$0xff]   ;;  %v1634_v20 = vld [vmem:[%s2119_s20 + $0x120] ss:$8 sps:$4 sm:$0xff]  }
  0x73   : > { %1145 = vmatprep.subr.bf16.mxu0 %v1625_v14  ;;  %v1635_v21 = vld [vmem:[%s2119_s20 + $0x34] ss:$8 sps:$4 sm:$0xff]   ;;  %v1639_v23 = vld [vmem:[%s2119_s20 + $0x30] ss:$8 sps:$4 sm:$0xff]   ;;  %v1641_v25 = vld [vmem:[%s2119_s20 + $0x44] ss:$8 sps:$4 sm:$0xff]  }
  0x74   : > { %v1637_v22 = vld [vmem:[%s2119_s20 + $0x134] ss:$8 sps:$4 sm:$0xff]   ;;  %v1640_v24 = vld [vmem:[%s2119_s20 + $0x130] ss:$8 sps:$4 sm:$0xff]   ;;  %v1643_v26 = vld [vmem:[%s2119_s20 + $0x144] ss:$8 sps:$4 sm:$0xff]  }
  0x75   : > { %1103 = vmatpush1.bf16.msra.mxu1 %v1627_v15  ;;  %v1645_v27 = vld [vmem:[%s2119_s20 + $0x40] ss:$8 sps:$4 sm:$0xff]   ;;  %v1647_v29 = vld [vmem:[%s2119_s20 + $0x54] ss:$8 sps:$4 sm:$0xff]   ;;  %v1651_v31 = vld [vmem:[%s2119_s20 + $0x50] ss:$8 sps:$4 sm:$0xff]  }
  0x76   : > { %1146 = vmatpush1.bf16.msra.mxu0 %v1628_v16  ;;  %1104 = vmatprep.subr.bf16.mxu1 %v1629_v17  ;;  %v1646_v28 = vld [vmem:[%s2119_s20 + $0x140] ss:$8 sps:$4 sm:$0xff]   ;;  %v1649_v30 = vld [vmem:[%s2119_s20 + $0x154] ss:$8 sps:$4 sm:$0xff]   ;;  %v1652_v32 = vld [vmem:[%s2119_s20 + $0x150] ss:$8 sps:$4 sm:$0xff]  }
  0x77   : > { %1147 = vmatprep.subr.bf16.mxu0 %v1631_v18  ;;  %v1653_v33 = vld [vmem:[%s2119_s20 + $0x64] ss:$8 sps:$4 sm:$0xff]   ;;  %v1657_v35 = vld [vmem:[%s2119_s20 + $0x60] ss:$8 sps:$4 sm:$0xff]   ;;  %v1659_v37 = vld [vmem:[%s2119_s20 + $0x74] ss:$8 sps:$4 sm:$0xff]  }
  0x78   : > { %v1655_v34 = vld [vmem:[%s2119_s20 + $0x164] ss:$8 sps:$4 sm:$0xff]   ;;  %v1658_v36 = vld [vmem:[%s2119_s20 + $0x160] ss:$8 sps:$4 sm:$0xff]   ;;  %v1661_v38 = vld [vmem:[%s2119_s20 + $0x174] ss:$8 sps:$4 sm:$0xff]  }
  0x79   : > { %1105 = vmatpush1.bf16.msra.mxu1 %v1633_v19  ;;  %v1663_v39 = vld [vmem:[%s2119_s20 + $0x70] ss:$8 sps:$4 sm:$0xff]   ;;  %v1665_v41 = vld [vmem:[%s2119_s20 + $0x84] ss:$8 sps:$4 sm:$0xff]   ;;  %v1669_v43 = vld [vmem:[%s2119_s20 + $0x80] ss:$8 sps:$4 sm:$0xff]  }
  0x7a   : > { %1148 = vmatpush1.bf16.msra.mxu0 %v1634_v20  ;;  %1106 = vmatprep.subr.bf16.mxu1 %v1635_v21  ;;  %v1664_v40 = vld [vmem:[%s2119_s20 + $0x170] ss:$8 sps:$4 sm:$0xff]   ;;  %v1667_v42 = vld [vmem:[%s2119_s20 + $0x184] ss:$8 sps:$4 sm:$0xff]   ;;  %v1670_v44 = vld [vmem:[%s2119_s20 + $0x180] ss:$8 sps:$4 sm:$0xff]  }
  0x7b   : > { %1149 = vmatprep.subr.bf16.mxu0 %v1637_v22  ;;  %v1671_v45 = vld [vmem:[%s2119_s20 + $0x94] ss:$8 sps:$4 sm:$0xff]   ;;  %v1675_v47 = vld [vmem:[%s2119_s20 + $0x90] ss:$8 sps:$4 sm:$0xff]   ;;  %v1677_v49 = vld [vmem:[%s2119_s20 + $0xa4] ss:$8 sps:$4 sm:$0xff]  }
  0x7c   : > { %v1673_v46 = vld [vmem:[%s2119_s20 + $0x194] ss:$8 sps:$4 sm:$0xff]   ;;  %v1676_v48 = vld [vmem:[%s2119_s20 + $0x190] ss:$8 sps:$4 sm:$0xff]   ;;  %v1679_v50 = vld [vmem:[%s2119_s20 + $0x1a4] ss:$8 sps:$4 sm:$0xff]  }
  0x7d   : > { %1107 = vmatpush1.bf16.msra.mxu1 %v1639_v23  ;;  %v1681_v51 = vld [vmem:[%s2119_s20 + $0xa0] ss:$8 sps:$4 sm:$0xff]   ;;  %v1683_v53 = vld [vmem:[%s2119_s20 + $0xb4] ss:$8 sps:$4 sm:$0xff]   ;;  %v1687_v55 = vld [vmem:[%s2119_s20 + $0xb0] ss:$8 sps:$4 sm:$0xff]  }
  0x7e   : > { %1150 = vmatpush1.bf16.msra.mxu0 %v1640_v24  ;;  %1108 = vmatprep.subr.bf16.mxu1 %v1641_v25  ;;  %v1682_v52 = vld [vmem:[%s2119_s20 + $0x1a0] ss:$8 sps:$4 sm:$0xff]   ;;  %v1685_v54 = vld [vmem:[%s2119_s20 + $0x1b4] ss:$8 sps:$4 sm:$0xff]   ;;  %v1688_v57 = vld [vmem:[%s2119_s20 + $0x1b0] ss:$8 sps:$4 sm:$0xff]  }
  0x7f   : > { %1151 = vmatprep.subr.bf16.mxu0 %v1643_v26  ;;  %v1715_v56 = vld [vmem:[%s2117_s22 + $0x4] ss:$16 sps:$4 sm:$0xff]   ;;  %v1718_v60 = vld [vmem:[%s2117_s22 + $0xc] ss:$16 sps:$4 sm:$0xff]   ;;  %v1693_v61 = vld [vmem:[%s2119_s20 + $0xc0] ss:$8 sps:$4 sm:$0xff]  }
  0x80   : > { %v1689_v58 = vld [vmem:[%s2119_s20 + $0xc4] ss:$8 sps:$4 sm:$0xff]   ;;  %1132 = vmatprep.mubr.bf16.mxu1 %v1715_v56  ;;  %1175 = vmatprep.mubr.bf16.mxu0 %v1718_v60  ;;  %v1694_v62 = vld [vmem:[%s2119_s20 + $0x1c0] ss:$8 sps:$4 sm:$0xff]   ;;  %v1695_v63 = vld [vmem:[%s2119_s20 + $0xd4] ss:$8 sps:$4 sm:$0xff]  }
  0x81   : > { %1109 = vmatpush1.bf16.msra.mxu1 %v1645_v27  ;;  %v1691_v59 = vld [vmem:[%s2119_s20 + $0x1c4] ss:$8 sps:$4 sm:$0xff]   ;;  %v1697_v0 = vld [vmem:[%s2119_s20 + $0x1d4] ss:$8 sps:$4 sm:$0xff]   ;;  %v1699_v1 = vld [vmem:[%s2119_s20 + $0xd0] ss:$8 sps:$4 sm:$0xff]  }
  0x82   : > { %1152 = vmatpush1.bf16.msra.mxu0 %v1646_v28  ;;  %1110 = vmatprep.subr.bf16.mxu1 %v1647_v29  ;;  %v1700_v2 = vld [vmem:[%s2119_s20 + $0x1d0] ss:$8 sps:$4 sm:$0xff]   ;;  %v1701_v3 = vld [vmem:[%s2119_s20 + $0xe4] ss:$8 sps:$4 sm:$0xff]   ;;  %v1705_v5 = vld [vmem:[%s2119_s20 + $0xe0] ss:$8 sps:$4 sm:$0xff]  }
  0x83   : > { %1153 = vmatprep.subr.bf16.mxu0 %v1649_v30  ;;  %v1703_v4 = vld [vmem:[%s2119_s20 + $0x1e4] ss:$8 sps:$4 sm:$0xff]   ;;  %v1706_v6 = vld [vmem:[%s2119_s20 + $0x1e0] ss:$8 sps:$4 sm:$0xff]   ;;  %v1707_v7 = vld [vmem:[%s2119_s20 + $0xf4] ss:$8 sps:$4 sm:$0xff]  }
  0x84   : > { %v1709_v8 = vld [vmem:[%s2119_s20 + $0x1f4] ss:$8 sps:$4 sm:$0xff]   ;;  %v1711_v9 = vld [vmem:[%s2119_s20 + $0xf0] ss:$8 sps:$4 sm:$0xff]   ;;  %v688_v14 = vld [vmem:[%s2123_s23] sm:$0xff]  ;;  %p1514_p6 = scmp.ne.s32.totalorder %s1789_s24, 8 }
  0x85   : > { %1111 = vmatpush1.bf16.msra.mxu1 %v1651_v31  ;;  %v1712_v10 = vld [vmem:[%s2119_s20 + $0x1f0] ss:$8 sps:$4 sm:$0xff]   ;;  %v689_v18 = vld [vmem:[%s2123_s23 + $0x8] sm:$0xff] }
  0x86   : > { %1154 = vmatpush1.bf16.msra.mxu0 %v1652_v32  ;;  %1112 = vmatprep.subr.bf16.mxu1 %v1653_v33  ;;  %v1713_v11 = vld [vmem:[%s2117_s22] ss:$16 sps:$4 sm:$0xff]   ;;  %v1716_v12 = vld [vmem:[%s2117_s22 + $0x8] ss:$16 sps:$4 sm:$0xff]   ;;  %v1204_v33 = vlaneseq (!%p1514_p6) }
  0x87   : > { %1155 = vmatprep.subr.bf16.mxu0 %v1655_v34  ;;  %v690_v22 = vld [vmem:[%s2123_s23 + $0x10] sm:$0xff]  ;;  %v691_v27 = vld [vmem:[%s2123_s23 + $0x18] sm:$0xff] }
  0x88   : > { %v1205_v34 = vshrl.u32 (!%p1514_p6), %v1204_v33, 7 }
  0x89   : > { %1113 = vmatpush1.bf16.msra.mxu1 %v1657_v35  ;;  %v1202_v35 = vld [vmem:[%s669_s29] sm:$0x3] (!%p1514_p6) }
  0x8a   : > { %1156 = vmatpush1.bf16.msra.mxu0 %v1658_v36  ;;  %1114 = vmatprep.subr.bf16.mxu1 %v1659_v37  ;;  %v1218_v36 = vld [vmem:[%s674_s6] sm:$0x3] (!%p1514_p6) }
  0x8b   : > { %1157 = vmatprep.subr.bf16.mxu0 %v1661_v38  ;;  %v1206_v38 = vsub.s32 (!%p1514_p6), 0, %v1205_v34 }
  0x8d   : > { %1115 = vmatpush1.bf16.msra.mxu1 %v1663_v39  ;;  %v1210_v39 = vsub.s32 (!%p1514_p6), 1, %v1205_v34 }
  0x8e   : > { %1158 = vmatpush1.bf16.msra.mxu0 %v1664_v40  ;;  %1116 = vmatprep.subr.bf16.mxu1 %v1665_v41 }
  0x8f   : > { %1159 = vmatprep.subr.bf16.mxu0 %v1667_v42 }
  0x91   : > { %1117 = vmatpush1.bf16.msra.mxu1 %v1669_v43  ;;  %v1207_v43 = vrot.slane (!%p1514_p6), %v1202_v35, %v1206_v38 }
  0x92   : > { %1160 = vmatpush1.bf16.msra.mxu0 %v1670_v44  ;;  %1118 = vmatprep.subr.bf16.mxu1 %v1671_v45  ;;  %v1223_v44 = vrot.slane (!%p1514_p6), %v1218_v36, %v1206_v38  ;;  %v1211_v45 = vrot.slane (!%p1514_p6), %v1202_v35, %v1210_v39 }
  0x93   : > { %1161 = vmatprep.subr.bf16.mxu0 %v1673_v46  ;;  %v1227_v46 = vrot.slane (!%p1514_p6), %v1218_v36, %v1210_v39 }
  0x95   : > { %1119 = vmatpush1.bf16.msra.mxu1 %v1675_v47 }
  0x96   : > { %1162 = vmatpush1.bf16.msra.mxu0 %v1676_v48  ;;  %1120 = vmatprep.subr.bf16.mxu1 %v1677_v49  ;;  %v1234_v48 = vld [vmem:[%s2121_s18] sm:$0xff] (!%p1514_p6) }
  0x97   : > { %1163 = vmatprep.subr.bf16.mxu0 %v1679_v50 }
  0x99   : > { %1121 = vmatpush1.bf16.msra.mxu1 %v1681_v51 }
  0x9a   : > { %1164 = vmatpush1.bf16.msra.mxu0 %v1682_v52  ;;  %1122 = vmatprep.subr.bf16.mxu1 %v1683_v53  ;;  %v1235_v52 = vld [vmem:[%s2121_s18 + $0x8] sm:$0xff] (!%p1514_p6)  ;;  %v1236_v53 = vld [vmem:[%s2121_s18 + $0x10] sm:$0xff] (!%p1514_p6) }
  0x9b   : > { %1165 = vmatprep.subr.bf16.mxu0 %v1685_v54  ;;  %v1237_v54 = vld [vmem:[%s2121_s18 + $0x18] sm:$0xff] (!%p1514_p6) }
  0x9d   : > { %1123 = vmatpush1.bf16.msra.mxu1 %v1687_v55 }
  0x9e   : > { %1166 = vmatpush1.bf16.msra.mxu0 %v1688_v57  ;;  %1124 = vmatprep.subr.bf16.mxu1 %v1689_v58 }
  0x9f   : > { %1167 = vmatprep.subr.bf16.mxu0 %v1691_v59 }
  0xa1   : > { %1125 = vmatpush1.bf16.msra.mxu1 %v1693_v61 }
  0xa2   : > { %1168 = vmatpush1.bf16.msra.mxu0 %v1694_v62  ;;  %1126 = vmatprep.subr.bf16.mxu1 %v1695_v63 }
  0xa3   : > { %1169 = vmatprep.subr.bf16.mxu0 %v1697_v0 }
  0xa5   : > { %1127 = vmatpush1.bf16.msra.mxu1 %v1699_v1 }
  0xa6   : > { %1170 = vmatpush1.bf16.msra.mxu0 %v1700_v2  ;;  %1128 = vmatprep.subr.bf16.mxu1 %v1701_v3 }
  0xa7   : > { %1171 = vmatprep.subr.bf16.mxu0 %v1703_v4 }
  0xa9   : > { %1129 = vmatpush1.bf16.msra.mxu1 %v1705_v5 }
  0xaa   : > { %1172 = vmatpush1.bf16.msra.mxu0 %v1706_v6  ;;  %1130 = vmatprep.subr.bf16.mxu1 %v1707_v7 }
  0xab   : > { %1173 = vmatprep.subr.bf16.mxu0 %v1709_v8 }
  0xad   : > { %1131 = vmatpush1.bf16.msra.mxu1 %v1711_v9 }
  0xae   : > { %1174 = vmatpush1.bf16.msra.mxu0 %v1712_v10 }
  0xb0   : > { %1133 = vmatmul.mubr.bf16.vlgmr.msra.gmra.mrb[0].mxu1 %v1713_v11 }
  0xb1   : > { %1176 = vmatmul.mubr.bf16.vlgmr.msra.gmra.mrb[0].mxu0 %v1716_v12 }
 0x183   : > { %v1134_v13 = vpop.f32.mrb[0].mxu1 }
 0x184   : > { %v1177_v15 = vpop.f32.mrb[0].mxu0  ;;  %v1136_v17 = vpop.f32.mrb[1].mxu1 }
 0x185   : > { %v1178_v16 = vadd.f32 %v1177_v15, %v1134_v13  ;;  %v1179_v19 = vpop.f32.mrb[1].mxu0  ;;  %v1138_v21 = vpop.f32.mrb[2].mxu1 }
 0x186   : > { %v1180_v20 = vadd.f32 %v1179_v19, %v1136_v17  ;;  %v1181_v23 = vpop.f32.mrb[2].mxu0  ;;  %v1140_v26 = vpop.f32.mrb[3].mxu1  ;;  %1197 = sbr.rel (%p1514_p6) target bundleno = 413 (0x19d), region = 132 }
 0x187   : > { %v1186_v24 = vadd.f32 %v1178_v16, %v688_v14  ;;  %v1182_v25 = vadd.f32 %v1181_v23, %v1138_v21  ;;  %v1183_v28 = vpop.f32.mrb[3].mxu0 }
 0x188   : > { %v1187_v29 = vadd.f32 %v1180_v20, %v689_v18  ;;  %v1184_v30 = vadd.f32 %v1183_v28, %v1140_v26 }
 0x189   : > { %1190 = vst [vmem:[%s2123_s23] sm:$0xff] %v1186_v24  ;;  %v1188_v31 = vadd.f32 %v1182_v25, %v690_v22 }
 0x18a   : > { %1191 = vst [vmem:[%s2123_s23 + $0x8] sm:$0xff] %v1187_v29  ;;  %v1189_v32 = vadd.f32 %v1184_v30, %v691_v27 }
 0x18b   : > { %1192 = vst [vmem:[%s2123_s23 + $0x10] sm:$0xff] %v1188_v31 }
 0x18c   : > { %1193 = vst [vmem:[%s2123_s23 + $0x18] sm:$0xff] %v1189_v32 }
 0x190   : > { %v1198_v37 = vld [vmem:[%s2123_s23] sm:$0xff] }
 0x191   : > { %v1199_v40 = vld [vmem:[%s2123_s23 + $0x8] sm:$0xff]  ;;  %v1214_v47 = vmul.f32 %v1207_v43, %v1198_v37 }
 0x192   : > { %v1200_v41 = vld [vmem:[%s2123_s23 + $0x10] sm:$0xff]  ;;  %v1215_v49 = vmul.f32 %v1211_v45, %v1199_v40 }
 0x193   : > { %v1201_v42 = vld [vmem:[%s2123_s23 + $0x18] sm:$0xff]  ;;  %v1216_v50 = vmul.f32 %v1207_v43, %v1200_v41  ;;  %v1230_v55 = vadd.f32 %v1223_v44, %v1214_v47 }
 0x194   : > { %v1217_v51 = vmul.f32 %v1211_v45, %v1201_v42  ;;  %v1231_v56 = vadd.f32 %v1227_v46, %v1215_v49 }
 0x195   : > { %v1232_v57 = vadd.f32 %v1223_v44, %v1216_v50  ;;  %v1238_v59 = vadd.f32 %v1234_v48, %v1230_v55 }
 0x196   : > { %v1233_v58 = vadd.f32 %v1227_v46, %v1217_v51  ;;  %v1239_v60 = vadd.f32 %v1235_v52, %v1231_v56 }
 0x197   : > { %v1240_v61 = vadd.f32 %v1236_v53, %v1232_v57  ;;  %v1242_v63 = vmax.f32 %v1238_v59, 0.0 }
 0x198   : > { %v1241_v62 = vadd.f32 %v1237_v54, %v1233_v58  ;;  %v1243_v0 = vmax.f32 %v1239_v60, 0.0 }
 0x199   : > { %v1244_v1 = vmax.f32 %v1240_v61, 0.0  ;;  %1246 = vst [vmem:[%s2123_s23] sm:$0xff] %v1242_v63 }
 0x19a   : > { %v1245_v2 = vmax.f32 %v1241_v62, 0.0  ;;  %1247 = vst [vmem:[%s2123_s23 + $0x8] sm:$0xff] %v1243_v0 }
 0x19b   : > { %1248 = vst [vmem:[%s2123_s23 + $0x10] sm:$0xff] %v1244_v1 }
 0x19c   : > { %1249 = vst [vmem:[%s2123_s23 + $0x18] sm:$0xff] %v1245_v2 }
 0x19d PF: > { %1256 = sbr.rel (!%p1942_p13) target bundleno = 421 (0x1a5), region = 136  ;;  %s1523_s24 = sshll.u32 (%p1942_p13), %s1793_s25, 4 }
 0x19e   : > { %s1262_s11 = scalar_lea.vmem (%p1942_p13), %s2277_s5, %s1523_s24 }
 0x1a0   : > { %v1275_v3 = vld [vmem:[%s2123_s23] sm:$0xff] (%p1942_p13) }
 0x1a1   : > { %v1277_v4 = vld [vmem:[%s2123_s23 + $0x8] sm:$0xff] (%p1942_p13)  ;;  %1276 = vst [vmem:[%s1262_s11] sm:$0xff] (%p1942_p13), %v1275_v3 }
 0x1a2   : > { %v1279_v5 = vld [vmem:[%s2123_s23 + $0x10] sm:$0xff] (%p1942_p13)  ;;  %1278 = vst [vmem:[%s1262_s11 + $0x8] sm:$0xff] (%p1942_p13), %v1277_v4 }
 0x1a3   : > { %v1281_v6 = vld [vmem:[%s2123_s23 + $0x18] sm:$0xff] (%p1942_p13)  ;;  %1280 = vst [vmem:[%s1262_s11 + $0x20] sm:$0xff] (%p1942_p13), %v1279_v5 }
 0x1a4   : > { %1282 = vst [vmem:[%s1262_s11 + $0x28] sm:$0xff] %v1281_v6 }
 0x1a5 PF: > { %s15_s28 = sadd.s32 1, %s1805_s28   ;;  %s2291_s22 = sld [smem:[#allocation6_spill]] }
 0x1a6   : > { %p12_p7 = scmp.ge.s32.totalorder %s15_s28, 20   ;;  %s2292_s23 = sld [smem:[#allocation9_spill]] }
 0x1a7   : > { %s2293_s8 = sld [smem:[#allocation7_spill]]  ;;  %s2294_s14 = sld [smem:[#allocation8_spill]] }
 0x1a8   : > { %s2295_s18 = smov %s1769_s19  ;;  %s2296_s19 = smov %s1934_s17 }
 0x1a9   : > { %s2297_s20 = smov %s1777_s21  ;;  %s2298_s21 = smov %s1931_s16 }
 0x1aa   : > { %s2299_s24 = smov %s1797_s26  ;;  %s2300_s25 = smov %s1801_s27 }
 0x1ab   :  { %14 = sbr.rel (!%p12_p7) target bundleno = 8 (0x8), region = 212 }
 0x1ad   : > { %s2301_s26 = smov %s2293_s8  ;;  %s2302_s27 = smov %s2294_s14 }

// kernel: featurizer_forward.41
= control target key start
LH: loop header
LB: loop body
LE: loop exit
PB: predicated region body
PF: predicated region fallthrough
CT: control target
= control target key end

     0   :  { %s2130_s0 = inlined_call_operand.vmem [shape: bf16[16,4608], index: 0, kind: input, shape index: {}]   ;;  %s2131_s1 = inlined_call_operand.vmem [shape: bf16[4608,512], index: 1, kind: input, shape index: {}]   ;;  %s2132_s2 = inlined_call_operand.vmem [shape: f32[1,512], index: 2, kind: input, shape index: {}]   ;;  %s2133_s3 = inlined_call_operand.vmem [shape: f32[1,512], index: 3, kind: input, shape index: {}]   ;;  %s2134_s4 = inlined_call_operand.vmem [shape: f32[16,512], index: 4, kind: output, shape index: {}]  }
   0x1   :  { %2137 = sst [smem:[#allocation7_spill]] %s2130_s0 }
   0x2   :  { %2138 = sst [smem:[#allocation8_spill]] %s2131_s1 }
   0x3   :  { %s1719_s15 = smov 0   ;;  %s1721_s16 = smov 0  }
   0x4   :  { %s1723_s17 = smov 0   ;;  %s1725_s18 = smov 0  }
   0x5   :  { %s1727_s19 = smov 0   ;;  %s1729_s20 = smov 0  }
   0x6   :  { %s1731_s21 = smov 0   ;;  %s1733_s22 = smov 0  }
   0x7   :  { %s1735_s23 = smov 0   ;;  %s1737_s24 = smov 0  }
   0x8   :  { %s1739_s25 = smov 0  }
   0x9 LB: > { %s1314_s26 = sadd.s32 4294967295, %s1691_s25   ;;  %s26_s27 = sadd.s32 1, %s1683_s23  ;;  %s1691_s25 = sphi %s1739_s25, %s14_s25   ;;  %s1687_s24 = sphi %s1737_s24, %s2157_s24   ;;  %s1683_s23 = sphi %s1735_s23, %s2156_s23   ;;  %s1679_s22 = sphi %s1733_s22, %s2155_s22   ;;  %s1675_s21 = sphi %s1731_s21, %s2154_s21   ;;  %s1671_s20 = sphi %s1729_s20, %s2153_s20   ;;  %s1667_s19 = sphi %s1727_s19, %s2152_s19   ;;  %s1663_s18 = sphi %s1725_s18, %s2151_s18   ;;  %s1659_s17 = sphi %s1723_s17, %s2150_s17   ;;  %s1655_s16 = sphi %s1721_s16, %s2149_s16   ;;  %s1651_s15 = sphi %s1719_s15, %s2148_s15  }
   0xa   : > { %p27_p0 = scmp.ge.s32.totalorder %s26_s27, 9  ;;  %s29_s28 = sadd.s32 1, %s1687_s24 }
   0xb   : > { %s42_s29 = sadd.s32 1, %s1671_s20  ;;  %p49_p1 = scmp.ne.s32.totalorder %s1671_s20, %s1667_s19 }
   0xc   : > { %s2159_s27 = smov (%p27_p0, %s26_s27), 0  ;;  %s2161_s28 = smov (!%p27_p0, %s29_s28), %s1687_s24 }
   0xd   : > { %2139 = sst [smem:[#allocation5_spill]] %s2159_s27  ;;  %s38_s30 = ssub.s32 %s1683_s23, %s2159_s27 }
   0xe   : > { %p50_p2 = scmp.eq.s32.totalorder %s1691_s25, 0  ;;  %p31_p3 = scmp.ge.s32.totalorder %s2161_s28, 2 }
   0xf   : > { %p40_p4 = scmp.eq.s32.totalorder %s38_s30, 0  ;;  %s70_s6 = sadd.s32 1, %s1663_s18 }
  0x10   : > { %p1786_p5 = por %p50_p2, %p49_p1  ;;  %s2163_s28 = smov (%p31_p3, %s2161_s28), 0 }
  0x11   : > { %2141 = sst [smem:[#allocation6_spill]] %s2163_s28  ;;  %s66_s8 = ssub.s32 %s1687_s24, %s2163_s28 }
  0x12   : > { %s1794_s7 = scalar_select %p40_p4, %s1671_s20, %s42_s29  }
  0x13   : > { %p77_p6 = scmp.ne.s32.totalorder %s1663_s18, %s1659_s17  ;;  %s67_s9 = sor.u32 %s66_s8, %s38_s30 }
  0x14   : > { %p148_p7 = scmp.eq.s32.totalorder %s66_s8, 0  ;;  %p68_p8 = scmp.eq.s32.totalorder %s67_s9, 0 }
  0x15   : > { %p1800_p9 = por %p77_p6, %p50_p2  ;;  %s150_s11 = sadd.s32 1, %s1655_s16 }
  0x16   : > { %p160_p10 = scmp.ne.s32.totalorder %s1655_s16, %s1651_s15  ;;  %p161_p11 = scmp.eq.s32.totalorder %s1314_s26, 17 }
  0x17   : > { %s1808_s12 = scalar_select %p68_p8, %s1663_s18, %s70_s6  }
  0x18   : > { %s1811_s13 = scalar_select %p148_p7, %s1655_s16, %s150_s11  }
  0x19   : > { %p1813_p12 = por %p161_p11, %p160_p10  ;;  %p1317_p13 = scmp.ge.s32.totalorder %s1691_s25, 18 }
  0x1b   : > { %183 = sbr.rel (%p1317_p13) target bundleno = 88 (0x58), region = 16 }
  0x22   : > { %186 = sbr.rel (!%p1786_p5) target bundleno = 46 (0x2e), region = 20  ;;  %s188_s29 = sand.u32 (%p1786_p5), 1, %s1671_s20  }
  0x23   : > { %s1407_s30 = sshll.u32 (%p1786_p5), %s1683_s23, 4  ;;  %s1318_s8 = sshll.u32 (%p1786_p5), %s188_s29, 5 }
  0x24   : > { %s2144_s0 = sld [smem:[#allocation7_spill]] (%p1786_p5)  ;;  %s190_s26 = scalar_lea.vmem (%p1786_p5), [#allocation2], %s1318_s8 }
  0x2a   : > { %s196_s11 = scalar_lea.vmem %s2144_s0, %s1407_s30 }
  0x2b   : > { %v209_v0 = vld [vmem:[%s196_s11] sm:$0xff]  ;;  %v211_v1 = vld [vmem:[%s196_s11 + $0x8] sm:$0xff]  ;;  %v213_v2 = vld [vmem:[%s196_s11 + $0x90] sm:$0xff] }
  0x2c   : > { %210 = vst [vmem:[%s190_s26] sm:$0xff] %v209_v0  ;;  %212 = vst [vmem:[%s190_s26 + $0x8] sm:$0xff] %v211_v1  ;;  %v215_v3 = vld [vmem:[%s196_s11 + $0x98] sm:$0xff] }
  0x2d   : > { %214 = vst [vmem:[%s190_s26 + $0x10] sm:$0xff] %v213_v2  ;;  %216 = vst [vmem:[%s190_s26 + $0x18] sm:$0xff] %v215_v3 }
  0x2e PF: > { %222 = sbr.rel (!%p1800_p9) target bundleno = 88 (0x58), region = 43  ;;  %s224_s5 = sand.u32 (%p1800_p9), 1, %s1663_s18  }
  0x2f   : > { %s1323_s29 = sshll.u32 (%p1800_p9), %s1687_s24, 1  ;;  %s1321_s6 = sshll.u32 (%p1800_p9), %s224_s5, 9 }
  0x30   : > { %s1408_s30 = sshll.u32 (%p1800_p9), %s1683_s23, 8  ;;  %s2145_s1 = sld [smem:[#allocation8_spill]] (%p1800_p9) }
  0x31   : > { %s230_s9 = sadd.s32 (%p1800_p9), %s1408_s30, %s1323_s29  ;;  %s1838_s10 = scalar_lea.vmem (%p1800_p9), [#allocation3], %s1321_s6 }
  0x32   : > { %s1325_s0 = sshll.u32 (%p1800_p9), %s230_s9, 2 }
  0x36   : > { %s1833_s27 = scalar_lea.vmem %s2145_s1, %s1325_s0 }
  0x37   : > { %v386_v4 = vld [vmem:[%s1833_s27] sm:$0xff]  ;;  %v388_v5 = vld [vmem:[%s1833_s27 + $0x10] sm:$0xff] }
  0x38   : > { %v390_v6 = vld [vmem:[%s1833_s27 + $0x20] sm:$0xff]  ;;  %387 = vst [vmem:[%s1838_s10] sm:$0xff] %v386_v4  ;;  %389 = vst [vmem:[%s1838_s10 + $0x8] sm:$0xff] %v388_v5  ;;  %v392_v7 = vld [vmem:[%s1833_s27 + $0x30] sm:$0xff] }
  0x39   : > { %391 = vst [vmem:[%s1838_s10 + $0x10] sm:$0xff] %v390_v6  ;;  %v394_v8 = vld [vmem:[%s1833_s27 + $0x40] sm:$0xff]  ;;  %v396_v9 = vld [vmem:[%s1833_s27 + $0x50] sm:$0xff]  ;;  %393 = vst [vmem:[%s1838_s10 + $0x18] sm:$0xff] %v392_v7 }
  0x3a   : > { %395 = vst [vmem:[%s1838_s10 + $0x20] sm:$0xff] %v394_v8  ;;  %397 = vst [vmem:[%s1838_s10 + $0x28] sm:$0xff] %v396_v9  ;;  %v398_v10 = vld [vmem:[%s1833_s27 + $0x60] sm:$0xff]  ;;  %v400_v11 = vld [vmem:[%s1833_s27 + $0x70] sm:$0xff] }
  0x3b   : > { %v402_v12 = vld [vmem:[%s1833_s27 + $0x80] sm:$0xff]  ;;  %399 = vst [vmem:[%s1838_s10 + $0x30] sm:$0xff] %v398_v10  ;;  %401 = vst [vmem:[%s1838_s10 + $0x38] sm:$0xff] %v400_v11  ;;  %v404_v13 = vld [vmem:[%s1833_s27 + $0x90] sm:$0xff] }
  0x3c   : > { %403 = vst [vmem:[%s1838_s10 + $0x40] sm:$0xff] %v402_v12  ;;  %v406_v14 = vld [vmem:[%s1833_s27 + $0xa0] sm:$0xff]  ;;  %v408_v15 = vld [vmem:[%s1833_s27 + $0xb0] sm:$0xff]  ;;  %405 = vst [vmem:[%s1838_s10 + $0x48] sm:$0xff] %v404_v13 }
  0x3d   : > { %407 = vst [vmem:[%s1838_s10 + $0x50] sm:$0xff] %v406_v14  ;;  %409 = vst [vmem:[%s1838_s10 + $0x58] sm:$0xff] %v408_v15  ;;  %v410_v16 = vld [vmem:[%s1833_s27 + $0xc0] sm:$0xff]  ;;  %v412_v17 = vld [vmem:[%s1833_s27 + $0xd0] sm:$0xff] }
  0x3e   : > { %v414_v18 = vld [vmem:[%s1833_s27 + $0xe0] sm:$0xff]  ;;  %411 = vst [vmem:[%s1838_s10 + $0x60] sm:$0xff] %v410_v16  ;;  %413 = vst [vmem:[%s1838_s10 + $0x68] sm:$0xff] %v412_v17  ;;  %v416_v19 = vld [vmem:[%s1833_s27 + $0xf0] sm:$0xff] }
  0x3f   : > { %415 = vst [vmem:[%s1838_s10 + $0x70] sm:$0xff] %v414_v18  ;;  %v418_v20 = vld [vmem:[%s1833_s27 + $0x100] sm:$0xff]  ;;  %v420_v21 = vld [vmem:[%s1833_s27 + $0x110] sm:$0xff]  ;;  %417 = vst [vmem:[%s1838_s10 + $0x78] sm:$0xff] %v416_v19 }
  0x40   : > { %419 = vst [vmem:[%s1838_s10 + $0x80] sm:$0xff] %v418_v20  ;;  %421 = vst [vmem:[%s1838_s10 + $0x88] sm:$0xff] %v420_v21  ;;  %v422_v22 = vld [vmem:[%s1833_s27 + $0x120] sm:$0xff]  ;;  %v424_v23 = vld [vmem:[%s1833_s27 + $0x130] sm:$0xff] }
  0x41   : > { %v426_v24 = vld [vmem:[%s1833_s27 + $0x140] sm:$0xff]  ;;  %423 = vst [vmem:[%s1838_s10 + $0x90] sm:$0xff] %v422_v22  ;;  %425 = vst [vmem:[%s1838_s10 + $0x98] sm:$0xff] %v424_v23  ;;  %v428_v25 = vld [vmem:[%s1833_s27 + $0x150] sm:$0xff] }
  0x42   : > { %427 = vst [vmem:[%s1838_s10 + $0xa0] sm:$0xff] %v426_v24  ;;  %v430_v26 = vld [vmem:[%s1833_s27 + $0x160] sm:$0xff]  ;;  %v432_v27 = vld [vmem:[%s1833_s27 + $0x170] sm:$0xff]  ;;  %429 = vst [vmem:[%s1838_s10 + $0xa8] sm:$0xff] %v428_v25 }
  0x43   : > { %431 = vst [vmem:[%s1838_s10 + $0xb0] sm:$0xff] %v430_v26  ;;  %433 = vst [vmem:[%s1838_s10 + $0xb8] sm:$0xff] %v432_v27  ;;  %v434_v28 = vld [vmem:[%s1833_s27 + $0x180] sm:$0xff]  ;;  %v436_v29 = vld [vmem:[%s1833_s27 + $0x190] sm:$0xff] }
  0x44   : > { %v438_v30 = vld [vmem:[%s1833_s27 + $0x1a0] sm:$0xff]  ;;  %435 = vst [vmem:[%s1838_s10 + $0xc0] sm:$0xff] %v434_v28  ;;  %437 = vst [vmem:[%s1838_s10 + $0xc8] sm:$0xff] %v436_v29  ;;  %v440_v31 = vld [vmem:[%s1833_s27 + $0x1b0] sm:$0xff] }
  0x45   : > { %439 = vst [vmem:[%s1838_s10 + $0xd0] sm:$0xff] %v438_v30  ;;  %v442_v32 = vld [vmem:[%s1833_s27 + $0x1c0] sm:$0xff]  ;;  %v444_v33 = vld [vmem:[%s1833_s27 + $0x1d0] sm:$0xff]  ;;  %441 = vst [vmem:[%s1838_s10 + $0xd8] sm:$0xff] %v440_v31 }
  0x46   : > { %443 = vst [vmem:[%s1838_s10 + $0xe0] sm:$0xff] %v442_v32  ;;  %445 = vst [vmem:[%s1838_s10 + $0xe8] sm:$0xff] %v444_v33  ;;  %v446_v34 = vld [vmem:[%s1833_s27 + $0x1e0] sm:$0xff]  ;;  %v448_v35 = vld [vmem:[%s1833_s27 + $0x1f0] sm:$0xff] }
  0x47   : > { %v450_v36 = vld [vmem:[%s1833_s27 + $0x200] sm:$0xff]  ;;  %447 = vst [vmem:[%s1838_s10 + $0xf0] sm:$0xff] %v446_v34  ;;  %449 = vst [vmem:[%s1838_s10 + $0xf8] sm:$0xff] %v448_v35  ;;  %v452_v37 = vld [vmem:[%s1833_s27 + $0x210] sm:$0xff] }
  0x48   : > { %451 = vst [vmem:[%s1838_s10 + $0x100] sm:$0xff] %v450_v36  ;;  %v454_v38 = vld [vmem:[%s1833_s27 + $0x220] sm:$0xff]  ;;  %v456_v39 = vld [vmem:[%s1833_s27 + $0x230] sm:$0xff]  ;;  %453 = vst [vmem:[%s1838_s10 + $0x108] sm:$0xff] %v452_v37 }
  0x49   : > { %455 = vst [vmem:[%s1838_s10 + $0x110] sm:$0xff] %v454_v38  ;;  %457 = vst [vmem:[%s1838_s10 + $0x118] sm:$0xff] %v456_v39  ;;  %v458_v40 = vld [vmem:[%s1833_s27 + $0x240] sm:$0xff]  ;;  %v460_v41 = vld [vmem:[%s1833_s27 + $0x250] sm:$0xff] }
  0x4a   : > { %v462_v42 = vld [vmem:[%s1833_s27 + $0x260] sm:$0xff]  ;;  %459 = vst [vmem:[%s1838_s10 + $0x120] sm:$0xff] %v458_v40  ;;  %461 = vst [vmem:[%s1838_s10 + $0x128] sm:$0xff] %v460_v41  ;;  %v464_v43 = vld [vmem:[%s1833_s27 + $0x270] sm:$0xff] }
  0x4b   : > { %463 = vst [vmem:[%s1838_s10 + $0x130] sm:$0xff] %v462_v42  ;;  %v466_v44 = vld [vmem:[%s1833_s27 + $0x280] sm:$0xff]  ;;  %v468_v45 = vld [vmem:[%s1833_s27 + $0x290] sm:$0xff]  ;;  %465 = vst [vmem:[%s1838_s10 + $0x138] sm:$0xff] %v464_v43 }
  0x4c   : > { %467 = vst [vmem:[%s1838_s10 + $0x140] sm:$0xff] %v466_v44  ;;  %469 = vst [vmem:[%s1838_s10 + $0x148] sm:$0xff] %v468_v45  ;;  %v470_v46 = vld [vmem:[%s1833_s27 + $0x2a0] sm:$0xff]  ;;  %v472_v47 = vld [vmem:[%s1833_s27 + $0x2b0] sm:$0xff] }
  0x4d   : > { %v474_v48 = vld [vmem:[%s1833_s27 + $0x2c0] sm:$0xff]  ;;  %471 = vst [vmem:[%s1838_s10 + $0x150] sm:$0xff] %v470_v46  ;;  %473 = vst [vmem:[%s1838_s10 + $0x158] sm:$0xff] %v472_v47  ;;  %v476_v49 = vld [vmem:[%s1833_s27 + $0x2d0] sm:$0xff] }
  0x4e   : > { %475 = vst [vmem:[%s1838_s10 + $0x160] sm:$0xff] %v474_v48  ;;  %v478_v50 = vld [vmem:[%s1833_s27 + $0x2e0] sm:$0xff]  ;;  %v480_v51 = vld [vmem:[%s1833_s27 + $0x2f0] sm:$0xff]  ;;  %477 = vst [vmem:[%s1838_s10 + $0x168] sm:$0xff] %v476_v49 }
  0x4f   : > { %479 = vst [vmem:[%s1838_s10 + $0x170] sm:$0xff] %v478_v50  ;;  %481 = vst [vmem:[%s1838_s10 + $0x178] sm:$0xff] %v480_v51  ;;  %v482_v52 = vld [vmem:[%s1833_s27 + $0x300] sm:$0xff]  ;;  %v484_v53 = vld [vmem:[%s1833_s27 + $0x310] sm:$0xff] }
  0x50   : > { %v486_v54 = vld [vmem:[%s1833_s27 + $0x320] sm:$0xff]  ;;  %483 = vst [vmem:[%s1838_s10 + $0x180] sm:$0xff] %v482_v52  ;;  %485 = vst [vmem:[%s1838_s10 + $0x188] sm:$0xff] %v484_v53  ;;  %v488_v55 = vld [vmem:[%s1833_s27 + $0x330] sm:$0xff] }
  0x51   : > { %487 = vst [vmem:[%s1838_s10 + $0x190] sm:$0xff] %v486_v54  ;;  %v490_v56 = vld [vmem:[%s1833_s27 + $0x340] sm:$0xff]  ;;  %v492_v57 = vld [vmem:[%s1833_s27 + $0x350] sm:$0xff]  ;;  %489 = vst [vmem:[%s1838_s10 + $0x198] sm:$0xff] %v488_v55 }
  0x52   : > { %491 = vst [vmem:[%s1838_s10 + $0x1a0] sm:$0xff] %v490_v56  ;;  %493 = vst [vmem:[%s1838_s10 + $0x1a8] sm:$0xff] %v492_v57  ;;  %v494_v58 = vld [vmem:[%s1833_s27 + $0x360] sm:$0xff]  ;;  %v496_v59 = vld [vmem:[%s1833_s27 + $0x370] sm:$0xff] }
  0x53   : > { %v498_v60 = vld [vmem:[%s1833_s27 + $0x380] sm:$0xff]  ;;  %495 = vst [vmem:[%s1838_s10 + $0x1b0] sm:$0xff] %v494_v58  ;;  %497 = vst [vmem:[%s1838_s10 + $0x1b8] sm:$0xff] %v496_v59  ;;  %v500_v61 = vld [vmem:[%s1833_s27 + $0x390] sm:$0xff] }
  0x54   : > { %499 = vst [vmem:[%s1838_s10 + $0x1c0] sm:$0xff] %v498_v60  ;;  %v502_v62 = vld [vmem:[%s1833_s27 + $0x3a0] sm:$0xff]  ;;  %v504_v63 = vld [vmem:[%s1833_s27 + $0x3b0] sm:$0xff]  ;;  %501 = vst [vmem:[%s1838_s10 + $0x1c8] sm:$0xff] %v500_v61 }
  0x55   : > { %503 = vst [vmem:[%s1838_s10 + $0x1d0] sm:$0xff] %v502_v62  ;;  %505 = vst [vmem:[%s1838_s10 + $0x1d8] sm:$0xff] %v504_v63  ;;  %v506_v0 = vld [vmem:[%s1833_s27 + $0x3c0] sm:$0xff]  ;;  %v508_v1 = vld [vmem:[%s1833_s27 + $0x3d0] sm:$0xff] }
  0x56   : > { %v510_v2 = vld [vmem:[%s1833_s27 + $0x3e0] sm:$0xff]  ;;  %507 = vst [vmem:[%s1838_s10 + $0x1e0] sm:$0xff] %v506_v0  ;;  %509 = vst [vmem:[%s1838_s10 + $0x1e8] sm:$0xff] %v508_v1  ;;  %v512_v3 = vld [vmem:[%s1833_s27 + $0x3f0] sm:$0xff] }
  0x57   : > { %511 = vst [vmem:[%s1838_s10 + $0x1f0] sm:$0xff] %v510_v2  ;;  %513 = vst [vmem:[%s1838_s10 + $0x1f8] sm:$0xff] %v512_v3 }
  0x58 PF: > { %p1326_p0 = scmp.ge.s32.totalorder %s1691_s25, 1  ;;  %p534_p1 = scmp.lt.s32.totalorder %s1691_s25, 19 }
  0x5a   : > { %p535_p2 = pnand %p1326_p0, %p534_p1 }
  0x5b   : > { %s541_s0 = sand.u32 (!%p535_p2), 1, %s1667_s19   ;;  %s548_s28 = sand.u32 (!%p535_p2), 1, %s1659_s17  }
  0x5c   : > { %538 = sbr.rel (%p535_p2) target bundleno = 414 (0x19e), region = 89  ;;  %s1327_s11 = sshll.u32 (!%p535_p2), %s541_s0, 5 }
  0x5d   : > { %s1328_s26 = sshll.u32 (!%p535_p2), %s548_s28, 9  ;;  %s581_s5 = sand.u32 (!%p535_p2), 1, %s1651_s15  }
  0x5e   : > { %s1330_s29 = sshll.u32 (!%p535_p2), %s1679_s22, 1  ;;  %s1329_s27 = sshll.u32 (!%p535_p2), %s581_s5, 5 }
  0x5f   : > { %p589_p3 = scmp.lt.s32.totalorder (!%p535_p2), %s1330_s29, 3  ;;  %s1981_s19 = scalar_lea.vmem (!%p535_p2), [#allocation2], %s1327_s11 }
  0x60   : > { %s1983_s17 = scalar_lea.vmem (!%p535_p2), [#allocation3], %s1328_s26  ;;  %s1985_s15 = scalar_lea.vmem (!%p535_p2), [#allocation4], %s1329_s27 }
  0x61   : > { %p1332_p4 = scmp.ne.s32.totalorder (!%p535_p2), %s1675_s21, 0 }
  0x63   : > { %s2165_s29 = smov (!%p589_p3, %s1330_s29), 3  ;;  %603 = sbr.rel (%p1332_p4) target bundleno = 106 (0x6a), region = 101 }
  0x64   : > { %s591_s9 = scalar_lea.vmem %s2132_s2, %s2165_s29  ;;  %s596_s1 = scalar_lea.vmem %s2133_s3, %s2165_s29  ;;  %v1693_v4 = vmov (!%p1332_p4), 0.0  }
  0x65   : > { %604 = vst [vmem:[%s1985_s15] sm:$0xff] (!%p1332_p4), %v1693_v4  ;;  %605 = vst [vmem:[%s1985_s15 + $0x8] sm:$0xff] (!%p1332_p4), %v1693_v4 }
  0x66   : > { %606 = vst [vmem:[%s1985_s15 + $0x10] sm:$0xff] (!%p1332_p4), %v1693_v4  ;;  %607 = vst [vmem:[%s1985_s15 + $0x18] sm:$0xff] (!%p1332_p4), %v1693_v4 }
  0x6a PF: > { %v1503_v5 = vld [vmem:[%s1983_s17 + $0x4] ss:$8 sps:$4 sm:$0xff]   ;;  %v1507_v7 = vld [vmem:[%s1983_s17] ss:$8 sps:$4 sm:$0xff]   ;;  %v1509_v9 = vld [vmem:[%s1983_s17 + $0x14] ss:$8 sps:$4 sm:$0xff]  }
  0x6b   : > { %v1505_v6 = vld [vmem:[%s1983_s17 + $0x104] ss:$8 sps:$4 sm:$0xff]   ;;  %1020 = vmatprep.subr.bf16.mxu1 %v1503_v5  ;;  %v1508_v8 = vld [vmem:[%s1983_s17 + $0x100] ss:$8 sps:$4 sm:$0xff]   ;;  %v1511_v10 = vld [vmem:[%s1983_s17 + $0x114] ss:$8 sps:$4 sm:$0xff]  }
  0x6c   : > { %1063 = vmatprep.subr.bf16.mxu0 %v1505_v6  ;;  %1021 = vmatpush1.bf16.msra.mxu1 %v1507_v7  ;;  %v1513_v11 = vld [vmem:[%s1983_s17 + $0x10] ss:$8 sps:$4 sm:$0xff]   ;;  %v1515_v13 = vld [vmem:[%s1983_s17 + $0x24] ss:$8 sps:$4 sm:$0xff]   ;;  %v1519_v15 = vld [vmem:[%s1983_s17 + $0x20] ss:$8 sps:$4 sm:$0xff]  }
  0x6d   : > { %1064 = vmatpush1.bf16.msra.mxu0 %v1508_v8  ;;  %1022 = vmatprep.subr.bf16.mxu1 %v1509_v9  ;;  %v1514_v12 = vld [vmem:[%s1983_s17 + $0x110] ss:$8 sps:$4 sm:$0xff]   ;;  %v1517_v14 = vld [vmem:[%s1983_s17 + $0x124] ss:$8 sps:$4 sm:$0xff]   ;;  %v1520_v16 = vld [vmem:[%s1983_s17 + $0x120] ss:$8 sps:$4 sm:$0xff]  }
  0x6e   : > { %1065 = vmatprep.subr.bf16.mxu0 %v1511_v10  ;;  %v1521_v17 = vld [vmem:[%s1983_s17 + $0x34] ss:$8 sps:$4 sm:$0xff]   ;;  %v1525_v19 = vld [vmem:[%s1983_s17 + $0x30] ss:$8 sps:$4 sm:$0xff]   ;;  %v1527_v21 = vld [vmem:[%s1983_s17 + $0x44] ss:$8 sps:$4 sm:$0xff]  }
  0x6f   : > { %v1523_v18 = vld [vmem:[%s1983_s17 + $0x134] ss:$8 sps:$4 sm:$0xff]   ;;  %v1526_v20 = vld [vmem:[%s1983_s17 + $0x130] ss:$8 sps:$4 sm:$0xff]   ;;  %v1529_v22 = vld [vmem:[%s1983_s17 + $0x144] ss:$8 sps:$4 sm:$0xff]  }
  0x70   : > { %1023 = vmatpush1.bf16.msra.mxu1 %v1513_v11  ;;  %v1531_v23 = vld [vmem:[%s1983_s17 + $0x40] ss:$8 sps:$4 sm:$0xff]   ;;  %v1533_v25 = vld [vmem:[%s1983_s17 + $0x54] ss:$8 sps:$4 sm:$0xff]   ;;  %v1537_v27 = vld [vmem:[%s1983_s17 + $0x50] ss:$8 sps:$4 sm:$0xff]  }
  0x71   : > { %1066 = vmatpush1.bf16.msra.mxu0 %v1514_v12  ;;  %1024 = vmatprep.subr.bf16.mxu1 %v1515_v13  ;;  %v1532_v24 = vld [vmem:[%s1983_s17 + $0x140] ss:$8 sps:$4 sm:$0xff]   ;;  %v1535_v26 = vld [vmem:[%s1983_s17 + $0x154] ss:$8 sps:$4 sm:$0xff]   ;;  %v1538_v28 = vld [vmem:[%s1983_s17 + $0x150] ss:$8 sps:$4 sm:$0xff]  }
  0x72   : > { %1067 = vmatprep.subr.bf16.mxu0 %v1517_v14  ;;  %v1539_v29 = vld [vmem:[%s1983_s17 + $0x64] ss:$8 sps:$4 sm:$0xff]   ;;  %v1543_v31 = vld [vmem:[%s1983_s17 + $0x60] ss:$8 sps:$4 sm:$0xff]   ;;  %v1545_v33 = vld [vmem:[%s1983_s17 + $0x74] ss:$8 sps:$4 sm:$0xff]  }
  0x73   : > { %v1541_v30 = vld [vmem:[%s1983_s17 + $0x164] ss:$8 sps:$4 sm:$0xff]   ;;  %v1544_v32 = vld [vmem:[%s1983_s17 + $0x160] ss:$8 sps:$4 sm:$0xff]   ;;  %v1547_v34 = vld [vmem:[%s1983_s17 + $0x174] ss:$8 sps:$4 sm:$0xff]  }
  0x74   : > { %1025 = vmatpush1.bf16.msra.mxu1 %v1519_v15  ;;  %v1549_v35 = vld [vmem:[%s1983_s17 + $0x70] ss:$8 sps:$4 sm:$0xff]   ;;  %v1551_v37 = vld [vmem:[%s1983_s17 + $0x84] ss:$8 sps:$4 sm:$0xff]   ;;  %v1555_v39 = vld [vmem:[%s1983_s17 + $0x80] ss:$8 sps:$4 sm:$0xff]  }
  0x75   : > { %1068 = vmatpush1.bf16.msra.mxu0 %v1520_v16  ;;  %1026 = vmatprep.subr.bf16.mxu1 %v1521_v17  ;;  %v1550_v36 = vld [vmem:[%s1983_s17 + $0x170] ss:$8 sps:$4 sm:$0xff]   ;;  %v1553_v38 = vld [vmem:[%s1983_s17 + $0x184] ss:$8 sps:$4 sm:$0xff]   ;;  %v1556_v40 = vld [vmem:[%s1983_s17 + $0x180] ss:$8 sps:$4 sm:$0xff]  }
  0x76   : > { %1069 = vmatprep.subr.bf16.mxu0 %v1523_v18  ;;  %v1557_v41 = vld [vmem:[%s1983_s17 + $0x94] ss:$8 sps:$4 sm:$0xff]   ;;  %v1561_v43 = vld [vmem:[%s1983_s17 + $0x90] ss:$8 sps:$4 sm:$0xff]   ;;  %v1563_v45 = vld [vmem:[%s1983_s17 + $0xa4] ss:$8 sps:$4 sm:$0xff]  }
  0x77   : > { %v1559_v42 = vld [vmem:[%s1983_s17 + $0x194] ss:$8 sps:$4 sm:$0xff]   ;;  %v1562_v44 = vld [vmem:[%s1983_s17 + $0x190] ss:$8 sps:$4 sm:$0xff]   ;;  %v1565_v46 = vld [vmem:[%s1983_s17 + $0x1a4] ss:$8 sps:$4 sm:$0xff]  }
  0x78   : > { %1027 = vmatpush1.bf16.msra.mxu1 %v1525_v19  ;;  %v1567_v47 = vld [vmem:[%s1983_s17 + $0xa0] ss:$8 sps:$4 sm:$0xff]   ;;  %v1569_v49 = vld [vmem:[%s1983_s17 + $0xb4] ss:$8 sps:$4 sm:$0xff]   ;;  %v1573_v51 = vld [vmem:[%s1983_s17 + $0xb0] ss:$8 sps:$4 sm:$0xff]  }
  0x79   : > { %1070 = vmatpush1.bf16.msra.mxu0 %v1526_v20  ;;  %1028 = vmatprep.subr.bf16.mxu1 %v1527_v21  ;;  %v1568_v48 = vld [vmem:[%s1983_s17 + $0x1a0] ss:$8 sps:$4 sm:$0xff]   ;;  %v1571_v50 = vld [vmem:[%s1983_s17 + $0x1b4] ss:$8 sps:$4 sm:$0xff]   ;;  %v1574_v53 = vld [vmem:[%s1983_s17 + $0x1b0] ss:$8 sps:$4 sm:$0xff]  }
  0x7a   : > { %1071 = vmatprep.subr.bf16.mxu0 %v1529_v22  ;;  %v1601_v52 = vld [vmem:[%s1981_s19 + $0x4] ss:$16 sps:$4 sm:$0xff]   ;;  %v1604_v56 = vld [vmem:[%s1981_s19 + $0xc] ss:$16 sps:$4 sm:$0xff]   ;;  %v1579_v57 = vld [vmem:[%s1983_s17 + $0xc0] ss:$8 sps:$4 sm:$0xff]  }
  0x7b   : > { %v1575_v54 = vld [vmem:[%s1983_s17 + $0xc4] ss:$8 sps:$4 sm:$0xff]   ;;  %1052 = vmatprep.mubr.bf16.mxu1 %v1601_v52  ;;  %1095 = vmatprep.mubr.bf16.mxu0 %v1604_v56  ;;  %v1580_v58 = vld [vmem:[%s1983_s17 + $0x1c0] ss:$8 sps:$4 sm:$0xff]   ;;  %v1581_v59 = vld [vmem:[%s1983_s17 + $0xd4] ss:$8 sps:$4 sm:$0xff]  }
  0x7c   : > { %1029 = vmatpush1.bf16.msra.mxu1 %v1531_v23  ;;  %v1577_v55 = vld [vmem:[%s1983_s17 + $0x1c4] ss:$8 sps:$4 sm:$0xff]   ;;  %v1583_v60 = vld [vmem:[%s1983_s17 + $0x1d4] ss:$8 sps:$4 sm:$0xff]   ;;  %v1585_v61 = vld [vmem:[%s1983_s17 + $0xd0] ss:$8 sps:$4 sm:$0xff]  }
  0x7d   : > { %1072 = vmatpush1.bf16.msra.mxu0 %v1532_v24  ;;  %1030 = vmatprep.subr.bf16.mxu1 %v1533_v25  ;;  %v1586_v62 = vld [vmem:[%s1983_s17 + $0x1d0] ss:$8 sps:$4 sm:$0xff]   ;;  %v1587_v63 = vld [vmem:[%s1983_s17 + $0xe4] ss:$8 sps:$4 sm:$0xff]   ;;  %v1591_v1 = vld [vmem:[%s1983_s17 + $0xe0] ss:$8 sps:$4 sm:$0xff]  }
  0x7e   : > { %1073 = vmatprep.subr.bf16.mxu0 %v1535_v26  ;;  %v1589_v0 = vld [vmem:[%s1983_s17 + $0x1e4] ss:$8 sps:$4 sm:$0xff]   ;;  %v1592_v2 = vld [vmem:[%s1983_s17 + $0x1e0] ss:$8 sps:$4 sm:$0xff]   ;;  %v1593_v3 = vld [vmem:[%s1983_s17 + $0xf4] ss:$8 sps:$4 sm:$0xff]  }
  0x7f   : > { %v1595_v4 = vld [vmem:[%s1983_s17 + $0x1f4] ss:$8 sps:$4 sm:$0xff]   ;;  %v1597_v5 = vld [vmem:[%s1983_s17 + $0xf0] ss:$8 sps:$4 sm:$0xff]   ;;  %v608_v10 = vld [vmem:[%s1985_s15] sm:$0xff]  ;;  %p1401_p5 = scmp.ne.s32.totalorder %s1675_s21, 8 }
  0x80   : > { %1031 = vmatpush1.bf16.msra.mxu1 %v1537_v27  ;;  %v1598_v6 = vld [vmem:[%s1983_s17 + $0x1f0] ss:$8 sps:$4 sm:$0xff]   ;;  %v609_v14 = vld [vmem:[%s1985_s15 + $0x8] sm:$0xff] }
  0x81   : > { %1074 = vmatpush1.bf16.msra.mxu0 %v1538_v28  ;;  %1032 = vmatprep.subr.bf16.mxu1 %v1539_v29  ;;  %v1599_v7 = vld [vmem:[%s1981_s19] ss:$16 sps:$4 sm:$0xff]   ;;  %v1602_v8 = vld [vmem:[%s1981_s19 + $0x8] ss:$16 sps:$4 sm:$0xff]   ;;  %v1124_v29 = vlaneseq (!%p1401_p5) }
  0x82   : > { %1075 = vmatprep.subr.bf16.mxu0 %v1541_v30  ;;  %v610_v18 = vld [vmem:[%s1985_s15 + $0x10] sm:$0xff]  ;;  %v611_v23 = vld [vmem:[%s1985_s15 + $0x18] sm:$0xff] }
  0x83   : > { %v1125_v30 = vshrl.u32 (!%p1401_p5), %v1124_v29, 7 }
  0x84   : > { %1033 = vmatpush1.bf16.msra.mxu1 %v1543_v31  ;;  %v1122_v31 = vld [vmem:[%s591_s9] sm:$0x3] (!%p1401_p5) }
  0x85   : > { %1076 = vmatpush1.bf16.msra.mxu0 %v1544_v32  ;;  %1034 = vmatprep.subr.bf16.mxu1 %v1545_v33  ;;  %v1138_v32 = vld [vmem:[%s596_s1] sm:$0x3] (!%p1401_p5) }
  0x86   : > { %1077 = vmatprep.subr.bf16.mxu0 %v1547_v34  ;;  %v1126_v34 = vsub.s32 (!%p1401_p5), 0, %v1125_v30 }
  0x88   : > { %1035 = vmatpush1.bf16.msra.mxu1 %v1549_v35  ;;  %v1130_v35 = vsub.s32 (!%p1401_p5), 1, %v1125_v30 }
  0x89   : > { %1078 = vmatpush1.bf16.msra.mxu0 %v1550_v36  ;;  %1036 = vmatprep.subr.bf16.mxu1 %v1551_v37 }
  0x8a   : > { %1079 = vmatprep.subr.bf16.mxu0 %v1553_v38 }
  0x8c   : > { %1037 = vmatpush1.bf16.msra.mxu1 %v1555_v39  ;;  %v1127_v39 = vrot.slane (!%p1401_p5), %v1122_v31, %v1126_v34 }
  0x8d   : > { %1080 = vmatpush1.bf16.msra.mxu0 %v1556_v40  ;;  %1038 = vmatprep.subr.bf16.mxu1 %v1557_v41  ;;  %v1143_v40 = vrot.slane (!%p1401_p5), %v1138_v32, %v1126_v34  ;;  %v1131_v41 = vrot.slane (!%p1401_p5), %v1122_v31, %v1130_v35 }
  0x8e   : > { %1081 = vmatprep.subr.bf16.mxu0 %v1559_v42  ;;  %v1147_v42 = vrot.slane (!%p1401_p5), %v1138_v32, %v1130_v35 }
  0x90   : > { %1039 = vmatpush1.bf16.msra.mxu1 %v1561_v43 }
  0x91   : > { %1082 = vmatpush1.bf16.msra.mxu0 %v1562_v44  ;;  %1040 = vmatprep.subr.bf16.mxu1 %v1563_v45 }
  0x92   : > { %1083 = vmatprep.subr.bf16.mxu0 %v1565_v46 }
  0x94   : > { %1041 = vmatpush1.bf16.msra.mxu1 %v1567_v47 }
  0x95   : > { %1084 = vmatpush1.bf16.msra.mxu0 %v1568_v48  ;;  %1042 = vmatprep.subr.bf16.mxu1 %v1569_v49 }
  0x96   : > { %1085 = vmatprep.subr.bf16.mxu0 %v1571_v50 }
  0x98   : > { %1043 = vmatpush1.bf16.msra.mxu1 %v1573_v51 }
  0x99   : > { %1086 = vmatpush1.bf16.msra.mxu0 %v1574_v53  ;;  %1044 = vmatprep.subr.bf16.mxu1 %v1575_v54 }
  0x9a   : > { %1087 = vmatprep.subr.bf16.mxu0 %v1577_v55 }
  0x9c   : > { %1045 = vmatpush1.bf16.msra.mxu1 %v1579_v57 }
  0x9d   : > { %1088 = vmatpush1.bf16.msra.mxu0 %v1580_v58  ;;  %1046 = vmatprep.subr.bf16.mxu1 %v1581_v59 }
  0x9e   : > { %1089 = vmatprep.subr.bf16.mxu0 %v1583_v60 }
  0xa0   : > { %1047 = vmatpush1.bf16.msra.mxu1 %v1585_v61 }
  0xa1   : > { %1090 = vmatpush1.bf16.msra.mxu0 %v1586_v62  ;;  %1048 = vmatprep.subr.bf16.mxu1 %v1587_v63 }
  0xa2   : > { %1091 = vmatprep.subr.bf16.mxu0 %v1589_v0 }
  0xa4   : > { %1049 = vmatpush1.bf16.msra.mxu1 %v1591_v1 }
  0xa5   : > { %1092 = vmatpush1.bf16.msra.mxu0 %v1592_v2  ;;  %1050 = vmatprep.subr.bf16.mxu1 %v1593_v3 }
  0xa6   : > { %1093 = vmatprep.subr.bf16.mxu0 %v1595_v4 }
  0xa8   : > { %1051 = vmatpush1.bf16.msra.mxu1 %v1597_v5 }
  0xa9   : > { %1094 = vmatpush1.bf16.msra.mxu0 %v1598_v6 }
  0xab   : > { %1053 = vmatmul.mubr.bf16.vlgmr.msra.gmra.mrb[0].mxu1 %v1599_v7 }
  0xac   : > { %1096 = vmatmul.mubr.bf16.vlgmr.msra.gmra.mrb[0].mxu0 %v1602_v8 }
 0x17e   : > { %v1054_v9 = vpop.f32.mrb[0].mxu1 }
 0x17f   : > { %v1097_v11 = vpop.f32.mrb[0].mxu0  ;;  %v1056_v13 = vpop.f32.mrb[1].mxu1 }
 0x180   : > { %v1098_v12 = vadd.f32 %v1097_v11, %v1054_v9  ;;  %v1099_v15 = vpop.f32.mrb[1].mxu0  ;;  %v1058_v17 = vpop.f32.mrb[2].mxu1 }
 0x181   : > { %v1100_v16 = vadd.f32 %v1099_v15, %v1056_v13  ;;  %v1101_v19 = vpop.f32.mrb[2].mxu0  ;;  %v1060_v22 = vpop.f32.mrb[3].mxu1  ;;  %1117 = sbr.rel (%p1401_p5) target bundleno = 406 (0x196), region = 105 }
 0x182   : > { %v1106_v20 = vadd.f32 %v1098_v12, %v608_v10  ;;  %v1102_v21 = vadd.f32 %v1101_v19, %v1058_v17  ;;  %v1103_v24 = vpop.f32.mrb[3].mxu0 }
 0x183   : > { %v1107_v25 = vadd.f32 %v1100_v16, %v609_v14  ;;  %v1104_v26 = vadd.f32 %v1103_v24, %v1060_v22 }
 0x184   : > { %1110 = vst [vmem:[%s1985_s15] sm:$0xff] %v1106_v20  ;;  %v1108_v27 = vadd.f32 %v1102_v21, %v610_v18 }
 0x185   : > { %1111 = vst [vmem:[%s1985_s15 + $0x8] sm:$0xff] %v1107_v25  ;;  %v1109_v28 = vadd.f32 %v1104_v26, %v611_v23 }
 0x186   : > { %1112 = vst [vmem:[%s1985_s15 + $0x10] sm:$0xff] %v1108_v27 }
 0x187   : > { %1113 = vst [vmem:[%s1985_s15 + $0x18] sm:$0xff] %v1109_v28 }
 0x18b   : > { %v1118_v33 = vld [vmem:[%s1985_s15] sm:$0xff] }
 0x18c   : > { %v1119_v36 = vld [vmem:[%s1985_s15 + $0x8] sm:$0xff]  ;;  %v1134_v43 = vmul.f32 %v1127_v39, %v1118_v33 }
 0x18d   : > { %v1120_v37 = vld [vmem:[%s1985_s15 + $0x10] sm:$0xff]  ;;  %v1135_v44 = vmul.f32 %v1131_v41, %v1119_v36 }
 0x18e   : > { %v1121_v38 = vld [vmem:[%s1985_s15 + $0x18] sm:$0xff]  ;;  %v1136_v45 = vmul.f32 %v1127_v39, %v1120_v37  ;;  %v1150_v47 = vadd.f32 %v1143_v40, %v1134_v43 }
 0x18f   : > { %v1137_v46 = vmul.f32 %v1131_v41, %v1121_v38  ;;  %v1151_v48 = vadd.f32 %v1147_v42, %v1135_v44 }
 0x190   : > { %v1152_v49 = vadd.f32 %v1143_v40, %v1136_v45  ;;  %v1154_v51 = vmax.f32 %v1150_v47, 0.0 }
 0x191   : > { %v1153_v50 = vadd.f32 %v1147_v42, %v1137_v46  ;;  %v1155_v52 = vmax.f32 %v1151_v48, 0.0 }
 0x192   : > { %v1156_v53 = vmax.f32 %v1152_v49, 0.0  ;;  %1158 = vst [vmem:[%s1985_s15] sm:$0xff] %v1154_v51 }
 0x193   : > { %v1157_v54 = vmax.f32 %v1153_v50, 0.0  ;;  %1159 = vst [vmem:[%s1985_s15 + $0x8] sm:$0xff] %v1155_v52 }
 0x194   : > { %1160 = vst [vmem:[%s1985_s15 + $0x10] sm:$0xff] %v1156_v53 }
 0x195   : > { %1161 = vst [vmem:[%s1985_s15 + $0x18] sm:$0xff] %v1157_v54 }
 0x196 PF: > { %1168 = sbr.rel (!%p1813_p12) target bundleno = 414 (0x19e), region = 109  ;;  %s1409_s1 = sshll.u32 (%p1813_p12), %s1679_s22, 4 }
 0x197   : > { %s1174_s29 = scalar_lea.vmem (%p1813_p12), %s2134_s4, %s1409_s1 }
 0x199   : > { %v1187_v55 = vld [vmem:[%s1985_s15] sm:$0xff] (%p1813_p12) }
 0x19a   : > { %v1189_v56 = vld [vmem:[%s1985_s15 + $0x8] sm:$0xff] (%p1813_p12)  ;;  %1188 = vst [vmem:[%s1174_s29] sm:$0xff] (%p1813_p12), %v1187_v55 }
 0x19b   : > { %v1191_v57 = vld [vmem:[%s1985_s15 + $0x10] sm:$0xff] (%p1813_p12)  ;;  %1190 = vst [vmem:[%s1174_s29 + $0x8] sm:$0xff] (%p1813_p12), %v1189_v56 }
 0x19c   : > { %v1193_v58 = vld [vmem:[%s1985_s15 + $0x18] sm:$0xff] (%p1813_p12)  ;;  %1192 = vst [vmem:[%s1174_s29 + $0x20] sm:$0xff] (%p1813_p12), %v1191_v57 }
 0x19d   : > { %1194 = vst [vmem:[%s1174_s29 + $0x28] sm:$0xff] %v1193_v58 }
 0x19e PF: > { %s14_s25 = sadd.s32 1, %s1691_s25   ;;  %s2146_s14 = sld [smem:[#allocation5_spill]] }
 0x19f   : > { %p11_p6 = scmp.ge.s32.totalorder %s14_s25, 20   ;;  %s2147_s27 = sld [smem:[#allocation6_spill]] }
 0x1a0   : > { %s2148_s15 = smov %s1655_s16  ;;  %s2149_s16 = smov %s1811_s13 }
 0x1a1   : > { %s2150_s17 = smov %s1663_s18  ;;  %s2151_s18 = smov %s1808_s12 }
 0x1a2   : > { %s2152_s19 = smov %s1671_s20  ;;  %s2153_s20 = smov %s1794_s7 }
 0x1a3   : > { %s2154_s21 = smov %s1683_s23  ;;  %s2155_s22 = smov %s1687_s24 }
 0x1a4   : > { %s2156_s23 = smov %s2146_s14  ;;  %13 = sbr.rel (!%p11_p6) target bundleno = 9 (0x9), region = 177 }
 0x1a5   : > { %s2157_s24 = smov %s2147_s27 }

// kernel: featurizer_forward.43
= control target key start
LH: loop header
LB: loop body
LE: loop exit
PB: predicated region body
PF: predicated region fallthrough
CT: control target
= control target key end

     0   :  { %s92_s0 = inlined_call_operand.vmem [shape: f32[2,1,512], index: 0, kind: input, shape index: {}]   ;;  %s93_s1 = inlined_call_operand.hbm [shape: f32[2,512], index: 1, kind: output, shape index: {}]  }
   0x1   :  { %v41_v0 = vld [vmem:[%s92_s0] sm:$0xff]  }
   0x2   :  { %6 = vsyncpa [#allocation3], 0  ;;  %s66_s8 = smov [#allocation2]   ;;  %39 = vst.sshfl [vmem:[#allocation2] sm:$0xff pattern:$0x75316420] %v41_v0 }
   0x3   :  { %s31_s9 = sshll.u32 %s66_s8, 4  ;;  %s32_s9 = int_to_ptr.vmem [resolvable:$true] %s31_s9 }
   0x4   :  { %s42_s10 = scalar_lea.vmem %s32_s9, 128  ;;  %p47_p1 = scmp.lt.s32.totalorder %s32_s9, %s32_s9 }
   0x5   :  { %p43_p0 = scmp.ne.s32.totalorder %s32_s9, %s42_s10  ;;  %p48_p2 = scmp.lt.s32.totalorder %s42_s10, %s42_s10 }
   0x7   :  { %p49_p3 = por %p48_p2, %p47_p1 }
   0x9   :  { %p50_p4 = pnand %p49_p3, %p43_p0 }
   0xb   :  { %53 = shalt.err (!%p50_p4)
}
   0xc   :  { %s54_s13 = scalar_lea.hbm %s93_s1, 128 }
   0xd   :  { %p55_p5 = scmp.ne.s32.totalorder %s93_s1, %s54_s13  ;;  %p58_p6 = scmp.lt.u32.totalorder %s54_s13, %s93_s1 }
   0xf   :  { %p60_p7 = pnand %p58_p6, %p55_p5 }
  0x11   :  { %63 = shalt.err (!%p60_p7)
}
  0x12   :  { %34 = dma.vmem_to_hbm [thread:$0]  %s32_s9, 128, %s93_s1, [#allocation3]  }
  0x13   :  { %64 = dma.done.wait [#allocation3], 128  }
  0x14   :  { %65 = vsyncadd [#allocation3], 4294967168 }
  0x15   :  { %38 = vsyncpa [#allocation3], 1 }

</bundles_post_ra>
